<compile_context>
chip_gen: v7x
topology: tpu7x:2x2x1
jax: 0.10.0
libtpu: 0.0.40
codegen_flags: <defaults>
</compile_context>

<pallas_src>
import jax
import jax.numpy as jnp
from jax.experimental import pallas as pl
from jax.experimental.pallas import tpu as pltpu


# Output channel layout (matches torch.cat((x0, x1, x2, x3), 1)):
#   [  0: 96) branch0     [ 96:160) branch1
#   [160:256) branch2     [256:320) branch3
C_OUT = 320

# Fused 1x1 "head" column layout (every op that reads x):
#   [  0: 96) branch0        [ 96:160) branch3 1x1 (pre-pool)
#   [160:161) validity col   [161:209) branch1_0 (48)
#   [209:273) branch2_0 (64)
HEAD_COLS = 273


# ----------------------------------------------------------------------------
# The fused Pallas kernel (one grid step == one image)
# ----------------------------------------------------------------------------
def _mixed_5b_kernel(x_ref, w_head_ref,
                     w5_ref, b5_ref,
                     w3a_ref, b3a_ref,
                     w3b_ref, b3b_ref,
                     pl0_ref, pl1_ref, pl2_ref, pl3_ref,
                     o_ref,
                     b1_buf, b2a_buf, b2b_buf, z3_buf):
    H, W = o_ref.shape[1], o_ref.shape[2]
    PW = W + 4                      # padded row length (halo = 2 on each side)
    NP = x_ref.shape[1]             # (H + 4) * (W + 4), flattened padded image
    HWP = H * PW                    # rows of every conv / pool accumulator
    HW = H * W
    bf16 = jnp.bfloat16

    def crop(v):
        """Accumulator row m = h*PW + w  ->  (H, W, C); drops W-pad garbage cols."""
        c = v.shape[-1]
        return v[:HWP, :].reshape(H, PW, c)[:, :W, :]

    def conv(src_ref, w_ref, k):
        """k x k 'same' conv over a halo-2 flat buffer, f32 accumulation.

        Flat-shift addressing: tap (kh, kw) is a single contiguous pl.ds slice at
        static offset (a+kh)*PW + (a+kw); no per-tap slice+reshape relayouts.
        """
        a = 2 - (k - 1) // 2        # 0 for 5x5 (pad 2), 1 for 3x3 (pad 1)
        cout = w_ref.shape[-1]
        acc = jnp.zeros((HWP, cout), jnp.float32)
        for kh in range(k):
            for kw in range(k):
                start = (a + kh) * PW + (a + kw)
                acc = acc + jnp.dot(src_ref[pl.ds(start, HWP), :], w_ref[kh, kw],
                                    preferred_element_type=jnp.float32)
        return acc

    # ---- fused 1x1 head over the padded image (halo rows come out exactly 0,
    # because x's halo is 0 and the BN bias is carried by the indicator channel).
    y = jnp.dot(x_ref[0], w_head_ref[...], preferred_element_type=jnp.float32)

    vcol = y[:, 160:161]                                   # 1.0 at valid pixels, 0.0 on halo
    b1_buf[pl.ds(0, NP), :] = jnp.maximum(y[:, 161:209], 0.0).astype(bf16)
    b1_buf[pl.ds(NP, PW), :] = jnp.zeros((PW, 48), bf16)   # guard rows for 5x5 over-read
    b2a_buf[...] = jnp.maximum(y[:, 209:273], 0.0).astype(bf16)
    z3_buf[...] = y[:, 96:161]                             # branch3 pre-pool + validity lane

    # ---- branch0: 1x1 + ReLU, placed at out[:, 0:96) ----
    p0 = jnp.maximum(crop(y[2 * PW + 2:2 * PW + 2 + HWP, 0:96]), 0.0)
    out = jnp.dot(p0.reshape(HW, 96).astype(bf16), pl0_ref[...],
                  preferred_element_type=jnp.float32)

    # ---- branch1: 5x5 conv 48 -> 64 at natural width, placed at out[:, 96:160) ----
    p1 = jnp.maximum(conv(b1_buf, w5_ref, 5) + b5_ref[...], 0.0)
    p1 = crop(p1).reshape(HW, 64).astype(bf16)
    out = out + jnp.dot(p1, pl1_ref[...], preferred_element_type=jnp.float32)

    # ---- branch2: 3x3 (64->96) then 3x3 (96->96), placed at out[:, 160:256) ----
    t = jnp.maximum(conv(b2a_buf, w3a_ref, 3) + b3a_ref[...], 0.0)
    t = t * vcol[2 * PW + 2:2 * PW + 2 + HWP, :]           # re-zero pad positions for chaining
    # border-only zeroing of the one scratch buffer whose interior store does not
    # cover the whole buffer (everything else is fully overwritten each step).
    b2b_buf[pl.ds(0, 2 * PW + 2), :] = jnp.zeros((2 * PW + 2, 96), bf16)
    b2b_buf[pl.ds(2 * PW + 2 + HWP, 2 * PW - 2), :] = jnp.zeros((2 * PW - 2, 96), bf16)
    b2b_buf[pl.ds(2 * PW + 2, HWP), :] = t.astype(bf16)
    p2 = jnp.maximum(conv(b2b_buf, w3b_ref, 3) + b3b_ref[...], 0.0)
    p2 = crop(p2).reshape(HW, 96).astype(bf16)
    out = out + jnp.dot(p2, pl2_ref[...], preferred_element_type=jnp.float32)

    # ---- branch3: AvgPool(3,1,1, count_include_pad=False) of the (commuted)
    # 1x1-conv + BN affine, then ReLU.  Lane 64 of z3_buf holds the validity
    # indicator, so the pooled lane 64 is exactly the valid-neighbour count. ----
    pooled = jnp.zeros((HWP, 65), jnp.float32)
    for kh in range(3):
        for kw in range(3):
            start = (1 + kh) * PW + (1 + kw)
            pooled = pooled + z3_buf[pl.ds(start, HWP), :]
    pooled = crop(pooled)                                   # (H, W, 65): sums + counts
    p3 = jnp.maximum(pooled[:, :, 0:64] / pooled[:, :, 64:65], 0.0)
    p3 = p3.reshape(HW, 64).astype(bf16)
    out = out + jnp.dot(p3, pl3_ref[...], preferred_element_type=jnp.float32)

    # Single f32 accumulator, one lane-dense full-block store.
    o_ref[...] = out.reshape(1, H, W, C_OUT).astype(o_ref.dtype)


# ----------------------------------------------------------------------------
# Wrapper (glue: padding / indicator channel, BlockSpecs, grid over batch)
# ----------------------------------------------------------------------------
def _const_spec(a):
    nd = a.ndim
    return pl.BlockSpec(a.shape, lambda n, _nd=nd: (0,) * _nd)


def mixed_5b_pallas(x_nhwc, p):
    N, H, W, cin = x_nhwc.shape
    PH, PW = H + 4, W + 4
    NP = PH * PW

    # bf16 cast in the wrapper (perf review), + indicator channel carrying the
    # folded BN biases, + 2-pixel zero halo, flattened to (N, NP, 193).
    ind = jnp.ones((N, H, W, 1), x_nhwc.dtype)
    xe = jnp.concatenate([x_nhwc, ind], axis=-1)
    xe = jnp.pad(xe, ((0, 0), (2, 2), (2, 2), (0, 0)))
    xe = xe.astype(jnp.bfloat16).reshape(N, NP, cin + 1)

    consts = (p["w_head"],
              p["w5"], p["b5"], p["w3a"], p["b3a"], p["w3b"], p["b3b"],
              p["p0m"], p["p1m"], p["p2m"], p["p3m"])

    return pl.pallas_call(
        _mixed_5b_kernel,
        out_shape=jax.ShapeDtypeStruct((N, H, W, C_OUT), jnp.float32),
        grid=(N,),
        in_specs=[pl.BlockSpec((1, NP, cin + 1), lambda n: (n, 0, 0))]
        + [_const_spec(a) for a in consts],
        out_specs=pl.BlockSpec((1, H, W, C_OUT), lambda n: (n, 0, 0, 0)),
        scratch_shapes=[
            pltpu.VMEM((NP + PW, 48), jnp.bfloat16),   # branch1_0 act (halo 2 + guard rows)
            pltpu.VMEM((NP, 64), jnp.bfloat16),        # branch2_0 act
            pltpu.VMEM((NP, 96), jnp.bfloat16),        # branch2_1 act
            pltpu.VMEM((NP, 65), jnp.float32),         # branch3 pre-pool + validity lane
        ],
        compiler_params=pltpu.CompilerParams(
            dimension_semantics=("parallel",),
            # Peak VMEM at the real 35x35 input is ~12 MiB (in/out double buffers
            # + weights + 4 scratch buffers + live y / accumulators); 32 MiB
            # leaves ample headroom on v5e/v6e/v7x.
            vmem_limit_bytes=32 * 1024 * 1024,
        ),
    )(xe, *consts)


@jax.jit
def mixed_5b_forward(x_nchw, packed):
    x = jnp.transpose(x_nchw, (0, 2, 3, 1))    # NCHW -> NHWC (module boundary)
    out = mixed_5b_pallas(x, packed)
    return jnp.transpose(out, (0, 3, 1, 2))    # NHWC -> NCHW


# ----------------------------------------------------------------------------
# Parameters: synthetic raw params (BN folded), then packed for the fused kernel
# ----------------------------------------------------------------------------
def _make_basic_conv_params(key, cin, cout, k):
    kw_, kg, kb, km, kv = jax.random.split(key, 5)
    eps = 0.001
    w = jax.random.normal(kw_, (k, k, cin, cout), jnp.float32) * 0.05  # HWIO
    gamma = jax.random.uniform(kg, (cout,), jnp.float32, 0.5, 1.5)
    beta = jax.random.normal(kb, (cout,), jnp.float32) * 0.1
    rmean = jax.random.normal(km, (cout,), jnp.float32) * 0.1
    rvar = jax.random.uniform(kv, (cout,), jnp.float32, 0.5, 1.5)
    scale = gamma / jnp.sqrt(rvar + eps)
    bias = beta - rmean * scale
    return (w, scale, bias)


def make_mixed_5b_params(key):
    ks = jax.random.split(key, 7)
    return {
        "b0":   _make_basic_conv_params(ks[0], 192, 96, 1),
        "b1_0": _make_basic_conv_params(ks[1], 192, 48, 1),
        "b1_1": _make_basic_conv_params(ks[2], 48, 64, 5),
        "b2_0": _make_basic_conv_params(ks[3], 192, 64, 1),
        "b2_1": _make_basic_conv_params(ks[4], 64, 96, 3),
        "b2_2": _make_basic_conv_params(ks[5], 96, 96, 3),
        "b3":   _make_basic_conv_params(ks[6], 192, 64, 1),
    }


def pack_mixed_5b_params(raw):
    """Fold BN scale into the weights, route BN biases through the indicator
    channel of the fused head, and build the one-hot placement matrices."""
    def mat(w):                                  # (1,1,cin,cout) -> (cin,cout)
        return w.reshape(w.shape[2], w.shape[3])

    w0, s0, c0 = raw["b0"]
    w3, s3, c3 = raw["b3"]
    w10, s10, c10 = raw["b1_0"]
    w20, s20, c20 = raw["b2_0"]
    w11, s11, c11 = raw["b1_1"]
    w21, s21, c21 = raw["b2_1"]
    w22, s22, c22 = raw["b2_2"]

    head = jnp.zeros((193, HEAD_COLS), jnp.float32)
    head = head.at[0:192, 0:96].set(mat(w0) * s0)        # branch0
    head = head.at[192, 0:96].set(c0)
    head = head.at[0:192, 96:160].set(mat(w3) * s3)      # branch3 1x1 (pre-pool)
    head = head.at[192, 96:160].set(c3)
    head = head.at[192, 160].set(1.0)                    # validity passthrough
    head = head.at[0:192, 161:209].set(mat(w10) * s10)   # branch1_0
    head = head.at[192, 161:209].set(c10)
    head = head.at[0:192, 209:273].set(mat(w20) * s20)   # branch2_0
    head = head.at[192, 209:273].set(c20)

    def place(cw, off):
        m = jnp.zeros((cw, C_OUT), jnp.float32)
        return m.at[jnp.arange(cw), off + jnp.arange(cw)].set(1.0)

    bf = jnp.bfloat16
    return {
        "w_head": head.astype(bf),
        "w5": (w11 * s11).astype(bf), "b5": c11.reshape(1, -1),
        "w3a": (w21 * s21).astype(bf), "b3a": c21.reshape(1, -1),
        "w3b": (w22 * s22).astype(bf), "b3b": c22.reshape(1, -1),
        "p0m": place(96, 0).astype(bf),
        "p1m": place(64, 96).astype(bf),
        "p2m": place(96, 160).astype(bf),
        "p3m": place(64, 256).astype(bf),
    }


# ----------------------------------------------------------------------------
# Pure-JAX reference (f32 convs) for a wiring/placement sanity check
# ----------------------------------------------------------------------------
def mixed_5b_reference(x_nchw, raw):
    x = jnp.transpose(x_nchw, (0, 2, 3, 1))

    def bc(z, prm, pad):
        w, s, b = prm
        z = jax.lax.conv_general_dilated(
            z, w, (1, 1), ((pad, pad), (pad, pad)),
            dimension_numbers=("NHWC", "HWIO", "NHWC"))
        return jnp.maximum(z * s + b, 0.0)

    x0 = bc(x, raw["b0"], 0)
    x1 = bc(bc(x, raw["b1_0"], 0), raw["b1_1"], 2)
    x2 = bc(bc(bc(x, raw["b2_0"], 0), raw["b2_1"], 1), raw["b2_2"], 1)
    ssum = jax.lax.reduce_window(x, 0.0, jax.lax.add, (1, 3, 3, 1), (1, 1, 1, 1), "SAME")
    cnt = jax.lax.reduce_window(jnp.ones_like(x[..., :1]), 0.0, jax.lax.add,
                                (1, 3, 3, 1), (1, 1, 1, 1), "SAME")
    x3 = bc(ssum / cnt, raw["b3"], 0)
    out = jnp.concatenate([x0, x1, x2, x3], axis=-1)
    return jnp.transpose(out, (0, 3, 1, 2))


if __name__ == "__main__":
    key = jax.random.PRNGKey(0)
    k_params, k_x = jax.random.split(key)

    raw = make_mixed_5b_params(k_params)
    packed = pack_mixed_5b_params(raw)

    # Mixed_5b requires 192 input channels; keep batch/spatial small.
    N, C, H, W = 2, 192, 8, 8
    x = jax.random.normal(k_x, (N, C, H, W), jnp.float32)

    out = mixed_5b_forward(x, packed)
    out = jax.block_until_ready(out)

    assert out.shape == (N, 320, H, W), out.shape
    assert bool(jnp.all(jnp.isfinite(out)))

    # Tolerance check against an f32 XLA reference (bf16 matmuls in the kernel).
    ref = mixed_5b_reference(x, raw)
    err = float(jnp.max(jnp.abs(out - ref) / (1.0 + jnp.abs(ref))))
    assert err < 0.1, f"kernel mismatch vs reference: max normalized error {err}"

    print("KERNEL_OK")
</pallas_src>

<mosaic_0001>
module attributes {stable_mosaic.version = 11 : i64} {
  func.func @_mixed_5b_kernel(%arg0: i32, %arg1: memref<1x144x193xbf16, #tpu.memory_space<vmem>>, %arg2: memref<193x273xbf16, #tpu.memory_space<vmem>>, %arg3: memref<5x5x48x64xbf16, #tpu.memory_space<vmem>>, %arg4: memref<1x64xf32, #tpu.memory_space<vmem>>, %arg5: memref<3x3x64x96xbf16, #tpu.memory_space<vmem>>, %arg6: memref<1x96xf32, #tpu.memory_space<vmem>>, %arg7: memref<3x3x96x96xbf16, #tpu.memory_space<vmem>>, %arg8: memref<1x96xf32, #tpu.memory_space<vmem>>, %arg9: memref<96x320xbf16, #tpu.memory_space<vmem>>, %arg10: memref<64x320xbf16, #tpu.memory_space<vmem>>, %arg11: memref<96x320xbf16, #tpu.memory_space<vmem>>, %arg12: memref<64x320xbf16, #tpu.memory_space<vmem>>, %arg13: memref<1x8x8x320xf32, #tpu.memory_space<vmem>>, %arg14: memref<156x48xbf16, #tpu.memory_space<vmem>>, %arg15: memref<144x64xbf16, #tpu.memory_space<vmem>>, %arg16: memref<144x96xbf16, #tpu.memory_space<vmem>>, %arg17: memref<144x65xf32, #tpu.memory_space<vmem>>) attributes {dimension_semantics = [#tpu.dimension_semantics<parallel>], iteration_bounds = array<i64: 2>, scalar_prefetch = 0 : i64, scratch_operands = 4 : i64, tpu.core_type = #tpu.core_type<tc>, window_params = [{transform_indices = @transform_0, window_bounds = array<i64: 1, 144, 193>}, {pipeline_mode = #tpu.pipeline_mode<synchronous>, transform_indices = @transform_1, window_bounds = array<i64: 193, 273>}, {pipeline_mode = #tpu.pipeline_mode<synchronous>, transform_indices = @transform_2, window_bounds = array<i64: 5, 5, 48, 64>}, {pipeline_mode = #tpu.pipeline_mode<synchronous>, transform_indices = @transform_3, window_bounds = array<i64: 1, 64>}, {pipeline_mode = #tpu.pipeline_mode<synchronous>, transform_indices = @transform_4, window_bounds = array<i64: 3, 3, 64, 96>}, {pipeline_mode = #tpu.pipeline_mode<synchronous>, transform_indices = @transform_5, window_bounds = array<i64: 1, 96>}, {pipeline_mode = #tpu.pipeline_mode<synchronous>, transform_indices = @transform_6, window_bounds = array<i64: 3, 3, 96, 96>}, {pipeline_mode = #tpu.pipeline_mode<synchronous>, transform_indices = @transform_7, window_bounds = array<i64: 1, 96>}, {pipeline_mode = #tpu.pipeline_mode<synchronous>, transform_indices = @transform_8, window_bounds = array<i64: 96, 320>}, {pipeline_mode = #tpu.pipeline_mode<synchronous>, transform_indices = @transform_9, window_bounds = array<i64: 64, 320>}, {pipeline_mode = #tpu.pipeline_mode<synchronous>, transform_indices = @transform_10, window_bounds = array<i64: 96, 320>}, {pipeline_mode = #tpu.pipeline_mode<synchronous>, transform_indices = @transform_11, window_bounds = array<i64: 64, 320>}, {transform_indices = @transform_12, window_bounds = array<i64: 1, 8, 8, 320>}]} {
    %c0 = arith.constant 0 : index
    %c0_0 = arith.constant 0 : index
    %c0_1 = arith.constant 0 : index
    %0 = vector.load %arg1[%c0, %c0_0, %c0_1] : memref<1x144x193xbf16, #tpu.memory_space<vmem>>, vector<1x144x193xbf16>
    %1 = vector.shape_cast %0 : vector<1x144x193xbf16> to vector<144x193xbf16>
    %c0_2 = arith.constant 0 : index
    %c0_3 = arith.constant 0 : index
    %2 = vector.load %arg2[%c0_2, %c0_3] : memref<193x273xbf16, #tpu.memory_space<vmem>>, vector<193x273xbf16>
    %cst = arith.constant dense<0.000000e+00> : vector<144x273xf32>
    %3 = tpu.matmul %1, %2, %cst {dimension_numbers = #tpu.dot_dimension_numbers<[1], [0], [0], [1], [0, 0, 1, 1], [], []>} : vector<144x193xbf16>, vector<193x273xbf16>, vector<144x273xf32> -> vector<144x273xf32>
    %4 = vector.extract_strided_slice %3 {offsets = [0, 160], sizes = [144, 1], strides = [1, 1]} : vector<144x273xf32> to vector<144x1xf32>
    %5 = vector.extract_strided_slice %3 {offsets = [0, 161], sizes = [144, 48], strides = [1, 1]} : vector<144x273xf32> to vector<144x48xf32>
    %cst_4 = arith.constant 0.000000e+00 : f32
    %6 = vector.broadcast %cst_4 : f32 to vector<144x48xf32>
    %7 = arith.maximumf %5, %6 : vector<144x48xf32>
    %8 = arith.truncf %7 : vector<144x48xf32> to vector<144x48xbf16>
    %c0_5 = arith.constant 0 : index
    %c0_6 = arith.constant 0 : index
    %9 = vector.load %arg14[%c0_5, %c0_6] : memref<156x48xbf16, #tpu.memory_space<vmem>>, vector<144x48xbf16>
    tpu.vector_store %arg14[%c0_5, %c0_6], %8 {strides = array<i32>} : memref<156x48xbf16, #tpu.memory_space<vmem>>, vector<144x48xbf16>,
    %cst_7 = arith.constant 0.000000e+00 : bf16
    %10 = vector.broadcast %cst_7 : bf16 to vector<12x48xbf16>
    %c144 = arith.constant 144 : index
    %c0_8 = arith.constant 0 : index
    %11 = vector.load %arg14[%c144, %c0_8] : memref<156x48xbf16, #tpu.memory_space<vmem>>, vector<12x48xbf16>
    tpu.vector_store %arg14[%c144, %c0_8], %10 {strides = array<i32>} : memref<156x48xbf16, #tpu.memory_space<vmem>>, vector<12x48xbf16>,
    %12 = vector.extract_strided_slice %3 {offsets = [0, 209], sizes = [144, 64], strides = [1, 1]} : vector<144x273xf32> to vector<144x64xf32>
    %cst_9 = arith.constant 0.000000e+00 : f32
    %13 = vector.broadcast %cst_9 : f32 to vector<144x64xf32>
    %14 = arith.maximumf %12, %13 : vector<144x64xf32>
    %15 = arith.truncf %14 : vector<144x64xf32> to vector<144x64xbf16>
    %c0_10 = arith.constant 0 : index
    %c0_11 = arith.constant 0 : index
    %16 = vector.load %arg15[%c0_10, %c0_11] : memref<144x64xbf16, #tpu.memory_space<vmem>>, vector<144x64xbf16>
    tpu.vector_store %arg15[%c0_10, %c0_11], %15 {strides = array<i32>} : memref<144x64xbf16, #tpu.memory_space<vmem>>, vector<144x64xbf16>,
    %17 = vector.extract_strided_slice %3 {offsets = [0, 96], sizes = [144, 65], strides = [1, 1]} : vector<144x273xf32> to vector<144x65xf32>
    %c0_12 = arith.constant 0 : index
    %c0_13 = arith.constant 0 : index
    %18 = vector.load %arg17[%c0_12, %c0_13] : memref<144x65xf32, #tpu.memory_space<vmem>>, vector<144x65xf32>
    tpu.vector_store %arg17[%c0_12, %c0_13], %17 {strides = array<i32>} : memref<144x65xf32, #tpu.memory_space<vmem>>, vector<144x65xf32>,
    %19 = vector.extract_strided_slice %3 {offsets = [26, 0], sizes = [96, 96], strides = [1, 1]} : vector<144x273xf32> to vector<96x96xf32>
    %20 = vector.shape_cast %19 : vector<96x96xf32> to vector<8x12x96xf32>
    %21 = vector.extract_strided_slice %20 {offsets = [0, 0, 0], sizes = [8, 8, 96], strides = [1, 1, 1]} : vector<8x12x96xf32> to vector<8x8x96xf32>
    %cst_14 = arith.constant 0.000000e+00 : f32
    %22 = vector.broadcast %cst_14 : f32 to vector<8x8x96xf32>
    %23 = arith.maximumf %21, %22 : vector<8x8x96xf32>
    %24 = vector.shape_cast %23 : vector<8x8x96xf32> to vector<64x96xf32>
    %25 = arith.truncf %24 : vector<64x96xf32> to vector<64x96xbf16>
    %c0_15 = arith.constant 0 : index
    %c0_16 = arith.constant 0 : index
    %26 = vector.load %arg9[%c0_15, %c0_16] : memref<96x320xbf16, #tpu.memory_space<vmem>>, vector<96x320xbf16>
    %cst_17 = arith.constant dense<0.000000e+00> : vector<64x320xf32>
    %27 = tpu.matmul %25, %26, %cst_17 {dimension_numbers = #tpu.dot_dimension_numbers<[1], [0], [0], [1], [0, 0, 1, 1], [], []>} : vector<64x96xbf16>, vector<96x320xbf16>, vector<64x320xf32> -> vector<64x320xf32>
    %cst_18 = arith.constant 0.000000e+00 : f32
    %28 = vector.broadcast %cst_18 : f32 to vector<96x64xf32>
    %c0_19 = arith.constant 0 : index
    %c0_20 = arith.constant 0 : index
    %29 = vector.load %arg14[%c0_19, %c0_20] : memref<156x48xbf16, #tpu.memory_space<vmem>>, vector<96x48xbf16>
    %c0_21 = arith.constant 0 : index
    %c0_22 = arith.constant 0 : index
    %c0_23 = arith.constant 0 : index
    %c0_24 = arith.constant 0 : index
    %30 = vector.load %arg3[%c0_21, %c0_22, %c0_23, %c0_24] : memref<5x5x48x64xbf16, #tpu.memory_space<vmem>>, vector<1x1x48x64xbf16>
    %31 = vector.shape_cast %30 : vector<1x1x48x64xbf16> to vector<48x64xbf16>
    %cst_25 = arith.constant dense<0.000000e+00> : vector<96x64xf32>
    %32 = tpu.matmul %29, %31, %cst_25 {dimension_numbers = #tpu.dot_dimension_numbers<[1], [0], [0], [1], [0, 0, 1, 1], [], []>} : vector<96x48xbf16>, vector<48x64xbf16>, vector<96x64xf32> -> vector<96x64xf32>
    %33 = arith.addf %28, %32 : vector<96x64xf32>
    %c1 = arith.constant 1 : index
    %c0_26 = arith.constant 0 : index
    %34 = vector.load %arg14[%c1, %c0_26] : memref<156x48xbf16, #tpu.memory_space<vmem>>, vector<96x48xbf16>
    %c0_27 = arith.constant 0 : index
    %c1_28 = arith.constant 1 : index
    %c0_29 = arith.constant 0 : index
    %c0_30 = arith.constant 0 : index
    %35 = vector.load %arg3[%c0_27, %c1_28, %c0_29, %c0_30] : memref<5x5x48x64xbf16, #tpu.memory_space<vmem>>, vector<1x1x48x64xbf16>
    %36 = vector.shape_cast %35 : vector<1x1x48x64xbf16> to vector<48x64xbf16>
    %cst_31 = arith.constant dense<0.000000e+00> : vector<96x64xf32>
    %37 = tpu.matmul %34, %36, %cst_31 {dimension_numbers = #tpu.dot_dimension_numbers<[1], [0], [0], [1], [0, 0, 1, 1], [], []>} : vector<96x48xbf16>, vector<48x64xbf16>, vector<96x64xf32> -> vector<96x64xf32>
    %38 = arith.addf %33, %37 : vector<96x64xf32>
    %c2 = arith.constant 2 : index
    %c0_32 = arith.constant 0 : index
    %39 = vector.load %arg14[%c2, %c0_32] : memref<156x48xbf16, #tpu.memory_space<vmem>>, vector<96x48xbf16>
    %c0_33 = arith.constant 0 : index
    %c2_34 = arith.constant 2 : index
    %c0_35 = arith.constant 0 : index
    %c0_36 = arith.constant 0 : index
    %40 = vector.load %arg3[%c0_33, %c2_34, %c0_35, %c0_36] : memref<5x5x48x64xbf16, #tpu.memory_space<vmem>>, vector<1x1x48x64xbf16>
    %41 = vector.shape_cast %40 : vector<1x1x48x64xbf16> to vector<48x64xbf16>
    %cst_37 = arith.constant dense<0.000000e+00> : vector<96x64xf32>
    %42 = tpu.matmul %39, %41, %cst_37 {dimension_numbers = #tpu.dot_dimension_numbers<[1], [0], [0], [1], [0, 0, 1, 1], [], []>} : vector<96x48xbf16>, vector<48x64xbf16>, vector<96x64xf32> -> vector<96x64xf32>
    %43 = arith.addf %38, %42 : vector<96x64xf32>
    %c3 = arith.constant 3 : index
    %c0_38 = arith.constant 0 : index
    %44 = vector.load %arg14[%c3, %c0_38] : memref<156x48xbf16, #tpu.memory_space<vmem>>, vector<96x48xbf16>
    %c0_39 = arith.constant 0 : index
    %c3_40 = arith.constant 3 : index
    %c0_41 = arith.constant 0 : index
    %c0_42 = arith.constant 0 : index
    %45 = vector.load %arg3[%c0_39, %c3_40, %c0_41, %c0_42] : memref<5x5x48x64xbf16, #tpu.memory_space<vmem>>, vector<1x1x48x64xbf16>
    %46 = vector.shape_cast %45 : vector<1x1x48x64xbf16> to vector<48x64xbf16>
    %cst_43 = arith.constant dense<0.000000e+00> : vector<96x64xf32>
    %47 = tpu.matmul %44, %46, %cst_43 {dimension_numbers = #tpu.dot_dimension_numbers<[1], [0], [0], [1], [0, 0, 1, 1], [], []>} : vector<96x48xbf16>, vector<48x64xbf16>, vector<96x64xf32> -> vector<96x64xf32>
    %48 = arith.addf %43, %47 : vector<96x64xf32>
    %c4 = arith.constant 4 : index
    %c0_44 = arith.constant 0 : index
    %49 = vector.load %arg14[%c4, %c0_44] : memref<156x48xbf16, #tpu.memory_space<vmem>>, vector<96x48xbf16>
    %c0_45 = arith.constant 0 : index
    %c4_46 = arith.constant 4 : index
    %c0_47 = arith.constant 0 : index
    %c0_48 = arith.constant 0 : index
    %50 = vector.load %arg3[%c0_45, %c4_46, %c0_47, %c0_48] : memref<5x5x48x64xbf16, #tpu.memory_space<vmem>>, vector<1x1x48x64xbf16>
    %51 = vector.shape_cast %50 : vector<1x1x48x64xbf16> to vector<48x64xbf16>
    %cst_49 = arith.constant dense<0.000000e+00> : vector<96x64xf32>
    %52 = tpu.matmul %49, %51, %cst_49 {dimension_numbers = #tpu.dot_dimension_numbers<[1], [0], [0], [1], [0, 0, 1, 1], [], []>} : vector<96x48xbf16>, vector<48x64xbf16>, vector<96x64xf32> -> vector<96x64xf32>
    %53 = arith.addf %48, %52 : vector<96x64xf32>
    %c12 = arith.constant 12 : index
    %c0_50 = arith.constant 0 : index
    %54 = vector.load %arg14[%c12, %c0_50] : memref<156x48xbf16, #tpu.memory_space<vmem>>, vector<96x48xbf16>
    %c1_51 = arith.constant 1 : index
    %c0_52 = arith.constant 0 : index
    %c0_53 = arith.constant 0 : index
    %c0_54 = arith.constant 0 : index
    %55 = vector.load %arg3[%c1_51, %c0_52, %c0_53, %c0_54] : memref<5x5x48x64xbf16, #tpu.memory_space<vmem>>, vector<1x1x48x64xbf16>
    %56 = vector.shape_cast %55 : vector<1x1x48x64xbf16> to vector<48x64xbf16>
    %cst_55 = arith.constant dense<0.000000e+00> : vector<96x64xf32>
    %57 = tpu.matmul %54, %56, %cst_55 {dimension_numbers = #tpu.dot_dimension_numbers<[1], [0], [0], [1], [0, 0, 1, 1], [], []>} : vector<96x48xbf16>, vector<48x64xbf16>, vector<96x64xf32> -> vector<96x64xf32>
    %58 = arith.addf %53, %57 : vector<96x64xf32>
    %c13 = arith.constant 13 : index
    %c0_56 = arith.constant 0 : index
    %59 = vector.load %arg14[%c13, %c0_56] : memref<156x48xbf16, #tpu.memory_space<vmem>>, vector<96x48xbf16>
    %c1_57 = arith.constant 1 : index
    %c1_58 = arith.constant 1 : index
    %c0_59 = arith.constant 0 : index
    %c0_60 = arith.constant 0 : index
    %60 = vector.load %arg3[%c1_57, %c1_58, %c0_59, %c0_60] : memref<5x5x48x64xbf16, #tpu.memory_space<vmem>>, vector<1x1x48x64xbf16>
    %61 = vector.shape_cast %60 : vector<1x1x48x64xbf16> to vector<48x64xbf16>
    %cst_61 = arith.constant dense<0.000000e+00> : vector<96x64xf32>
    %62 = tpu.matmul %59, %61, %cst_61 {dimension_numbers = #tpu.dot_dimension_numbers<[1], [0], [0], [1], [0, 0, 1, 1], [], []>} : vector<96x48xbf16>, vector<48x64xbf16>, vector<96x64xf32> -> vector<96x64xf32>
    %63 = arith.addf %58, %62 : vector<96x64xf32>
    %c14 = arith.constant 14 : index
    %c0_62 = arith.constant 0 : index
    %64 = vector.load %arg14[%c14, %c0_62] : memref<156x48xbf16, #tpu.memory_space<vmem>>, vector<96x48xbf16>
    %c1_63 = arith.constant 1 : index
    %c2_64 = arith.constant 2 : index
    %c0_65 = arith.constant 0 : index
    %c0_66 = arith.constant 0 : index
    %65 = vector.load %arg3[%c1_63, %c2_64, %c0_65, %c0_66] : memref<5x5x48x64xbf16, #tpu.memory_space<vmem>>, vector<1x1x48x64xbf16>
    %66 = vector.shape_cast %65 : vector<1x1x48x64xbf16> to vector<48x64xbf16>
    %cst_67 = arith.constant dense<0.000000e+00> : vector<96x64xf32>
    %67 = tpu.matmul %64, %66, %cst_67 {dimension_numbers = #tpu.dot_dimension_numbers<[1], [0], [0], [1], [0, 0, 1, 1], [], []>} : vector<96x48xbf16>, vector<48x64xbf16>, vector<96x64xf32> -> vector<96x64xf32>
    %68 = arith.addf %63, %67 : vector<96x64xf32>
    %c15 = arith.constant 15 : index
    %c0_68 = arith.constant 0 : index
    %69 = vector.load %arg14[%c15, %c0_68] : memref<156x48xbf16, #tpu.memory_space<vmem>>, vector<96x48xbf16>
    %c1_69 = arith.constant 1 : index
    %c3_70 = arith.constant 3 : index
    %c0_71 = arith.constant 0 : index
    %c0_72 = arith.constant 0 : index
    %70 = vector.load %arg3[%c1_69, %c3_70, %c0_71, %c0_72] : memref<5x5x48x64xbf16, #tpu.memory_space<vmem>>, vector<1x1x48x64xbf16>
    %71 = vector.shape_cast %70 : vector<1x1x48x64xbf16> to vector<48x64xbf16>
    %cst_73 = arith.constant dense<0.000000e+00> : vector<96x64xf32>
    %72 = tpu.matmul %69, %71, %cst_73 {dimension_numbers = #tpu.dot_dimension_numbers<[1], [0], [0], [1], [0, 0, 1, 1], [], []>} : vector<96x48xbf16>, vector<48x64xbf16>, vector<96x64xf32> -> vector<96x64xf32>
    %73 = arith.addf %68, %72 : vector<96x64xf32>
    %c16 = arith.constant 16 : index
    %c0_74 = arith.constant 0 : index
    %74 = vector.load %arg14[%c16, %c0_74] : memref<156x48xbf16, #tpu.memory_space<vmem>>, vector<96x48xbf16>
    %c1_75 = arith.constant 1 : index
    %c4_76 = arith.constant 4 : index
    %c0_77 = arith.constant 0 : index
    %c0_78 = arith.constant 0 : index
    %75 = vector.load %arg3[%c1_75, %c4_76, %c0_77, %c0_78] : memref<5x5x48x64xbf16, #tpu.memory_space<vmem>>, vector<1x1x48x64xbf16>
    %76 = vector.shape_cast %75 : vector<1x1x48x64xbf16> to vector<48x64xbf16>
    %cst_79 = arith.constant dense<0.000000e+00> : vector<96x64xf32>
    %77 = tpu.matmul %74, %76, %cst_79 {dimension_numbers = #tpu.dot_dimension_numbers<[1], [0], [0], [1], [0, 0, 1, 1], [], []>} : vector<96x48xbf16>, vector<48x64xbf16>, vector<96x64xf32> -> vector<96x64xf32>
    %78 = arith.addf %73, %77 : vector<96x64xf32>
    %c24 = arith.constant 24 : index
    %c0_80 = arith.constant 0 : index
    %79 = vector.load %arg14[%c24, %c0_80] : memref<156x48xbf16, #tpu.memory_space<vmem>>, vector<96x48xbf16>
    %c2_81 = arith.constant 2 : index
    %c0_82 = arith.constant 0 : index
    %c0_83 = arith.constant 0 : index
    %c0_84 = arith.constant 0 : index
    %80 = vector.load %arg3[%c2_81, %c0_82, %c0_83, %c0_84] : memref<5x5x48x64xbf16, #tpu.memory_space<vmem>>, vector<1x1x48x64xbf16>
    %81 = vector.shape_cast %80 : vector<1x1x48x64xbf16> to vector<48x64xbf16>
    %cst_85 = arith.constant dense<0.000000e+00> : vector<96x64xf32>
    %82 = tpu.matmul %79, %81, %cst_85 {dimension_numbers = #tpu.dot_dimension_numbers<[1], [0], [0], [1], [0, 0, 1, 1], [], []>} : vector<96x48xbf16>, vector<48x64xbf16>, vector<96x64xf32> -> vector<96x64xf32>
    %83 = arith.addf %78, %82 : vector<96x64xf32>
    %c25 = arith.constant 25 : index
    %c0_86 = arith.constant 0 : index
    %84 = vector.load %arg14[%c25, %c0_86] : memref<156x48xbf16, #tpu.memory_space<vmem>>, vector<96x48xbf16>
    %c2_87 = arith.constant 2 : index
    %c1_88 = arith.constant 1 : index
    %c0_89 = arith.constant 0 : index
    %c0_90 = arith.constant 0 : index
    %85 = vector.load %arg3[%c2_87, %c1_88, %c0_89, %c0_90] : memref<5x5x48x64xbf16, #tpu.memory_space<vmem>>, vector<1x1x48x64xbf16>
    %86 = vector.shape_cast %85 : vector<1x1x48x64xbf16> to vector<48x64xbf16>
    %cst_91 = arith.constant dense<0.000000e+00> : vector<96x64xf32>
    %87 = tpu.matmul %84, %86, %cst_91 {dimension_numbers = #tpu.dot_dimension_numbers<[1], [0], [0], [1], [0, 0, 1, 1], [], []>} : vector<96x48xbf16>, vector<48x64xbf16>, vector<96x64xf32> -> vector<96x64xf32>
    %88 = arith.addf %83, %87 : vector<96x64xf32>
    %c26 = arith.constant 26 : index
    %c0_92 = arith.constant 0 : index
    %89 = vector.load %arg14[%c26, %c0_92] : memref<156x48xbf16, #tpu.memory_space<vmem>>, vector<96x48xbf16>
    %c2_93 = arith.constant 2 : index
    %c2_94 = arith.constant 2 : index
    %c0_95 = arith.constant 0 : index
    %c0_96 = arith.constant 0 : index
    %90 = vector.load %arg3[%c2_93, %c2_94, %c0_95, %c0_96] : memref<5x5x48x64xbf16, #tpu.memory_space<vmem>>, vector<1x1x48x64xbf16>
    %91 = vector.shape_cast %90 : vector<1x1x48x64xbf16> to vector<48x64xbf16>
    %cst_97 = arith.constant dense<0.000000e+00> : vector<96x64xf32>
    %92 = tpu.matmul %89, %91, %cst_97 {dimension_numbers = #tpu.dot_dimension_numbers<[1], [0], [0], [1], [0, 0, 1, 1], [], []>} : vector<96x48xbf16>, vector<48x64xbf16>, vector<96x64xf32> -> vector<96x64xf32>
    %93 = arith.addf %88, %92 : vector<96x64xf32>
    %c27 = arith.constant 27 : index
    %c0_98 = arith.constant 0 : index
    %94 = vector.load %arg14[%c27, %c0_98] : memref<156x48xbf16, #tpu.memory_space<vmem>>, vector<96x48xbf16>
    %c2_99 = arith.constant 2 : index
    %c3_100 = arith.constant 3 : index
    %c0_101 = arith.constant 0 : index
    %c0_102 = arith.constant 0 : index
    %95 = vector.load %arg3[%c2_99, %c3_100, %c0_101, %c0_102] : memref<5x5x48x64xbf16, #tpu.memory_space<vmem>>, vector<1x1x48x64xbf16>
    %96 = vector.shape_cast %95 : vector<1x1x48x64xbf16> to vector<48x64xbf16>
    %cst_103 = arith.constant dense<0.000000e+00> : vector<96x64xf32>
    %97 = tpu.matmul %94, %96, %cst_103 {dimension_numbers = #tpu.dot_dimension_numbers<[1], [0], [0], [1], [0, 0, 1, 1], [], []>} : vector<96x48xbf16>, vector<48x64xbf16>, vector<96x64xf32> -> vector<96x64xf32>
    %98 = arith.addf %93, %97 : vector<96x64xf32>
    %c28 = arith.constant 28 : index
    %c0_104 = arith.constant 0 : index
    %99 = vector.load %arg14[%c28, %c0_104] : memref<156x48xbf16, #tpu.memory_space<vmem>>, vector<96x48xbf16>
    %c2_105 = arith.constant 2 : index
    %c4_106 = arith.constant 4 : index
    %c0_107 = arith.constant 0 : index
    %c0_108 = arith.constant 0 : index
    %100 = vector.load %arg3[%c2_105, %c4_106, %c0_107, %c0_108] : memref<5x5x48x64xbf16, #tpu.memory_space<vmem>>, vector<1x1x48x64xbf16>
    %101 = vector.shape_cast %100 : vector<1x1x48x64xbf16> to vector<48x64xbf16>
    %cst_109 = arith.constant dense<0.000000e+00> : vector<96x64xf32>
    %102 = tpu.matmul %99, %101, %cst_109 {dimension_numbers = #tpu.dot_dimension_numbers<[1], [0], [0], [1], [0, 0, 1, 1], [], []>} : vector<96x48xbf16>, vector<48x64xbf16>, vector<96x64xf32> -> vector<96x64xf32>
    %103 = arith.addf %98, %102 : vector<96x64xf32>
    %c36 = arith.constant 36 : index
    %c0_110 = arith.constant 0 : index
    %104 = vector.load %arg14[%c36, %c0_110] : memref<156x48xbf16, #tpu.memory_space<vmem>>, vector<96x48xbf16>
    %c3_111 = arith.constant 3 : index
    %c0_112 = arith.constant 0 : index
    %c0_113 = arith.constant 0 : index
    %c0_114 = arith.constant 0 : index
    %105 = vector.load %arg3[%c3_111, %c0_112, %c0_113, %c0_114] : memref<5x5x48x64xbf16, #tpu.memory_space<vmem>>, vector<1x1x48x64xbf16>
    %106 = vector.shape_cast %105 : vector<1x1x48x64xbf16> to vector<48x64xbf16>
    %cst_115 = arith.constant dense<0.000000e+00> : vector<96x64xf32>
    %107 = tpu.matmul %104, %106, %cst_115 {dimension_numbers = #tpu.dot_dimension_numbers<[1], [0], [0], [1], [0, 0, 1, 1], [], []>} : vector<96x48xbf16>, vector<48x64xbf16>, vector<96x64xf32> -> vector<96x64xf32>
    %108 = arith.addf %103, %107 : vector<96x64xf32>
    %c37 = arith.constant 37 : index
    %c0_116 = arith.constant 0 : index
    %109 = vector.load %arg14[%c37, %c0_116] : memref<156x48xbf16, #tpu.memory_space<vmem>>, vector<96x48xbf16>
    %c3_117 = arith.constant 3 : index
    %c1_118 = arith.constant 1 : index
    %c0_119 = arith.constant 0 : index
    %c0_120 = arith.constant 0 : index
    %110 = vector.load %arg3[%c3_117, %c1_118, %c0_119, %c0_120] : memref<5x5x48x64xbf16, #tpu.memory_space<vmem>>, vector<1x1x48x64xbf16>
    %111 = vector.shape_cast %110 : vector<1x1x48x64xbf16> to vector<48x64xbf16>
    %cst_121 = arith.constant dense<0.000000e+00> : vector<96x64xf32>
    %112 = tpu.matmul %109, %111, %cst_121 {dimension_numbers = #tpu.dot_dimension_numbers<[1], [0], [0], [1], [0, 0, 1, 1], [], []>} : vector<96x48xbf16>, vector<48x64xbf16>, vector<96x64xf32> -> vector<96x64xf32>
    %113 = arith.addf %108, %112 : vector<96x64xf32>
    %c38 = arith.constant 38 : index
    %c0_122 = arith.constant 0 : index
    %114 = vector.load %arg14[%c38, %c0_122] : memref<156x48xbf16, #tpu.memory_space<vmem>>, vector<96x48xbf16>
    %c3_123 = arith.constant 3 : index
    %c2_124 = arith.constant 2 : index
    %c0_125 = arith.constant 0 : index
    %c0_126 = arith.constant 0 : index
    %115 = vector.load %arg3[%c3_123, %c2_124, %c0_125, %c0_126] : memref<5x5x48x64xbf16, #tpu.memory_space<vmem>>, vector<1x1x48x64xbf16>
    %116 = vector.shape_cast %115 : vector<1x1x48x64xbf16> to vector<48x64xbf16>
    %cst_127 = arith.constant dense<0.000000e+00> : vector<96x64xf32>
    %117 = tpu.matmul %114, %116, %cst_127 {dimension_numbers = #tpu.dot_dimension_numbers<[1], [0], [0], [1], [0, 0, 1, 1], [], []>} : vector<96x48xbf16>, vector<48x64xbf16>, vector<96x64xf32> -> vector<96x64xf32>
    %118 = arith.addf %113, %117 : vector<96x64xf32>
    %c39 = arith.constant 39 : index
    %c0_128 = arith.constant 0 : index
    %119 = vector.load %arg14[%c39, %c0_128] : memref<156x48xbf16, #tpu.memory_space<vmem>>, vector<96x48xbf16>
    %c3_129 = arith.constant 3 : index
    %c3_130 = arith.constant 3 : index
    %c0_131 = arith.constant 0 : index
    %c0_132 = arith.constant 0 : index
    %120 = vector.load %arg3[%c3_129, %c3_130, %c0_131, %c0_132] : memref<5x5x48x64xbf16, #tpu.memory_space<vmem>>, vector<1x1x48x64xbf16>
    %121 = vector.shape_cast %120 : vector<1x1x48x64xbf16> to vector<48x64xbf16>
    %cst_133 = arith.constant dense<0.000000e+00> : vector<96x64xf32>
    %122 = tpu.matmul %119, %121, %cst_133 {dimension_numbers = #tpu.dot_dimension_numbers<[1], [0], [0], [1], [0, 0, 1, 1], [], []>} : vector<96x48xbf16>, vector<48x64xbf16>, vector<96x64xf32> -> vector<96x64xf32>
    %123 = arith.addf %118, %122 : vector<96x64xf32>
    %c40 = arith.constant 40 : index
    %c0_134 = arith.constant 0 : index
    %124 = vector.load %arg14[%c40, %c0_134] : memref<156x48xbf16, #tpu.memory_space<vmem>>, vector<96x48xbf16>
    %c3_135 = arith.constant 3 : index
    %c4_136 = arith.constant 4 : index
    %c0_137 = arith.constant 0 : index
    %c0_138 = arith.constant 0 : index
    %125 = vector.load %arg3[%c3_135, %c4_136, %c0_137, %c0_138] : memref<5x5x48x64xbf16, #tpu.memory_space<vmem>>, vector<1x1x48x64xbf16>
    %126 = vector.shape_cast %125 : vector<1x1x48x64xbf16> to vector<48x64xbf16>
    %cst_139 = arith.constant dense<0.000000e+00> : vector<96x64xf32>
    %127 = tpu.matmul %124, %126, %cst_139 {dimension_numbers = #tpu.dot_dimension_numbers<[1], [0], [0], [1], [0, 0, 1, 1], [], []>} : vector<96x48xbf16>, vector<48x64xbf16>, vector<96x64xf32> -> vector<96x64xf32>
    %128 = arith.addf %123, %127 : vector<96x64xf32>
    %c48 = arith.constant 48 : index
    %c0_140 = arith.constant 0 : index
    %129 = vector.load %arg14[%c48, %c0_140] : memref<156x48xbf16, #tpu.memory_space<vmem>>, vector<96x48xbf16>
    %c4_141 = arith.constant 4 : index
    %c0_142 = arith.constant 0 : index
    %c0_143 = arith.constant 0 : index
    %c0_144 = arith.constant 0 : index
    %130 = vector.load %arg3[%c4_141, %c0_142, %c0_143, %c0_144] : memref<5x5x48x64xbf16, #tpu.memory_space<vmem>>, vector<1x1x48x64xbf16>
    %131 = vector.shape_cast %130 : vector<1x1x48x64xbf16> to vector<48x64xbf16>
    %cst_145 = arith.constant dense<0.000000e+00> : vector<96x64xf32>
    %132 = tpu.matmul %129, %131, %cst_145 {dimension_numbers = #tpu.dot_dimension_numbers<[1], [0], [0], [1], [0, 0, 1, 1], [], []>} : vector<96x48xbf16>, vector<48x64xbf16>, vector<96x64xf32> -> vector<96x64xf32>
    %133 = arith.addf %128, %132 : vector<96x64xf32>
    %c49 = arith.constant 49 : index
    %c0_146 = arith.constant 0 : index
    %134 = vector.load %arg14[%c49, %c0_146] : memref<156x48xbf16, #tpu.memory_space<vmem>>, vector<96x48xbf16>
    %c4_147 = arith.constant 4 : index
    %c1_148 = arith.constant 1 : index
    %c0_149 = arith.constant 0 : index
    %c0_150 = arith.constant 0 : index
    %135 = vector.load %arg3[%c4_147, %c1_148, %c0_149, %c0_150] : memref<5x5x48x64xbf16, #tpu.memory_space<vmem>>, vector<1x1x48x64xbf16>
    %136 = vector.shape_cast %135 : vector<1x1x48x64xbf16> to vector<48x64xbf16>
    %cst_151 = arith.constant dense<0.000000e+00> : vector<96x64xf32>
    %137 = tpu.matmul %134, %136, %cst_151 {dimension_numbers = #tpu.dot_dimension_numbers<[1], [0], [0], [1], [0, 0, 1, 1], [], []>} : vector<96x48xbf16>, vector<48x64xbf16>, vector<96x64xf32> -> vector<96x64xf32>
    %138 = arith.addf %133, %137 : vector<96x64xf32>
    %c50 = arith.constant 50 : index
    %c0_152 = arith.constant 0 : index
    %139 = vector.load %arg14[%c50, %c0_152] : memref<156x48xbf16, #tpu.memory_space<vmem>>, vector<96x48xbf16>
    %c4_153 = arith.constant 4 : index
    %c2_154 = arith.constant 2 : index
    %c0_155 = arith.constant 0 : index
    %c0_156 = arith.constant 0 : index
    %140 = vector.load %arg3[%c4_153, %c2_154, %c0_155, %c0_156] : memref<5x5x48x64xbf16, #tpu.memory_space<vmem>>, vector<1x1x48x64xbf16>
    %141 = vector.shape_cast %140 : vector<1x1x48x64xbf16> to vector<48x64xbf16>
    %cst_157 = arith.constant dense<0.000000e+00> : vector<96x64xf32>
    %142 = tpu.matmul %139, %141, %cst_157 {dimension_numbers = #tpu.dot_dimension_numbers<[1], [0], [0], [1], [0, 0, 1, 1], [], []>} : vector<96x48xbf16>, vector<48x64xbf16>, vector<96x64xf32> -> vector<96x64xf32>
    %143 = arith.addf %138, %142 : vector<96x64xf32>
    %c51 = arith.constant 51 : index
    %c0_158 = arith.constant 0 : index
    %144 = vector.load %arg14[%c51, %c0_158] : memref<156x48xbf16, #tpu.memory_space<vmem>>, vector<96x48xbf16>
    %c4_159 = arith.constant 4 : index
    %c3_160 = arith.constant 3 : index
    %c0_161 = arith.constant 0 : index
    %c0_162 = arith.constant 0 : index
    %145 = vector.load %arg3[%c4_159, %c3_160, %c0_161, %c0_162] : memref<5x5x48x64xbf16, #tpu.memory_space<vmem>>, vector<1x1x48x64xbf16>
    %146 = vector.shape_cast %145 : vector<1x1x48x64xbf16> to vector<48x64xbf16>
    %cst_163 = arith.constant dense<0.000000e+00> : vector<96x64xf32>
    %147 = tpu.matmul %144, %146, %cst_163 {dimension_numbers = #tpu.dot_dimension_numbers<[1], [0], [0], [1], [0, 0, 1, 1], [], []>} : vector<96x48xbf16>, vector<48x64xbf16>, vector<96x64xf32> -> vector<96x64xf32>
    %148 = arith.addf %143, %147 : vector<96x64xf32>
    %c52 = arith.constant 52 : index
    %c0_164 = arith.constant 0 : index
    %149 = vector.load %arg14[%c52, %c0_164] : memref<156x48xbf16, #tpu.memory_space<vmem>>, vector<96x48xbf16>
    %c4_165 = arith.constant 4 : index
    %c4_166 = arith.constant 4 : index
    %c0_167 = arith.constant 0 : index
    %c0_168 = arith.constant 0 : index
    %150 = vector.load %arg3[%c4_165, %c4_166, %c0_167, %c0_168] : memref<5x5x48x64xbf16, #tpu.memory_space<vmem>>, vector<1x1x48x64xbf16>
    %151 = vector.shape_cast %150 : vector<1x1x48x64xbf16> to vector<48x64xbf16>
    %cst_169 = arith.constant dense<0.000000e+00> : vector<96x64xf32>
    %152 = tpu.matmul %149, %151, %cst_169 {dimension_numbers = #tpu.dot_dimension_numbers<[1], [0], [0], [1], [0, 0, 1, 1], [], []>} : vector<96x48xbf16>, vector<48x64xbf16>, vector<96x64xf32> -> vector<96x64xf32>
    %153 = arith.addf %148, %152 : vector<96x64xf32>
    %c0_170 = arith.constant 0 : index
    %c0_171 = arith.constant 0 : index
    %154 = vector.load %arg4[%c0_170, %c0_171] : memref<1x64xf32, #tpu.memory_space<vmem>>, vector<1x64xf32>
    %155 = vector.broadcast %154 : vector<1x64xf32> to vector<96x64xf32>
    %156 = arith.addf %153, %155 : vector<96x64xf32>
    %cst_172 = arith.constant 0.000000e+00 : f32
    %157 = vector.broadcast %cst_172 : f32 to vector<96x64xf32>
    %158 = arith.maximumf %156, %157 : vector<96x64xf32>
    %159 = vector.shape_cast %158 : vector<96x64xf32> to vector<8x12x64xf32>
    %160 = vector.extract_strided_slice %159 {offsets = [0, 0, 0], sizes = [8, 8, 64], strides = [1, 1, 1]} : vector<8x12x64xf32> to vector<8x8x64xf32>
    %161 = vector.shape_cast %160 : vector<8x8x64xf32> to vector<64x64xf32>
    %162 = arith.truncf %161 : vector<64x64xf32> to vector<64x64xbf16>
    %c0_173 = arith.constant 0 : index
    %c0_174 = arith.constant 0 : index
    %163 = vector.load %arg10[%c0_173, %c0_174] : memref<64x320xbf16, #tpu.memory_space<vmem>>, vector<64x320xbf16>
    %cst_175 = arith.constant dense<0.000000e+00> : vector<64x320xf32>
    %164 = tpu.matmul %162, %163, %cst_175 {dimension_numbers = #tpu.dot_dimension_numbers<[1], [0], [0], [1], [0, 0, 1, 1], [], []>} : vector<64x64xbf16>, vector<64x320xbf16>, vector<64x320xf32> -> vector<64x320xf32>
    %165 = arith.addf %27, %164 : vector<64x320xf32>
    %cst_176 = arith.constant 0.000000e+00 : f32
    %166 = vector.broadcast %cst_176 : f32 to vector<96x96xf32>
    %c13_177 = arith.constant 13 : index
    %c0_178 = arith.constant 0 : index
    %167 = vector.load %arg15[%c13_177, %c0_178] : memref<144x64xbf16, #tpu.memory_space<vmem>>, vector<96x64xbf16>
    %c0_179 = arith.constant 0 : index
    %c0_180 = arith.constant 0 : index
    %c0_181 = arith.constant 0 : index
    %c0_182 = arith.constant 0 : index
    %168 = vector.load %arg5[%c0_179, %c0_180, %c0_181, %c0_182] : memref<3x3x64x96xbf16, #tpu.memory_space<vmem>>, vector<1x1x64x96xbf16>
    %169 = vector.shape_cast %168 : vector<1x1x64x96xbf16> to vector<64x96xbf16>
    %cst_183 = arith.constant dense<0.000000e+00> : vector<96x96xf32>
    %170 = tpu.matmul %167, %169, %cst_183 {dimension_numbers = #tpu.dot_dimension_numbers<[1], [0], [0], [1], [0, 0, 1, 1], [], []>} : vector<96x64xbf16>, vector<64x96xbf16>, vector<96x96xf32> -> vector<96x96xf32>
    %171 = arith.addf %166, %170 : vector<96x96xf32>
    %c14_184 = arith.constant 14 : index
    %c0_185 = arith.constant 0 : index
    %172 = vector.load %arg15[%c14_184, %c0_185] : memref<144x64xbf16, #tpu.memory_space<vmem>>, vector<96x64xbf16>
    %c0_186 = arith.constant 0 : index
    %c1_187 = arith.constant 1 : index
    %c0_188 = arith.constant 0 : index
    %c0_189 = arith.constant 0 : index
    %173 = vector.load %arg5[%c0_186, %c1_187, %c0_188, %c0_189] : memref<3x3x64x96xbf16, #tpu.memory_space<vmem>>, vector<1x1x64x96xbf16>
    %174 = vector.shape_cast %173 : vector<1x1x64x96xbf16> to vector<64x96xbf16>
    %cst_190 = arith.constant dense<0.000000e+00> : vector<96x96xf32>
    %175 = tpu.matmul %172, %174, %cst_190 {dimension_numbers = #tpu.dot_dimension_numbers<[1], [0], [0], [1], [0, 0, 1, 1], [], []>} : vector<96x64xbf16>, vector<64x96xbf16>, vector<96x96xf32> -> vector<96x96xf32>
    %176 = arith.addf %171, %175 : vector<96x96xf32>
    %c15_191 = arith.constant 15 : index
    %c0_192 = arith.constant 0 : index
    %177 = vector.load %arg15[%c15_191, %c0_192] : memref<144x64xbf16, #tpu.memory_space<vmem>>, vector<96x64xbf16>
    %c0_193 = arith.constant 0 : index
    %c2_194 = arith.constant 2 : index
    %c0_195 = arith.constant 0 : index
    %c0_196 = arith.constant 0 : index
    %178 = vector.load %arg5[%c0_193, %c2_194, %c0_195, %c0_196] : memref<3x3x64x96xbf16, #tpu.memory_space<vmem>>, vector<1x1x64x96xbf16>
    %179 = vector.shape_cast %178 : vector<1x1x64x96xbf16> to vector<64x96xbf16>
    %cst_197 = arith.constant dense<0.000000e+00> : vector<96x96xf32>
    %180 = tpu.matmul %177, %179, %cst_197 {dimension_numbers = #tpu.dot_dimension_numbers<[1], [0], [0], [1], [0, 0, 1, 1], [], []>} : vector<96x64xbf16>, vector<64x96xbf16>, vector<96x96xf32> -> vector<96x96xf32>
    %181 = arith.addf %176, %180 : vector<96x96xf32>
    %c25_198 = arith.constant 25 : index
    %c0_199 = arith.constant 0 : index
    %182 = vector.load %arg15[%c25_198, %c0_199] : memref<144x64xbf16, #tpu.memory_space<vmem>>, vector<96x64xbf16>
    %c1_200 = arith.constant 1 : index
    %c0_201 = arith.constant 0 : index
    %c0_202 = arith.constant 0 : index
    %c0_203 = arith.constant 0 : index
    %183 = vector.load %arg5[%c1_200, %c0_201, %c0_202, %c0_203] : memref<3x3x64x96xbf16, #tpu.memory_space<vmem>>, vector<1x1x64x96xbf16>
    %184 = vector.shape_cast %183 : vector<1x1x64x96xbf16> to vector<64x96xbf16>
    %cst_204 = arith.constant dense<0.000000e+00> : vector<96x96xf32>
    %185 = tpu.matmul %182, %184, %cst_204 {dimension_numbers = #tpu.dot_dimension_numbers<[1], [0], [0], [1], [0, 0, 1, 1], [], []>} : vector<96x64xbf16>, vector<64x96xbf16>, vector<96x96xf32> -> vector<96x96xf32>
    %186 = arith.addf %181, %185 : vector<96x96xf32>
    %c26_205 = arith.constant 26 : index
    %c0_206 = arith.constant 0 : index
    %187 = vector.load %arg15[%c26_205, %c0_206] : memref<144x64xbf16, #tpu.memory_space<vmem>>, vector<96x64xbf16>
    %c1_207 = arith.constant 1 : index
    %c1_208 = arith.constant 1 : index
    %c0_209 = arith.constant 0 : index
    %c0_210 = arith.constant 0 : index
    %188 = vector.load %arg5[%c1_207, %c1_208, %c0_209, %c0_210] : memref<3x3x64x96xbf16, #tpu.memory_space<vmem>>, vector<1x1x64x96xbf16>
    %189 = vector.shape_cast %188 : vector<1x1x64x96xbf16> to vector<64x96xbf16>
    %cst_211 = arith.constant dense<0.000000e+00> : vector<96x96xf32>
    %190 = tpu.matmul %187, %189, %cst_211 {dimension_numbers = #tpu.dot_dimension_numbers<[1], [0], [0], [1], [0, 0, 1, 1], [], []>} : vector<96x64xbf16>, vector<64x96xbf16>, vector<96x96xf32> -> vector<96x96xf32>
    %191 = arith.addf %186, %190 : vector<96x96xf32>
    %c27_212 = arith.constant 27 : index
    %c0_213 = arith.constant 0 : index
    %192 = vector.load %arg15[%c27_212, %c0_213] : memref<144x64xbf16, #tpu.memory_space<vmem>>, vector<96x64xbf16>
    %c1_214 = arith.constant 1 : index
    %c2_215 = arith.constant 2 : index
    %c0_216 = arith.constant 0 : index
    %c0_217 = arith.constant 0 : index
    %193 = vector.load %arg5[%c1_214, %c2_215, %c0_216, %c0_217] : memref<3x3x64x96xbf16, #tpu.memory_space<vmem>>, vector<1x1x64x96xbf16>
    %194 = vector.shape_cast %193 : vector<1x1x64x96xbf16> to vector<64x96xbf16>
    %cst_218 = arith.constant dense<0.000000e+00> : vector<96x96xf32>
    %195 = tpu.matmul %192, %194, %cst_218 {dimension_numbers = #tpu.dot_dimension_numbers<[1], [0], [0], [1], [0, 0, 1, 1], [], []>} : vector<96x64xbf16>, vector<64x96xbf16>, vector<96x96xf32> -> vector<96x96xf32>
    %196 = arith.addf %191, %195 : vector<96x96xf32>
    %c37_219 = arith.constant 37 : index
    %c0_220 = arith.constant 0 : index
    %197 = vector.load %arg15[%c37_219, %c0_220] : memref<144x64xbf16, #tpu.memory_space<vmem>>, vector<96x64xbf16>
    %c2_221 = arith.constant 2 : index
    %c0_222 = arith.constant 0 : index
    %c0_223 = arith.constant 0 : index
    %c0_224 = arith.constant 0 : index
    %198 = vector.load %arg5[%c2_221, %c0_222, %c0_223, %c0_224] : memref<3x3x64x96xbf16, #tpu.memory_space<vmem>>, vector<1x1x64x96xbf16>
    %199 = vector.shape_cast %198 : vector<1x1x64x96xbf16> to vector<64x96xbf16>
    %cst_225 = arith.constant dense<0.000000e+00> : vector<96x96xf32>
    %200 = tpu.matmul %197, %199, %cst_225 {dimension_numbers = #tpu.dot_dimension_numbers<[1], [0], [0], [1], [0, 0, 1, 1], [], []>} : vector<96x64xbf16>, vector<64x96xbf16>, vector<96x96xf32> -> vector<96x96xf32>
    %201 = arith.addf %196, %200 : vector<96x96xf32>
    %c38_226 = arith.constant 38 : index
    %c0_227 = arith.constant 0 : index
    %202 = vector.load %arg15[%c38_226, %c0_227] : memref<144x64xbf16, #tpu.memory_space<vmem>>, vector<96x64xbf16>
    %c2_228 = arith.constant 2 : index
    %c1_229 = arith.constant 1 : index
    %c0_230 = arith.constant 0 : index
    %c0_231 = arith.constant 0 : index
    %203 = vector.load %arg5[%c2_228, %c1_229, %c0_230, %c0_231] : memref<3x3x64x96xbf16, #tpu.memory_space<vmem>>, vector<1x1x64x96xbf16>
    %204 = vector.shape_cast %203 : vector<1x1x64x96xbf16> to vector<64x96xbf16>
    %cst_232 = arith.constant dense<0.000000e+00> : vector<96x96xf32>
    %205 = tpu.matmul %202, %204, %cst_232 {dimension_numbers = #tpu.dot_dimension_numbers<[1], [0], [0], [1], [0, 0, 1, 1], [], []>} : vector<96x64xbf16>, vector<64x96xbf16>, vector<96x96xf32> -> vector<96x96xf32>
    %206 = arith.addf %201, %205 : vector<96x96xf32>
    %c39_233 = arith.constant 39 : index
    %c0_234 = arith.constant 0 : index
    %207 = vector.load %arg15[%c39_233, %c0_234] : memref<144x64xbf16, #tpu.memory_space<vmem>>, vector<96x64xbf16>
    %c2_235 = arith.constant 2 : index
    %c2_236 = arith.constant 2 : index
    %c0_237 = arith.constant 0 : index
    %c0_238 = arith.constant 0 : index
    %208 = vector.load %arg5[%c2_235, %c2_236, %c0_237, %c0_238] : memref<3x3x64x96xbf16, #tpu.memory_space<vmem>>, vector<1x1x64x96xbf16>
    %209 = vector.shape_cast %208 : vector<1x1x64x96xbf16> to vector<64x96xbf16>
    %cst_239 = arith.constant dense<0.000000e+00> : vector<96x96xf32>
    %210 = tpu.matmul %207, %209, %cst_239 {dimension_numbers = #tpu.dot_dimension_numbers<[1], [0], [0], [1], [0, 0, 1, 1], [], []>} : vector<96x64xbf16>, vector<64x96xbf16>, vector<96x96xf32> -> vector<96x96xf32>
    %211 = arith.addf %206, %210 : vector<96x96xf32>
    %c0_240 = arith.constant 0 : index
    %c0_241 = arith.constant 0 : index
    %212 = vector.load %arg6[%c0_240, %c0_241] : memref<1x96xf32, #tpu.memory_space<vmem>>, vector<1x96xf32>
    %213 = vector.broadcast %212 : vector<1x96xf32> to vector<96x96xf32>
    %214 = arith.addf %211, %213 : vector<96x96xf32>
    %cst_242 = arith.constant 0.000000e+00 : f32
    %215 = vector.broadcast %cst_242 : f32 to vector<96x96xf32>
    %216 = arith.maximumf %214, %215 : vector<96x96xf32>
    %217 = vector.extract_strided_slice %4 {offsets = [26, 0], sizes = [96, 1], strides = [1, 1]} : vector<144x1xf32> to vector<96x1xf32>
    %218 = vector.broadcast %217 : vector<96x1xf32> to vector<96x96xf32>
    %219 = arith.mulf %216, %218 : vector<96x96xf32>
    %cst_243 = arith.constant 0.000000e+00 : bf16
    %220 = vector.broadcast %cst_243 : bf16 to vector<26x96xbf16>
    %c0_244 = arith.constant 0 : index
    %c0_245 = arith.constant 0 : index
    %221 = vector.load %arg16[%c0_244, %c0_245] : memref<144x96xbf16, #tpu.memory_space<vmem>>, vector<26x96xbf16>
    tpu.vector_store %arg16[%c0_244, %c0_245], %220 {strides = array<i32>} : memref<144x96xbf16, #tpu.memory_space<vmem>>, vector<26x96xbf16>,
    %cst_246 = arith.constant 0.000000e+00 : bf16
    %222 = vector.broadcast %cst_246 : bf16 to vector<22x96xbf16>
    %c122 = arith.constant 122 : index
    %c0_247 = arith.constant 0 : index
    %223 = vector.load %arg16[%c122, %c0_247] : memref<144x96xbf16, #tpu.memory_space<vmem>>, vector<22x96xbf16>
    tpu.vector_store %arg16[%c122, %c0_247], %222 {strides = array<i32>} : memref<144x96xbf16, #tpu.memory_space<vmem>>, vector<22x96xbf16>,
    %224 = arith.truncf %219 : vector<96x96xf32> to vector<96x96xbf16>
    %c26_248 = arith.constant 26 : index
    %c0_249 = arith.constant 0 : index
    %225 = vector.load %arg16[%c26_248, %c0_249] : memref<144x96xbf16, #tpu.memory_space<vmem>>, vector<96x96xbf16>
    tpu.vector_store %arg16[%c26_248, %c0_249], %224 {strides = array<i32>} : memref<144x96xbf16, #tpu.memory_space<vmem>>, vector<96x96xbf16>,
    %cst_250 = arith.constant 0.000000e+00 : f32
    %226 = vector.broadcast %cst_250 : f32 to vector<96x96xf32>
    %c13_251 = arith.constant 13 : index
    %c0_252 = arith.constant 0 : index
    %227 = vector.load %arg16[%c13_251, %c0_252] : memref<144x96xbf16, #tpu.memory_space<vmem>>, vector<96x96xbf16>
    %c0_253 = arith.constant 0 : index
    %c0_254 = arith.constant 0 : index
    %c0_255 = arith.constant 0 : index
    %c0_256 = arith.constant 0 : index
    %228 = vector.load %arg7[%c0_253, %c0_254, %c0_255, %c0_256] : memref<3x3x96x96xbf16, #tpu.memory_space<vmem>>, vector<1x1x96x96xbf16>
    %229 = vector.shape_cast %228 : vector<1x1x96x96xbf16> to vector<96x96xbf16>
    %cst_257 = arith.constant dense<0.000000e+00> : vector<96x96xf32>
    %230 = tpu.matmul %227, %229, %cst_257 {dimension_numbers = #tpu.dot_dimension_numbers<[1], [0], [0], [1], [0, 0, 1, 1], [], []>} : vector<96x96xbf16>, vector<96x96xbf16>, vector<96x96xf32> -> vector<96x96xf32>
    %231 = arith.addf %226, %230 : vector<96x96xf32>
    %c14_258 = arith.constant 14 : index
    %c0_259 = arith.constant 0 : index
    %232 = vector.load %arg16[%c14_258, %c0_259] : memref<144x96xbf16, #tpu.memory_space<vmem>>, vector<96x96xbf16>
    %c0_260 = arith.constant 0 : index
    %c1_261 = arith.constant 1 : index
    %c0_262 = arith.constant 0 : index
    %c0_263 = arith.constant 0 : index
    %233 = vector.load %arg7[%c0_260, %c1_261, %c0_262, %c0_263] : memref<3x3x96x96xbf16, #tpu.memory_space<vmem>>, vector<1x1x96x96xbf16>
    %234 = vector.shape_cast %233 : vector<1x1x96x96xbf16> to vector<96x96xbf16>
    %cst_264 = arith.constant dense<0.000000e+00> : vector<96x96xf32>
    %235 = tpu.matmul %232, %234, %cst_264 {dimension_numbers = #tpu.dot_dimension_numbers<[1], [0], [0], [1], [0, 0, 1, 1], [], []>} : vector<96x96xbf16>, vector<96x96xbf16>, vector<96x96xf32> -> vector<96x96xf32>
    %236 = arith.addf %231, %235 : vector<96x96xf32>
    %c15_265 = arith.constant 15 : index
    %c0_266 = arith.constant 0 : index
    %237 = vector.load %arg16[%c15_265, %c0_266] : memref<144x96xbf16, #tpu.memory_space<vmem>>, vector<96x96xbf16>
    %c0_267 = arith.constant 0 : index
    %c2_268 = arith.constant 2 : index
    %c0_269 = arith.constant 0 : index
    %c0_270 = arith.constant 0 : index
    %238 = vector.load %arg7[%c0_267, %c2_268, %c0_269, %c0_270] : memref<3x3x96x96xbf16, #tpu.memory_space<vmem>>, vector<1x1x96x96xbf16>
    %239 = vector.shape_cast %238 : vector<1x1x96x96xbf16> to vector<96x96xbf16>
    %cst_271 = arith.constant dense<0.000000e+00> : vector<96x96xf32>
    %240 = tpu.matmul %237, %239, %cst_271 {dimension_numbers = #tpu.dot_dimension_numbers<[1], [0], [0], [1], [0, 0, 1, 1], [], []>} : vector<96x96xbf16>, vector<96x96xbf16>, vector<96x96xf32> -> vector<96x96xf32>
    %241 = arith.addf %236, %240 : vector<96x96xf32>
    %c25_272 = arith.constant 25 : index
    %c0_273 = arith.constant 0 : index
    %242 = vector.load %arg16[%c25_272, %c0_273] : memref<144x96xbf16, #tpu.memory_space<vmem>>, vector<96x96xbf16>
    %c1_274 = arith.constant 1 : index
    %c0_275 = arith.constant 0 : index
    %c0_276 = arith.constant 0 : index
    %c0_277 = arith.constant 0 : index
    %243 = vector.load %arg7[%c1_274, %c0_275, %c0_276, %c0_277] : memref<3x3x96x96xbf16, #tpu.memory_space<vmem>>, vector<1x1x96x96xbf16>
    %244 = vector.shape_cast %243 : vector<1x1x96x96xbf16> to vector<96x96xbf16>
    %cst_278 = arith.constant dense<0.000000e+00> : vector<96x96xf32>
    %245 = tpu.matmul %242, %244, %cst_278 {dimension_numbers = #tpu.dot_dimension_numbers<[1], [0], [0], [1], [0, 0, 1, 1], [], []>} : vector<96x96xbf16>, vector<96x96xbf16>, vector<96x96xf32> -> vector<96x96xf32>
    %246 = arith.addf %241, %245 : vector<96x96xf32>
    %c26_279 = arith.constant 26 : index
    %c0_280 = arith.constant 0 : index
    %247 = vector.load %arg16[%c26_279, %c0_280] : memref<144x96xbf16, #tpu.memory_space<vmem>>, vector<96x96xbf16>
    %c1_281 = arith.constant 1 : index
    %c1_282 = arith.constant 1 : index
    %c0_283 = arith.constant 0 : index
    %c0_284 = arith.constant 0 : index
    %248 = vector.load %arg7[%c1_281, %c1_282, %c0_283, %c0_284] : memref<3x3x96x96xbf16, #tpu.memory_space<vmem>>, vector<1x1x96x96xbf16>
    %249 = vector.shape_cast %248 : vector<1x1x96x96xbf16> to vector<96x96xbf16>
    %cst_285 = arith.constant dense<0.000000e+00> : vector<96x96xf32>
    %250 = tpu.matmul %247, %249, %cst_285 {dimension_numbers = #tpu.dot_dimension_numbers<[1], [0], [0], [1], [0, 0, 1, 1], [], []>} : vector<96x96xbf16>, vector<96x96xbf16>, vector<96x96xf32> -> vector<96x96xf32>
    %251 = arith.addf %246, %250 : vector<96x96xf32>
    %c27_286 = arith.constant 27 : index
    %c0_287 = arith.constant 0 : index
    %252 = vector.load %arg16[%c27_286, %c0_287] : memref<144x96xbf16, #tpu.memory_space<vmem>>, vector<96x96xbf16>
    %c1_288 = arith.constant 1 : index
    %c2_289 = arith.constant 2 : index
    %c0_290 = arith.constant 0 : index
    %c0_291 = arith.constant 0 : index
    %253 = vector.load %arg7[%c1_288, %c2_289, %c0_290, %c0_291] : memref<3x3x96x96xbf16, #tpu.memory_space<vmem>>, vector<1x1x96x96xbf16>
    %254 = vector.shape_cast %253 : vector<1x1x96x96xbf16> to vector<96x96xbf16>
    %cst_292 = arith.constant dense<0.000000e+00> : vector<96x96xf32>
    %255 = tpu.matmul %252, %254, %cst_292 {dimension_numbers = #tpu.dot_dimension_numbers<[1], [0], [0], [1], [0, 0, 1, 1], [], []>} : vector<96x96xbf16>, vector<96x96xbf16>, vector<96x96xf32> -> vector<96x96xf32>
    %256 = arith.addf %251, %255 : vector<96x96xf32>
    %c37_293 = arith.constant 37 : index
    %c0_294 = arith.constant 0 : index
    %257 = vector.load %arg16[%c37_293, %c0_294] : memref<144x96xbf16, #tpu.memory_space<vmem>>, vector<96x96xbf16>
    %c2_295 = arith.constant 2 : index
    %c0_296 = arith.constant 0 : index
    %c0_297 = arith.constant 0 : index
    %c0_298 = arith.constant 0 : index
    %258 = vector.load %arg7[%c2_295, %c0_296, %c0_297, %c0_298] : memref<3x3x96x96xbf16, #tpu.memory_space<vmem>>, vector<1x1x96x96xbf16>
    %259 = vector.shape_cast %258 : vector<1x1x96x96xbf16> to vector<96x96xbf16>
    %cst_299 = arith.constant dense<0.000000e+00> : vector<96x96xf32>
    %260 = tpu.matmul %257, %259, %cst_299 {dimension_numbers = #tpu.dot_dimension_numbers<[1], [0], [0], [1], [0, 0, 1, 1], [], []>} : vector<96x96xbf16>, vector<96x96xbf16>, vector<96x96xf32> -> vector<96x96xf32>
    %261 = arith.addf %256, %260 : vector<96x96xf32>
    %c38_300 = arith.constant 38 : index
    %c0_301 = arith.constant 0 : index
    %262 = vector.load %arg16[%c38_300, %c0_301] : memref<144x96xbf16, #tpu.memory_space<vmem>>, vector<96x96xbf16>
    %c2_302 = arith.constant 2 : index
    %c1_303 = arith.constant 1 : index
    %c0_304 = arith.constant 0 : index
    %c0_305 = arith.constant 0 : index
    %263 = vector.load %arg7[%c2_302, %c1_303, %c0_304, %c0_305] : memref<3x3x96x96xbf16, #tpu.memory_space<vmem>>, vector<1x1x96x96xbf16>
    %264 = vector.shape_cast %263 : vector<1x1x96x96xbf16> to vector<96x96xbf16>
    %cst_306 = arith.constant dense<0.000000e+00> : vector<96x96xf32>
    %265 = tpu.matmul %262, %264, %cst_306 {dimension_numbers = #tpu.dot_dimension_numbers<[1], [0], [0], [1], [0, 0, 1, 1], [], []>} : vector<96x96xbf16>, vector<96x96xbf16>, vector<96x96xf32> -> vector<96x96xf32>
    %266 = arith.addf %261, %265 : vector<96x96xf32>
    %c39_307 = arith.constant 39 : index
    %c0_308 = arith.constant 0 : index
    %267 = vector.load %arg16[%c39_307, %c0_308] : memref<144x96xbf16, #tpu.memory_space<vmem>>, vector<96x96xbf16>
    %c2_309 = arith.constant 2 : index
    %c2_310 = arith.constant 2 : index
    %c0_311 = arith.constant 0 : index
    %c0_312 = arith.constant 0 : index
    %268 = vector.load %arg7[%c2_309, %c2_310, %c0_311, %c0_312] : memref<3x3x96x96xbf16, #tpu.memory_space<vmem>>, vector<1x1x96x96xbf16>
    %269 = vector.shape_cast %268 : vector<1x1x96x96xbf16> to vector<96x96xbf16>
    %cst_313 = arith.constant dense<0.000000e+00> : vector<96x96xf32>
    %270 = tpu.matmul %267, %269, %cst_313 {dimension_numbers = #tpu.dot_dimension_numbers<[1], [0], [0], [1], [0, 0, 1, 1], [], []>} : vector<96x96xbf16>, vector<96x96xbf16>, vector<96x96xf32> -> vector<96x96xf32>
    %271 = arith.addf %266, %270 : vector<96x96xf32>
    %c0_314 = arith.constant 0 : index
    %c0_315 = arith.constant 0 : index
    %272 = vector.load %arg8[%c0_314, %c0_315] : memref<1x96xf32, #tpu.memory_space<vmem>>, vector<1x96xf32>
    %273 = vector.broadcast %272 : vector<1x96xf32> to vector<96x96xf32>
    %274 = arith.addf %271, %273 : vector<96x96xf32>
    %cst_316 = arith.constant 0.000000e+00 : f32
    %275 = vector.broadcast %cst_316 : f32 to vector<96x96xf32>
    %276 = arith.maximumf %274, %275 : vector<96x96xf32>
    %277 = vector.shape_cast %276 : vector<96x96xf32> to vector<8x12x96xf32>
    %278 = vector.extract_strided_slice %277 {offsets = [0, 0, 0], sizes = [8, 8, 96], strides = [1, 1, 1]} : vector<8x12x96xf32> to vector<8x8x96xf32>
    %279 = vector.shape_cast %278 : vector<8x8x96xf32> to vector<64x96xf32>
    %280 = arith.truncf %279 : vector<64x96xf32> to vector<64x96xbf16>
    %c0_317 = arith.constant 0 : index
    %c0_318 = arith.constant 0 : index
    %281 = vector.load %arg11[%c0_317, %c0_318] : memref<96x320xbf16, #tpu.memory_space<vmem>>, vector<96x320xbf16>
    %cst_319 = arith.constant dense<0.000000e+00> : vector<64x320xf32>
    %282 = tpu.matmul %280, %281, %cst_319 {dimension_numbers = #tpu.dot_dimension_numbers<[1], [0], [0], [1], [0, 0, 1, 1], [], []>} : vector<64x96xbf16>, vector<96x320xbf16>, vector<64x320xf32> -> vector<64x320xf32>
    %283 = arith.addf %165, %282 : vector<64x320xf32>
    %cst_320 = arith.constant 0.000000e+00 : f32
    %284 = vector.broadcast %cst_320 : f32 to vector<96x65xf32>
    %c13_321 = arith.constant 13 : index
    %c0_322 = arith.constant 0 : index
    %285 = vector.load %arg17[%c13_321, %c0_322] : memref<144x65xf32, #tpu.memory_space<vmem>>, vector<96x65xf32>
    %286 = arith.addf %284, %285 : vector<96x65xf32>
    %c14_323 = arith.constant 14 : index
    %c0_324 = arith.constant 0 : index
    %287 = vector.load %arg17[%c14_323, %c0_324] : memref<144x65xf32, #tpu.memory_space<vmem>>, vector<96x65xf32>
    %288 = arith.addf %286, %287 : vector<96x65xf32>
    %c15_325 = arith.constant 15 : index
    %c0_326 = arith.constant 0 : index
    %289 = vector.load %arg17[%c15_325, %c0_326] : memref<144x65xf32, #tpu.memory_space<vmem>>, vector<96x65xf32>
    %290 = arith.addf %288, %289 : vector<96x65xf32>
    %c25_327 = arith.constant 25 : index
    %c0_328 = arith.constant 0 : index
    %291 = vector.load %arg17[%c25_327, %c0_328] : memref<144x65xf32, #tpu.memory_space<vmem>>, vector<96x65xf32>
    %292 = arith.addf %290, %291 : vector<96x65xf32>
    %c26_329 = arith.constant 26 : index
    %c0_330 = arith.constant 0 : index
    %293 = vector.load %arg17[%c26_329, %c0_330] : memref<144x65xf32, #tpu.memory_space<vmem>>, vector<96x65xf32>
    %294 = arith.addf %292, %293 : vector<96x65xf32>
    %c27_331 = arith.constant 27 : index
    %c0_332 = arith.constant 0 : index
    %295 = vector.load %arg17[%c27_331, %c0_332] : memref<144x65xf32, #tpu.memory_space<vmem>>, vector<96x65xf32>
    %296 = arith.addf %294, %295 : vector<96x65xf32>
    %c37_333 = arith.constant 37 : index
    %c0_334 = arith.constant 0 : index
    %297 = vector.load %arg17[%c37_333, %c0_334] : memref<144x65xf32, #tpu.memory_space<vmem>>, vector<96x65xf32>
    %298 = arith.addf %296, %297 : vector<96x65xf32>
    %c38_335 = arith.constant 38 : index
    %c0_336 = arith.constant 0 : index
    %299 = vector.load %arg17[%c38_335, %c0_336] : memref<144x65xf32, #tpu.memory_space<vmem>>, vector<96x65xf32>
    %300 = arith.addf %298, %299 : vector<96x65xf32>
    %c39_337 = arith.constant 39 : index
    %c0_338 = arith.constant 0 : index
    %301 = vector.load %arg17[%c39_337, %c0_338] : memref<144x65xf32, #tpu.memory_space<vmem>>, vector<96x65xf32>
    %302 = arith.addf %300, %301 : vector<96x65xf32>
    %303 = vector.shape_cast %302 : vector<96x65xf32> to vector<8x12x65xf32>
    %304 = vector.extract_strided_slice %303 {offsets = [0, 0, 0], sizes = [8, 8, 65], strides = [1, 1, 1]} : vector<8x12x65xf32> to vector<8x8x65xf32>
    %305 = vector.extract_strided_slice %304 {offsets = [0, 0, 0], sizes = [8, 8, 64], strides = [1, 1, 1]} : vector<8x8x65xf32> to vector<8x8x64xf32>
    %306 = vector.extract_strided_slice %304 {offsets = [0, 0, 64], sizes = [8, 8, 1], strides = [1, 1, 1]} : vector<8x8x65xf32> to vector<8x8x1xf32>
    %307 = vector.broadcast %306 : vector<8x8x1xf32> to vector<8x8x64xf32>
    %308 = arith.divf %305, %307 : vector<8x8x64xf32>
    %cst_339 = arith.constant 0.000000e+00 : f32
    %309 = vector.broadcast %cst_339 : f32 to vector<8x8x64xf32>
    %310 = arith.maximumf %308, %309 : vector<8x8x64xf32>
    %311 = vector.shape_cast %310 : vector<8x8x64xf32> to vector<64x64xf32>
    %312 = arith.truncf %311 : vector<64x64xf32> to vector<64x64xbf16>
    %c0_340 = arith.constant 0 : index
    %c0_341 = arith.constant 0 : index
    %313 = vector.load %arg12[%c0_340, %c0_341] : memref<64x320xbf16, #tpu.memory_space<vmem>>, vector<64x320xbf16>
    %cst_342 = arith.constant dense<0.000000e+00> : vector<64x320xf32>
    %314 = tpu.matmul %312, %313, %cst_342 {dimension_numbers = #tpu.dot_dimension_numbers<[1], [0], [0], [1], [0, 0, 1, 1], [], []>} : vector<64x64xbf16>, vector<64x320xbf16>, vector<64x320xf32> -> vector<64x320xf32>
    %315 = arith.addf %283, %314 : vector<64x320xf32>
    %316 = vector.shape_cast %315 : vector<64x320xf32> to vector<1x8x8x320xf32>
    %c0_343 = arith.constant 0 : index
    %c0_344 = arith.constant 0 : index
    %c0_345 = arith.constant 0 : index
    %c0_346 = arith.constant 0 : index
    %317 = vector.load %arg13[%c0_343, %c0_344, %c0_345, %c0_346] : memref<1x8x8x320xf32, #tpu.memory_space<vmem>>, vector<1x8x8x320xf32>
    tpu.vector_store %arg13[%c0_343, %c0_344, %c0_345, %c0_346], %316 {strides = array<i32>} : memref<1x8x8x320xf32, #tpu.memory_space<vmem>>, vector<1x8x8x320xf32>,
    return
  }
  func.func @transform_0(%arg0: i32) -> (i32, i32, i32) {
    %c0_i32 = arith.constant 0 : i32
    %c0_i32_0 = arith.constant 0 : i32
    %c0_i32_1 = arith.constant 0 : i32
    return %arg0, %c0_i32, %c0_i32_0 : i32, i32, i32
  }
  func.func @transform_1(%arg0: i32) -> (i32, i32) {
    %c0_i32 = arith.constant 0 : i32
    %c0_i32_0 = arith.constant 0 : i32
    %c0_i32_1 = arith.constant 0 : i32
    return %c0_i32, %c0_i32_0 : i32, i32
  }
  func.func @transform_2(%arg0: i32) -> (i32, i32, i32, i32) {
    %c0_i32 = arith.constant 0 : i32
    %c0_i32_0 = arith.constant 0 : i32
    %c0_i32_1 = arith.constant 0 : i32
    %c0_i32_2 = arith.constant 0 : i32
    %c0_i32_3 = arith.constant 0 : i32
    return %c0_i32, %c0_i32_0, %c0_i32_1, %c0_i32_2 : i32, i32, i32, i32
  }
  func.func @transform_3(%arg0: i32) -> (i32, i32) {
    %c0_i32 = arith.constant 0 : i32
    %c0_i32_0 = arith.constant 0 : i32
    %c0_i32_1 = arith.constant 0 : i32
    return %c0_i32, %c0_i32_0 : i32, i32
  }
  func.func @transform_4(%arg0: i32) -> (i32, i32, i32, i32) {
    %c0_i32 = arith.constant 0 : i32
    %c0_i32_0 = arith.constant 0 : i32
    %c0_i32_1 = arith.constant 0 : i32
    %c0_i32_2 = arith.constant 0 : i32
    %c0_i32_3 = arith.constant 0 : i32
    return %c0_i32, %c0_i32_0, %c0_i32_1, %c0_i32_2 : i32, i32, i32, i32
  }
  func.func @transform_5(%arg0: i32) -> (i32, i32) {
    %c0_i32 = arith.constant 0 : i32
    %c0_i32_0 = arith.constant 0 : i32
    %c0_i32_1 = arith.constant 0 : i32
    return %c0_i32, %c0_i32_0 : i32, i32
  }
  func.func @transform_6(%arg0: i32) -> (i32, i32, i32, i32) {
    %c0_i32 = arith.constant 0 : i32
    %c0_i32_0 = arith.constant 0 : i32
    %c0_i32_1 = arith.constant 0 : i32
    %c0_i32_2 = arith.constant 0 : i32
    %c0_i32_3 = arith.constant 0 : i32
    return %c0_i32, %c0_i32_0, %c0_i32_1, %c0_i32_2 : i32, i32, i32, i32
  }
  func.func @transform_7(%arg0: i32) -> (i32, i32) {
    %c0_i32 = arith.constant 0 : i32
    %c0_i32_0 = arith.constant 0 : i32
    %c0_i32_1 = arith.constant 0 : i32
    return %c0_i32, %c0_i32_0 : i32, i32
  }
  func.func @transform_8(%arg0: i32) -> (i32, i32) {
    %c0_i32 = arith.constant 0 : i32
    %c0_i32_0 = arith.constant 0 : i32
    %c0_i32_1 = arith.constant 0 : i32
    return %c0_i32, %c0_i32_0 : i32, i32
  }
  func.func @transform_9(%arg0: i32) -> (i32, i32) {
    %c0_i32 = arith.constant 0 : i32
    %c0_i32_0 = arith.constant 0 : i32
    %c0_i32_1 = arith.constant 0 : i32
    return %c0_i32, %c0_i32_0 : i32, i32
  }
  func.func @transform_10(%arg0: i32) -> (i32, i32) {
    %c0_i32 = arith.constant 0 : i32
    %c0_i32_0 = arith.constant 0 : i32
    %c0_i32_1 = arith.constant 0 : i32
    return %c0_i32, %c0_i32_0 : i32, i32
  }
  func.func @transform_11(%arg0: i32) -> (i32, i32) {
    %c0_i32 = arith.constant 0 : i32
    %c0_i32_0 = arith.constant 0 : i32
    %c0_i32_1 = arith.constant 0 : i32
    return %c0_i32, %c0_i32_0 : i32, i32
  }
  func.func @transform_12(%arg0: i32) -> (i32, i32, i32, i32) {
    %c0_i32 = arith.constant 0 : i32
    %c0_i32_0 = arith.constant 0 : i32
    %c0_i32_1 = arith.constant 0 : i32
    %c0_i32_2 = arith.constant 0 : i32
    return %arg0, %c0_i32, %c0_i32_0, %c0_i32_1 : i32, i32, i32, i32
  }
}

</mosaic_0001>

<bundles_post_ra>
// kernel: mixed_5b_forward.1
= control target key start
LH: loop header
LB: loop body
LE: loop exit
PB: predicated region body
PF: predicated region fallthrough
CT: control target
= control target key end

     0   :  { %17 = vsyncpa [#allocation7], 0  ;;  %s18364_s0 = inlined_call_operand.vmem [shape: bf16[2,144,193], index: 0, kind: input, shape index: {}]   ;;  %s18365_s1 = inlined_call_operand.vmem [shape: bf16[193,273], index: 1, kind: input, shape index: {}]   ;;  %s18366_s2 = inlined_call_operand.vmem [shape: bf16[5,5,48,64], index: 2, kind: input, shape index: {}]   ;;  %s18367_s3 = inlined_call_operand.vmem [shape: f32[1,64], index: 3, kind: input, shape index: {}]   ;;  %s18368_s4 = inlined_call_operand.vmem [shape: bf16[3,3,64,96], index: 4, kind: input, shape index: {}]   ;;  %s18369_s5 = inlined_call_operand.vmem [shape: f32[1,96], index: 5, kind: input, shape index: {}]   ;;  %s18370_s6 = inlined_call_operand.vmem [shape: bf16[3,3,96,96], index: 6, kind: input, shape index: {}]   ;;  %s18371_s7 = inlined_call_operand.vmem [shape: f32[1,96], index: 7, kind: input, shape index: {}]   ;;  %s18372_s8 = inlined_call_operand.vmem [shape: bf16[96,320], index: 8, kind: input, shape index: {}]   ;;  %s18373_s9 = inlined_call_operand.vmem [shape: bf16[64,320], index: 9, kind: input, shape index: {}]   ;;  %s18374_s10 = inlined_call_operand.vmem [shape: bf16[96,320], index: 10, kind: input, shape index: {}]   ;;  %s18375_s11 = inlined_call_operand.vmem [shape: bf16[64,320], index: 11, kind: input, shape index: {}]   ;;  %s18376_s12 = inlined_call_operand.hbm [shape: f32[2,8,8,320], index: 12, kind: output, shape index: {}]  }
   0x1   :  { %19 = vsyncpa [#allocation7 + $0x1], 0  ;;  %s14929_s21 = smov 0   ;;  %s14931_s22 = smov 0  }
   0x2   :  { %s14933_s23 = smov 0   ;;  %s14935_s24 = smov 0  }
   0x3 LB: > { %18448 = sst [smem:[#allocation9_spill]] %s14848_s23  ;;  %s14950_s25 = sadd.s32 4294967295, %s14852_s24   ;;  %s14852_s24 = sphi %s14935_s24, %s18686_s24   ;;  %s14848_s23 = sphi %s14933_s23, %s18688_s23   ;;  %s14844_s22 = sphi %s14931_s22, %s18690_s22   ;;  %s14840_s21 = sphi %s14929_s21, %s18689_s21  }
   0x4   : > { %s11310_s26 = sadd.s32 4294967294, %s14852_s24   ;;  %s14954_s27 = sadd.s32 1, %s14852_s24  }
   0x5   : > { %18449 = sst [smem:[#allocation10_spill]] %s14954_s27  ;;  %s289_s28 = sadd.s32 1, %s14848_s23 }
   0x6   : > { %s286_s29 = ssub.s32 %s14852_s24, %s14954_s27  ;;  %p299_p0 = scmp.ne.s32.totalorder %s14848_s23, %s14844_s22 }
   0x7   : > { %p287_p1 = scmp.eq.s32.totalorder %s286_s29, 0  ;;  %p300_p2 = scmp.eq.s32.totalorder %s14950_s25, 1 }
   0x8   : > { %p305_p3 = scmp.ne.s32.totalorder %s14844_s22, %s14840_s21  ;;  %p306_p4 = scmp.eq.s32.totalorder %s11310_s26, 1 }
   0x9   : > { %s14965_s30 = scalar_select %p287_p1, %s14848_s23, %s289_s28  }
   0xa   : > { %p14967_p5 = por %p300_p2, %p299_p0  ;;  %p14971_p6 = por %p306_p4, %p305_p3 }
   0xb   : > { %18450 = sst [smem:[#allocation11_spill]] %s14965_s30  ;;  %p11313_p7 = scmp.ge.s32.totalorder %s14852_s24, 1 }
   0xc   : > { %p365_p8 = scmp.lt.s32.totalorder %s14852_s24, 3 }
   0xe   : > { %p366_p9 = pnand %p11313_p7, %p365_p8 }
  0x10   : > { %369 = sbr.rel (%p366_p9) target bundleno = 2526 (0x9de), region = 68 }
  0x17   : > { %v14343_v0 = vld [vmem:[%s18365_s1 + $0x4] ss:$12 sps:$4 sm:$0xff]   ;;  %v14345_v1 = vld [vmem:[%s18365_s1] ss:$12 sps:$4 sm:$0xff]   ;;  %v18380_v2 = vmov 0   ;;  %p407_p10 = scmp.lt.s32.totalorder %s14950_s25, 1 }
  0x18   : > { %13710 = vmatprep.subr.bf16.mxu1 %v18380_v2  ;;  %802 = vmatprep.subr.bf16.mxu0 %v14343_v0  ;;  %v14346_v3 = vld [vmem:[%s18365_s1 + $0x1c] ss:$12 sps:$4 sm:$0xff]   ;;  %v14348_v4 = vld [vmem:[%s18365_s1 + $0x18] ss:$12 sps:$4 sm:$0xff]   ;;  %v14349_v5 = vld [vmem:[%s18365_s1 + $0x34] ss:$12 sps:$4 sm:$0xff]  }
  0x19   : > { %803 = vmatpush1.bf16.msra.mxu0 %v14345_v1  ;;  %s408_s16 = scalar_select %p407_p10, %s14950_s25, 1  ;;  %v14351_v6 = vld [vmem:[%s18365_s1 + $0x30] ss:$12 sps:$4 sm:$0xff]   ;;  %v14352_v7 = vld [vmem:[%s18365_s1 + $0x4c] ss:$12 sps:$4 sm:$0xff]   ;;  %vm762_vm0 = vcmask 531456  }
  0x1a   : > { %804 = vmatprep.subr.bf16.mxu0 %v14346_v3  ;;  %v14354_v8 = vld [vmem:[%s18365_s1 + $0x48] ss:$12 sps:$4 sm:$0xff]   ;;  %v14355_v9 = vld [vmem:[%s18365_s1 + $0x64] ss:$12 sps:$4 sm:$0xff]   ;;  %v14357_v10 = vld [vmem:[%s18365_s1 + $0x60] ss:$12 sps:$4 sm:$0xff]  }
  0x1b   : > { %s14289_s30 = smul.u32 144, %s408_s16  ;;  %v14358_v11 = vld [vmem:[%s18365_s1 + $0x7c] ss:$12 sps:$4 sm:$0xff]   ;;  %v14360_v13 = vld [vmem:[%s18365_s1 + $0x78] ss:$12 sps:$4 sm:$0xff]   ;;  %vm790_vm1 = vcmask 1040384  }
  0x1c   : > { %v14361_v14 = vld [vmem:[%s18365_s1 + $0x94] ss:$12 sps:$4 sm:$0xff]   ;;  %v14363_v18 = vld [vmem:[%s18365_s1 + $0x90] ss:$12 sps:$4 sm:$0xff]   ;;  %v14364_v19 = vld [vmem:[%s18365_s1 + $0xac] ss:$12 sps:$4 sm:$0xff]  }
  0x1d   : > { %805 = vmatpush1.bf16.msra.mxu0 %v14348_v4  ;;  %s15010_s17 = scalar_lea.vmem %s18364_s0, %s14289_s30  ;;  %v15032_v15 = vld [vmem:[%s18365_s1 + $0x8] ss:$12 sps:$4 sm:$0xff]   ;;  %v15037_v16 = vld [vmem:[%s18365_s1 + $0x20] ss:$12 sps:$4 sm:$0xff]   ;;  %v15056_v20 = vld [vmem:[%s18365_s1 + $0x38] ss:$12 sps:$4 sm:$0xff]  }
  0x1e   : > { %806 = vmatprep.subr.bf16.mxu0 %v14349_v5  ;;  %v15019_v12 = vld [vmem:[%s15010_s17 + $0x4] ss:$8 sps:$4 sm:$0xff]   ;;  %13723 = vmatpush1.bf16.msra.mxu1 %v15032_v15  ;;  %v14366_v21 = vld [vmem:[%s18365_s1 + $0xa8] ss:$12 sps:$4 sm:$0xff]   ;;  %v15069_v23 = vld [vmem:[%s18365_s1 + $0x50] ss:$12 sps:$4 sm:$0xff]  }
  0x1f   : > { %11372 = vmatprep.mubr.msk.bf16.mxu0 %vm762_vm0, %v15019_v12  ;;  %v15041_v17 = vld [vmem:[%s15010_s17 + $0x24] ss:$8 sps:$4 sm:$0xff]   ;;  %13711 = vmatprep.subr.bf16.mxu1 %v18380_v2  ;;  %v14370_v25 = vld [vmem:[%s18365_s1 + $0xdc] ss:$12 sps:$4 sm:$0xff]   ;;  %v14373_v28 = vld [vmem:[%s18365_s1 + $0xf4] ss:$12 sps:$4 sm:$0xff]  }
  0x20   : > { %11383 = vmatprep.mubr.msk.bf16.mxu1 %vm762_vm0, %v15041_v17  ;;  %v14367_v22 = vld [vmem:[%s18365_s1 + $0xc4] ss:$12 sps:$4 sm:$0xff]   ;;  %v14369_v24 = vld [vmem:[%s18365_s1 + $0xc0] ss:$12 sps:$4 sm:$0xff]   ;;  %v15082_v26 = vld [vmem:[%s18365_s1 + $0x68] ss:$12 sps:$4 sm:$0xff]  }
  0x21   : > { %807 = vmatpush1.bf16.msra.mxu0 %v14351_v6  ;;  %v14372_v27 = vld [vmem:[%s18365_s1 + $0xd8] ss:$12 sps:$4 sm:$0xff]   ;;  %v15098_v30 = vld [vmem:[%s18365_s1 + $0x80] ss:$12 sps:$4 sm:$0xff]   ;;  %v14375_v31 = vld [vmem:[%s18365_s1 + $0xf0] ss:$12 sps:$4 sm:$0xff]  }
  0x22   : > { %808 = vmatprep.subr.bf16.mxu0 %v14352_v7  ;;  %13724 = vmatpush1.bf16.msra.mxu1 %v15037_v16  ;;  %v479_v29 = vld [vmem:[%s18365_s1 + $0x120] sm:$0x11]  ;;  %v14376_v32 = vld [vmem:[%s18365_s1 + $0x10c] ss:$12 sps:$4 sm:$0xff]   ;;  %v792_v34 = vsel %vm790_vm1, 65535, %v18380_v2  ;;  %v14855_v63 = vmov 32  }
  0x23   : > { %13712 = vmatprep.subr.bf16.mxu1 %v18380_v2  ;;  %v11370_v33 = vcombine.high %v479_v29, %v479_v29  ;;  %v14402_v35 = vld [vmem:[%s18365_s1 + $0x98] ss:$12 sps:$4 sm:$0xff]   ;;  %v14378_v36 = vld [vmem:[%s18365_s1 + $0x108] ss:$12 sps:$4 sm:$0xff]   ;;  %v11369_v37 = vcombine.low %v479_v29, %v479_v29  ;;  %v14403_v38 = vld [vmem:[%s18365_s1 + $0xb0] ss:$12 sps:$4 sm:$0xff]   ;;  %14339 = vset.pattern.permute.xlu0 %v14855_v63 }
  0x24   : > { %v14407_v41 = vld [vmem:[%s18365_s1 + $0xc8] ss:$12 sps:$4 sm:$0xff]   ;;  %v14408_v44 = vld [vmem:[%s18365_s1 + $0xe0] ss:$12 sps:$4 sm:$0xff]   ;;  %v14412_v45 = vld [vmem:[%s18365_s1 + $0xf8] ss:$12 sps:$4 sm:$0xff]   ;;  %14340 = vset.pattern.permute.xlu1 %v14855_v63 }
  0x25   : > { %809 = vmatpush1.bf16.msra.mxu0 %v14354_v8  ;;  %v797_v39 = vand.u32 %v11370_v33, %v792_v34  ;;  %v794_v40 = vand.u32 %v11369_v37, %v792_v34  ;;  %v15125_v42 = vld [vmem:[%s15010_s17] ss:$8 sps:$4 sm:$0xff]   ;;  %v15128_v43 = vld [vmem:[%s15010_s17 + $0x14] ss:$8 sps:$4 sm:$0xff]   ;;  %v15144_v46 = vld [vmem:[%s15010_s17 + $0x10] ss:$8 sps:$4 sm:$0xff]  }
  0x26   : > { %810 = vmatprep.subr.bf16.mxu0 %v14355_v9  ;;  %13725 = vmatpush1.bf16.msra.mxu1 %v15056_v20  ;;  %v14413_v47 = vld [vmem:[%s18365_s1 + $0x110] ss:$12 sps:$4 sm:$0xff]   ;;  %v14417_v48 = vld [vmem:[%s18365_s1 + $0x128] ss:$0 sps:$4 sm:$0x11]   ;;  %vm1156_vm2 = vcmask 388096  }
  0x27   : > { %13713 = vmatprep.subr.bf16.mxu1 %v18380_v2  ;;  %v14391_v49 = vld [vmem:[%s15010_s17 + $0x20] ss:$8 sps:$4 sm:$0xff]   ;;  %v14394_v50 = vld [vmem:[%s15010_s17 + $0x34] ss:$8 sps:$4 sm:$0xff]   ;;  %v800_v51 = vand.u32 %v14417_v48, %v792_v34  ;;  %v14396_v52 = vld [vmem:[%s15010_s17 + $0x30] ss:$8 sps:$4 sm:$0xff]  }
  0x28   : > { %v14399_v53 = vld [vmem:[%s15010_s17 + $0x44] ss:$8 sps:$4 sm:$0xff]   ;;  %v14401_v54 = vld [vmem:[%s15010_s17 + $0x40] ss:$8 sps:$4 sm:$0xff]   ;;  %v14404_v55 = vld [vmem:[%s15010_s17 + $0x54] ss:$8 sps:$4 sm:$0xff]  }
  0x29   : > { %811 = vmatpush1.bf16.msra.mxu0 %v14357_v10  ;;  %v14406_v56 = vld [vmem:[%s15010_s17 + $0x50] ss:$8 sps:$4 sm:$0xff]   ;;  %v14409_v57 = vld [vmem:[%s15010_s17 + $0x64] ss:$8 sps:$4 sm:$0xff]   ;;  %v14411_v58 = vld [vmem:[%s15010_s17 + $0x60] ss:$8 sps:$4 sm:$0xff]  }
  0x2a   : > { %812 = vmatprep.subr.bf16.mxu0 %v14358_v11  ;;  %13726 = vmatpush1.bf16.msra.mxu1 %v15069_v23  ;;  %v14414_v59 = vld [vmem:[%s15010_s17 + $0x74] ss:$8 sps:$4 sm:$0xff]   ;;  %v14416_v60 = vld [vmem:[%s15010_s17 + $0x70] ss:$8 sps:$4 sm:$0xff]   ;;  %v14418_v61 = vld [vmem:[%s15010_s17 + $0x84] ss:$8 sps:$4 sm:$0xff]  }
  0x2b   : > { %13714 = vmatprep.subr.bf16.mxu1 %v18380_v2  ;;  %v14420_v62 = vld [vmem:[%s15010_s17 + $0x80] ss:$8 sps:$4 sm:$0xff]   ;;  %1175 = vst.msk [vmem:[#allocation2 + $0x48] sm:$0xf] %vm1156_vm2, %v18380_v2  ;;  %s14856_s17 = smov 95   ;;  %vm1454_vm3 = vcmask 1041408  }
  0x2c   : > { %vm1455_vm4 = vcmask 1045508   ;;  %s14857_s18 = smov 47   ;;  %s14858_s16 = smov 32   ;;  %vm1664_vm6 = vsmask.f32 7424  ;;  %vm1957_vm7 = vcmask 1046528  }
  0x2d   : > { %813 = vmatpush1.bf16.msra.mxu0 %v14360_v13  ;;  %vm15247_vm5 = vmor %vm1454_vm3, %vm1455_vm4  ;;  %vm2289_vm8 = vcmask 1045504   ;;  %vm1735_vm9 = vcmask 392192   ;;  %vm2111_vm10 = vsmask.f32 6400  ;;  %vm1250_vm11 = vcmask 384000   ;;  %s14861_s23 = smov [#allocation6]  }
  0x2e   : > { %814 = vmatprep.subr.bf16.mxu0 %v14361_v14  ;;  %13727 = vmatpush1.bf16.msra.mxu1 %v15082_v26  ;;  %vm1269_vm12 = vcmask 523264   ;;  %vm1387_vm13 = vcmask 261120   ;;  %vm7270_vm14 = vcmask 1042432   ;;  %vm2638_vm15 = vsmask.f32 5376  ;;  %s14794_s27 = sshll.u32 %s14861_s23, 4  ;;  %s14795_s27 = int_to_ptr.vmem [resolvable:$false] %s14794_s27 }
  0x2f   : > { %13715 = vmatprep.subr.bf16.mxu1 %v18380_v2  ;;  %vm7429_vm3 = vsmask.f32 2304  ;;  %vm2995_vm4 = vsmask.f32 4352  ;;  %s14796_s30 = scalar_lea.vmem %s14795_s27, 6144 }
  0x31   : > { %815 = vmatpush1.bf16.msra.mxu0 %v14363_v18 }
  0x32   : > { %816 = vmatprep.subr.bf16.mxu0 %v14364_v19  ;;  %13728 = vmatpush1.bf16.msra.mxu1 %v15098_v30 }
  0x33   : > { %13716 = vmatprep.subr.bf16.mxu1 %v18380_v2 }
  0x35   : > { %817 = vmatpush1.bf16.msra.mxu0 %v14366_v21 }
  0x36   : > { %818 = vmatprep.subr.bf16.mxu0 %v14367_v22  ;;  %13729 = vmatpush1.bf16.msra.mxu1 %v14402_v35 }
  0x37   : > { %13717 = vmatprep.subr.bf16.mxu1 %v18380_v2 }
  0x39   : > { %819 = vmatpush1.bf16.msra.mxu0 %v14369_v24 }
  0x3a   : > { %820 = vmatprep.subr.bf16.mxu0 %v14370_v25  ;;  %13730 = vmatpush1.bf16.msra.mxu1 %v14403_v38 }
  0x3b   : > { %13718 = vmatprep.subr.bf16.mxu1 %v18380_v2 }
  0x3d   : > { %821 = vmatpush1.bf16.msra.mxu0 %v14372_v27 }
  0x3e   : > { %822 = vmatprep.subr.bf16.mxu0 %v14373_v28  ;;  %13731 = vmatpush1.bf16.msra.mxu1 %v14407_v41 }
  0x3f   : > { %13719 = vmatprep.subr.bf16.mxu1 %v18380_v2 }
  0x41   : > { %823 = vmatpush1.bf16.msra.mxu0 %v14375_v31 }
  0x42   : > { %824 = vmatprep.subr.bf16.mxu0 %v14376_v32  ;;  %13732 = vmatpush1.bf16.msra.mxu1 %v14408_v44 }
  0x43   : > { %13720 = vmatprep.subr.bf16.mxu1 %v18380_v2 }
  0x45   : > { %825 = vmatpush1.bf16.msra.mxu0 %v14378_v36 }
  0x46   : > { %826 = vmatprep.subr.bf16.mxu0 %v797_v39  ;;  %13733 = vmatpush1.bf16.msra.mxu1 %v14412_v45 }
  0x47   : > { %13721 = vmatprep.subr.bf16.mxu1 %v18380_v2 }
  0x49   : > { %827 = vmatpush1.bf16.msra.mxu0 %v794_v40 }
  0x4a   : > { %925 = vmatprep.subr.bf16.mxu0 %v18380_v2  ;;  %13734 = vmatpush1.bf16.msra.mxu1 %v14413_v47 }
  0x4b   : > { %13722 = vmatprep.subr.bf16.mxu1 %v18380_v2 }
  0x4c   : > { %835 = vmatmul.mubr.bf16.vlgmr.msra.gmra.mrb[0].mxu0 %v15125_v42 }
  0x4d   : > { %11373 = vmatprep.mubr.msk.bf16.mxu0 %vm762_vm0, %v15128_v43  ;;  %926 = vmatpush1.bf16.msra.mxu0 %v15032_v15 }
  0x4e   : > { %927 = vmatprep.subr.bf16.mxu0 %v18380_v2  ;;  %13735 = vmatpush1.bf16.msra.mxu1 %v800_v51 }
  0x51   : > { %928 = vmatpush1.bf16.msra.mxu0 %v15037_v16  ;;  %974 = vmatmul.mubr.bf16.vlgmr.msra.gmra.mrb[0].mxu1 %v14391_v49  ;;  %v14421_v16 = vld [vmem:[%s18366_s2 + $0x18] sm:$0xff]  }
  0x52   : > { %929 = vmatprep.subr.bf16.mxu0 %v18380_v2  ;;  %11384 = vmatprep.mubr.msk.bf16.mxu1 %vm762_vm0, %v14394_v50 }
  0x54   : > { %845 = vmatmul.mubr.bf16.gmra.mrb[4].mxu0 %v15144_v46 }
  0x55   : > { %11374 = vmatprep.mubr.msk.bf16.mxu0 %vm762_vm0, %v15041_v17  ;;  %930 = vmatpush1.bf16.msra.mxu0 %v15056_v20 }
  0x56   : > { %931 = vmatprep.subr.bf16.mxu0 %v18380_v2 }
  0x59   : > { %932 = vmatpush1.bf16.msra.mxu0 %v15069_v23  ;;  %982 = vmatmul.mubr.bf16.gmra.mrb[4].mxu1 %v14396_v52 }
  0x5a   : > { %933 = vmatprep.subr.bf16.mxu0 %v18380_v2  ;;  %11385 = vmatprep.mubr.msk.bf16.mxu1 %vm762_vm0, %v14399_v53 }
  0x5c   : > { %855 = vmatmul.mubr.bf16.gmra.mrb[8].mxu0 %v14391_v49 }
  0x5d   : > { %11375 = vmatprep.mubr.msk.bf16.mxu0 %vm762_vm0, %v14394_v50  ;;  %934 = vmatpush1.bf16.msra.mxu0 %v15082_v26  ;;  %v14422_v26 = vld [vmem:[%s18366_s2 + $0x20] sm:$0xff]  }
  0x5e   : > { %935 = vmatprep.subr.bf16.mxu0 %v18380_v2 }
  0x61   : > { %936 = vmatpush1.bf16.msra.mxu0 %v15098_v30  ;;  %990 = vmatmul.mubr.bf16.gmra.mrb[8].mxu1 %v14401_v54 }
  0x62   : > { %937 = vmatprep.subr.bf16.mxu0 %v18380_v2  ;;  %11386 = vmatprep.mubr.msk.bf16.mxu1 %vm762_vm0, %v14404_v55 }
  0x64   : > { %865 = vmatmul.mubr.bf16.gmra.mrb[12].mxu0 %v14396_v52 }
  0x65   : > { %11376 = vmatprep.mubr.msk.bf16.mxu0 %vm762_vm0, %v14399_v53  ;;  %938 = vmatpush1.bf16.msra.mxu0 %v14402_v35 }
  0x66   : > { %939 = vmatprep.subr.bf16.mxu0 %v18380_v2 }
  0x69   : > { %940 = vmatpush1.bf16.msra.mxu0 %v14403_v38  ;;  %998 = vmatmul.mubr.bf16.gmra.mrb[12].mxu1 %v14406_v56 }
  0x6a   : > { %941 = vmatprep.subr.bf16.mxu0 %v18380_v2  ;;  %11387 = vmatprep.mubr.msk.bf16.mxu1 %vm762_vm0, %v14409_v57 }
  0x6c   : > { %875 = vmatmul.mubr.bf16.gmra.mrb[16].mxu0 %v14401_v54 }
  0x6d   : > { %11377 = vmatprep.mubr.msk.bf16.mxu0 %vm762_vm0, %v14404_v55  ;;  %942 = vmatpush1.bf16.msra.mxu0 %v14407_v41  ;;  %v14425_v41 = vld [vmem:[%s18366_s2 + $0x28] sm:$0xff]  }
  0x6e   : > { %943 = vmatprep.subr.bf16.mxu0 %v18380_v2 }
  0x71   : > { %944 = vmatpush1.bf16.msra.mxu0 %v14408_v44  ;;  %1006 = vmatmul.mubr.bf16.gmra.mrb[16].mxu1 %v14411_v58 }
  0x72   : > { %945 = vmatprep.subr.bf16.mxu0 %v18380_v2  ;;  %11388 = vmatprep.mubr.msk.bf16.mxu1 %vm762_vm0, %v14414_v59 }
  0x74   : > { %885 = vmatmul.mubr.bf16.gmra.mrb[20].mxu0 %v14406_v56 }
  0x75   : > { %11378 = vmatprep.mubr.msk.bf16.mxu0 %vm762_vm0, %v14409_v57  ;;  %946 = vmatpush1.bf16.msra.mxu0 %v14412_v45 }
  0x76   : > { %947 = vmatprep.subr.bf16.mxu0 %v18380_v2 }
  0x79   : > { %948 = vmatpush1.bf16.msra.mxu0 %v14413_v47  ;;  %1014 = vmatmul.mubr.bf16.gmra.mrb[20].mxu1 %v14416_v60 }
  0x7a   : > { %949 = vmatprep.subr.bf16.mxu0 %v18380_v2  ;;  %11389 = vmatprep.mubr.msk.bf16.mxu1 %vm762_vm0, %v14418_v61 }
  0x7c   : > { %895 = vmatmul.mubr.bf16.gmra.mrb[24].mxu0 %v14411_v58 }
  0x7d   : > { %11379 = vmatprep.mubr.msk.bf16.mxu0 %vm762_vm0, %v14414_v59  ;;  %950 = vmatpush1.bf16.msra.mxu0 %v800_v51 }
  0x7e   : > { %12792 = vmatprep.subr.bf16.mxu0 %v14421_v16 }
  0x81   : > { %1022 = vmatmul.mubr.bf16.gmra.mrb[24].mxu1 %v14420_v62 }
  0x82   : > { %6158 = vmatprep.mubr.bf16.mxu1 %v18380_v2 }
  0x84   : > { %905 = vmatmul.mubr.bf16.gmra.mrb[28].mxu0 %v14416_v60 }
  0x85   : > { %11380 = vmatprep.mubr.msk.bf16.mxu0 %vm762_vm0, %v14418_v61 }
  0x8c   : > { %915 = vmatmul.mubr.bf16.gmra.mrb[32].mxu0 %v14420_v62 }
  0x8d   : > { %11381 = vmatprep.mubr.msk.bf16.mxu0 %vm762_vm0, %v15019_v12 }
  0x94   : > { %958 = vmatmul.mubr.bf16.vlgmr.msra.gmra.mrb[36].mxu0 %v15125_v42 }
  0x95   : > { %11382 = vmatprep.mubr.msk.bf16.mxu0 %vm762_vm0, %v15128_v43  ;;  %12793 = vmatpush3.bf16.msra.mxu0 %v14421_v16 }
  0x96   : > { %12794 = vmatprep.subr.bf16.mxu0 %v14422_v26 }
  0x99   : > { %12795 = vmatpush3.bf16.msra.mxu0 %v14422_v26 }
  0x9a   : > { %12796 = vmatprep.subr.bf16.mxu0 %v14425_v41 }
  0x9c   : > { %966 = vmatmul.mubr.bf16.gmra.mrb[40].mxu0 %v15144_v46 }
  0x9d   : > { %12797 = vmatpush3.bf16.msra.mxu0 %v14425_v41 }
 0x11f   : > { %v15209_v0 = vpop.f32.mrb[0].mxu0 }
 0x120   : > { %18453 = vst [vmem:[#allocation12_spill] sm:$0xff] %v15209_v0  ;;  %v15211_v1 = vpop.f32.mrb[1].mxu0 }
 0x121   : > { %18454 = vst [vmem:[#allocation13_spill] sm:$0xff] %v15211_v1  ;;  %v15214_v3 = vmax.f32 %v15211_v1, 0.0  ;;  %v15216_v4 = vpop.f32.mrb[2].mxu0 }
 0x122   : > { %v15218_v5 = vpop.f32.mrb[3].mxu0 }
 0x123   : > { %v15221_v6 = vmax.f32 %v15218_v5, 0.0  ;;  %v12315_v7 = vpack.c.bf16 %v15214_v3, %v15214_v3 }
 0x124   : > { %v975_v34 = vpop.f32.mrb[0].mxu1 }
 0x125   : > { %1102 = vrot.lane.b32.xlu0 %v12315_v7, %s14856_s17  ;;  %v12316_v9 = vpack.c.bf16 %v15221_v6, %v15221_v6  ;;  %v977_v40 = vpop.f32.mrb[1].mxu1  ;;  %v1182_v45 = vmax.f32 %v975_v34, 0.0 }
 0x126   : > { %v978_v46 = vpop.f32.mrb[2].mxu1 }
 0x127   : > { %v15230_v10 = vpop.f32.mrb[4].mxu0  ;;  %v1183_v50 = vmax.f32 %v978_v46, 0.0  ;;  %v980_v51 = vpop.f32.mrb[3].mxu1 }
 0x128   : > { %v15232_v11 = vpop.f32.mrb[5].mxu0 }
 0x129   : > { %v15235_v12 = vmax.f32 %v15232_v11, 0.0  ;;  %1104 = vrot.lane.b32.xlu0 %v12316_v9, %s14856_s17  ;;  %v15238_v13 = vpop.f32.mrb[6].mxu0  ;;  %v15304_v56 = vpack.c.bf16 %v1183_v50, %v1182_v45 }
 0x12a   : > { %v1442_v14 = vcombine.high %v15238_v13, %v15238_v13  ;;  %v15242_v15 = vpop.f32.mrb[7].mxu0  ;;  %v11408_v20 = vrot.slane %v15238_v13, 10 }
 0x12b   : > { %v15252_v18 = vmax.f32 %v15242_v15, 0.0  ;;  %v12317_v19 = vpack.c.bf16 %v15235_v12, %v15235_v12 }
 0x12c   : > { %v1459_v21 = vrot.slane %v1442_v14, 6  ;;  %v983_v9 = vpop.f32.mrb[4].mxu1 }
 0x12d   : > { %1106 = vrot.lane.b32.xlu1 %v12317_v19, %s14856_s17  ;;  %v12318_v25 = vpack.c.bf16 %v15252_v18, %v15252_v18 }
 0x12e   : > { %v1460_v23 = vsel %vm15247_vm5, %v11408_v20, %v1459_v21  ;;  %v1461_v27 = vrot.slane %v1459_v21, 4  ;;  %v1184_v20 = vmax.f32 %v983_v9, 0.0  ;;  %v985_v21 = vpop.f32.mrb[5].mxu1 }
 0x12f   : > { %v15262_v24 = vpop.f32.mrb[8].mxu0  ;;  %v1529_v31 = vmax.f32 %v1460_v23, 0.0 }
 0x130   : > { %v1443_v28 = vcombine.high %v15262_v24, %v15262_v24  ;;  %v1462_v29 = vrot.slane %v15262_v24, 6  ;;  %v15272_v30 = vpop.f32.mrb[9].mxu0 }
 0x131   : > { %v15275_v32 = vmax.f32 %v15272_v30, 0.0  ;;  %1108 = vrot.lane.b32.xlu1 %v12318_v25, %s14856_s17  ;;  %v15278_v33 = vpop.f32.mrb[10].mxu0 }
 0x132   : > { %v1463_v35 = vsel %vm15247_vm5, %v1461_v27, %v1462_v29  ;;  %v11409_v36 = vrot.slane %v1443_v28, 10  ;;  %v1444_v37 = vcombine.high %v15278_v33, %v15278_v33  ;;  %v1466_v38 = vrot.slane %v15278_v33, 6  ;;  %v15285_v39 = vpop.f32.mrb[11].mxu0  ;;  %v986_v28 = vpop.f32.mrb[6].mxu1 }
 0x133   : > { %v1530_v42 = vmax.f32 %v1463_v35, 0.0  ;;  %v15291_v43 = vmax.f32 %v15285_v39, 0.0  ;;  %v12319_v44 = vpack.c.bf16 %v15275_v32, %v15275_v32  ;;  %v1185_v35 = vmax.f32 %v986_v28, 0.0 }
 0x134   : > { %v1467_v47 = vsel %vm15247_vm5, %v11409_v36, %v1466_v38  ;;  %v1468_v48 = vrot.slane %v1466_v38, 4  ;;  %v1469_v49 = vrot.slane %v1444_v37, 6  ;;  %v988_v36 = vpop.f32.mrb[7].mxu1 }
 0x135   : > { %v1561_v52 = vcombine.low %v1529_v31, %v1530_v42  ;;  %1110 = vrot.lane.b32.xlu0 %v12319_v44, %s14856_s17  ;;  %v12320_v53 = vpack.c.bf16 %v15291_v43, %v15291_v43  ;;  %v1531_v57 = vmax.f32 %v1467_v47, 0.0  ;;  %v15340_v41 = vpack.c.bf16 %v1185_v35, %v1184_v20 }
 0x136   : > { %v1470_v55 = vsel %vm15247_vm5, %v1468_v48, %v1469_v49 }
 0x137   : > { %v1532_v58 = vmax.f32 %v1470_v55, 0.0  ;;  %1112 = vrot.lane.b32.xlu1 %v12320_v53, %s14856_s17  ;;  %v15307_v59 = vpop.f32.mrb[12].mxu0 }
 0x138   : > { %v1445_v60 = vcombine.high %v15307_v59, %v15307_v59  ;;  %v15311_v61 = vpop.f32.mrb[13].mxu0  ;;  %v11410_v14 = vrot.slane %v15307_v59, 10 }
 0x139   : > { %v1562_v62 = vcombine.low %v1531_v57, %v1532_v58  ;;  %v15314_v63 = vmax.f32 %v15311_v61, 0.0  ;;  %v15316_v7 = vpop.f32.mrb[14].mxu0 }
 0x13a   : > { %v1473_v16 = vrot.slane %v1445_v60, 6  ;;  %v15319_v19 = vpop.f32.mrb[15].mxu0  ;;  %v1446_v25 = vcombine.high %v15316_v7, %v15316_v7  ;;  %v1476_v34 = vrot.slane %v15316_v7, 6 }
 0x13b   : > { %v15321_v23 = vpack.c.bf16 %v1562_v62, %v1561_v52  ;;  %v15326_v26 = vmax.f32 %v15319_v19, 0.0  ;;  %v12321_v27 = vpack.c.bf16 %v15314_v63, %v15314_v63  ;;  %v991_v52 = vpop.f32.mrb[8].mxu1 }
 0x13c   : > { %v1474_v29 = vsel %vm15247_vm5, %v11410_v14, %v1473_v16  ;;  %v1475_v31 = vrot.slane %v1473_v16, 4  ;;  %v11411_v46 = vrot.slane %v1446_v25, 10  ;;  %v993_v9 = vpop.f32.mrb[9].mxu1  ;;  %v1186_v28 = vmax.f32 %v991_v52, 0.0 }
 0x13d   : > { %18457 = vst [vmem:[#allocation14_spill] sm:$0xff] %v15321_v23  ;;  %1114 = vrot.lane.b32.xlu0 %v12321_v27, %s14856_s17  ;;  %v12322_v37 = vpack.c.bf16 %v15326_v26, %v15326_v26  ;;  %v1533_v42 = vmax.f32 %v1474_v29, 0.0  ;;  %v994_v21 = vpop.f32.mrb[10].mxu1 }
 0x13e   : > { %v1477_v40 = vsel %vm15247_vm5, %v1475_v31, %v1476_v34  ;;  %v1187_v29 = vmax.f32 %v994_v21, 0.0  ;;  %v996_v31 = vpop.f32.mrb[11].mxu1 }
 0x13f   : > { %v1534_v44 = vmax.f32 %v1477_v40, 0.0  ;;  %1116 = vrot.lane.b32.xlu1 %v12322_v37, %s14856_s17  ;;  %v15343_v45 = vpop.f32.mrb[16].mxu0 }
 0x140   : > { %v1447_v47 = vcombine.high %v15343_v45, %v15343_v45  ;;  %v1480_v48 = vrot.slane %v15343_v45, 6  ;;  %v15348_v49 = vpop.f32.mrb[17].mxu0 }
 0x141   : > { %v15351_v50 = vmax.f32 %v15348_v49, 0.0  ;;  %v15353_v51 = vpop.f32.mrb[18].mxu0  ;;  %v1563_v53 = vcombine.low %v1533_v42, %v1534_v44  ;;  %v15376_v42 = vpack.c.bf16 %v1187_v29, %v1186_v28  ;;  %v15381_v44 = vld [vmem:[%s18366_s2] sm:$0xff]  }
 0x142   : > { %18458 = vst [vmem:[#allocation15_spill] sm:$0xff] %v15353_v51  ;;  %v1481_v55 = vsel %vm15247_vm5, %v11411_v46, %v1480_v48  ;;  %v1482_v57 = vrot.slane %v1480_v48, 4  ;;  %v1483_v58 = vrot.slane %v1447_v47, 6  ;;  %v1448_v60 = vcombine.high %v15353_v51, %v15353_v51  ;;  %v15359_v62 = vpop.f32.mrb[19].mxu0  ;;  %12810 = vmatprep.subr.bf16.mxu0 %v15381_v44 }
 0x143   : > { %v11412_v14 = vrot.slane %v15353_v51, 10  ;;  %v15363_v16 = vmax.f32 %v15359_v62, 0.0  ;;  %v12323_v20 = vpack.c.bf16 %v15351_v50, %v15351_v50  ;;  %v1535_v34 = vmax.f32 %v1481_v55, 0.0 }
 0x144   : > { %v1484_v25 = vsel %vm15247_vm5, %v1482_v57, %v1483_v58  ;;  %v1487_v27 = vrot.slane %v1448_v60, 6 }
 0x145   : > { %v1536_v35 = vmax.f32 %v1484_v25, 0.0  ;;  %1118 = vrot.lane.b32.xlu0 %v12323_v20, %s14856_s17  ;;  %v12324_v36 = vpack.c.bf16 %v15363_v16, %v15363_v16 }
 0x146   : > { %v1488_v40 = vsel %vm15247_vm5, %v11412_v14, %v1487_v27  ;;  %v1489_v48 = vrot.slane %v1487_v27, 4  ;;  %v999_v14 = vpop.f32.mrb[12].mxu1 }
 0x147   : > { %1120 = vrot.lane.b32.xlu1 %v12324_v36, %s14856_s17  ;;  %v15384_v46 = vpop.f32.mrb[20].mxu0  ;;  %v1564_v47 = vcombine.low %v1535_v34, %v1536_v35  ;;  %v1537_v58 = vmax.f32 %v1488_v40, 0.0  ;;  %v1001_v31 = vpop.f32.mrb[13].mxu1  ;;  %v1188_v36 = vmax.f32 %v999_v14, 0.0 }
 0x148   : > { %18459 = vst [vmem:[#allocation16_spill] sm:$0xff] %v15384_v46  ;;  %v1449_v52 = vcombine.high %v15384_v46, %v15384_v46  ;;  %v1490_v55 = vrot.slane %v15384_v46, 6  ;;  %v15389_v57 = vpop.f32.mrb[21].mxu0  ;;  %v1002_v40 = vpop.f32.mrb[14].mxu1 }
 0x149   : > { %v15393_v60 = vmax.f32 %v15389_v57, 0.0  ;;  %v15395_v9 = vpop.f32.mrb[22].mxu0  ;;  %v15397_v20 = vpack.c.bf16 %v1564_v47, %v1563_v53  ;;  %v1004_v2 = vpop.f32.mrb[15].mxu1 }
 0x14a   : > { %18460 = vst [vmem:[#allocation17_spill] sm:$0xff] %v15395_v9  ;;  %v1491_v21 = vsel %vm15247_vm5, %v1489_v48, %v1490_v55  ;;  %v11413_v25 = vrot.slane %v1449_v52, 10  ;;  %v1450_v27 = vcombine.high %v15395_v9, %v15395_v9  ;;  %v1494_v28 = vrot.slane %v15395_v9, 6  ;;  %v15404_v29 = vpop.f32.mrb[23].mxu0 }
 0x14b   : > { %18461 = vst [vmem:[#allocation18_spill] sm:$0xff] %v15397_v20  ;;  %v1538_v34 = vmax.f32 %v1491_v21, 0.0  ;;  %v15407_v35 = vmax.f32 %v15404_v29, 0.0  ;;  %v12325_v53 = vpack.c.bf16 %v15393_v60, %v15393_v60  ;;  %v1189_v55 = vmax.f32 %v1002_v40, 0.0 }
 0x14c   : > { %v1495_v47 = vsel %vm15247_vm5, %v11413_v25, %v1494_v28  ;;  %v1496_v48 = vrot.slane %v1494_v28, 4  ;;  %v1497_v52 = vrot.slane %v1450_v27, 6 }
 0x14d   : > { %1122 = vrot.lane.b32.xlu0 %v12325_v53, %s14856_s17  ;;  %v12326_v21 = vpack.c.bf16 %v15407_v35, %v15407_v35  ;;  %v1565_v37 = vcombine.low %v1537_v58, %v1538_v34  ;;  %v15420_v38 = vpack.c.bf16 %v1189_v55, %v1188_v36  ;;  %v1539_v54 = vmax.f32 %v1495_v47, 0.0  ;;  %v1007_v34 = vpop.f32.mrb[16].mxu1 }
 0x14e   : > { %v1498_v14 = vsel %vm15247_vm5, %v1496_v48, %v1497_v52  ;;  %v1190_v52 = vmax.f32 %v1007_v34, 0.0  ;;  %v1009_v55 = vpop.f32.mrb[17].mxu1 }
 0x14f   : > { %v1540_v25 = vmax.f32 %v1498_v14, 0.0  ;;  %1124 = vrot.lane.b32.xlu1 %v12326_v21, %s14856_s17  ;;  %v15423_v27 = vpop.f32.mrb[24].mxu0  ;;  %v1010_v22 = vpop.f32.mrb[18].mxu1 }
 0x150   : > { %18462 = vst [vmem:[#allocation19_spill] sm:$0xff] %v15423_v27  ;;  %v1451_v2 = vcombine.high %v15423_v27, %v15423_v27  ;;  %v15427_v28 = vpop.f32.mrb[25].mxu0  ;;  %v11414_v36 = vrot.slane %v15423_v27, 10  ;;  %v1191_v34 = vmax.f32 %v1010_v22, 0.0  ;;  %v1012_v55 = vpop.f32.mrb[19].mxu1 }
 0x151   : > { %v15430_v53 = vmax.f32 %v15427_v28, 0.0  ;;  %v15432_v58 = vpop.f32.mrb[26].mxu0  ;;  %v1566_v40 = vcombine.low %v1539_v54, %v1540_v25 }
 0x152   : > { %18463 = vst [vmem:[#allocation20_spill] sm:$0xff] %v15432_v58  ;;  %v1501_v47 = vrot.slane %v1451_v2, 6  ;;  %v15435_v48 = vpop.f32.mrb[27].mxu0  ;;  %v1452_v21 = vcombine.high %v15432_v58, %v15432_v58  ;;  %v1504_v2 = vrot.slane %v15432_v58, 6 }
 0x153   : > { %v15440_v14 = vmax.f32 %v15435_v48, 0.0  ;;  %v12327_v31 = vpack.c.bf16 %v15430_v53, %v15430_v53  ;;  %v15444_v8 = vpack.c.bf16 %v1566_v40, %v1565_v37  ;;  %v15456_v40 = vpack.c.bf16 %v1191_v34, %v1190_v52  ;;  %v1015_v52 = vpop.f32.mrb[20].mxu1 }
 0x154   : > { %v1502_v54 = vsel %vm15247_vm5, %v11414_v36, %v1501_v47  ;;  %v1503_v25 = vrot.slane %v1501_v47, 4  ;;  %v11415_v22 = vrot.slane %v1452_v21, 10  ;;  %v1017_v0 = vpop.f32.mrb[21].mxu1 }
 0x155   : > { %18464 = vst [vmem:[#allocation21_spill] sm:$0xff] %v15444_v8  ;;  %1126 = vrot.lane.b32.xlu0 %v12327_v31, %s14856_s17  ;;  %v12328_v20 = vpack.c.bf16 %v15440_v14, %v15440_v14  ;;  %v1541_v8 = vmax.f32 %v1502_v54, 0.0  ;;  %v1018_v27 = vpop.f32.mrb[22].mxu1 }
 0x156   : > { %v1505_v37 = vsel %vm15247_vm5, %v1503_v25, %v1504_v2  ;;  %v1193_v9 = vmax.f32 %v1018_v27, 0.0 }
 0x157   : > { %v1542_v36 = vmax.f32 %v1505_v37, 0.0  ;;  %1128 = vrot.lane.b32.xlu1 %v12328_v20, %s14856_s17  ;;  %v15459_v47 = vpop.f32.mrb[28].mxu0  ;;  %v1192_v37 = vmax.f32 %v1015_v52, 0.0 }
 0x158   : > { %18465 = vst [vmem:[#allocation22_spill] sm:$0xff] %v15459_v47  ;;  %v1453_v31 = vcombine.high %v15459_v47, %v15459_v47  ;;  %v1508_v55 = vrot.slane %v15459_v47, 6  ;;  %v15464_v1 = vpop.f32.mrb[29].mxu0 }
 0x159   : > { %v15467_v23 = vmax.f32 %v15464_v1, 0.0  ;;  %v15469_v25 = vpop.f32.mrb[30].mxu0  ;;  %v1567_v54 = vcombine.low %v1541_v8, %v1542_v36  ;;  %v1020_v8 = vpop.f32.mrb[23].mxu1 }
 0x15a   : > { %18466 = vst [vmem:[#allocation23_spill] sm:$0xff] %v15469_v25  ;;  %v1509_v20 = vsel %vm15247_vm5, %v11415_v22, %v1508_v55  ;;  %v1510_v2 = vrot.slane %v1508_v55, 4  ;;  %v1511_v34 = vrot.slane %v1453_v31, 6  ;;  %v15473_v21 = vpop.f32.mrb[31].mxu0  ;;  %v1203_v55 = vpack.c.bf16 %v1193_v9, %v1192_v37  ;;  %v1023_v27 = vpop.f32.mrb[24].mxu1 }
 0x15b   : > { %v1045_v47 = vmax.f32 %v15473_v21, 0.0  ;;  %v12329_v58 = vpack.c.bf16 %v15467_v23, %v15467_v23  ;;  %v1543_v36 = vmax.f32 %v1509_v20, 0.0 }
 0x15c   : > { %v1512_v25 = vsel %vm15247_vm5, %v1510_v2, %v1511_v34  ;;  %v1025_v34 = vpop.f32.mrb[25].mxu1  ;;  %vm6680_vm5 = vsmask.f32 1280 }
 0x15d   : > { %v1544_v46 = vmax.f32 %v1512_v25, 0.0  ;;  %1130 = vrot.lane.b32.xlu0 %v12329_v58, %s14856_s17  ;;  %v12330_v22 = vpack.c.bf16 %v1045_v47, %v1045_v47  ;;  %v1055_v31 = vpack.c.bf16 %v1045_v47, %v15467_v23  ;;  %v1194_v58 = vmax.f32 %v1023_v27, 0.0  ;;  %v1026_v47 = vpop.f32.mrb[26].mxu1 }
 0x15e   : > { %v1195_v37 = vmax.f32 %v1026_v47, 0.0  ;;  %v1028_v8 = vpop.f32.mrb[27].mxu1  ;;  %v18471_v27 = vpack.c.bf16 %v15221_v6, %v15214_v3 }
 0x15f   : > { %1132 = vrot.lane.b32.xlu1 %v12330_v22, %s14856_s17  ;;  %v15483_v0 = vpop.f32.mrb[32].mxu0  ;;  %v1568_v52 = vcombine.low %v1543_v36, %v1544_v46 }
 0x160   : > { %v15485_v51 = vpop.f32.mrb[33].mxu0  ;;  %v1204_v22 = vpack.c.bf16 %v1195_v37, %v1194_v58 }
 0x161   : > { %18467 = vst [vmem:[#allocation24_spill] sm:$0xff] %v15485_v51  ;;  %v1046_v17 = vmax.f32 %v15485_v51, 0.0  ;;  %v15488_v2 = vpop.f32.mrb[34].mxu0  ;;  %v15490_v20 = vpack.c.bf16 %v1568_v52, %v1567_v54 }
 0x162   : > { %18468 = vst [vmem:[#allocation25_spill] sm:$0xff] %v15488_v2  ;;  %v15492_v25 = vpop.f32.mrb[35].mxu0 }
 0x163   : > { %18469 = vst [vmem:[#allocation26_spill] sm:$0xff] %v15490_v20  ;;  %18470 = vst [vmem:[#allocation27_spill] sm:$0xff] %v15492_v25  ;;  %v12331_v23 = vpack.c.bf16 %v1046_v17, %v1046_v17  ;;  %v1047_v9 = vmax.f32 %v15492_v25, 0.0 }
 0x165   : > { %1134 = vrot.lane.b32.xlu0 %v12331_v23, %s14856_s17  ;;  %v1056_v46 = vpack.c.bf16 %v1047_v9, %v1046_v17  ;;  %v12332_v36 = vpack.c.bf16 %v1047_v9, %v1047_v9  ;;  %v18472_v17 = vpack.c.bf16 %v15252_v18, %v15235_v12  ;;  %v18473_v9 = vpack.c.bf16 %v15291_v43, %v15275_v32 }
 0x166   : > { %v18475_v12 = vpack.c.bf16 %v15363_v16, %v15351_v50  ;;  %v18476_v18 = vpack.c.bf16 %v15407_v35, %v15393_v60  ;;  %v18477_v32 = vpack.c.bf16 %v15440_v14, %v15430_v53 }
 0x167   : > { %v959_v51 = vpop.f32.mrb[36].mxu0  ;;  %1136 = vrot.lane.b32.xlu1 %v12332_v36, %s14856_s17 }
 0x168   : > { %v1178_v54 = vmax.f32 %v959_v51, 0.0  ;;  %v961_v52 = vpop.f32.mrb[37].mxu0 }
 0x169   : > { %1214 = vrot.lane.b32.xlu0 %v18471_v27, %s14857_s18  ;;  %v962_v34 = vpop.f32.mrb[38].mxu0 }
 0x16a   : > { %v1179_v20 = vmax.f32 %v962_v34, 0.0  ;;  %v964_v47 = vpop.f32.mrb[39].mxu0 }
 0x16c   : > { %v1196_v8 = vpack.c.bf16 %v1179_v20, %v1178_v54  ;;  %v18474_v20 = vpack.c.bf16 %v15326_v26, %v15314_v63 }
 0x16d   : > { %1218 = vrot.lane.b32.xlu0 %v18472_v17, %s14857_s18 }
 0x16e   : > { %1216 = vrot.lane.b32.xlu1 %v1196_v8, %s14857_s18 }
 0x16f   : > { %v967_v58 = vpop.f32.mrb[40].mxu0 }
 0x170   : > { %v1180_v51 = vmax.f32 %v967_v58, 0.0  ;;  %v969_v23 = vpop.f32.mrb[41].mxu0 }
 0x171   : > { %1222 = vrot.lane.b32.xlu0 %v18473_v9, %s14857_s18  ;;  %v970_v3 = vpop.f32.mrb[42].mxu0 }
 0x172   : > { %v1181_v6 = vmax.f32 %v970_v3, 0.0  ;;  %v972_v37 = vpop.f32.mrb[43].mxu0 }
 0x174   : > { %v1197_v36 = vpack.c.bf16 %v1181_v6, %v1180_v51 }
 0x175   : > { %1226 = vrot.lane.b32.xlu0 %v18474_v20, %s14857_s18 }
 0x176   : > { %1220 = vrot.lane.b32.xlu1 %v1197_v36, %s14857_s18 }
 0x179   : > { %1230 = vrot.lane.b32.xlu0 %v18475_v12, %s14857_s18 }
 0x17a   : > { %1224 = vrot.lane.b32.xlu1 %v15304_v56, %s14857_s18 }
 0x17d   : > { %1234 = vrot.lane.b32.xlu0 %v18476_v18, %s14857_s18 }
 0x17e   : > { %1228 = vrot.lane.b32.xlu1 %v15340_v41, %s14857_s18 }
 0x181   : > { %1238 = vrot.lane.b32.xlu0 %v18477_v32, %s14857_s18 }
 0x182   : > { %1232 = vrot.lane.b32.xlu1 %v15376_v42, %s14857_s18 }
 0x185   : > { %1242 = vrot.lane.b32.xlu0 %v1055_v31, %s14857_s18 }
 0x186   : > { %1236 = vrot.lane.b32.xlu1 %v15420_v38, %s14857_s18 }
 0x189   : > { %1246 = vrot.lane.b32.xlu0 %v1056_v46, %s14857_s18 }
 0x18a   : > { %1240 = vrot.lane.b32.xlu1 %v15456_v40, %s14857_s18 }
 0x18d   : > { %8194 = vperm.xlu0 %14339, %v15242_v15  }
 0x18e   : > { %1244 = vrot.lane.b32.xlu1 %v1203_v55, %s14857_s18 }
 0x191   : > { %8203 = vperm.xlu0 %14339, %v15311_v61  }
 0x192   : > { %1248 = vrot.lane.b32.xlu1 %v1204_v22, %s14857_s18  ;;  %s14290_s18 = smul.u32 3072, %s14950_s25 }
 0x194   : > { %s18315_s26 = scalar_lea.hbm %s18376_s12, %s14290_s18 }
 0x195   : > { %8209 = vperm.xlu0 %14339, %v15348_v49  }
 0x196   : > { %8197 = vperm.xlu1 %14340, %v15272_v30  }
 0x197   : > { %v1103_v43 = vpop.permute.xlu0 %1102 }
 0x198   : > { %1157 = vst.msk [vmem:[#allocation2] sm:$0xf] %vm1156_vm2, %v1103_v43 }
 0x199   : > { %8215 = vperm.xlu0 %14339, %v15389_v57  }
 0x19a   : > { %8200 = vperm.xlu1 %14340, %v15285_v39  }
 0x19b   : > { %v1105_v56 = vpop.permute.xlu0 %1104 }
 0x19c   : > { %1158 = vst.msk [vmem:[#allocation2 + $0x4] sm:$0xf] %vm1156_vm2, %v1105_v56 }
 0x19d   : > { %8221 = vperm.xlu0 %14339, %v15427_v28  }
 0x19e   : > { %8206 = vperm.xlu1 %14340, %v15319_v19  }
 0x19f   : > { %v1107_v63 = vpop.permute.xlu1 %1106  ;;  %v1605_v38 = vld [vmem:[#allocation2] sm:$0xf] }
 0x1a0   : > { %1159 = vst.msk [vmem:[#allocation2 + $0x8] sm:$0xf] %vm1156_vm2, %v1107_v63  ;;  %v1946_v50 = vld [vmem:[#allocation2] sm:$0xe] }
 0x1a1   : > { %8227 = vperm.xlu0 %14339, %v15464_v1   ;;  %v2278_v31 = vld [vmem:[#allocation2] sm:$0xc] }
 0x1a2   : > { %8212 = vperm.xlu1 %14340, %v15359_v62  }
 0x1a3   : > { %v1109_v26 = vpop.permute.xlu1 %1108  ;;  %v1606_v41 = vld [vmem:[#allocation2 + $0x4] sm:$0xf] }
 0x1a4   : > { %1160 = vst.msk [vmem:[#allocation2 + $0xc] sm:$0xf] %vm1156_vm2, %v1109_v26  ;;  %v15555_v16 = vcombine.low %v1605_v38, %v1606_v41  ;;  %v11453_v42 = vcombine.low %v1946_v50, %v1606_v41  ;;  %v11485_v55 = vcombine.low %v2278_v31, %v1606_v41  ;;  %v14430_v31 = vld [vmem:[%s18366_s2 + $0x8] sm:$0xff]  }
 0x1a5   : > { %1319 = vrot.lane.b32.xlu0 %v15216_v4, %s14858_s16 }
 0x1a6   : > { %8218 = vperm.xlu1 %14340, %v15404_v29   ;;  %v1668_v60 = vshll.u32 %v15555_v16, 16  ;;  %v2113_v53 = vshrl.u32 %v11453_v42, 16  ;;  %v2116_v14 = vshll.u32 %v11453_v42, 16  ;;  %v1666_v54 = vshrl.u32 %v15555_v16, 16 }
 0x1a7   : > { %v1111_v35 = vpop.permute.xlu0 %1110  ;;  %v1958_v52 = vrot.slane %v11453_v42, 1  ;;  %v15577_v58 = vld [vmem:[#allocation2 + $0x8] sm:$0xf]  ;;  %v2290_v23 = vrot.slane %v11485_v55, 2 }
 0x1a8   : > { %1161 = vst.msk [vmem:[#allocation2 + $0x10] sm:$0xf] %vm1156_vm2, %v1111_v35  ;;  %v1670_v4 = vrot.slane %v1668_v60, 1  ;;  %v2115_v27 = vrot.slane %v2113_v53, 1  ;;  %v2118_v34 = vrot.slane %v2116_v14, 2  ;;  %18479 = vst [vmem:[#allocation29_spill] sm:$0xff] %v15577_v58 }
 0x1a9   : > { %v1113_v40 = vpop.permute.xlu1 %1112  ;;  %1323 = vrot.lane.b32.xlu0 %v15230_v10, %s14858_s16 }
 0x1aa   : > { %1162 = vst.msk [vmem:[#allocation2 + $0x14] sm:$0xf] %vm1156_vm2, %v1113_v40  ;;  %8224 = vperm.xlu1 %14340, %v15435_v48   ;;  %v1671_v51 = vor.u32 %v1670_v4, %v1666_v54  ;;  %v2119_v56 = vor.u32 %v2118_v34, %v2115_v27  ;;  %v14433_v34 = vld [vmem:[%s18366_s2 + $0x10] sm:$0xff]  }
 0x1ab   : > { %v15566_v46 = vld [vmem:[#allocation2 + $0x8] sm:$0xff]  }
 0x1ac   : > { %v15568_v22 = vld [vmem:[#allocation2 + $0xc] sm:$0xf]  ;;  %v1673_v10 = vshll.u32 %v15566_v46, 16  ;;  %v1677_v47 = vshrl.u32 %v15566_v46, 16  ;;  %v1959_v8 = vrot.slane %v15566_v46, 1  ;;  %v2291_v17 = vrot.slane %v15566_v46, 2 }
 0x1ad   : > { %18478 = vst [vmem:[#allocation28_spill] sm:$0xff] %v15568_v22  ;;  %1327 = vrot.lane.b32.xlu0 %v15238_v13, %s14858_s16 }
 0x1ae   : > { %8230 = vperm.xlu1 %14340, %v15473_v21   ;;  %v1675_v13 = vrot.slane %v1673_v10, 1  ;;  %v15583_v6 = vsel %vm1957_vm7, %v1958_v52, %v1959_v8  ;;  %v2120_v37 = vrot.slane %v1677_v47, 1  ;;  %v2121_v36 = vrot.slane %v1673_v10, 2 }
 0x1af   : > { %v1115_v3 = vpop.permute.xlu0 %1114  ;;  %v15587_v20 = vsel %vm2289_vm8, %v2290_v23, %v2291_v17  ;;  %v15589_v12 = vld [vmem:[#allocation2 + $0x10] sm:$0xf] }
 0x1b0   : > { %1163 = vst.msk [vmem:[#allocation2 + $0x18] sm:$0xf] %vm1156_vm2, %v1115_v3  ;;  %18480 = vst [vmem:[#allocation30_spill] sm:$0xff] %v15589_v12  ;;  %v1676_v32 = vsel %vm1664_vm6, %v1671_v51, %v1675_v13  ;;  %v2122_v63 = vor.u32 %v2121_v36, %v2120_v37  ;;  %v1679_v60 = vor.u32 %v1677_v47, %v1675_v13  ;;  %v15655_v23 = vld [vmem:[%s18366_s2 + $0x30] sm:$0xff]  }
 0x1b1   : > { %v1117_v18 = vpop.permute.xlu1 %1116  ;;  %1331 = vrot.lane.b32.xlu0 %v15262_v24, %s14858_s16  ;;  %v15594_v43 = vld [vmem:[#allocation2 + $0x10] sm:$0xff]   ;;  %12798 = vmatprep.mubr.msk.bf16.mxu0 %vm1735_vm9, %v1676_v32 }
 0x1b2   : > { %v15596_v26 = vld [vmem:[#allocation2 + $0x14] sm:$0xf]  ;;  %1164 = vst.msk [vmem:[#allocation2 + $0x1c] sm:$0xf] %vm1156_vm2, %v1117_v18  ;;  %1321 = vrot.lane.b32.xlu1 %v15218_v5, %s14858_s16  ;;  %v1681_v24 = vshll.u32 %v15594_v43, 16  ;;  %v1685_v41 = vshrl.u32 %v15594_v43, 16  ;;  %v15608_v42 = vsel %vm2111_vm10, %v2119_v56, %v2122_v63 }
 0x1b3   : > { %18481 = vst [vmem:[#allocation31_spill] sm:$0xff] %v15596_v26  ;;  %v1961_v50 = vrot.slane %v15594_v43, 1  ;;  %v2293_v35 = vrot.slane %v15594_v43, 2 }
 0x1b4   : > { %v1683_v5 = vrot.slane %v1681_v24, 1  ;;  %v2124_v53 = vrot.slane %v1685_v41, 1  ;;  %v2125_v40 = vrot.slane %v1681_v24, 2 }
 0x1b5   : > { %1335 = vrot.lane.b32.xlu0 %v15278_v33, %s14858_s16  ;;  %v15616_v14 = vsel %vm1957_vm7, %v1959_v8, %v1961_v50  ;;  %v15624_v4 = vsel %vm2289_vm8, %v2291_v17, %v2293_v35 }
 0x1b6   : > { %1325 = vrot.lane.b32.xlu1 %v15232_v11, %s14858_s16  ;;  %v1684_v33 = vsel %vm1664_vm6, %v1679_v60, %v1683_v5  ;;  %v2126_v54 = vor.u32 %v2125_v40, %v2124_v53 }
 0x1b7   : > { %v1119_v55 = vpop.permute.xlu0 %1118  ;;  %12799 = vmatmul.mubr.msk.bf16.vlgmr.msra.gmra.mrb[44].mxu0 %vm1735_vm9, %v1684_v33  ;;  %v15661_v36 = vld [vmem:[#allocation2 + $0x18] sm:$0xf] }
 0x1b8   : > { %1165 = vst.msk [vmem:[#allocation2 + $0x20] sm:$0xf] %vm1156_vm2, %v1119_v55  ;;  %12811 = vmatpush3.bf16.msra.mxu0 %v15381_v44  ;;  %v15635_v27 = vsel %vm2111_vm10, %v2122_v63, %v2126_v54  ;;  %v1687_v44 = vor.u32 %v1685_v41, %v1683_v5  ;;  %18483 = vst [vmem:[#allocation33_spill] sm:$0xff] %v15661_v36 }
 0x1b9   : > { %v1121_v52 = vpop.permute.xlu1 %1120  ;;  %1339 = vrot.lane.b32.xlu0 %v15307_v59, %s14858_s16  ;;  %v15631_v11 = vld [vmem:[#allocation2 + $0x18] sm:$0xff]   ;;  %12812 = vmatprep.subr.bf16.mxu0 %v14430_v31 }
 0x1ba   : > { %1166 = vst.msk [vmem:[#allocation2 + $0x24] sm:$0xf] %vm1156_vm2, %v1121_v52  ;;  %1329 = vrot.lane.b32.xlu1 %v15242_v15, %s14858_s16  ;;  %v1689_v10 = vshll.u32 %v15631_v11, 16  ;;  %v1693_v59 = vshrl.u32 %v15631_v11, 16  ;;  %v2295_v47 = vrot.slane %v15631_v11, 2 }
 0x1bb   : > { %v15648_v15 = vld [vmem:[#allocation2 + $0x1c] sm:$0xf] }
 0x1bc   : > { %v1691_v8 = vrot.slane %v1689_v10, 1  ;;  %12813 = vmatpush3.bf16.msra.mxu0 %v14430_v31  ;;  %v2128_v17 = vrot.slane %v1693_v59, 1  ;;  %v2129_v51 = vrot.slane %v1689_v10, 2  ;;  %18482 = vst [vmem:[#allocation32_spill] sm:$0xff] %v15648_v15  ;;  %v15658_v3 = vsel %vm2289_vm8, %v2293_v35, %v2295_v47  ;;  %v18487_v10 = vld [vmem:[#allocation16_spill] sm:$0xff] }
 0x1bd   : > { %1343 = vrot.lane.b32.xlu0 %v15316_v7, %s14858_s16  ;;  %12814 = vmatprep.subr.bf16.mxu0 %v14433_v34 }
 0x1be   : > { %1333 = vrot.lane.b32.xlu1 %v15272_v30, %s14858_s16  ;;  %v1692_v13 = vsel %vm1664_vm6, %v1687_v44, %v1691_v8  ;;  %v2130_v37 = vor.u32 %v2129_v51, %v2128_v17  ;;  %v1695_v60 = vor.u32 %v1693_v59, %v1691_v8  ;;  %v18489_v51 = vld [vmem:[#allocation17_spill] sm:$0xff] }
 0x1bf   : > { %v1123_v7 = vpop.permute.xlu0 %1122  ;;  %12802 = vmatprep.mubr.msk.bf16.mxu0 %vm1735_vm9, %v1692_v13 }
 0x1c0   : > { %1167 = vst.msk [vmem:[#allocation2 + $0x28] sm:$0xf] %vm1156_vm2, %v1123_v7  ;;  %12815 = vmatpush3.bf16.msra.mxu0 %v14433_v34  ;;  %v15672_v56 = vsel %vm2111_vm10, %v2126_v54, %v2130_v37  ;;  %v15691_v54 = vld [vmem:[#allocation2 + $0x20] sm:$0xf] }
 0x1c1   : > { %v1125_v18 = vpop.permute.xlu1 %1124  ;;  %1347 = vrot.lane.b32.xlu0 %v15343_v45, %s14858_s16  ;;  %v15669_v32 = vld [vmem:[#allocation2 + $0x20] sm:$0xff]   ;;  %12828 = vmatprep.subr.bf16.mxu0 %v15655_v23  ;;  %v18484_v45 = vld [vmem:[#allocation15_spill] sm:$0xff]  ;;  %18486 = vst [vmem:[#allocation34_spill] sm:$0xff] %v15691_v54 }
 0x1c2   : > { %1168 = vst.msk [vmem:[#allocation2 + $0x2c] sm:$0xf] %vm1156_vm2, %v1125_v18  ;;  %1337 = vrot.lane.b32.xlu1 %v15285_v39, %s14858_s16  ;;  %v1697_v63 = vshll.u32 %v15669_v32, 16  ;;  %v1701_v24 = vshrl.u32 %v15669_v32, 16  ;;  %v2297_v41 = vrot.slane %v15669_v32, 2 }
 0x1c3   : > { %v15683_v40 = vld [vmem:[#allocation2 + $0x24] sm:$0xf] }
 0x1c4   : > { %v1699_v35 = vrot.slane %v1697_v63, 1  ;;  %v2132_v5 = vrot.slane %v1701_v24, 1  ;;  %v2133_v53 = vrot.slane %v1697_v63, 2  ;;  %18485 = vst [vmem:[#allocation15_spill] sm:$0xff] %v15683_v40  ;;  %v15688_v39 = vsel %vm2289_vm8, %v2295_v47, %v2297_v41 }
 0x1c5   : > { %1351 = vrot.lane.b32.xlu0 %v18484_v45, %s14858_s16 }
 0x1c6   : > { %1341 = vrot.lane.b32.xlu1 %v15311_v61, %s14858_s16  ;;  %v1700_v55 = vsel %vm1664_vm6, %v1695_v60, %v1699_v35  ;;  %v2134_v33 = vor.u32 %v2133_v53, %v2132_v5  ;;  %v1703_v7 = vor.u32 %v1701_v24, %v1699_v35 }
 0x1c7   : > { %v1127_v31 = vpop.permute.xlu0 %1126  ;;  %12803 = vmatmul.mubr.msk.bf16.gmra.mrb[48].mxu0 %vm1735_vm9, %v1700_v55  ;;  %v15721_v63 = vld [vmem:[#allocation2 + $0x28] sm:$0xf] }
 0x1c8   : > { %1169 = vst.msk [vmem:[#allocation2 + $0x30] sm:$0xf] %vm1156_vm2, %v1127_v31  ;;  %v15702_v59 = vsel %vm2111_vm10, %v2130_v37, %v2134_v33  ;;  %18490 = vst [vmem:[#allocation17_spill] sm:$0xff] %v15721_v63 }
 0x1c9   : > { %v1129_v34 = vpop.permute.xlu1 %1128  ;;  %1355 = vrot.lane.b32.xlu0 %v18487_v10, %s14858_s16  ;;  %v15699_v61 = vld [vmem:[#allocation2 + $0x28] sm:$0xff]   ;;  %v14859_v10 = vmov 64  }
 0x1ca   : > { %1170 = vst.msk [vmem:[#allocation2 + $0x34] sm:$0xf] %vm1156_vm2, %v1129_v34  ;;  %1345 = vrot.lane.b32.xlu1 %v15319_v19, %s14858_s16  ;;  %v1705_v47 = vshll.u32 %v15699_v61, 16  ;;  %v1709_v44 = vshrl.u32 %v15699_v61, 16  ;;  %v18396_v8 = vrot.slane %v15699_v61, 2  ;;  %14341 = vset.pattern.permute.xlu0 %v14859_v10 }
 0x1cb   : > { %v15710_v17 = vld [vmem:[#allocation2 + $0x2c] sm:$0xf]  ;;  %14342 = vset.pattern.permute.xlu1 %v14859_v10 }
 0x1cc   : > { %18488 = vst [vmem:[#allocation16_spill] sm:$0xff] %v15710_v17  ;;  %v1707_v13 = vrot.slane %v1705_v47, 1  ;;  %v2136_v37 = vrot.slane %v1709_v44, 1  ;;  %v2137_v18 = vrot.slane %v1705_v47, 2  ;;  %v15719_v19 = vsel %vm2289_vm8, %v2297_v41, %v18396_v8  ;;  %v18491_v41 = vld [vmem:[#allocation19_spill] sm:$0xff]  ;;  %v18492_v47 = vld [vmem:[#allocation20_spill] sm:$0xff] }
 0x1cd   : > { %1359 = vrot.lane.b32.xlu0 %v18489_v51, %s14858_s16 }
 0x1ce   : > { %1349 = vrot.lane.b32.xlu1 %v15348_v49, %s14858_s16  ;;  %v1708_v60 = vsel %vm1664_vm6, %v1703_v7, %v1707_v13  ;;  %v15726_v53 = vor.u32 %v2137_v18, %v2136_v37  ;;  %v1711_v55 = vor.u32 %v1709_v44, %v1707_v13  ;;  %v18493_v44 = vld [vmem:[#allocation22_spill] sm:$0xff]  ;;  %v18494_v13 = vld [vmem:[#allocation23_spill] sm:$0xff] }
 0x1cf   : > { %v1131_v45 = vpop.permute.xlu0 %1130  ;;  %v15724_v5 = vld [vmem:[#allocation2 + $0x30] ss:$0 sps:$4 sm:$0x11]   ;;  %12806 = vmatprep.mubr.msk.bf16.mxu0 %vm1735_vm9, %v1708_v60  ;;  %v14436_v37 = vld [vmem:[%s18366_s2 + $0x40] sm:$0xff]   ;;  %v4046_v60 = vld [vmem:[#allocation2 + $0xc] sm:$0xc] }
 0x1d0   : > { %1171 = vst.msk [vmem:[#allocation2 + $0x38] sm:$0xf] %vm1156_vm2, %v1131_v45  ;;  %v1713_v35 = vshll.u32 %v15724_v5, 16  ;;  %v15737_v31 = vsel %vm2111_vm10, %v2134_v33, %v15726_v53  ;;  %v3483_v45 = vld [vmem:[#allocation2 + $0x10] sm:$0xf] }
 0x1d1   : > { %v1133_v49 = vpop.permute.xlu1 %1132  ;;  %1363 = vrot.lane.b32.xlu0 %v18491_v41, %s14858_s16  ;;  %v14482_v41 = vld [vmem:[#allocation2 + $0x1c] sm:$0xff]   ;;  %v14485_v10 = vld [vmem:[#allocation2 + $0x2c] sm:$0xff]  }
 0x1d2   : > { %1172 = vst.msk [vmem:[#allocation2 + $0x3c] sm:$0xf] %vm1156_vm2, %v1133_v49  ;;  %1353 = vrot.lane.b32.xlu1 %v15359_v62, %s14858_s16  ;;  %v1715_v34 = vrot.slane %v1713_v35, 1  ;;  %v14481_v49 = vld [vmem:[#allocation2 + $0x14] sm:$0xff]  }
 0x1d4   : > { %v1716_v51 = vsel %vm1664_vm6, %v1711_v55, %v1715_v34  ;;  %v11667_v55 = vcombine.low %v4046_v60, %v3483_v45 }
 0x1d5   : > { %1367 = vrot.lane.b32.xlu0 %v18492_v47, %s14858_s16  ;;  %12807 = vmatmul.mubr.msk.bf16.gmra.mrb[52].mxu0 %vm1735_vm9, %v1716_v51  ;;  %v18495_v51 = vld [vmem:[#allocation24_spill] sm:$0xff] }
 0x1d6   : > { %1357 = vrot.lane.b32.xlu1 %v15389_v57, %s14858_s16  ;;  %12816 = vmatprep.mubr.msk.bf16.mxu0 %vm1735_vm9, %v15555_v16  ;;  %v14435_v57 = vld [vmem:[%s18366_s2 + $0x38] sm:$0xff]  }
 0x1d7   : > { %v1135_v33 = vpop.permute.xlu0 %1134 }
 0x1d8   : > { %1173 = vst.msk [vmem:[#allocation2 + $0x40] sm:$0xf] %vm1156_vm2, %v1135_v33  ;;  %v15796_v33 = vld [vmem:[#allocation2 + $0x34] sm:$0xff]  }
 0x1d9   : > { %v1137_v62 = vpop.permute.xlu1 %1136  ;;  %1371 = vrot.lane.b32.xlu0 %v18493_v44, %s14858_s16  ;;  %18496 = vst [vmem:[#allocation19_spill] sm:$0xff] %v15796_v33  ;;  %v4058_v44 = vrot.slane %v14481_v49, 2 }
 0x1da   : > { %1361 = vrot.lane.b32.xlu1 %v15404_v29, %s14858_s16  ;;  %1174 = vst.msk [vmem:[#allocation2 + $0x44] sm:$0xf] %vm1156_vm2, %v1137_v62  ;;  %v4057_v62 = vrot.slane %v11667_v55, 2  ;;  %v1965_v55 = vrot.slane %v15669_v32, 1  ;;  %vm2841_vm2 = vcmask 1044480  }
 0x1db   : > { %v1215_v7 = vpop.permute.xlu0 %1214 }
 0x1dd   : > { %1375 = vrot.lane.b32.xlu0 %v18494_v13, %s14858_s16  ;;  %12817 = vmatmul.mubr.msk.bf16.vlgmr.msra.gmra.mrb[44].mxu0 %vm1735_vm9, %v15566_v46  ;;  %v14437_v46 = vld [vmem:[%s18366_s2 + $0x48] sm:$0xff]  }
 0x1de   : > { %1365 = vrot.lane.b32.xlu1 %v15427_v28, %s14858_s16  ;;  %12820 = vmatprep.mubr.msk.bf16.mxu0 %vm1735_vm9, %v15594_v43  ;;  %v1967_v43 = vrot.slane %v15699_v61, 1 }
 0x1df   : > { %v1219_v16 = vpop.permute.xlu0 %1218  ;;  %12829 = vmatpush3.bf16.msra.mxu0 %v15655_v23 }
 0x1e0   : > { %v1217_v29 = vpop.permute.xlu1 %1216  ;;  %12830 = vmatprep.subr.bf16.mxu0 %v14435_v57 }
 0x1e1   : > { %v1251_v18 = vsel %vm1250_vm11, %v1215_v7, %v1217_v29  ;;  %1379 = vrot.lane.b32.xlu0 %v15483_v0, %s14858_s16  ;;  %v4060_v7 = vrot.slane %v14482_v41, 2  ;;  %v1963_v29 = vrot.slane %v15631_v11, 1 }
 0x1e2   : > { %1270 = vst.msk [vmem:[#allocation3] sm:$0xff] %vm1269_vm12, %v1251_v18  ;;  %1369 = vrot.lane.b32.xlu1 %v15435_v48, %s14858_s16 }
 0x1e3   : > { %v1223_v28 = vpop.permute.xlu0 %1222  ;;  %12831 = vmatpush3.bf16.msra.mxu0 %v14435_v57  ;;  %v15807_v18 = vsel %vm2289_vm8, %v4058_v44, %v4060_v7  ;;  %v1964_v49 = vsel %vm1957_vm7, %v1961_v50, %v1963_v29 }
 0x1e4   : > { %12832 = vmatprep.subr.bf16.mxu0 %v14436_v37  ;;  %18498 = vst [vmem:[#allocation22_spill] sm:$0xff] %v15807_v18 }
 0x1e5   : > { %12821 = vmatmul.mubr.msk.bf16.gmra.mrb[48].mxu0 %vm1735_vm9, %v15631_v11  ;;  %v14438_v11 = vld [vmem:[%s18366_s2 + $0x50] sm:$0xff]  }
 0x1e6   : > { %1373 = vrot.lane.b32.xlu1 %v15464_v1, %s14858_s16  ;;  %12824 = vmatprep.mubr.msk.bf16.mxu0 %vm1735_vm9, %v15669_v32  ;;  %v14484_v1 = vld [vmem:[#allocation2 + $0x24] sm:$0xff]   ;;  %v1968_v32 = vsel %vm1957_vm7, %v1965_v55, %v1967_v43 }
 0x1e7   : > { %12833 = vmatpush3.bf16.msra.mxu0 %v14436_v37  ;;  %v1227_v0 = vpop.permute.xlu0 %1226  ;;  %v4062_v13 = vrot.slane %v14484_v1, 2  ;;  %v15804_v37 = vsel %vm2289_vm8, %v4057_v62, %v4058_v44  ;;  %v1969_v62 = vrot.slane %v15724_v5, 1  ;;  %v15861_v5 = vld [vmem:[#allocation2 + $0x14] sm:$0xf] }
 0x1e8   : > { %v1221_v23 = vpop.permute.xlu1 %1220  ;;  %12846 = vmatprep.subr.bf16.mxu0 %v14437_v46  ;;  %18497 = vst [vmem:[#allocation20_spill] sm:$0xff] %v15804_v37  ;;  %18504 = vst [vmem:[#allocation38_spill] sm:$0xff] %v15861_v5 }
 0x1e9   : > { %v1252_v48 = vsel %vm1250_vm11, %v1219_v16, %v1221_v23  ;;  %v4064_v16 = vrot.slane %v14485_v10, 2  ;;  %v1966_v10 = vsel %vm1957_vm7, %v1963_v29, %v1965_v55  ;;  %v15857_v29 = vld [vmem:[#allocation2 + $0x20] sm:$0xf] }
 0x1ea   : > { %1271 = vst.msk [vmem:[#allocation3 + $0x8] sm:$0xff] %vm1269_vm12, %v1252_v48  ;;  %1377 = vrot.lane.b32.xlu1 %v15473_v21, %s14858_s16  ;;  %18503 = vst [vmem:[#allocation37_spill] sm:$0xff] %v15857_v29  ;;  %v16047_v29 = vcombine.low %v15683_v40, %v15721_v63 }
 0x1eb   : > { %v1231_v47 = vpop.permute.xlu0 %1230  ;;  %v15814_v23 = vsel %vm2289_vm8, %v4062_v13, %v4064_v16 }
 0x1ec   : > { %v1225_v35 = vpop.permute.xlu1 %1224  ;;  %18500 = vst [vmem:[#allocation24_spill] sm:$0xff] %v15814_v23 }
 0x1ed   : > { %v1253_v34 = vsel %vm1250_vm11, %v1223_v28, %v1225_v35  ;;  %12825 = vmatmul.mubr.msk.bf16.gmra.mrb[52].mxu0 %vm1735_vm9, %v15699_v61  ;;  %v15811_v28 = vsel %vm2289_vm8, %v4060_v7, %v4062_v13  ;;  %v14439_v35 = vld [vmem:[%s18366_s2 + $0x58] sm:$0xff]  }
 0x1ee   : > { %1272 = vst.msk [vmem:[#allocation3 + $0x10] sm:$0xff] %vm1269_vm12, %v1253_v34  ;;  %1381 = vrot.lane.b32.xlu1 %v18495_v51, %s14858_s16  ;;  %12834 = vmatprep.mubr.msk.bf16.mxu0 %vm1735_vm9, %v15583_v6  ;;  %v18394_v6 = vrot.slane %v15796_v33, 2  ;;  %18499 = vst [vmem:[#allocation23_spill] sm:$0xff] %v15811_v28 }
 0x1f0   : > { %v1229_v21 = vpop.permute.xlu1 %1228  ;;  %v15822_v45 = vsel %vm2289_vm8, %v4064_v16, %v18394_v6  ;;  %v15855_v16 = vld [vmem:[#allocation2 + $0x18] sm:$0xf] }
 0x1f1   : > { %v1254_v57 = vsel %vm1250_vm11, %v1227_v0, %v1229_v21  ;;  %v1235_v0 = vpop.permute.xlu0 %1234  ;;  %18501 = vst [vmem:[#allocation35_spill] sm:$0xff] %v15822_v45  ;;  %18502 = vst [vmem:[#allocation36_spill] sm:$0xff] %v15855_v16 }
 0x1f2   : > { %1273 = vst.msk [vmem:[#allocation3 + $0x18] sm:$0xff] %vm1269_vm12, %v1254_v57  ;;  %v1970_v57 = vsel %vm1957_vm7, %v1967_v43, %v1969_v62  ;;  %v14545_v43 = vld [vmem:[#allocation2 + $0x30] sm:$0xff]  }
 0x1f4   : > { %v1233_v48 = vpop.permute.xlu1 %1232 }
 0x1f5   : > { %v1255_v60 = vsel %vm1250_vm11, %v1231_v47, %v1233_v48  ;;  %12835 = vmatmul.mubr.msk.bf16.vlgmr.msra.gmra.mrb[44].mxu0 %vm1735_vm9, %v15616_v14  ;;  %v1239_v34 = vpop.permute.xlu0 %1238  ;;  %v14440_v14 = vld [vmem:[%s18366_s2 + $0x60] sm:$0xff]   ;;  %v15865_v48 = vld [vmem:[#allocation2 + $0x1c] sm:$0xf] }
 0x1f6   : > { %1274 = vst.msk [vmem:[#allocation3 + $0x20] sm:$0xff] %vm1269_vm12, %v1255_v60  ;;  %12838 = vmatprep.mubr.msk.bf16.mxu0 %vm1735_vm9, %v1964_v49  ;;  %12847 = vmatpush3.bf16.msra.mxu0 %v14437_v46  ;;  %18506 = vst [vmem:[#allocation40_spill] sm:$0xff] %v15865_v48  ;;  %v15869_v60 = vld [vmem:[#allocation2 + $0x38] sm:$0xf]  ;;  %v15871_v49 = vld [vmem:[#allocation2 + $0x24] sm:$0xf] }
 0x1f7   : > { %12848 = vmatprep.subr.bf16.mxu0 %v14438_v11  ;;  %18508 = vst [vmem:[#allocation42_spill] sm:$0xff] %v15869_v60  ;;  %18509 = vst [vmem:[#allocation43_spill] sm:$0xff] %v15871_v49 }
 0x1f8   : > { %v1237_v41 = vpop.permute.xlu1 %1236 }
 0x1f9   : > { %v1256_v1 = vsel %vm1250_vm11, %v1235_v0, %v1237_v41  ;;  %v1243_v47 = vpop.permute.xlu0 %1242  ;;  %v15863_v0 = vld [vmem:[#allocation2 + $0x28] sm:$0xf] }
 0x1fa   : > { %1275 = vst.msk [vmem:[#allocation3 + $0x28] sm:$0xff] %vm1269_vm12, %v1256_v1  ;;  %12849 = vmatpush3.bf16.msra.mxu0 %v14438_v11  ;;  %18505 = vst [vmem:[#allocation39_spill] sm:$0xff] %v15863_v0  ;;  %v15867_v11 = vld [vmem:[#allocation2 + $0x30] sm:$0xf]  ;;  %v15877_v1 = vld [vmem:[#allocation2 + $0x2c] sm:$0xf] }
 0x1fb   : > { %12850 = vmatprep.subr.bf16.mxu0 %v14439_v35  ;;  %18507 = vst [vmem:[#allocation41_spill] sm:$0xff] %v15867_v11  ;;  %18510 = vst [vmem:[#allocation44_spill] sm:$0xff] %v15877_v1 }
 0x1fc   : > { %v1241_v50 = vpop.permute.xlu1 %1240 }
 0x1fd   : > { %v1257_v46 = vsel %vm1250_vm11, %v1239_v34, %v1241_v50  ;;  %12839 = vmatmul.mubr.msk.bf16.gmra.mrb[48].mxu0 %vm1735_vm9, %v1966_v10  ;;  %v1247_v44 = vpop.permute.xlu0 %1246  ;;  %v15892_v10 = vld [vmem:[#allocation2 + $0x30] ss:$0 sps:$4 sm:$0x33]   ;;  %v5810_v34 = vld [vmem:[#allocation2 + $0x18] sm:$0xc] }
 0x1fe   : > { %1276 = vst.msk [vmem:[#allocation3 + $0x30] sm:$0xff] %vm1269_vm12, %v1257_v46  ;;  %12842 = vmatprep.mubr.msk.bf16.mxu0 %vm1735_vm9, %v1968_v32  ;;  %12851 = vmatpush3.bf16.msra.mxu0 %v14439_v35  ;;  %v14441_v46 = vld [vmem:[%s18366_s2 + $0x68] sm:$0xff]  }
 0x1ff   : > { %12864 = vmatprep.subr.bf16.mxu0 %v14440_v14 }
 0x200   : > { %v1245_v51 = vpop.permute.xlu1 %1244 }
 0x201   : > { %v1258_v21 = vsel %vm1250_vm11, %v1243_v47, %v1245_v51  ;;  %v14443_v47 = vld [vmem:[%s18366_s2 + $0x70] sm:$0xff]   ;;  %v2141_v51 = vshrl.u32 %v15892_v10, 16  ;;  %v16039_v49 = vld [vmem:[#allocation3 + $0x28] sm:$0xff] }
 0x202   : > { %1277 = vst.msk [vmem:[#allocation3 + $0x38] sm:$0xff] %vm1269_vm12, %v1258_v21  ;;  %v2144_v21 = vshll.u32 %v15892_v10, 16  ;;  %v18408_v5 = vrot.slane %v16039_v49, 5 }
 0x204   : > { %v1249_v7 = vpop.permute.xlu1 %1248 }
 0x205   : > { %v1259_v13 = vsel %vm1250_vm11, %v1247_v44, %v1249_v7  ;;  %12843 = vmatmul.mubr.msk.bf16.gmra.mrb[52].mxu0 %vm1735_vm9, %v1970_v57  ;;  %v2146_v44 = vrot.slane %v2144_v21, 2  ;;  %v5247_v7 = vld [vmem:[#allocation2 + $0x1c] sm:$0xf]  ;;  %v14542_v57 = vld [vmem:[#allocation2 + $0x20] sm:$0xff]  }
 0x206   : > { %1278 = vst.msk [vmem:[#allocation3 + $0x40] sm:$0xff] %vm1269_vm12, %v1259_v13  ;;  %12852 = vmatprep.mubr.msk.bf16.mxu0 %vm1735_vm9, %v15608_v42  ;;  %v15879_v42 = vld [vmem:[#allocation2 + $0x34] sm:$0xf]  ;;  %v14543_v13 = vld [vmem:[#allocation2 + $0x28] sm:$0xff]   ;;  %v11849_v21 = vcombine.low %v5810_v34, %v5247_v7  ;;  %v16071_v16 = vld [vmem:[#allocation3 + $0x30] sm:$0xff] }
 0x207   : > { %18511 = vst [vmem:[#allocation45_spill] sm:$0xff] %v15879_v42  ;;  %v5824_v6 = vrot.slane %v14543_v13, 2  ;;  %18527 = vst [vmem:[#allocation55_spill] sm:$0xff] %v16071_v16 }
 0x208   : > { %v5821_v41 = vrot.slane %v11849_v21, 2 }
 0x20c   : > { %v15887_v50 = vpop.permute.xlu0 %8194 }
 0x20d   : > { %12853 = vmatmul.mubr.msk.bf16.vlgmr.msra.gmra.mrb[44].mxu0 %vm1735_vm9, %v15635_v27  ;;  %v14444_v27 = vld [vmem:[%s18366_s2 + $0x78] sm:$0xff]  }
 0x20e   : > { %12856 = vmatprep.mubr.msk.bf16.mxu0 %vm1735_vm9, %v15672_v56  ;;  %12865 = vmatpush3.bf16.msra.mxu0 %v14440_v14  ;;  %v2143_v14 = vrot.slane %v2141_v51, 1  ;;  %v15920_v51 = vld [vmem:[#allocation2 + $0x38] sm:$0xff]  }
 0x20f   : > { %12866 = vmatprep.subr.bf16.mxu0 %v14441_v46  ;;  %18512 = vst [vmem:[#allocation46_spill] sm:$0xff] %v15920_v51 }
 0x210   : > { %v15898_v32 = vpop.permute.xlu0 %8203  ;;  %v2147_v35 = vor.u32 %v2146_v44, %v2143_v14  ;;  %v18395_v14 = vrot.slane %v15920_v51, 2 }
 0x212   : > { %12867 = vmatpush3.bf16.msra.mxu0 %v14441_v46  ;;  %v2148_v52 = vsel %vm2111_vm10, %v15726_v53, %v2147_v35 }
 0x213   : > { %12868 = vmatprep.subr.bf16.mxu0 %v14443_v47 }
 0x214   : > { %v15905_v62 = vpop.permute.xlu0 %8209 }
 0x215   : > { %v15910_v56 = vpop.permute.xlu1 %8197  ;;  %12857 = vmatmul.mubr.msk.bf16.gmra.mrb[48].mxu0 %vm1735_vm9, %v15702_v59  ;;  %v5822_v59 = vrot.slane %v14542_v57, 2  ;;  %v2432_v57 = vld [vmem:[#allocation2 + $0x4] sm:$0xc] }
 0x216   : > { %12860 = vmatprep.mubr.msk.bf16.mxu0 %vm1735_vm9, %v15737_v31  ;;  %12869 = vmatpush3.bf16.msra.mxu0 %v14443_v47  ;;  %v5826_v31 = vrot.slane %v14545_v43, 2  ;;  %v11501_v21 = vcombine.low %v2432_v57, %v15577_v58  ;;  %v2301_v57 = vrot.slane %v15892_v10, 2 }
 0x217   : > { %12882 = vmatprep.subr.bf16.mxu0 %v14444_v27  ;;  %v15929_v30 = vsel %vm2289_vm8, %v5821_v41, %v5822_v59  ;;  %v15932_v38 = vsel %vm2289_vm8, %v5822_v59, %v5824_v6 }
 0x218   : > { %v15916_v46 = vpop.permute.xlu0 %8215  ;;  %18513 = vst [vmem:[#allocation47_spill] sm:$0xff] %v15929_v30  ;;  %18514 = vst [vmem:[#allocation48_spill] sm:$0xff] %v15932_v38  ;;  %v15937_v34 = vsel %vm2289_vm8, %v5824_v6, %v5826_v31  ;;  %v15944_v53 = vsel %vm2289_vm8, %v5826_v31, %v18395_v14  ;;  %v14446_v6 = vld [vmem:[%s18366_s2 + $0x88] sm:$0xff]   ;;  %v2640_v31 = vshrl.u32 %v11501_v21, 16  ;;  %v2643_v9 = vshll.u32 %v11501_v21, 16 }
 0x219   : > { %v15918_v55 = vpop.permute.xlu1 %8200  ;;  %18515 = vst [vmem:[#allocation49_spill] sm:$0xff] %v15937_v34  ;;  %18516 = vst [vmem:[#allocation50_spill] sm:$0xff] %v15944_v53  ;;  %v2485_v53 = vrot.slane %v11501_v21, 2  ;;  %v15995_v34 = vcombine.low %v15648_v15, %v15691_v54 }
 0x21a   : > { %v15999_v38 = vrot.slane %v2640_v31, 2  ;;  %v16005_v60 = vrot.slane %v2643_v9, 3  ;;  %v16031_v9 = vld [vmem:[#allocation3 + $0x20] sm:$0xff] }
 0x21c   : > { %v15922_v24 = vpop.permute.xlu0 %8221 }
 0x21d   : > { %v15924_v47 = vpop.permute.xlu1 %8206  ;;  %12861 = vmatmul.mubr.msk.bf16.gmra.mrb[52].mxu0 %vm1735_vm9, %v2148_v52  ;;  %v14445_v52 = vld [vmem:[%s18366_s2 + $0x80] sm:$0xff]  }
 0x21e   : > { %12870 = vmatprep.mubr.msk.bf16.mxu0 %vm1735_vm9, %v15587_v20 }
 0x220   : > { %v15946_v41 = vpop.permute.xlu0 %8227 }
 0x221   : > { %v15948_v35 = vpop.permute.xlu1 %8212 }
 0x224   : > { %v1320_v43 = vpop.permute.xlu0 %1319 }
 0x225   : > { %v15953_v44 = vpop.permute.xlu1 %8218  ;;  %12871 = vmatmul.mubr.msk.bf16.vlgmr.msra.gmra.mrb[44].mxu0 %vm1735_vm9, %v15624_v4  ;;  %v15968_v4 = vld [vmem:[%s18366_s2 + $0x90] sm:$0xff]  }
 0x226   : > { %12874 = vmatprep.mubr.msk.bf16.mxu0 %vm1735_vm9, %v15658_v3  ;;  %12883 = vmatpush3.bf16.msra.mxu0 %v14444_v27  ;;  %v15974_v27 = vcombine.low %v15568_v22, %v15589_v12 }
 0x227   : > { %12884 = vmatprep.subr.bf16.mxu0 %v14445_v52 }
 0x228   : > { %v1324_v20 = vpop.permute.xlu0 %1323  ;;  %v2486_v14 = vrot.slane %v15974_v27, 2  ;;  %v18520_v31 = vshll.u32 %v15974_v27, 16 }
 0x229   : > { %v15962_v7 = vpop.permute.xlu1 %8224 }
 0x22a   : > { %12885 = vmatpush3.bf16.msra.mxu0 %v14445_v52  ;;  %v2487_v30 = vsel %vm2289_vm8, %v2485_v53, %v2486_v14  ;;  %v2653_v11 = vrot.slane %v18520_v31, 3 }
 0x22b   : > { %12886 = vmatprep.subr.bf16.mxu0 %v14446_v6 }
 0x22c   : > { %v1328_v13 = vpop.permute.xlu0 %1327 }
 0x22d   : > { %v15970_v3 = vpop.permute.xlu1 %8230  ;;  %12875 = vmatmul.mubr.msk.bf16.gmra.mrb[48].mxu0 %vm1735_vm9, %v15688_v39 }
 0x22e   : > { %18517 = vst [vmem:[#allocation51_spill] sm:$0xff] %v15970_v3  ;;  %12878 = vmatprep.mubr.msk.bf16.mxu0 %vm1735_vm9, %v15719_v19  ;;  %12887 = vmatpush3.bf16.msra.mxu0 %v14446_v6  ;;  %v15989_v19 = vcombine.low %v15596_v26, %v15661_v36 }
 0x22f   : > { %12900 = vmatprep.subr.bf16.mxu0 %v15968_v4 }
 0x230   : > { %v15980_v59 = vpop.permute.xlu0 %1331  ;;  %v2488_v42 = vrot.slane %v15989_v19, 2  ;;  %v18522_v0 = vshrl.u32 %v15989_v19, 16 }
 0x231   : > { %v1322_v52 = vpop.permute.xlu1 %1321 }
 0x232   : > { %v1389_v39 = vsel %vm1387_vm13, %v1320_v43, %v1322_v52  ;;  %v18518_v43 = vrot.slane %v15699_v61, 2  ;;  %v2489_v61 = vsel %vm2289_vm8, %v2486_v14, %v2488_v42 }
 0x233   : > { %1425 = vst.msk [vmem:[#allocation5 + $0x8] sm:$0xff] %vm762_vm0, %v1389_v39  ;;  %v18519_v39 = vshrl.u32 %v15974_v27, 16 }
 0x234   : > { %v15997_v10 = vpop.permute.xlu0 %1335  ;;  %v2302_v52 = vsel %vm2289_vm8, %v18518_v43, %v2301_v57 }
 0x235   : > { %v1326_v8 = vpop.permute.xlu1 %1325  ;;  %v2650_v21 = vrot.slane %v18519_v39, 2  ;;  %12879 = vmatmul.mubr.msk.bf16.gmra.mrb[52].mxu0 %vm1735_vm9, %v2302_v52  ;;  %v2659_v52 = vrot.slane %v18522_v0, 2  ;;  %v14453_v0 = vld [vmem:[%s18366_s2 + $0x98] sm:$0xff]  }
 0x236   : > { %v1390_v6 = vsel %vm1387_vm13, %v1324_v20, %v1326_v8  ;;  %12888 = vmatprep.mubr.msk.bf16.mxu0 %vm1735_vm9, %v2487_v30  ;;  %v2443_v8 = vld [vmem:[#allocation2 + $0x30] sm:$0xf]  ;;  %v2830_v20 = vld [vmem:[#allocation2 + $0x4] sm:$0x8]  ;;  %v16029_v30 = vld [vmem:[#allocation3 + $0x18] sm:$0xff] }
 0x237   : > { %1426 = vst.msk [vmem:[#allocation5 + $0x10] sm:$0xff] %vm762_vm0, %v1390_v6  ;;  %v16024_v39 = vcombine.low %v2830_v20, %v15577_v58  ;;  %v16027_v6 = vld [vmem:[#allocation3 + $0x10] sm:$0xff]  ;;  %v16035_v1 = vor.u32 %v2653_v11, %v2650_v21  ;;  %v18523_v20 = vrot.slane %v15995_v34, 2  ;;  %v18524_v11 = vshll.u32 %v15989_v19, 16 }
 0x238   : > { %v16019_v57 = vpop.permute.xlu0 %1339  ;;  %18521 = vst [vmem:[#allocation52_spill] sm:$0xff] %v16027_v6  ;;  %v16066_v48 = vshll.u32 %v16027_v6, 16  ;;  %v16078_v23 = vshll.u32 %v16029_v30, 16  ;;  %v18528_v28 = vrot.slane %v16027_v6, 5 }
 0x239   : > { %v1330_v43 = vpop.permute.xlu1 %1329  ;;  %v2491_v31 = vsel %vm2289_vm8, %v2488_v42, %v18523_v20  ;;  %v2662_v14 = vrot.slane %v18524_v11, 3  ;;  %v7276_v20 = vrot.slane %v16031_v9, 5  ;;  %v16069_v11 = vshrl.u32 %v16029_v30, 16 }
 0x23a   : > { %v1391_v53 = vsel %vm1387_vm13, %v1328_v13, %v1330_v43  ;;  %v16050_v13 = vcombine.low %v15710_v17, %v2443_v8  ;;  %v7274_v43 = vrot.slane %v16029_v30, 5  ;;  %18526 = vst [vmem:[#allocation54_spill] sm:$0xff] %v16066_v48  ;;  %v7443_v51 = vrot.slane %v16078_v23, 6 }
 0x23b   : > { %1427 = vst.msk [vmem:[#allocation5 + $0x18] sm:$0xff] %vm762_vm0, %v1391_v53  ;;  %v16060_v53 = vshrl.u32 %v16027_v6, 16  ;;  %v7442_v6 = vrot.slane %v16069_v11, 5  ;;  %v16124_v63 = vor.u32 %v2662_v14, %v2659_v52  ;;  %v18534_v17 = vrot.slane %v15995_v34, 2 }
 0x23c   : > { %v16054_v21 = vpop.permute.xlu0 %1343  ;;  %v16083_v18 = vsel %vm7270_vm14, %v18528_v28, %v7274_v43  ;;  %v16086_v37 = vsel %vm7270_vm14, %v7274_v43, %v7276_v20  ;;  %v16101_v28 = vsel %vm7270_vm14, %v7276_v20, %v18408_v5  ;;  %v18537_v22 = vrot.slane %v16050_v13, 2 }
 0x23d   : > { %18525 = vst [vmem:[#allocation53_spill] sm:$0xff] %v16060_v53  ;;  %v1334_v8 = vpop.permute.xlu1 %1333  ;;  %12889 = vmatmul.mubr.msk.bf16.vlgmr.msra.gmra.mrb[44].mxu0 %vm1735_vm9, %v2489_v61  ;;  %18529 = vst [vmem:[#allocation56_spill] sm:$0xff] %v16083_v18  ;;  %v16093_v61 = vshrl.u32 %v16031_v9, 16  ;;  %v7438_v5 = vrot.slane %v16060_v53, 5 }
 0x23e   : > { %v1392_v33 = vsel %vm1387_vm13, %v15980_v59, %v1334_v8  ;;  %v10479_v42 = vld [vmem:[#allocation5 + $0xd] sm:$0xff]  ;;  %18530 = vst [vmem:[#allocation57_spill] sm:$0xff] %v16086_v37  ;;  %12892 = vmatprep.mubr.msk.bf16.mxu0 %vm1735_vm9, %v2491_v31  ;;  %12901 = vmatpush3.bf16.msra.mxu0 %v15968_v4  ;;  %v16096_v8 = vshll.u32 %v16031_v9, 16  ;;  %18531 = vst [vmem:[#allocation58_spill] sm:$0xff] %v16101_v28  ;;  %v14456_v4 = vld [vmem:[%s18366_s2 + $0xa0] sm:$0xff]   ;;  %v16111_v59 = vshrl.u32 %v16071_v16, 16 }
 0x23f   : > { %v10503_v45 = vld [vmem:[#allocation5 + $0xe] sm:$0xff]  ;;  %1428 = vst.msk [vmem:[#allocation5 + $0x20] sm:$0xff] %vm762_vm0, %v1392_v33  ;;  %v2492_v33 = vrot.slane %v16047_v29, 2  ;;  %12902 = vmatprep.subr.bf16.mxu0 %v14453_v0  ;;  %v16114_v37 = vshll.u32 %v16071_v16, 16  ;;  %v7439_v28 = vrot.slane %v16066_v48, 6 }
 0x240   : > { %v16103_v43 = vpop.permute.xlu0 %1347  ;;  %v10515_v20 = vadd.f32 %v10503_v45, %v10479_v42  ;;  %v16122_v31 = vld [vmem:[#allocation2 + $0x34] ss:$0 sps:$4 sm:$0x33]   ;;  %v18532_v45 = vshrl.u32 %v15995_v34, 16 }
 0x241   : > { %v1338_v18 = vpop.permute.xlu1 %1337  ;;  %v16130_v40 = vor.u32 %v7439_v28, %v7438_v5  ;;  %v2493_v52 = vsel %vm2289_vm8, %v18534_v17, %v2492_v33  ;;  %v10527_v14 = vld [vmem:[#allocation5 + $0xf] sm:$0xff]  ;;  %v7444_v5 = vor.u32 %v7443_v51, %v7442_v6  ;;  %v7454_v17 = vrot.slane %v16111_v59, 5 }
 0x242   : > { %v1393_v3 = vsel %vm1387_vm13, %v15997_v10, %v1338_v18  ;;  %12903 = vmatpush3.bf16.msra.mxu0 %v14453_v0  ;;  %v2668_v42 = vrot.slane %v18532_v45, 2  ;;  %v10480_v48 = vld [vmem:[#allocation5 + $0x15] sm:$0xff]  ;;  %v7446_v18 = vrot.slane %v16093_v61, 5  ;;  %v7447_v10 = vrot.slane %v16096_v8, 6 }
 0x243   : > { %1429 = vst.msk [vmem:[#allocation5 + $0x28] sm:$0xff] %vm762_vm0, %v1393_v3  ;;  %v10504_v53 = vld [vmem:[#allocation5 + $0x16] sm:$0xff]  ;;  %18533 = vst [vmem:[#allocation59_spill] sm:$0xff] %v16130_v40  ;;  %12904 = vmatprep.subr.bf16.mxu0 %v14456_v4  ;;  %v16140_v3 = vld [vmem:[%s18366_s2 + $0xa8] sm:$0xff]   ;;  %v18535_v0 = vshll.u32 %v15995_v34, 16  ;;  %v10539_v15 = vadd.f32 %v10527_v14, %v10515_v20  ;;  %v7455_v26 = vrot.slane %v16114_v37, 6  ;;  %v16158_v20 = vsel %vm7429_vm3, %v16130_v40, %v7444_v5 }
 0x244   : > { %v16144_v28 = vpop.permute.xlu0 %1351  ;;  %v16146_v36 = vor.u32 %v7447_v10, %v7446_v18  ;;  %v10516_v6 = vadd.f32 %v10504_v53, %v10480_v48  ;;  %18538 = vst [vmem:[#allocation61_spill] sm:$0xff] %v16158_v20  ;;  %v2496_v48 = vrot.slane %v16122_v31, 2  ;;  %v10528_v31 = vld [vmem:[#allocation5 + $0x17] sm:$0xff]  ;;  %v18547_v40 = vshll.u32 %v16047_v29, 16 }
 0x245   : > { %v2671_v45 = vrot.slane %v18535_v0, 3  ;;  %v1342_v54 = vpop.permute.xlu1 %1341  ;;  %12893 = vmatmul.mubr.msk.bf16.gmra.mrb[48].mxu0 %vm1735_vm9, %v2493_v52  ;;  %v2495_v0 = vsel %vm2289_vm8, %v2492_v33, %v18537_v22  ;;  %v16167_v22 = vor.u32 %v7455_v26, %v7454_v17  ;;  %v7641_v33 = vrot.slane %v16096_v8, 3 }
 0x246   : > { %18536 = vst [vmem:[#allocation60_spill] sm:$0xff] %v16146_v36  ;;  %v1394_v12 = vsel %vm1387_vm13, %v16019_v57, %v1342_v54  ;;  %v10551_v51 = vld [vmem:[#allocation5 + $0x19] sm:$0xff]  ;;  %12896 = vmatprep.mubr.msk.bf16.mxu0 %vm1735_vm9, %v2495_v0  ;;  %12905 = vmatpush3.bf16.msra.mxu0 %v14456_v4  ;;  %v2842_v57 = vrot.slane %v16024_v39, 3  ;;  %v16165_v52 = vsel %vm7429_vm3, %v7444_v5, %v16146_v36  ;;  %v18544_v0 = vrot.slane %v15974_v27, 3 }
 0x247   : > { %1430 = vst.msk [vmem:[#allocation5 + $0x30] sm:$0xff] %vm762_vm0, %v1394_v12  ;;  %v10563_v18 = vadd.f32 %v10551_v51, %v10539_v15  ;;  %v10481_v10 = vld [vmem:[#allocation5 + $0x1d] sm:$0xff]  ;;  %18539 = vst [vmem:[#allocation62_spill] sm:$0xff] %v16165_v52  ;;  %12918 = vmatprep.subr.bf16.mxu0 %v16140_v3  ;;  %v18541_v15 = vshrl.u32 %v15974_v27, 16  ;;  %v18543_v5 = vor.u32 %v16005_v60, %v15999_v38 }
 0x248   : > { %v10505_v54 = vld [vmem:[#allocation5 + $0x1e] sm:$0xff]  ;;  %18540 = vst [vmem:[#allocation63_spill] sm:$0xff] %v16167_v22  ;;  %v16185_v51 = vsel %vm2841_vm2, %v2842_v57, %v18544_v0  ;;  %v16190_v52 = vor.u32 %v2671_v45, %v2668_v42  ;;  %v10540_v38 = vadd.f32 %v10528_v31, %v10516_v6  ;;  %v16198_v57 = vsel %vm2638_vm15, %v16035_v1, %v16124_v63 }
 0x249   : > { %v10575_v53 = vld [vmem:[#allocation5 + $0x1a] sm:$0xff]  ;;  %v16175_v4 = vrot.slane %v18541_v15, 3  ;;  %v1346_v14 = vpop.permute.xlu1 %1345  ;;  %v2655_v26 = vsel %vm2638_vm15, %v18543_v5, %v16035_v1  ;;  %v10517_v60 = vadd.f32 %v10505_v54, %v10481_v10  ;;  %v16192_v5 = vpop.permute.xlu0 %1355  ;;  %v18545_v42 = vrot.slane %v16050_v13, 2 }
 0x24a   : > { %v10587_v17 = vadd.f32 %v10575_v53, %v10563_v18  ;;  %v1395_v15 = vsel %vm1387_vm13, %v16054_v21, %v1346_v14  ;;  %v10482_v12 = vld [vmem:[#allocation5 + $0x25] sm:$0xff]  ;;  %v10599_v36 = vld [vmem:[#allocation5 + $0x1b] sm:$0xff]  ;;  %v7629_v54 = vrot.slane %v16069_v11, 2  ;;  %v7632_v1 = vrot.slane %v16078_v23, 3 }
 0x24b   : > { %18542 = vst [vmem:[#allocation64_spill] sm:$0xff] %v16175_v4  ;;  %v10506_v22 = vld [vmem:[#allocation5 + $0x26] sm:$0xff]  ;;  %1431 = vst.msk [vmem:[#allocation5 + $0x38] sm:$0xff] %vm762_vm0, %v1395_v15  ;;  %v2497_v45 = vsel %vm2289_vm8, %v18545_v42, %v2496_v48  ;;  %v7638_v15 = vrot.slane %v16093_v61, 2  ;;  %v16215_v48 = vsel %vm2638_vm15, %v16124_v63, %v16190_v52  ;;  %v2680_v63 = vrot.slane %v18547_v40, 3 }
 0x24c   : > { %v10611_v18 = vadd.f32 %v10599_v36, %v10587_v17  ;;  %v10552_v53 = vld [vmem:[#allocation5 + $0x21] sm:$0xff]  ;;  %v10518_v6 = vadd.f32 %v10506_v22, %v10482_v12  ;;  %v16217_v42 = vld [vmem:[#allocation2 + $0x34] ss:$0 sps:$4 sm:$0x77]   ;;  %v16231_v4 = vor.u32 %v7632_v1, %v7629_v54 }
 0x24d   : > { %v10564_v10 = vadd.f32 %v10552_v53, %v10540_v38  ;;  %v1350_v31 = vpop.permute.xlu1 %1349  ;;  %v10576_v17 = vld [vmem:[#allocation5 + $0x22] sm:$0xff]  ;;  %12897 = vmatmul.mubr.msk.bf16.gmra.mrb[52].mxu0 %vm1735_vm9, %v2497_v45  ;;  %v18546_v45 = vshrl.u32 %v16047_v29, 16 }
 0x24e   : > { %v10626_v36 = vadd.f32 %v10611_v18, %v10482_v12  ;;  %v10529_v0 = vld [vmem:[#allocation5 + $0x1f] sm:$0xff]  ;;  %v1396_v14 = vsel %vm1387_vm13, %v16103_v43, %v1350_v31  ;;  %v10483_v38 = vld [vmem:[#allocation5 + $0x2d] sm:$0xff]  ;;  %12906 = vmatprep.mubr.msk.bf16.mxu0 %vm1735_vm9, %v2655_v26  ;;  %18549 = vst [vmem:[#allocation66_spill] sm:$0xff] %v16231_v4 }
 0x24f   : > { %v10507_v12 = vld [vmem:[#allocation5 + $0x2e] sm:$0xff]  ;;  %v10588_v18 = vadd.f32 %v10576_v17, %v10564_v10  ;;  %v10541_v53 = vadd.f32 %v10529_v0, %v10517_v60  ;;  %1432 = vst.msk [vmem:[#allocation5 + $0x40] sm:$0xff] %vm762_vm0, %v1396_v14  ;;  %v10600_v20 = vld [vmem:[#allocation5 + $0x23] sm:$0xff]  ;;  %v2677_v31 = vrot.slane %v18546_v45, 2  ;;  %v16227_v14 = vpop.permute.xlu0 %1359  ;;  %v16233_v45 = vor.u32 %v7641_v33, %v7638_v15 }
 0x250   : > { %v10641_v21 = vadd.f32 %v10626_v36, %v10506_v22  ;;  %v10553_v43 = vld [vmem:[#allocation5 + $0x29] sm:$0xff]  ;;  %v10519_v60 = vadd.f32 %v10507_v12, %v10483_v38 }
 0x251   : > { %v10530_v25 = vld [vmem:[#allocation5 + $0x27] sm:$0xff]  ;;  %v10612_v10 = vadd.f32 %v10600_v20, %v10588_v18  ;;  %v10565_v17 = vadd.f32 %v10553_v43, %v10541_v53  ;;  %v1354_v26 = vpop.permute.xlu1 %1353  ;;  %18550 = vst [vmem:[#allocation67_spill] sm:$0xff] %v16233_v45  ;;  %v2693_v43 = vshrl.u32 %v16217_v42, 16  ;;  %v10531_v33 = vld [vmem:[#allocation5 + $0x2f] sm:$0xff] }
 0x252   : > { %v16229_v22 = vadd.f32 %v10641_v21, %v10530_v25  ;;  %v10542_v36 = vadd.f32 %v10530_v25, %v10518_v6  ;;  %v10577_v2 = vld [vmem:[#allocation5 + $0x2a] sm:$0xff]  ;;  %v1397_v40 = vsel %vm1387_vm13, %v16144_v28, %v1354_v26  ;;  %v10484_v18 = vld [vmem:[#allocation5 + $0x35] sm:$0xff]  ;;  %v2696_v28 = vshll.u32 %v16217_v42, 16 }
 0x253   : > { %v10554_v58 = vld [vmem:[#allocation5 + $0x31] sm:$0xff]  ;;  %v10627_v20 = vadd.f32 %v10612_v10, %v10483_v38  ;;  %v10589_v53 = vadd.f32 %v10577_v2, %v10565_v17  ;;  %1433 = vst.msk [vmem:[#allocation5 + $0x48] sm:$0xff] %vm762_vm0, %v1397_v40  ;;  %v16248_v2 = vsel %vm2638_vm15, %v16231_v4, %v16233_v45  ;;  %v10543_v38 = vadd.f32 %v10531_v33, %v10519_v60 }
 0x254   : > { %18548 = vst [vmem:[#allocation65_spill] sm:$0xff] %v16229_v22  ;;  %10697 = vperm.xlu0 %14341, %v16229_v22   ;;  %v10566_v21 = vadd.f32 %v10554_v58, %v10542_v36  ;;  %v16242_v25 = vcombine.high %v16229_v22, %v16229_v22  ;;  %v10508_v6 = vld [vmem:[#allocation5 + $0x36] sm:$0xff]  ;;  %v10601_v54 = vld [vmem:[#allocation5 + $0x2b] sm:$0xff]  ;;  %18552 = vst [vmem:[#allocation69_spill] sm:$0xff] %v16248_v2  ;;  %v18553_v17 = vshrl.u32 %v16050_v13, 16  ;;  %v7656_v22 = vrot.slane %v16111_v59, 2  ;;  %v1364_v2 = vpop.permute.xlu0 %1363 }
 0x255   : > { %v10578_v1 = vld [vmem:[#allocation5 + $0x32] sm:$0xff]  ;;  %v10642_v15 = vadd.f32 %v10627_v20, %v10507_v12  ;;  %v10613_v10 = vadd.f32 %v10601_v54, %v10589_v53  ;;  %v1358_v40 = vpop.permute.xlu1 %1357  ;;  %v10520_v0 = vadd.f32 %v10508_v6, %v10484_v18  ;;  %v7659_v45 = vrot.slane %v16114_v37, 3  ;;  %12907 = vmatmul.mubr.msk.bf16.vlgmr.msra.gmra.mrb[44].mxu0 %vm1735_vm9, %v16198_v57 }
 0x256   : > { %18551 = vst [vmem:[#allocation68_spill] sm:$0xff] %v16242_v25  ;;  %v14458_v58 = vld [vmem:[%s18366_s2 + $0xb0] sm:$0xff]   ;;  %v2686_v26 = vrot.slane %v18553_v17, 2  ;;  %v10590_v36 = vadd.f32 %v10578_v1, %v10566_v21  ;;  %10708 = vperm.xlu1 %14342, %v16242_v25   ;;  %v1398_v12 = vsel %vm1387_vm13, %v16192_v5, %v1358_v40  ;;  %v10555_v20 = vld [vmem:[#allocation5 + $0x39] sm:$0xff]  ;;  %v18554_v21 = vshll.u32 %v16050_v13, 16  ;;  %12910 = vmatprep.mubr.msk.bf16.mxu0 %vm1735_vm9, %v16215_v48 }
 0x257   : > { %v10657_v60 = vadd.f32 %v10642_v15, %v10531_v33  ;;  %v10628_v53 = vadd.f32 %v10613_v10, %v10484_v18  ;;  %v10485_v54 = vld [vmem:[#allocation5 + $0x3d] sm:$0xff]  ;;  %v10602_v17 = vld [vmem:[#allocation5 + $0x33] sm:$0xff]  ;;  %1434 = vst.msk [vmem:[#allocation5 + $0x50] sm:$0xff] %vm762_vm0, %v1398_v12  ;;  %12919 = vmatpush3.bf16.msra.mxu0 %v16140_v3  ;;  %v10567_v5 = vadd.f32 %v10555_v20, %v10543_v38  ;;  %v16285_v33 = vrot.slane %v2696_v28, 3 }
 0x258   : > { %v2689_v1 = vrot.slane %v18554_v21, 3  ;;  %v2681_v40 = vor.u32 %v2680_v63, %v2677_v31  ;;  %v10509_v4 = vld [vmem:[#allocation5 + $0x3e] sm:$0xff]  ;;  %v10614_v57 = vadd.f32 %v10602_v17, %v10590_v36  ;;  %12920 = vmatprep.subr.bf16.mxu0 %v14458_v58  ;;  %v16271_v21 = vrot.slane %v2693_v43, 2 }
 0x259   : > { %v16269_v18 = vcombine.high %v10657_v60, %v10657_v60  ;;  %v10579_v15 = vld [vmem:[#allocation5 + $0x3a] sm:$0xff]  ;;  %v10643_v25 = vadd.f32 %v10628_v53, %v10508_v6  ;;  %v16276_v12 = vor.u32 %v7659_v45, %v7656_v22  ;;  %v1362_v31 = vpop.permute.xlu1 %1361  ;;  %v10521_v36 = vadd.f32 %v10509_v4, %v10485_v54 }
 0x25a   : > { %v10532_v10 = vld [vmem:[#allocation5 + $0x37] sm:$0xff]  ;;  %v10591_v3 = vadd.f32 %v10579_v15, %v10567_v5  ;;  %v10629_v38 = vadd.f32 %v10614_v57, %v10485_v54  ;;  %v1399_v60 = vsel %vm1387_vm13, %v16227_v14, %v1362_v31  ;;  %v10556_v43 = vld [vmem:[#allocation5 + $0x41] sm:$0xff]  ;;  %v16283_v20 = vor.u32 %v2689_v1, %v2686_v26  ;;  %v1368_v15 = vpop.permute.xlu0 %1367 }
 0x25b   : > { %v14460_v48 = vld [vmem:[%s18366_s2 + $0xb8] sm:$0xff]   ;;  %v10544_v63 = vadd.f32 %v10532_v10, %v10520_v0  ;;  %10719 = vperm.xlu1 %14342, %v16269_v18   ;;  %v16281_v6 = vadd.f32 %v10643_v25, %v10532_v10  ;;  %v10486_v53 = vld [vmem:[#allocation5 + $0x45] sm:$0xff]  ;;  %1435 = vst.msk [vmem:[#allocation5 + $0x58] sm:$0xff] %vm762_vm0, %v1399_v60  ;;  %12921 = vmatpush3.bf16.msra.mxu0 %v14458_v58  ;;  %v18433_v28 = vrot.slane %v16029_v30, 3  ;;  %v7835_v57 = vrot.slane %v16031_v9, 3 }
 0x25c   : > { %v10603_v17 = vld [vmem:[#allocation5 + $0x3b] sm:$0xff]  ;;  %v10644_v0 = vadd.f32 %v10629_v38, %v10509_v4  ;;  %v10510_v45 = vld [vmem:[#allocation5 + $0x46] sm:$0xff]  ;;  %v2682_v25 = vsel %vm2638_vm15, %v16190_v52, %v2681_v40  ;;  %12922 = vmatprep.subr.bf16.mxu0 %v14460_v48  ;;  %v2691_v9 = vsel %vm2638_vm15, %v2681_v40, %v16283_v20  ;;  %v2699_v60 = vor.u32 %v16285_v33, %v16271_v21 }
 0x25d   : > { %v10568_v22 = vadd.f32 %v10556_v43, %v10544_v63  ;;  %v10615_v54 = vadd.f32 %v10603_v17, %v10591_v3  ;;  %10730 = vperm.xlu0 %14341, %v16281_v6   ;;  %v10580_v14 = vld [vmem:[#allocation5 + $0x42] sm:$0xff]  ;;  %v10522_v1 = vadd.f32 %v10510_v45, %v10486_v53  ;;  %v1366_v58 = vpop.permute.xlu1 %1365  ;;  %12911 = vmatmul.mubr.msk.bf16.gmra.mrb[48].mxu0 %vm1735_vm9, %v2682_v25 }
 0x25e   : > { %v10533_v26 = vld [vmem:[#allocation5 + $0x3f] sm:$0xff]  ;;  %v1400_v52 = vsel %vm1387_vm13, %v1364_v2, %v1366_v58  ;;  %v10557_v38 = vld [vmem:[#allocation5 + $0x49] sm:$0xff]  ;;  %12914 = vmatprep.mubr.msk.bf16.mxu0 %vm1735_vm9, %v2691_v9 }
 0x25f   : > { %v10592_v4 = vadd.f32 %v10580_v14, %v10568_v22  ;;  %v16294_v10 = vadd.f32 %v10644_v0, %v10533_v26  ;;  %v10545_v3 = vadd.f32 %v10533_v26, %v10521_v36  ;;  %v10630_v31 = vadd.f32 %v10615_v54, %v10486_v53  ;;  %v16299_v63 = vld [vmem:[%s18366_s2 + $0xc0] sm:$0xff]   ;;  %v10487_v43 = vld [vmem:[#allocation5 + $0x4d] sm:$0xff]  ;;  %1436 = vst.msk [vmem:[#allocation5 + $0x60] sm:$0xff] %vm762_vm0, %v1400_v52  ;;  %v1372_v52 = vpop.permute.xlu0 %1371 }
 0x260   : > { %v16310_v36 = vsel %vm2841_vm2, %v18433_v28, %v7835_v57  ;;  %v10534_v40 = vld [vmem:[#allocation5 + $0x47] sm:$0xff]  ;;  %v7837_v22 = vrot.slane %v16039_v49, 3  ;;  %12923 = vmatpush3.bf16.msra.mxu0 %v14460_v48  ;;  %v18434_v26 = vrot.slane %v16071_v16, 3  ;;  %v18559_v28 = vrot.slane %v15974_v27, 3 }
 0x261   : > { %18555 = vst [vmem:[#allocation70_spill] sm:$0xff] %v16310_v36  ;;  %10741 = vperm.xlu1 %14342, %v16294_v10   ;;  %v10569_v2 = vadd.f32 %v10557_v38, %v10545_v3  ;;  %v16317_v53 = vcombine.high %v16294_v10, %v16294_v10  ;;  %v10645_v17 = vadd.f32 %v10630_v31, %v10510_v45  ;;  %v10511_v33 = vld [vmem:[#allocation5 + $0x4e] sm:$0xff]  ;;  %v10604_v21 = vld [vmem:[#allocation5 + $0x43] sm:$0xff]  ;;  %v1370_v3 = vpop.permute.xlu1 %1369  ;;  %v18556_v45 = vshll.u32 %v15974_v27, 16 }
 0x262   : > { %v10581_v0 = vld [vmem:[#allocation5 + $0x4a] sm:$0xff]  ;;  %v10546_v54 = vadd.f32 %v10534_v40, %v10522_v1  ;;  %v10616_v14 = vadd.f32 %v10604_v21, %v10592_v4  ;;  %v10523_v25 = vadd.f32 %v10511_v33, %v10487_v43  ;;  %12936 = vmatprep.subr.bf16.mxu0 %v16299_v63  ;;  %v16328_v9 = vsel %vm2841_vm2, %v7835_v57, %v7837_v22  ;;  %v10488_v21 = vld [vmem:[#allocation5 + $0x55] sm:$0xff] }
 0x263   : > { %v10593_v58 = vadd.f32 %v10581_v0, %v10569_v2  ;;  %10752 = vperm.xlu0 %14341, %v16317_v53   ;;  %v10660_v38 = vadd.f32 %v10645_v17, %v10534_v40  ;;  %v16325_v31 = vrot.slane %v18556_v45, 4  ;;  %18557 = vst [vmem:[#allocation71_spill] sm:$0xff] %v16328_v9  ;;  %v1401_v1 = vsel %vm1387_vm13, %v1368_v15, %v1370_v3  ;;  %v10558_v48 = vld [vmem:[#allocation5 + $0x51] sm:$0xff] }
 0x264   : > { %v10631_v4 = vadd.f32 %v10616_v14, %v10487_v43  ;;  %v10605_v2 = vld [vmem:[#allocation5 + $0x4b] sm:$0xff]  ;;  %v18558_v0 = vrot.slane %v15989_v19, 3  ;;  %1437 = vst.msk [vmem:[#allocation5 + $0x68] sm:$0xff] %vm762_vm0, %v1401_v1  ;;  %v10570_v57 = vadd.f32 %v10558_v48, %v10546_v54  ;;  %v10512_v5 = vld [vmem:[#allocation5 + $0x56] sm:$0xff]  ;;  %v16345_v43 = vsel %vm2841_vm2, %v7837_v22, %v18434_v26 }
 0x265   : > { %v16340_v45 = vcombine.high %v10660_v38, %v10660_v38  ;;  %v10617_v15 = vadd.f32 %v10605_v2, %v10593_v58  ;;  %18560 = vst [vmem:[#allocation72_spill] sm:$0xff] %v16345_v43  ;;  %v10582_v14 = vld [vmem:[#allocation5 + $0x52] sm:$0xff]  ;;  %v18562_v17 = vrot.slane %v15989_v19, 3  ;;  %v18563_v54 = vrot.slane %v16047_v29, 3  ;;  %v1374_v48 = vpop.permute.xlu1 %1373 }
 0x266   : > { %v16336_v40 = vsel %vm2841_vm2, %v18559_v28, %v18558_v0  ;;  %v10535_v27 = vld [vmem:[#allocation5 + $0x4f] sm:$0xff]  ;;  %v10646_v3 = vadd.f32 %v10631_v4, %v10511_v33  ;;  %v10524_v28 = vadd.f32 %v10512_v5, %v10488_v21  ;;  %v18561_v0 = vrot.slane %v15995_v34, 3  ;;  %v10489_v16 = vld [vmem:[#allocation5 + $0x5d] sm:$0xff] }
 0x267   : > { %10763 = vperm.xlu1 %14342, %v16340_v45   ;;  %v10594_v22 = vadd.f32 %v10582_v14, %v10570_v57  ;;  %v2700_v33 = vsel %vm2638_vm15, %v16283_v20, %v2699_v60  ;;  %v10547_v4 = vadd.f32 %v10535_v27, %v10523_v25  ;;  %v10632_v2 = vadd.f32 %v10617_v15, %v10488_v21  ;;  %v10606_v43 = vld [vmem:[#allocation5 + $0x53] sm:$0xff]  ;;  %v10513_v14 = vld [vmem:[#allocation5 + $0x5e] sm:$0xff] }
 0x268   : > { %v16352_v38 = vsel %vm2841_vm2, %v18562_v17, %v18561_v0  ;;  %v18564_v58 = vmov %v18561_v0  ;;  %v1402_v26 = vsel %vm1387_vm13, %v1372_v52, %v1374_v48  ;;  %12915 = vmatmul.mubr.msk.bf16.gmra.mrb[52].mxu0 %vm1735_vm9, %v2700_v33  ;;  %v16366_v17 = vadd.f32 %v10646_v3, %v10535_v27  ;;  %v10559_v0 = vld [vmem:[#allocation5 + $0x59] sm:$0xff]  ;;  %v1376_v52 = vpop.permute.xlu0 %1375 }
 0x269   : > { %v16359_v1 = vsel %vm2841_vm2, %v18564_v58, %v18563_v54  ;;  %v18565_v54 = vrot.slane %v16050_v13, 3  ;;  %v18566_v58 = vrot.slane %v16047_v29, 3  ;;  %v7998_v20 = vrot.slane %v16069_v11, 3  ;;  %1438 = vst.msk [vmem:[#allocation5 + $0x70] sm:$0xff] %vm762_vm0, %v1402_v26  ;;  %12924 = vmatprep.mubr.msk.bf16.mxu0 %vm1735_vm9, %v16185_v51  ;;  %v10536_v21 = vld [vmem:[#allocation5 + $0x57] sm:$0xff] }
 0x26a   : > { %v10571_v25 = vadd.f32 %v10559_v0, %v10547_v4  ;;  %v10647_v15 = vadd.f32 %v10632_v2, %v10512_v5  ;;  %v10618_v27 = vadd.f32 %v10606_v43, %v10594_v22  ;;  %10774 = vperm.xlu0 %14341, %v16366_v17   ;;  %v10583_v3 = vld [vmem:[#allocation5 + $0x5a] sm:$0xff]  ;;  %v10548_v48 = vadd.f32 %v10536_v21, %v10524_v28  ;;  %v1378_v4 = vpop.permute.xlu1 %1377 }
 0x26b   : > { %v16373_v57 = vsel %vm2841_vm2, %v18566_v58, %v18565_v54  ;;  %v7999_v33 = vrot.slane %v16078_v23, 4  ;;  %v8002_v54 = vrot.slane %v16093_v61, 3  ;;  %v8003_v58 = vrot.slane %v16096_v8, 4  ;;  %v10560_v22 = vld [vmem:[#allocation5 + $0x61] sm:$0xff] }
 0x26c   : > { %v10595_v26 = vadd.f32 %v10583_v3, %v10571_v25  ;;  %v16384_v0 = vadd.f32 %v10647_v15, %v10536_v21  ;;  %v10633_v51 = vadd.f32 %v10618_v27, %v10489_v16  ;;  %v10525_v60 = vadd.f32 %v10513_v14, %v10489_v16  ;;  %v10490_v2 = vld [vmem:[#allocation5 + $0x65] sm:$0xff]  ;;  %v10607_v9 = vld [vmem:[#allocation5 + $0x5b] sm:$0xff]  ;;  %v1380_v16 = vpop.permute.xlu0 %1379 }
 0x26d   : > { %v1403_v43 = vsel %vm1387_vm13, %v1376_v52, %v1378_v4  ;;  %v16388_v28 = vor.u32 %v7999_v33, %v7998_v20  ;;  %v16390_v36 = vor.u32 %v8003_v58, %v8002_v54  ;;  %v10572_v25 = vadd.f32 %v10560_v22, %v10548_v48  ;;  %v10514_v27 = vld [vmem:[#allocation5 + $0x66] sm:$0xff] }
 0x26e   : > { %1439 = vst.msk [vmem:[#allocation5 + $0x78] sm:$0xff] %vm762_vm0, %v1403_v43  ;;  %10785 = vperm.xlu1 %14342, %v16384_v0   ;;  %v16396_v21 = vcombine.high %v16384_v0, %v16384_v0  ;;  %v10648_v15 = vadd.f32 %v10633_v51, %v10513_v14  ;;  %v10619_v52 = vadd.f32 %v10607_v9, %v10595_v26  ;;  %v8236_v20 = vrot.slane %v15918_v55, 2  ;;  %v10584_v33 = vld [vmem:[#allocation5 + $0x62] sm:$0xff]  ;;  %v1382_v9 = vpop.permute.xlu1 %1381 }
 0x26f   : > { %18567 = vst [vmem:[#allocation73_spill] sm:$0xff] %v16390_v36  ;;  %v10537_v54 = vld [vmem:[#allocation5 + $0x5f] sm:$0xff]  ;;  %v10526_v58 = vadd.f32 %v10514_v27, %v10490_v2  ;;  %v14462_v4 = vld [vmem:[%s18366_s2 + $0xc8] sm:$0xff]   ;;  %v16406_v48 = vsel %vm2995_vm4, %v16388_v28, %v16390_v36  ;;  %v10596_v43 = vadd.f32 %v10584_v33, %v10572_v25  ;;  %v8240_v55 = vrot.slane %v15924_v47, 2 }
 0x270   : > { %10796 = vperm.xlu0 %14341, %v16396_v21   ;;  %v10663_v14 = vadd.f32 %v10648_v15, %v10537_v54  ;;  %v10549_v26 = vadd.f32 %v10537_v54, %v10525_v60  ;;  %v10634_v51 = vadd.f32 %v10619_v52, %v10490_v2  ;;  %12925 = vmatmul.mubr.msk.bf16.vlgmr.msra.gmra.mrb[44].mxu0 %vm1735_vm9, %v16336_v40  ;;  %v10561_v3 = vld [vmem:[#allocation5 + $0x69] sm:$0xff]  ;;  %v8010_v5 = vrot.slane %v16111_v59, 3 }
 0x271   : > { %v1404_v22 = vsel %vm1387_vm13, %v1380_v16, %v1382_v9  ;;  %v8011_v36 = vrot.slane %v16114_v37, 4  ;;  %v8244_v25 = vrot.slane %v15948_v35, 2  ;;  %12928 = vmatprep.mubr.msk.bf16.mxu0 %vm1735_vm9, %v16352_v38  ;;  %12937 = vmatpush3.bf16.msra.mxu0 %v16299_v63  ;;  %v10538_v40 = vld [vmem:[#allocation5 + $0x67] sm:$0xff]  ;;  %v8248_v15 = vrot.slane %v15953_v44, 2  ;;  %v14463_v35 = vld [vmem:[%s18366_s2 + $0xd0] sm:$0xff]  }
 0x272   : > { %1440 = vst.msk [vmem:[#allocation5 + $0x80] sm:$0xff] %vm762_vm0, %v1404_v22  ;;  %v16420_v47 = vcombine.high %v10663_v14, %v10663_v14  ;;  %v10573_v60 = vadd.f32 %v10561_v3, %v10549_v26  ;;  %v10649_v2 = vadd.f32 %v10634_v51, %v10514_v27  ;;  %v10608_v16 = vld [vmem:[#allocation5 + $0x63] sm:$0xff]  ;;  %v10550_v33 = vadd.f32 %v10538_v40, %v10526_v58  ;;  %v10623_v3 = vld [vmem:[#allocation5 + $0x6d] sm:$0xff] }
 0x273   : > { %v10585_v52 = vld [vmem:[#allocation5 + $0x6a] sm:$0xff]  ;;  %12938 = vmatprep.subr.bf16.mxu0 %v14462_v4  ;;  %v10620_v54 = vadd.f32 %v10608_v16, %v10596_v43  ;;  %v16426_v9 = vor.u32 %v8011_v36, %v8010_v5  ;;  %v18568_v14 = vrot.slane %v15898_v32, 2  ;;  %v18569_v58 = vrot.slane %v15910_v56, 2 }
 0x274   : > { %10807 = vperm.xlu1 %14342, %v16420_v47   ;;  %v10597_v63 = vadd.f32 %v10585_v52, %v10573_v60  ;;  %v16429_v38 = vadd.f32 %v10649_v2, %v10538_v40  ;;  %v10609_v27 = vld [vmem:[#allocation5 + $0x6b] sm:$0xff]  ;;  %v18570_v43 = vrot.slane %v15887_v50, 2  ;;  %v8246_v36 = vrot.slane %v15916_v46, 2 }
 0x275   : > { %v16434_v44 = vsel %vm2289_vm8, %v8236_v20, %v18568_v14  ;;  %v8252_v51 = vrot.slane %v15962_v7, 2  ;;  %v10562_v22 = vld [vmem:[#allocation5 + $0x71] sm:$0xff]  ;;  %v10635_v40 = vadd.f32 %v10623_v3, %v10620_v54  ;;  %v8242_v16 = vrot.slane %v15905_v62, 2  ;;  %12939 = vmatpush3.bf16.msra.mxu0 %v14462_v4 }
 0x276   : > { %v16441_v26 = vsel %vm2289_vm8, %v18570_v43, %v18569_v58  ;;  %v10586_v60 = vld [vmem:[#allocation5 + $0x72] sm:$0xff]  ;;  %10818 = vperm.xlu0 %14341, %v16429_v38   ;;  %v10574_v52 = vadd.f32 %v10562_v22, %v10550_v33  ;;  %v10621_v50 = vadd.f32 %v10609_v27, %v10597_v63  ;;  %v18571_v58 = vrot.slane %v15898_v32, 2  ;;  %12940 = vmatprep.subr.bf16.mxu0 %v14463_v35 }
 0x277   : > { %v10624_v2 = vld [vmem:[#allocation5 + $0x75] sm:$0xff]  ;;  %v8250_v43 = vrot.slane %v15922_v24, 2  ;;  %v18572_v33 = vrot.slane %v15910_v56, 2  ;;  %v16465_v32 = vsel %vm2289_vm8, %v8244_v25, %v8246_v36  ;;  %v16468_v27 = vsel %vm2289_vm8, %v8240_v55, %v8242_v16 }
 0x278   : > { %v10638_v14 = vld [vmem:[#allocation5 + $0x6e] sm:$0xff]  ;;  %v16451_v46 = vsel %vm2289_vm8, %v18571_v58, %v8240_v55  ;;  %v10639_v5 = vld [vmem:[#allocation5 + $0x76] sm:$0xff]  ;;  %v10598_v63 = vadd.f32 %v10586_v60, %v10574_v52  ;;  %v10636_v24 = vadd.f32 %v10624_v2, %v10621_v50  ;;  %v16471_v22 = vsel %vm2289_vm8, %v8246_v36, %v8248_v15  ;;  %12929 = vmatmul.mubr.msk.bf16.gmra.mrb[48].mxu0 %vm1735_vm9, %v16359_v1 }
 0x279   : > { %v10650_v7 = vadd.f32 %v10638_v14, %v10635_v40  ;;  %v10610_v54 = vld [vmem:[#allocation5 + $0x73] sm:$0xff]  ;;  %v16462_v4 = vsel %vm2289_vm8, %v18572_v33, %v8236_v20  ;;  %v10625_v20 = vld [vmem:[#allocation5 + $0x7d] sm:$0xff]  ;;  %v16478_v14 = vsel %vm2289_vm8, %v8242_v16, %v8244_v25  ;;  %v18574_v60 = vrot.slane %v15946_v41, 2  ;;  %12932 = vmatprep.mubr.msk.bf16.mxu0 %vm1735_vm9, %v16373_v57  ;;  %12941 = vmatpush3.bf16.msra.mxu0 %v14463_v35 }
 0x27a   : > { %v16457_v62 = vld [vmem:[%s18366_s2 + $0xd8] sm:$0xff]   ;;  %v10653_v3 = vld [vmem:[#allocation5 + $0x6f] sm:$0xff]  ;;  %18573 = vst [vmem:[#allocation74_spill] sm:$0xff] %v16478_v14  ;;  %v16486_v55 = vsel %vm2289_vm8, %v8248_v15, %v8250_v43  ;;  %v10651_v36 = vadd.f32 %v10639_v5, %v10636_v24  ;;  %v10622_v1 = vadd.f32 %v10610_v54, %v10598_v63  ;;  %v16491_v52 = vsel %vm2289_vm8, %v8250_v43, %v8252_v51 }
 0x27b   : > { %v16475_v40 = vadd.f32 %v10653_v3, %v10650_v7  ;;  %v10654_v56 = vld [vmem:[#allocation5 + $0x77] sm:$0xff]  ;;  %v16483_v2 = vsel %vm2289_vm8, %v8252_v51, %v18574_v60  ;;  %18576 = vst [vmem:[#allocation76_spill] sm:$0xff] %v16486_v55  ;;  %18577 = vst [vmem:[#allocation77_spill] sm:$0xff] %v16491_v52  ;;  %v18578_v50 = vshrl.u32 %v16024_v39, 16  ;;  %v18579_v58 = vshll.u32 %v16024_v39, 16  ;;  %12954 = vmatprep.subr.bf16.mxu0 %v16457_v62  ;;  %v10655_v51 = vld [vmem:[#allocation5 + $0x7f] sm:$0xff] }
 0x27c   : > { %18575 = vst [vmem:[#allocation75_spill] sm:$0xff] %v16483_v2  ;;  %v10640_v16 = vld [vmem:[#allocation5 + $0x7e] sm:$0xff]  ;;  %v10666_v57 = vadd.f32 %v10654_v56, %v10651_v36  ;;  %v2853_v35 = vrot.slane %v16217_v42, 3  ;;  %v10637_v5 = vadd.f32 %v10625_v20, %v10622_v1  ;;  %v18580_v43 = vld [vmem:[#allocation64_spill] sm:$0xff]  ;;  %v18581_v39 = vrot.slane %v16050_v13, 3 }
 0x27d   : > { %10829 = vperm.xlu1 %14342, %v16475_v40   ;;  %v16496_v25 = vcombine.high %v16475_v40, %v16475_v40  ;;  %v2999_v15 = vrot.slane %v18578_v50, 3  ;;  %v3002_v7 = vrot.slane %v18579_v58, 4  ;;  %v3006_v54 = vor.u32 %v16325_v31, %v18580_v43  ;;  %v18586_v58 = vld [vmem:[#allocation12_spill] sm:$0xff] }
 0x27e   : > { %v16507_v33 = vcombine.high %v10666_v57, %v10666_v57  ;;  %v10652_v63 = vadd.f32 %v10640_v16, %v10637_v5  ;;  %v2854_v24 = vsel %vm2841_vm2, %v18581_v39, %v2853_v35  ;;  %v18582_v42 = vshrl.u32 %v15989_v19, 16  ;;  %v2984_v57 = vld [vmem:[#allocation2 + $0x34] sm:$0xf]  ;;  %v18587_v35 = vld [vmem:[#allocation13_spill] sm:$0xff]  ;;  %v14465_v39 = vld [vmem:[%s18366_s2 + $0xe0] sm:$0xff]  }
 0x27f   : > { %10840 = vperm.xlu0 %14341, %v16496_v25   ;;  %v3003_v3 = vor.u32 %v3002_v7, %v2999_v15  ;;  %v18583_v60 = vshll.u32 %v15989_v19, 16  ;;  %v18584_v1 = vshrl.u32 %v15995_v34, 16  ;;  %v18585_v50 = vshll.u32 %v15995_v34, 16  ;;  %v18588_v5 = vld [vmem:[#allocation25_spill] sm:$0xff] }
 0x280   : > { %v16513_v56 = vadd.f32 %v10655_v51, %v10652_v63  ;;  %v3008_v20 = vrot.slane %v18582_v42, 3  ;;  %12933 = vmatmul.mubr.msk.bf16.gmra.mrb[52].mxu0 %vm1735_vm9, %v2854_v24  ;;  %v18589_v34 = vshrl.u32 %v16047_v29, 16  ;;  %v18590_v63 = vshll.u32 %v16047_v29, 16 }
 0x281   : > { %10851 = vperm.xlu1 %14342, %v16507_v33   ;;  %v3009_v36 = vrot.slane %v18583_v60, 4  ;;  %v3007_v31 = vsel %vm2995_vm4, %v3003_v3, %v3006_v54  ;;  %v3012_v16 = vrot.slane %v18584_v1, 3  ;;  %v3013_v15 = vrot.slane %v18585_v50, 4  ;;  %v14467_v50 = vld [vmem:[%s18366_s2 + $0xe8] sm:$0xff]  }
 0x282   : > { %12942 = vmatprep.mubr.msk.bf16.mxu0 %vm1735_vm9, %v3007_v31  ;;  %v3016_v43 = vrot.slane %v18589_v34, 3  ;;  %v3017_v3 = vrot.slane %v18590_v63, 4  ;;  %v11555_v24 = vcombine.low %v2984_v57, %v2984_v57  ;;  %v18593_v31 = vld [vmem:[#allocation27_spill] sm:$0xff]  ;;  %v18595_v34 = vld [vmem:[#allocation28_spill] sm:$0xff]  ;;  %v14469_v63 = vld [vmem:[%s18366_s2 + $0xf8] sm:$0xff]   ;;  %vm6360_vm0 = vcmask 785408  }
 0x283   : > { %10862 = vperm.xlu0 %14341, %v16513_v56   ;;  %v3010_v7 = vor.u32 %v3009_v36, %v3008_v20  ;;  %v3014_v19 = vor.u32 %v3013_v15, %v3012_v16  ;;  %v18591_v20 = vshrl.u32 %v16050_v13, 16 }
 0x284   : > { %v3018_v29 = vor.u32 %v3017_v3, %v3016_v43  ;;  %v3025_v1 = vshrl.u32 %v11555_v24, 16  ;;  %v3028_v16 = vshll.u32 %v11555_v24, 16  ;;  %v18597_v3 = vld [vmem:[#allocation30_spill] sm:$0xff] }
 0x285   : > { %1315 = vrot.lane.b32.xlu1 %v18586_v58, %s14858_s16  ;;  %v3011_v51 = vsel %vm2995_vm4, %v3006_v54, %v3010_v7  ;;  %v3015_v42 = vsel %vm2995_vm4, %v3010_v7, %v3014_v19  ;;  %v3020_v60 = vrot.slane %v18591_v20, 3  ;;  %v18592_v54 = vshll.u32 %v16050_v13, 16  ;;  %v18601_v20 = vld [vmem:[#allocation32_spill] sm:$0xff] }
 0x286   : > { %v3019_v13 = vsel %vm2995_vm4, %v3014_v19, %v3018_v29  ;;  %v3027_v58 = vrot.slane %v3025_v1, 3  ;;  %v3030_v7 = vrot.slane %v3028_v16, 4  ;;  %v18594_v19 = vld [vmem:[#allocation29_spill] sm:$0xff]  ;;  %v18603_v1 = vld [vmem:[#allocation34_spill] sm:$0xff]  ;;  %v18604_v16 = vld [vmem:[#allocation15_spill] sm:$0xff] }
 0x287   : > { %1317 = vrot.lane.b32.xlu0 %v18587_v35, %s14858_s16  ;;  %v3021_v36 = vrot.slane %v18592_v54, 4  ;;  %v14468_v35 = vld [vmem:[%s18366_s2 + $0xf0] sm:$0xff]   ;;  %v18596_v43 = vcombine.low %v18594_v19, %v18595_v34  ;;  %v14470_v54 = vld [vmem:[%s18366_s2 + $0x100] sm:$0xff]   ;;  %v18611_v34 = vld [vmem:[#allocation51_spill] sm:$0xff] }
 0x288   : > { %12943 = vmatmul.mubr.msk.bf16.vlgmr.msra.gmra.mrb[44].mxu0 %vm1735_vm9, %v3011_v51  ;;  %v14471_v19 = vld [vmem:[#allocation2 + $0xc] sm:$0xff]  }
 0x289   : > { %1383 = vrot.lane.b32.xlu1 %v18588_v5, %s14858_s16  ;;  %12946 = vmatprep.mubr.msk.bf16.mxu0 %vm1735_vm9, %v3015_v42  ;;  %v3022_v15 = vor.u32 %v3021_v36, %v3020_v60  ;;  %v3031_v5 = vor.u32 %v3030_v7, %v3027_v58  ;;  %v18600_v42 = vld [vmem:[#allocation33_spill] sm:$0xff]  ;;  %v16581_v36 = vld [vmem:[#allocation2 + $0x40] sm:$0xff]  }
 0x28a   : > { %12955 = vmatpush3.bf16.msra.mxu0 %v16457_v62  ;;  %v18602_v60 = vcombine.low %v18600_v42, %v18601_v20  ;;  %v18608_v7 = vld [vmem:[#allocation17_spill] sm:$0xff] }
 0x28b   : > { %1385 = vrot.lane.b32.xlu0 %v18593_v31, %s14858_s16  ;;  %12956 = vmatprep.subr.bf16.mxu0 %v14465_v39  ;;  %v3023_v62 = vsel %vm2995_vm4, %v3018_v29, %v3022_v15  ;;  %v3032_v51 = vsel %vm2995_vm4, %v3022_v15, %v3031_v5  ;;  %v14473_v31 = vld [vmem:[%s18366_s2 + $0x108] sm:$0xff]   ;;  %v18437_v29 = vrot.slane %v16581_v36, 2  ;;  %v18606_v15 = vld [vmem:[#allocation46_spill] sm:$0xff]  ;;  %v14762_v5 = vld [vmem:[#allocation2 + $0x30] sm:$0xf]  ;;  %s404_s16 = sand.u32 1, %s14844_s22  }
 0x28c   : > { %v14479_v20 = vld [vmem:[%s18366_s2 + $0x118] sm:$0xff]   ;;  %s14288_s29 = smul.u32 192, %s404_s16  ;;  %s18323_s25 = scalar_lea.sflag [#allocation7], %s404_s16 }
 0x28e   : > { %12957 = vmatpush3.bf16.msra.mxu0 %v14465_v39  ;;  %v18598_v39 = vld [vmem:[#allocation31_spill] sm:$0xff]  ;;  %s18278_s15 = scalar_lea.vmem [#allocation6], %s14288_s29 }
 0x28f   : > { %12958 = vmatprep.subr.bf16.mxu0 %v14467_v50  ;;  %v18599_v24 = vcombine.low %v18597_v3, %v18598_v39  ;;  %v14476_v3 = vld [vmem:[%s18366_s2 + $0x110] sm:$0xff]   ;;  %v14474_v39 = vld [vmem:[#allocation2 + $0x1c] sm:$0xff]   ;;  %s11248_s19 = sshll.u32 %s18278_s15, 4  ;;  %s18308_s19 = int_to_ptr.vmem [resolvable:$true] %s11248_s19 }
 0x290   : > { %12947 = vmatmul.mubr.msk.bf16.gmra.mrb[48].mxu0 %vm1735_vm9, %v3019_v13  ;;  %v18607_v13 = vrot.slane %v18606_v15, 2  ;;  %s14790_s28 = scalar_lea.vmem %s18308_s19, 3072  ;;  %p14797_p0 = scmp.lt.s32.totalorder %s18308_s19, %s14795_s27 }
 0x291   : > { %12950 = vmatprep.mubr.msk.bf16.mxu0 %vm1735_vm9, %v3023_v62  ;;  %p14791_p11 = scmp.ne.s32.totalorder %s18308_s19, %s14790_s28  ;;  %p14798_p1 = scmp.lt.s32.totalorder %s14796_s30, %s14790_s28 }
 0x292   : > { %12959 = vmatpush3.bf16.msra.mxu0 %v14467_v50  ;;  %v18605_v50 = vcombine.low %v18603_v1, %v18604_v16  ;;  %v16596_v58 = vsel %vm2289_vm8, %v18607_v13, %v18437_v29  ;;  %v14475_v1 = vld [vmem:[#allocation2 + $0x24] sm:$0xff]  }
 0x293   : > { %12972 = vmatprep.subr.bf16.mxu0 %v14468_v35  ;;  %v14483_v16 = vld [vmem:[%s18366_s2 + $0x120] sm:$0xff]   ;;  %p14792_p12 = pnand %p14791_p11, %p14967_p5  ;;  %p14799_p2 = por %p14798_p1, %p14797_p0 }
 0x295   : > { %p14793_p13 = pneg %p14792_p12 }
 0x297   : > { %p14800_p3 = pnand %p14799_p2, %p14793_p13 }
 0x298   : > { %12951 = vmatmul.mubr.msk.bf16.gmra.mrb[52].mxu0 %vm1735_vm9, %v3032_v51  ;;  %v11576_v51 = vcombine.low %v14762_v5, %v2984_v57  ;;  %v3482_v57 = vld [vmem:[#allocation2 + $0xc] sm:$0xf] }
 0x299   : > { %12960 = vmatprep.mubr.msk.bf16.mxu0 %vm1735_vm9, %v18596_v43  ;;  %v8256_v43 = vrot.slane %v18611_v34, 2 }
 0x2a0   : > { %12961 = vmatmul.mubr.msk.bf16.vlgmr.msra.gmra.mrb[44].mxu0 %vm1735_vm9, %v18599_v24  ;;  %v18612_v24 = vrot.slane %v15946_v41, 2 }
 0x2a1   : > { %12964 = vmatprep.mubr.msk.bf16.mxu0 %vm1735_vm9, %v18602_v60  ;;  %12973 = vmatpush3.bf16.msra.mxu0 %v14468_v35  ;;  %v18609_v35 = vld [vmem:[#allocation16_spill] sm:$0xff] }
 0x2a2   : > { %12974 = vmatprep.subr.bf16.mxu0 %v14469_v63  ;;  %v18610_v62 = vcombine.low %v18608_v7, %v18609_v35  ;;  %v16612_v42 = vsel %vm2289_vm8, %v18612_v24, %v8256_v43  ;;  %v16618_v60 = vld [vmem:[#allocation2 + $0x10] sm:$0xf]  ;;  %v16636_v43 = vld [vmem:[#allocation2 + $0x24] sm:$0xff]   ;;  %v10703_v24 = vlaneseq }
 0x2a3   : > { %18613 = vst [vmem:[#allocation64_spill] sm:$0xff] %v16612_v42 }
 0x2a5   : > { %12975 = vmatpush3.bf16.msra.mxu0 %v14469_v63  ;;  %v14472_v63 = vld [vmem:[#allocation2 + $0x14] sm:$0xff]  }
 0x2a6   : > { %12976 = vmatprep.subr.bf16.mxu0 %v14470_v54 }
 0x2a8   : > { %12965 = vmatmul.mubr.msk.bf16.gmra.mrb[48].mxu0 %vm1735_vm9, %v18605_v50  ;;  %v14477_v50 = vld [vmem:[#allocation2 + $0x2c] sm:$0xff]  }
 0x2a9   : > { %12968 = vmatprep.mubr.msk.bf16.mxu0 %vm1735_vm9, %v18610_v62  ;;  %12977 = vmatpush3.bf16.msra.mxu0 %v14470_v54  ;;  %v11613_v54 = vcombine.low %v3482_v57, %v16618_v60  ;;  %v14478_v62 = vld [vmem:[#allocation2 + $0x34] sm:$0xff]  }
 0x2aa   : > { %12990 = vmatprep.subr.bf16.mxu0 %v14473_v31 }
 0x2ab   : > { %v3538_v41 = vshll.u32 %v11613_v54, 16  ;;  %v3536_v7 = vshrl.u32 %v11613_v54, 16 }
 0x2ad   : > { %v3540_v13 = vrot.slane %v3538_v41, 1 }
 0x2af   : > { %v3541_v5 = vor.u32 %v3540_v13, %v3536_v7  ;;  %v10704_v13 = vshrl.u32 %v10703_v24, 7 }
 0x2b0   : > { %12969 = vmatmul.mubr.msk.bf16.gmra.mrb[52].mxu0 %vm1735_vm9, %v11576_v51  ;;  %v16631_v51 = vld [vmem:[#allocation2 + $0x1c] sm:$0xff]  }
 0x2b1   : > { %12978 = vmatprep.mubr.msk.bf16.mxu0 %vm1735_vm9, %v14471_v19  ;;  %v18439_v19 = vshll.u32 %v16631_v51, 16  ;;  %v18441_v54 = vshrl.u32 %v16631_v51, 16 }
 0x2b3   : > { %v3553_v57 = vrot.slane %v18439_v19, 1 }
 0x2b5   : > { %v3557_v7 = vor.u32 %v18441_v54, %v3553_v57  ;;  %v14491_v54 = vld [vmem:[%s18366_s2 + $0x138] sm:$0xff]  }
 0x2b8   : > { %12979 = vmatmul.mubr.msk.bf16.vlgmr.msra.gmra.mrb[44].mxu0 %vm1735_vm9, %v14472_v63  ;;  %v18438_v63 = vshll.u32 %v16636_v43, 16 }
 0x2b9   : > { %12982 = vmatprep.mubr.msk.bf16.mxu0 %vm1735_vm9, %v14474_v39  ;;  %12991 = vmatpush3.bf16.msra.mxu0 %v14473_v31  ;;  %v16625_v31 = vld [vmem:[#allocation2 + $0x14] sm:$0xff]  }
 0x2ba   : > { %12992 = vmatprep.subr.bf16.mxu0 %v14476_v3  ;;  %v18442_v15 = vshll.u32 %v16625_v31, 16  ;;  %v18617_v55 = vshll.u32 %v16625_v31, 16 }
 0x2bc   : > { %v3545_v35 = vrot.slane %v18442_v15, 1  ;;  %v3889_v2 = vrot.slane %v18617_v55, 2 }
 0x2bd   : > { %12993 = vmatpush3.bf16.msra.mxu0 %v14476_v3  ;;  %v14860_v3 = vmov 839922192  }
 0x2be   : > { %12994 = vmatprep.subr.bf16.mxu0 %v14479_v20  ;;  %v3546_v34 = vsel %vm1664_vm6, %v3541_v5, %v3545_v35  ;;  %v10701_v39 = vunpack.c.l.s4 %v14860_v3 }
 0x2c0   : > { %12983 = vmatmul.mubr.msk.bf16.gmra.mrb[48].mxu0 %vm1735_vm9, %v14475_v1  ;;  %v3561_v1 = vrot.slane %v18438_v63, 1 }
 0x2c1   : > { %12986 = vmatprep.mubr.msk.bf16.mxu0 %vm1735_vm9, %v14477_v50  ;;  %12995 = vmatpush3.bf16.msra.mxu0 %v14479_v20  ;;  %v18447_v20 = vshrl.u32 %v16625_v31, 16  ;;  %v10702_v50 = vunpack.c.0.s8 %v10701_v39 }
 0x2c2   : > { %13008 = vmatprep.subr.bf16.mxu0 %v14483_v16  ;;  %v3562_v29 = vsel %vm1664_vm6, %v3557_v7, %v3561_v1  ;;  %v16671_v7 = vld [vmem:[#allocation2 + $0x3c] ss:$0 sps:$4 sm:$0x11]  }
 0x2c3   : > { %v3549_v41 = vor.u32 %v18447_v20, %v3545_v35  ;;  %v16659_v35 = vld [vmem:[#allocation2 + $0x34] sm:$0xff]   ;;  %v16663_v24 = vsub.s32 %v10702_v50, %v10704_v13  ;;  %v3738_v55 = vrot.slane %v16671_v7, 1 }
 0x2c4   : > { %v18443_v39 = vshll.u32 %v16659_v35, 16 }
 0x2c5   : > { %v3554_v3 = vsel %vm1664_vm6, %v3549_v41, %v3553_v57  ;;  %v14489_v57 = vld [vmem:[%s18366_s2 + $0x130] sm:$0xff]   ;;  %v18445_v41 = vshrl.u32 %v16636_v43, 16 }
 0x2c7   : > { %v3565_v50 = vor.u32 %v18445_v41, %v3561_v1 }
 0x2c8   : > { %12987 = vmatmul.mubr.msk.bf16.gmra.mrb[52].mxu0 %vm1735_vm9, %v14478_v62  ;;  %v16650_v62 = vld [vmem:[#allocation2 + $0x2c] sm:$0xff]  }
 0x2c9   : > { %12996 = vmatprep.mubr.msk.bf16.mxu0 %vm1735_vm9, %v3546_v34  ;;  %v18440_v5 = vshll.u32 %v16650_v62, 16  ;;  %v14486_v34 = vld [vmem:[%s18366_s2 + $0x128] sm:$0xff]   ;;  %v18444_v19 = vshrl.u32 %v16650_v62, 16 }
 0x2cb   : > { %v3569_v63 = vrot.slane %v18440_v5, 1 }
 0x2cd   : > { %v3573_v5 = vor.u32 %v18444_v19, %v3569_v63  ;;  %v3716_v19 = vld [vmem:[#allocation2 + $0xc] sm:$0xe] }
 0x2ce   : > { %v16692_v41 = vcombine.low %v3716_v19, %v16618_v60 }
 0x2d0   : > { %12997 = vmatmul.mubr.msk.bf16.vlgmr.msra.gmra.mrb[44].mxu0 %vm1735_vm9, %v3554_v3 }
 0x2d1   : > { %13000 = vmatprep.mubr.msk.bf16.mxu0 %vm1735_vm9, %v3562_v29  ;;  %13009 = vmatpush3.bf16.msra.mxu0 %v14483_v16  ;;  %v3577_v29 = vrot.slane %v18443_v39, 1  ;;  %v3570_v39 = vsel %vm1664_vm6, %v3565_v50, %v3569_v63 }
 0x2d2   : > { %13010 = vmatprep.subr.bf16.mxu0 %v14486_v34 }
 0x2d3   : > { %v10698_v3 = vpop.permute.xlu0 %10697  ;;  %v3578_v1 = vsel %vm1664_vm6, %v3573_v5, %v3577_v29  ;;  %v3728_v5 = vrot.slane %v16625_v31, 1 }
 0x2d4   : > { %v10706_v16 = vrot.slane %v10698_v3, %v16663_v24  ;;  %v3583_v3 = vshll.u32 %v16671_v7, 16 }
 0x2d5   : > { %13011 = vmatpush3.bf16.msra.mxu0 %v14486_v34  ;;  %v10709_v13 = vpop.permute.xlu1 %10708  ;;  %v18446_v34 = vshrl.u32 %v16659_v35, 16 }
 0x2d6   : > { %13012 = vmatprep.subr.bf16.mxu0 %v14489_v57  ;;  %14730 = vrcp.f32 %v10706_v16  ;;  %v10717_v15 = vrot.slane %v10709_v13, %v16663_v24  ;;  %v3585_v50 = vrot.slane %v3583_v3, 1 }
 0x2d7   : > { %v3581_v63 = vor.u32 %v18446_v34, %v3577_v29 }
 0x2d8   : > { %13001 = vmatmul.mubr.msk.bf16.gmra.mrb[48].mxu0 %vm1735_vm9, %v3570_v39  ;;  %14732 = vrcp.f32 %v10717_v15 }
 0x2d9   : > { %13004 = vmatprep.mubr.msk.bf16.mxu0 %vm1735_vm9, %v3578_v1  ;;  %13013 = vmatpush3.bf16.msra.mxu0 %v14489_v57  ;;  %v3727_v57 = vrot.slane %v16692_v41, 1  ;;  %v3586_v1 = vsel %vm1664_vm6, %v3581_v63, %v3585_v50  ;;  %v3730_v63 = vrot.slane %v16631_v51, 1  ;;  %v18615_v50 = vld [vmem:[#allocation68_spill] sm:$0xff] }
 0x2da   : > { %13026 = vmatprep.subr.bf16.mxu0 %v14491_v54  ;;  %v10720_v16 = vpop.permute.xlu1 %10719 }
 0x2db   : > { %v10728_v39 = vrot.slane %v10720_v16, %v16663_v24  ;;  %v3729_v19 = vsel %vm1957_vm7, %v3727_v57, %v3728_v5  ;;  %v18614_v16 = vld [vmem:[#allocation65_spill] sm:$0xff] }
 0x2dc   : > { %v10731_v15 = vpop.permute.xlu0 %10730 }
 0x2dd   : > { %14734 = vrcp.f32 %v10728_v39  ;;  %v10739_v13 = vrot.slane %v10731_v15, %v16663_v24 }
 0x2df   : > { %14736 = vrcp.f32 %v10739_v13 }
 0x2e0   : > { %v10742_v60 = vpop.permute.xlu1 %10741  ;;  %13005 = vmatmul.mubr.msk.bf16.gmra.mrb[52].mxu0 %vm1735_vm9, %v3586_v1  ;;  %v14731_v29 = vpop.eup %14730  ;;  %v3732_v1 = vrot.slane %v16636_v43, 1 }
 0x2e1   : > { %v10750_v3 = vrot.slane %v10742_v60, %v16663_v24  ;;  %13014 = vmatprep.mubr.msk.bf16.mxu0 %vm1735_vm9, %v3729_v19  ;;  %v10873_v34 = vmul.f32 %v14731_v29, %v18614_v16  ;;  %v14492_v60 = vld [vmem:[%s18366_s2 + $0x140] sm:$0xff]   ;;  %v3731_v29 = vsel %vm1957_vm7, %v3728_v5, %v3730_v63  ;;  %v3734_v5 = vrot.slane %v16650_v62, 1 }
 0x2e2   : > { %v10753_v39 = vpop.permute.xlu0 %10752  ;;  %v14733_v20 = vpop.eup %14732 }
 0x2e3   : > { %14738 = vrcp.f32 %v10750_v3  ;;  %v10761_v15 = vrot.slane %v10753_v39, %v16663_v24  ;;  %v10875_v13 = vmul.f32 %v14733_v20, %v18615_v50  ;;  %v10904_v57 = vmax.f32 %v10873_v34, 0.0 }
 0x2e4   : > { %v3733_v20 = vsel %vm1957_vm7, %v3730_v63, %v3732_v1 }
 0x2e5   : > { %14740 = vrcp.f32 %v10761_v15  ;;  %v10905_v52 = vmax.f32 %v10875_v13, 0.0 }
 0x2e6   : > { %v10764_v42 = vpop.permute.xlu1 %10763 }
 0x2e7   : > { %v10772_v19 = vrot.slane %v10764_v42, %v16663_v24  ;;  %v14735_v3 = vpop.eup %14734  ;;  %v10936_v16 = vcombine.low %v10904_v57, %v10905_v52  ;;  %v14493_v42 = vld [vmem:[%s18366_s2 + $0x148] sm:$0xff]  }
 0x2e8   : > { %13015 = vmatmul.mubr.msk.bf16.vlgmr.msra.gmra.mrb[44].mxu0 %vm1735_vm9, %v3731_v29  ;;  %v10877_v39 = vmul.f32 %v14735_v3, %v16269_v18  ;;  %v3736_v18 = vrot.slane %v16659_v35, 1  ;;  %v3881_v3 = vshrl.u32 %v16692_v41, 16 }
 0x2e9   : > { %14742 = vrcp.f32 %v10772_v19  ;;  %v10775_v34 = vpop.permute.xlu0 %10774  ;;  %13018 = vmatprep.mubr.msk.bf16.mxu0 %vm1735_vm9, %v3733_v20  ;;  %13027 = vmatpush3.bf16.msra.mxu0 %v14491_v54  ;;  %v14737_v15 = vpop.eup %14736  ;;  %v3884_v20 = vshll.u32 %v16692_v41, 16  ;;  %v18616_v41 = vshrl.u32 %v16625_v31, 16 }
 0x2ea   : > { %v10783_v50 = vrot.slane %v10775_v34, %v16663_v24  ;;  %13028 = vmatprep.subr.bf16.mxu0 %v14492_v60  ;;  %v10879_v52 = vmul.f32 %v14737_v15, %v16281_v6  ;;  %v10906_v57 = vmax.f32 %v10877_v39, 0.0  ;;  %v16732_v6 = vld [vmem:[%s18366_s2 + $0x150] sm:$0xff]  }
 0x2ec   : > { %14744 = vrcp.f32 %v10783_v50  ;;  %v10907_v19 = vmax.f32 %v10879_v52, 0.0  ;;  %v3737_v52 = vsel %vm1957_vm7, %v3734_v5, %v3736_v18 }
 0x2ed   : > { %v10786_v63 = vpop.permute.xlu1 %10785  ;;  %v14739_v13 = vpop.eup %14738  ;;  %13029 = vmatpush3.bf16.msra.mxu0 %v14492_v60  ;;  %v3735_v60 = vsel %vm1957_vm7, %v3732_v1, %v3734_v5  ;;  %v3883_v1 = vrot.slane %v3881_v3, 1  ;;  %v18618_v3 = vshrl.u32 %v16631_v51, 16 }
 0x2ee   : > { %v10794_v54 = vrot.slane %v10786_v63, %v16663_v24  ;;  %13030 = vmatprep.subr.bf16.mxu0 %v14493_v42  ;;  %v10881_v34 = vmul.f32 %v14739_v13, %v16294_v10  ;;  %v10937_v50 = vcombine.low %v10906_v57, %v10907_v19  ;;  %v3888_v63 = vrot.slane %v18616_v41, 1 }
 0x2ef   : > { %v10797_v29 = vpop.permute.xlu0 %10796  ;;  %v14741_v15 = vpop.eup %14740  ;;  %v3886_v57 = vrot.slane %v3884_v20, 2  ;;  %v3892_v20 = vrot.slane %v18618_v3, 1  ;;  %v18621_v41 = vshll.u32 %v16636_v43, 16 }
 0x2f0   : > { %14746 = vrcp.f32 %v10794_v54  ;;  %v10805_v39 = vrot.slane %v10797_v29, %v16663_v24  ;;  %13019 = vmatmul.mubr.msk.bf16.gmra.mrb[48].mxu0 %vm1735_vm9, %v3735_v60  ;;  %v10883_v14 = vmul.f32 %v14741_v15, %v16317_v53  ;;  %v16744_v10 = vpack.c.bf16 %v10937_v50, %v10936_v16 }
 0x2f1   : > { %13022 = vmatprep.mubr.msk.bf16.mxu0 %vm1735_vm9, %v3737_v52  ;;  %13031 = vmatpush3.bf16.msra.mxu0 %v14493_v42  ;;  %v10908_v5 = vmax.f32 %v10881_v34, 0.0  ;;  %v3890_v53 = vor.u32 %v3889_v2, %v3888_v63  ;;  %v18619_v34 = vshll.u32 %v16631_v51, 16  ;;  %v18620_v52 = vshrl.u32 %v16636_v43, 16 }
 0x2f2   : > { %14748 = vrcp.f32 %v10805_v39  ;;  %13044 = vmatprep.subr.bf16.mxu0 %v16732_v6  ;;  %v10909_v19 = vmax.f32 %v10883_v14, 0.0  ;;  %v3887_v39 = vor.u32 %v3886_v57, %v3883_v1  ;;  %v3739_v14 = vsel %vm1957_vm7, %v3736_v18, %v3738_v55 }
 0x2f3   : > { %v10808_v13 = vpop.permute.xlu1 %10807  ;;  %v14743_v54 = vpop.eup %14742  ;;  %v3893_v60 = vrot.slane %v18619_v34, 2  ;;  %v3897_v63 = vrot.slane %v18621_v41, 2 }
 0x2f4   : > { %v10816_v29 = vrot.slane %v10808_v13, %v16663_v24  ;;  %v10938_v16 = vcombine.low %v10908_v5, %v10909_v19  ;;  %v10885_v42 = vmul.f32 %v14743_v54, %v16340_v45  ;;  %v3891_v2 = vsel %vm2111_vm10, %v3887_v39, %v3890_v53 }
 0x2f5   : > { %v10819_v31 = vpop.permute.xlu0 %10818  ;;  %v3896_v45 = vrot.slane %v18620_v52, 1  ;;  %v3894_v54 = vor.u32 %v3893_v60, %v3892_v20  ;;  %v16782_v52 = vld [vmem:[#allocation2 + $0x3c] ss:$0 sps:$4 sm:$0x33]  }
 0x2f6   : > { %14750 = vrcp.f32 %v10816_v29  ;;  %v10827_v15 = vrot.slane %v10819_v31, %v16663_v24  ;;  %v14745_v50 = vpop.eup %14744  ;;  %v10910_v18 = vmax.f32 %v10885_v42, 0.0  ;;  %v18622_v42 = vshrl.u32 %v16650_v62, 16 }
 0x2f7   : > { %v10887_v7 = vmul.f32 %v14745_v50, %v16366_v17  ;;  %v3898_v31 = vor.u32 %v3897_v63, %v3896_v45  ;;  %v3895_v60 = vsel %vm2111_vm10, %v3890_v53, %v3894_v54  ;;  %v18625_v63 = vshll.u32 %v16659_v35, 16 }
 0x2f8   : > { %14752 = vrcp.f32 %v10827_v15  ;;  %13023 = vmatmul.mubr.msk.bf16.gmra.mrb[52].mxu0 %vm1735_vm9, %v3739_v14  ;;  %v3900_v3 = vrot.slane %v18622_v42, 1 }
 0x2f9   : > { %13032 = vmatprep.mubr.msk.bf16.mxu0 %vm1735_vm9, %v3891_v2  ;;  %v10911_v57 = vmax.f32 %v10887_v7, 0.0  ;;  %v18624_v7 = vshrl.u32 %v16659_v35, 16  ;;  %v3899_v41 = vsel %vm2111_vm10, %v3894_v54, %v3898_v31 }
 0x2fa   : > { %v14747_v13 = vpop.eup %14746 }
 0x2fb   : > { %v10889_v17 = vmul.f32 %v14747_v13, %v16384_v0  ;;  %v10939_v29 = vcombine.low %v10910_v18, %v10911_v57  ;;  %v14495_v0 = vld [vmem:[%s18366_s2 + $0x158] sm:$0xff]   ;;  %v3904_v2 = vrot.slane %v18624_v7, 1  ;;  %v3905_v13 = vrot.slane %v18625_v63, 2 }
 0x2fc   : > { %v10830_v1 = vpop.permute.xlu1 %10829  ;;  %v14749_v5 = vpop.eup %14748 }
 0x2fd   : > { %v10838_v51 = vrot.slane %v10830_v1, %v16663_v24  ;;  %v10891_v43 = vmul.f32 %v14749_v5, %v16396_v21  ;;  %v16769_v15 = vpack.c.bf16 %v10939_v29, %v10938_v16  ;;  %v10912_v39 = vmax.f32 %v10889_v17, 0.0 }
 0x2fe   : > { %v10841_v19 = vpop.permute.xlu0 %10840  ;;  %v18623_v21 = vshll.u32 %v16650_v62, 16  ;;  %v3912_v5 = vshll.u32 %v16782_v52, 16 }
 0x2ff   : > { %14754 = vrcp.f32 %v10838_v51  ;;  %v10849_v55 = vrot.slane %v10841_v19, %v16663_v24  ;;  %v10913_v20 = vmax.f32 %v10891_v43, 0.0  ;;  %v14497_v51 = vld [vmem:[%s18366_s2 + $0x160] sm:$0xff]  }
 0x300   : > { %v10852_v50 = vpop.permute.xlu1 %10851  ;;  %v14751_v14 = vpop.eup %14750  ;;  %v3901_v16 = vrot.slane %v18623_v21, 2  ;;  %13033 = vmatmul.mubr.msk.bf16.vlgmr.msra.gmra.mrb[44].mxu0 %vm1735_vm9, %v3895_v60  ;;  %v3914_v42 = vrot.slane %v3912_v5, 2 }
 0x301   : > { %14756 = vrcp.f32 %v10849_v55  ;;  %v10860_v34 = vrot.slane %v10852_v50, %v16663_v24  ;;  %v10893_v1 = vmul.f32 %v14751_v14, %v16420_v47  ;;  %v10940_v18 = vcombine.low %v10912_v39, %v10913_v20  ;;  %13036 = vmatprep.mubr.msk.bf16.mxu0 %vm1735_vm9, %v3899_v41  ;;  %13045 = vmatpush3.bf16.msra.mxu0 %v16732_v6  ;;  %v14498_v55 = vld [vmem:[%s18366_s2 + $0x168] sm:$0xff]  }
 0x302   : > { %v10863_v45 = vpop.permute.xlu0 %10862  ;;  %v14753_v53 = vpop.eup %14752  ;;  %13046 = vmatprep.subr.bf16.mxu0 %v14495_v0  ;;  %v3902_v17 = vor.u32 %v3901_v16, %v3900_v3  ;;  %v3909_v47 = vshrl.u32 %v16782_v52, 16 }
 0x303   : > { %14758 = vrcp.f32 %v10860_v34  ;;  %v10871_v62 = vrot.slane %v10863_v45, %v16663_v24  ;;  %v10895_v35 = vmul.f32 %v14753_v53, %v16429_v38  ;;  %v3906_v24 = vor.u32 %v3905_v13, %v3904_v2 }
 0x304   : > { %v1316_v57 = vpop.permute.xlu1 %1315  ;;  %v10914_v54 = vmax.f32 %v10893_v1, 0.0  ;;  %v3903_v38 = vsel %vm2111_vm10, %v3898_v31, %v3902_v17  ;;  %v3911_v50 = vrot.slane %v3909_v47, 1  ;;  %v14770_v47 = vld [vmem:[#allocation2 + $0x1c] sm:$0xf] }
 0x305   : > { %14760 = vrcp.f32 %v10871_v62  ;;  %v10915_v29 = vmax.f32 %v10895_v35, 0.0  ;;  %13047 = vmatpush3.bf16.msra.mxu0 %v14495_v0  ;;  %v3907_v0 = vsel %vm2111_vm10, %v3902_v17, %v3906_v24  ;;  %v18627_v62 = vld [vmem:[#allocation22_spill] sm:$0xff]  ;;  %v14500_v57 = vld [vmem:[%s18366_s2 + $0x178] sm:$0xff]   ;;  %v18629_v35 = vld [vmem:[#allocation24_spill] sm:$0xff] }
 0x306   : > { %v1318_v19 = vpop.permute.xlu0 %1317  ;;  %13048 = vmatprep.subr.bf16.mxu0 %v14497_v51  ;;  %v3915_v21 = vor.u32 %v3914_v42, %v3911_v50  ;;  %v14769_v17 = vld [vmem:[#allocation2 + $0x18] sm:$0xf] }
 0x307   : > { %v10941_v43 = vcombine.low %v10914_v54, %v10915_v29  ;;  %v16832_v5 = vcombine.low %v14769_v17, %v14770_v47  ;;  %v18630_v19 = vld [vmem:[#allocation35_spill] sm:$0xff]  ;;  %v16836_v54 = vld [vmem:[#allocation2 + $0x14] sm:$0xf]  ;;  %v14509_v47 = vld [vmem:[#allocation2 + $0x40] ss:$0 sps:$4 sm:$0x33]  }
 0x308   : > { %v1384_v20 = vpop.permute.xlu1 %1383  ;;  %13037 = vmatmul.mubr.msk.bf16.gmra.mrb[48].mxu0 %vm1735_vm9, %v3903_v38  ;;  %v3916_v63 = vsel %vm2111_vm10, %v3906_v24, %v3915_v21  ;;  %v4199_v24 = vld [vmem:[#allocation2 + $0x10] sm:$0xc]  ;;  %v18631_v38 = vld [vmem:[#allocation19_spill] sm:$0xff] }
 0x309   : > { %v14755_v6 = vpop.eup %14754  ;;  %v16805_v34 = vpack.c.bf16 %v10941_v43, %v10940_v18  ;;  %13040 = vmatprep.mubr.msk.bf16.mxu0 %vm1735_vm9, %v3907_v0  ;;  %13049 = vmatpush3.bf16.msra.mxu0 %v14497_v51  ;;  %v18626_v18 = vld [vmem:[#allocation20_spill] sm:$0xff]  ;;  %v14504_v51 = vld [vmem:[%s18366_s2 + $0x180] sm:$0xff]   ;;  %v11683_v29 = vcombine.low %v4199_v24, %v16836_v54  ;;  %v18632_v50 = vrot.slane %v18631_v38, 2  ;;  %v14774_v0 = vld [vmem:[#allocation2 + $0x28] sm:$0xf] }
 0x30a   : > { %v10897_v3 = vmul.f32 %v14755_v6, %v16475_v40  ;;  %v1386_v14 = vpop.permute.xlu0 %1385  ;;  %13062 = vmatprep.subr.bf16.mxu0 %v14498_v55  ;;  %v4068_v6 = vrot.slane %v16782_v52, 2 }
 0x30b   : > { %v14757_v39 = vpop.eup %14756  ;;  %v4252_v43 = vrot.slane %v11683_v29, 2 }
 0x30c   : > { %v10899_v60 = vmul.f32 %v14757_v39, %v16496_v25  ;;  %v10916_v16 = vmax.f32 %v10897_v3, 0.0  ;;  %v4069_v42 = vsel %vm2289_vm8, %v18632_v50, %v4068_v6  ;;  %v14772_v3 = vld [vmem:[#allocation2 + $0x20] sm:$0xf]  ;;  %v14773_v39 = vld [vmem:[#allocation2 + $0x24] sm:$0xf] }
 0x30d   : > { %v14759_v31 = vpop.eup %14758  ;;  %v16844_v20 = vcombine.low %v14772_v3, %v14773_v39 }
 0x30e   : > { %v10917_v7 = vmax.f32 %v10899_v60, 0.0  ;;  %v10901_v40 = vmul.f32 %v14759_v31, %v16507_v33  ;;  %v14499_v33 = vld [vmem:[%s18366_s2 + $0x170] sm:$0xff]   ;;  %v14775_v60 = vld [vmem:[#allocation2 + $0x2c] sm:$0xf] }
 0x30f   : > { %v14761_v2 = vpop.eup %14760  ;;  %v16848_v31 = vcombine.low %v14774_v0, %v14775_v60  ;;  %v4255_v52 = vrot.slane %v16844_v20, 2  ;;  %v4423_v38 = vshrl.u32 %v16844_v20, 16  ;;  %v4426_v50 = vshll.u32 %v16844_v20, 16 }
 0x310   : > { %v10942_v45 = vcombine.low %v10916_v16, %v10917_v7  ;;  %v10903_v41 = vmul.f32 %v14761_v2, %v16513_v56  ;;  %13041 = vmatmul.mubr.msk.bf16.gmra.mrb[52].mxu0 %vm1735_vm9, %v3916_v63  ;;  %v10918_v13 = vmax.f32 %v10901_v40, 0.0  ;;  %v18628_v56 = vld [vmem:[#allocation23_spill] sm:$0xff]  ;;  %v16853_v16 = vld [vmem:[#allocation2 + $0x3c] sm:$0xf]  ;;  %v14776_v2 = vld [vmem:[#allocation2 + $0x30] sm:$0xf] }
 0x311   : > { %13050 = vmatprep.mubr.msk.bf16.mxu0 %vm1735_vm9, %v18626_v18  ;;  %v4257_v21 = vrot.slane %v16848_v31, 2  ;;  %v14507_v7 = vld [vmem:[%s18366_s2 + $0x188] sm:$0xff]   ;;  %v14510_v18 = vld [vmem:[%s18366_s2 + $0x190] sm:$0xff]   ;;  %v4432_v3 = vshrl.u32 %v16848_v31, 16  ;;  %v4435_v39 = vshll.u32 %v16848_v31, 16  ;;  %v4425_v60 = vrot.slane %v4423_v38, 2 }
 0x312   : > { %v10919_v1 = vmax.f32 %v10903_v41, 0.0 }
 0x313   : > { %v4258_v63 = vsel %vm2289_vm8, %v4255_v52, %v4257_v21 }
 0x314   : > { %v10943_v25 = vcombine.low %v10918_v13, %v10919_v1  ;;  %v14778_v13 = vld [vmem:[#allocation2 + $0x38] sm:$0xf] }
 0x315   : > { %v16864_v1 = vcombine.low %v14778_v13, %v16853_v16 }
 0x316   : > { %v16815_v53 = vpack.c.bf16 %v10943_v25, %v10942_v45  ;;  %v14777_v45 = vld [vmem:[#allocation2 + $0x34] sm:$0xf] }
 0x317   : > { %v16859_v41 = vcombine.low %v14776_v2, %v14777_v45 }
 0x318   : > { %13051 = vmatmul.mubr.msk.bf16.vlgmr.msra.gmra.mrb[44].mxu0 %vm1735_vm9, %v18627_v62  ;;  %v4414_v62 = vshrl.u32 %v16832_v5, 16 }
 0x319   : > { %13054 = vmatprep.mubr.msk.bf16.mxu0 %vm1735_vm9, %v18628_v56  ;;  %13063 = vmatpush3.bf16.msra.mxu0 %v14498_v55  ;;  %v4253_v55 = vrot.slane %v16832_v5, 2  ;;  %v4259_v25 = vrot.slane %v16859_v41, 2  ;;  %v4417_v56 = vshll.u32 %v16832_v5, 16  ;;  %v4441_v45 = vshrl.u32 %v16859_v41, 16 }
 0x31a   : > { %13064 = vmatprep.subr.bf16.mxu0 %v14499_v33  ;;  %v4416_v24 = vrot.slane %v4414_v62, 2 }
 0x31b   : > { %v4254_v14 = vsel %vm2289_vm8, %v4252_v43, %v4253_v55  ;;  %v4256_v40 = vsel %vm2289_vm8, %v4253_v55, %v4255_v52  ;;  %v4260_v17 = vsel %vm2289_vm8, %v4257_v21, %v4259_v25  ;;  %v4419_v6 = vrot.slane %v4417_v56, 3 }
 0x31c   : > { %v4263_v43 = vrot.slane %v14509_v47, 2  ;;  %v4428_v52 = vrot.slane %v4426_v50, 3  ;;  %v16913_v47 = vld [vmem:[#allocation2 + $0x40] ss:$0 sps:$4 sm:$0x77]  }
 0x31d   : > { %13065 = vmatpush3.bf16.msra.mxu0 %v14499_v33  ;;  %v4261_v33 = vrot.slane %v16864_v1, 2 }
 0x31e   : > { %13066 = vmatprep.subr.bf16.mxu0 %v14500_v57  ;;  %v4429_v2 = vor.u32 %v4428_v52, %v4425_v60 }
 0x31f   : > { %v4264_v0 = vsel %vm2289_vm8, %v4261_v33, %v4263_v43  ;;  %v4459_v43 = vshrl.u32 %v16913_v47, 16 }
 0x320   : > { %13055 = vmatmul.mubr.msk.bf16.gmra.mrb[48].mxu0 %vm1735_vm9, %v18629_v35  ;;  %v4409_v35 = vshll.u32 %v11683_v29, 16 }
 0x321   : > { %13058 = vmatprep.mubr.msk.bf16.mxu0 %vm1735_vm9, %v18630_v19  ;;  %13067 = vmatpush3.bf16.msra.mxu0 %v14500_v57  ;;  %v4406_v57 = vshrl.u32 %v11683_v29, 16  ;;  %v4262_v19 = vsel %vm2289_vm8, %v4259_v25, %v4261_v33  ;;  %v4453_v25 = vshll.u32 %v16864_v1, 16  ;;  %v14512_v33 = vld [vmem:[%s18366_s2 + $0x1a0] sm:$0xff]  }
 0x322   : > { %13080 = vmatprep.subr.bf16.mxu0 %v14504_v51  ;;  %v4411_v55 = vrot.slane %v4409_v35, 3  ;;  %v4443_v35 = vrot.slane %v4441_v45, 2 }
 0x323   : > { %v4408_v29 = vrot.slane %v4406_v57, 2 }
 0x328   : > { %13059 = vmatmul.mubr.msk.bf16.gmra.mrb[52].mxu0 %vm1735_vm9, %v4069_v42  ;;  %v4420_v42 = vor.u32 %v4419_v6, %v4416_v24  ;;  %v4455_v6 = vrot.slane %v4453_v25, 3 }
 0x329   : > { %13068 = vmatprep.mubr.msk.bf16.mxu0 %vm1735_vm9, %v4254_v14  ;;  %v4412_v14 = vor.u32 %v4411_v55, %v4408_v29  ;;  %v14514_v29 = vld [vmem:[%s18366_s2 + $0x1a8] sm:$0xff]  }
 0x32a   : > { %v4430_v57 = vsel %vm2638_vm15, %v4420_v42, %v4429_v2 }
 0x32b   : > { %v4421_v21 = vsel %vm2638_vm15, %v4412_v14, %v4420_v42  ;;  %v4462_v42 = vshll.u32 %v16913_v47, 16 }
 0x32d   : > { %v4464_v52 = vrot.slane %v4462_v42, 3 }
 0x330   : > { %13069 = vmatmul.mubr.msk.bf16.vlgmr.msra.gmra.mrb[44].mxu0 %vm1735_vm9, %v4256_v40  ;;  %v4437_v40 = vrot.slane %v4435_v39, 3 }
 0x331   : > { %13072 = vmatprep.mubr.msk.bf16.mxu0 %vm1735_vm9, %v4258_v63  ;;  %13081 = vmatpush3.bf16.msra.mxu0 %v14504_v51  ;;  %v14511_v51 = vld [vmem:[%s18366_s2 + $0x198] sm:$0xff]   ;;  %v4444_v63 = vshll.u32 %v16859_v41, 16 }
 0x332   : > { %13082 = vmatprep.subr.bf16.mxu0 %v14507_v7 }
 0x335   : > { %13083 = vmatpush3.bf16.msra.mxu0 %v14507_v7  ;;  %v4434_v7 = vrot.slane %v4432_v3, 2 }
 0x336   : > { %13084 = vmatprep.subr.bf16.mxu0 %v14510_v18 }
 0x337   : > { %v4438_v13 = vor.u32 %v4437_v40, %v4434_v7  ;;  %v4596_v7 = vld [vmem:[#allocation2 + $0x10] sm:$0x8] }
 0x338   : > { %13073 = vmatmul.mubr.msk.bf16.gmra.mrb[48].mxu0 %vm1735_vm9, %v4260_v17  ;;  %v4446_v17 = vrot.slane %v4444_v63, 3  ;;  %v11721_v40 = vcombine.low %v4596_v7, %v16836_v54  ;;  %v14517_v54 = vld [vmem:[%s18366_s2 + $0x1b8] sm:$0xff]  }
 0x339   : > { %13076 = vmatprep.mubr.msk.bf16.mxu0 %vm1735_vm9, %v4262_v19  ;;  %13085 = vmatpush3.bf16.msra.mxu0 %v14510_v18  ;;  %v4450_v18 = vshrl.u32 %v16864_v1, 16  ;;  %v4439_v19 = vsel %vm2638_vm15, %v4429_v2, %v4438_v13 }
 0x33a   : > { %13098 = vmatprep.subr.bf16.mxu0 %v14511_v51  ;;  %v4447_v55 = vor.u32 %v4446_v17, %v4443_v35  ;;  %v4610_v17 = vrot.slane %v16844_v20, 3  ;;  %v4761_v42 = vshrl.u32 %v11721_v40, 16  ;;  %v14520_v20 = vld [vmem:[%s18366_s2 + $0x1d0] sm:$0xff]  }
 0x33b   : > { %v4452_v24 = vrot.slane %v4450_v18, 2 }
 0x33c   : > { %v4448_v60 = vsel %vm2638_vm15, %v4438_v13, %v4447_v55  ;;  %v4763_v7 = vrot.slane %v4761_v42, 3 }
 0x33d   : > { %v4456_v14 = vor.u32 %v4455_v6, %v4452_v24 }
 0x340   : > { %13077 = vmatmul.mubr.msk.bf16.gmra.mrb[52].mxu0 %vm1735_vm9, %v4264_v0  ;;  %v14516_v0 = vld [vmem:[%s18366_s2 + $0x1b0] sm:$0xff]  }
 0x341   : > { %13086 = vmatprep.mubr.msk.bf16.mxu0 %vm1735_vm9, %v4421_v21  ;;  %v4457_v21 = vsel %vm2638_vm15, %v4447_v55, %v4456_v14  ;;  %v4614_v55 = vrot.slane %v16859_v41, 3  ;;  %v14522_v41 = vld [vmem:[%s18366_s2 + $0x1d8] sm:$0xff]  }
 0x348   : > { %13087 = vmatmul.mubr.msk.bf16.vlgmr.msra.gmra.mrb[44].mxu0 %vm1735_vm9, %v4430_v57  ;;  %v4607_v57 = vrot.slane %v11721_v40, 3 }
 0x349   : > { %13090 = vmatprep.mubr.msk.bf16.mxu0 %vm1735_vm9, %v4439_v19  ;;  %13099 = vmatpush3.bf16.msra.mxu0 %v14511_v51  ;;  %v4461_v51 = vrot.slane %v4459_v43, 2  ;;  %v4612_v19 = vrot.slane %v16848_v31, 3  ;;  %v4616_v43 = vrot.slane %v16864_v1, 3 }
 0x34a   : > { %13100 = vmatprep.subr.bf16.mxu0 %v14512_v33 }
 0x34b   : > { %v4465_v2 = vor.u32 %v4464_v52, %v4461_v51  ;;  %v4613_v6 = vsel %vm2841_vm2, %v4610_v17, %v4612_v19  ;;  %v4615_v51 = vsel %vm2841_vm2, %v4612_v19, %v4614_v55  ;;  %v4768_v52 = vrot.slane %v4414_v62, 3 }
 0x34c   : > { %v4773_v62 = vrot.slane %v4426_v50, 4  ;;  %v4780_v50 = vrot.slane %v4441_v45, 3 }
 0x34d   : > { %13101 = vmatpush3.bf16.msra.mxu0 %v14512_v33  ;;  %v4608_v33 = vrot.slane %v16832_v5, 3  ;;  %v4466_v35 = vsel %vm2638_vm15, %v4456_v14, %v4465_v2  ;;  %v4764_v14 = vshll.u32 %v11721_v40, 16  ;;  %v4618_v2 = vrot.slane %v16913_v47, 3 }
 0x34e   : > { %13102 = vmatprep.subr.bf16.mxu0 %v14514_v29  ;;  %v4777_v47 = vrot.slane %v4435_v39, 4  ;;  %v4784_v39 = vrot.slane %v4450_v18, 3  ;;  %v14525_v18 = vld [vmem:[%s18366_s2 + $0x1e0] sm:$0xff]  }
 0x34f   : > { %v4609_v13 = vsel %vm2841_vm2, %v4607_v57, %v4608_v33  ;;  %v4611_v24 = vsel %vm2841_vm2, %v4608_v33, %v4610_v17  ;;  %v4766_v40 = vrot.slane %v4764_v14, 4 }
 0x350   : > { %13091 = vmatmul.mubr.msk.bf16.gmra.mrb[48].mxu0 %vm1735_vm9, %v4448_v60  ;;  %v14519_v60 = vld [vmem:[%s18366_s2 + $0x1c8] sm:$0xff]  }
 0x351   : > { %13094 = vmatprep.mubr.msk.bf16.mxu0 %vm1735_vm9, %v4457_v21  ;;  %13103 = vmatpush3.bf16.msra.mxu0 %v14514_v29  ;;  %v14518_v29 = vld [vmem:[%s18366_s2 + $0x1c0] sm:$0xff]   ;;  %v4769_v21 = vrot.slane %v4417_v56, 4  ;;  %v4767_v57 = vor.u32 %v4766_v40, %v4763_v7  ;;  %v4776_v56 = vrot.slane %v4432_v3, 3  ;;  %v4781_v3 = vrot.slane %v4444_v63, 4  ;;  %v18636_v7 = vld [vmem:[#allocation40_spill] sm:$0xff]  ;;  %v18637_v40 = vld [vmem:[#allocation37_spill] sm:$0xff] }
 0x352   : > { %13116 = vmatprep.subr.bf16.mxu0 %v14516_v0 }
 0x353   : > { %v4770_v33 = vor.u32 %v4769_v21, %v4768_v52  ;;  %v4778_v19 = vor.u32 %v4777_v47, %v4776_v56  ;;  %v4782_v45 = vor.u32 %v4781_v3, %v4780_v50  ;;  %v14528_v21 = vld [vmem:[%s18366_s2 + $0x1e8] sm:$0xff]   ;;  %v18643_v56 = vld [vmem:[#allocation41_spill] sm:$0xff] }
 0x354   : > { %v14565_v3 = vld [vmem:[%s18373_s9 + $0x1c] ss:$12 sps:$4 sm:$0xff]  }
 0x355   : > { %v4771_v5 = vsel %vm2995_vm4, %v4767_v57, %v4770_v33  ;;  %v4783_v1 = vsel %vm2995_vm4, %v4778_v19, %v4782_v45  ;;  %v18640_v57 = vld [vmem:[#allocation39_spill] sm:$0xff] }
 0x358   : > { %13095 = vmatmul.mubr.msk.bf16.gmra.mrb[52].mxu0 %vm1735_vm9, %v4466_v35  ;;  %v4619_v35 = vsel %vm2841_vm2, %v4616_v43, %v4618_v2  ;;  %v18638_v2 = vcombine.low %v18636_v7, %v18637_v40  ;;  %v17073_v40 = vld [vmem:[#allocation2 + $0x28] sm:$0xff]  }
 0x359   : > { %13104 = vmatprep.mubr.msk.bf16.mxu0 %vm1735_vm9, %v4609_v13  ;;  %v4772_v13 = vrot.slane %v4423_v38, 3 }
 0x35b   : > { %v4774_v17 = vor.u32 %v4773_v62, %v4772_v13  ;;  %v14531_v13 = vld [vmem:[%s18366_s2 + $0x1f0] sm:$0xff]   ;;  %v14534_v62 = vld [vmem:[%s18366_s2 + $0x1f8] sm:$0xff]  }
 0x35d   : > { %v4775_v38 = vsel %vm2995_vm4, %v4770_v33, %v4774_v17  ;;  %v4779_v31 = vsel %vm2995_vm4, %v4774_v17, %v4778_v19  ;;  %v18639_v33 = vld [vmem:[#allocation43_spill] sm:$0xff]  ;;  %v14562_v19 = vld [vmem:[%s18373_s9 + $0x4] ss:$12 sps:$4 sm:$0xff]  }
 0x35e   : > { %v14560_v17 = vld [vmem:[%s18373_s9] ss:$12 sps:$4 sm:$0xff]   ;;  %6126 = vmatprep.subr.bf16.mxu1 %v14562_v19  ;;  %v17092_v19 = vld [vmem:[#allocation2 + $0x38] sm:$0xff]  }
 0x35f   : > { %6127 = vmatpush1.bf16.msra.mxu1 %v14560_v17 }
 0x360   : > { %13105 = vmatmul.mubr.msk.bf16.vlgmr.msra.gmra.mrb[44].mxu0 %vm1735_vm9, %v4611_v24  ;;  %6128 = vmatprep.subr.bf16.mxu1 %v14565_v3 }
 0x361   : > { %13108 = vmatprep.mubr.msk.bf16.mxu0 %vm1735_vm9, %v4613_v6  ;;  %13117 = vmatpush3.bf16.msra.mxu0 %v14516_v0  ;;  %v4617_v0 = vsel %vm2841_vm2, %v4614_v55, %v4616_v43  ;;  %v4785_v6 = vrot.slane %v4453_v25, 4 }
 0x362   : > { %13118 = vmatprep.subr.bf16.mxu0 %v14517_v54 }
 0x363   : > { %v4786_v55 = vor.u32 %v4785_v6, %v4784_v39  ;;  %v14532_v6 = vld [vmem:[#allocation2 + $0x18] sm:$0xff]  }
 0x365   : > { %13119 = vmatpush3.bf16.msra.mxu0 %v14517_v54  ;;  %v4749_v54 = vld [vmem:[#allocation2 + $0x40] sm:$0xf]  ;;  %v4787_v42 = vsel %vm2995_vm4, %v4782_v45, %v4786_v55 }
 0x366   : > { %13120 = vmatprep.subr.bf16.mxu0 %v14518_v29  ;;  %v11737_v24 = vcombine.low %v4749_v54, %v4749_v54  ;;  %v11758_v39 = vcombine.low %v16853_v16, %v4749_v54  ;;  %v14533_v45 = vld [vmem:[#allocation2 + $0x20] sm:$0xff]   ;;  %v5246_v16 = vld [vmem:[#allocation2 + $0x18] sm:$0xf]  ;;  %v14540_v54 = vld [vmem:[%s18366_s2 + $0x208] sm:$0xff]  }
 0x368   : > { %13109 = vmatmul.mubr.msk.bf16.gmra.mrb[48].mxu0 %vm1735_vm9, %v4615_v51  ;;  %v4789_v63 = vshrl.u32 %v11737_v24, 16  ;;  %v18633_v51 = vld [vmem:[#allocation38_spill] sm:$0xff] }
 0x369   : > { %13112 = vmatprep.mubr.msk.bf16.mxu0 %vm1735_vm9, %v4617_v0  ;;  %13121 = vmatpush3.bf16.msra.mxu0 %v14518_v29  ;;  %v4792_v29 = vshll.u32 %v11737_v24, 16  ;;  %v18634_v0 = vld [vmem:[#allocation36_spill] sm:$0xff]  ;;  %v14563_v24 = vld [vmem:[%s18373_s9 + $0x18] ss:$12 sps:$4 sm:$0xff]  }
 0x36a   : > { %13134 = vmatprep.subr.bf16.mxu0 %v14519_v60  ;;  %v4791_v25 = vrot.slane %v4789_v63, 3  ;;  %v18635_v52 = vcombine.low %v18633_v51, %v18634_v0  ;;  %6129 = vmatpush1.bf16.msra.mxu1 %v14563_v24  ;;  %v14537_v63 = vld [vmem:[%s18366_s2 + $0x200] sm:$0xff]  }
 0x36b   : > { %v4794_v43 = vrot.slane %v4792_v29, 4  ;;  %v14535_v29 = vld [vmem:[#allocation2 + $0x28] sm:$0xff]   ;;  %v17101_v24 = vld [vmem:[#allocation2 + $0x40] sm:$0xff]  }
 0x36d   : > { %v4795_v14 = vor.u32 %v4794_v43, %v4791_v25  ;;  %v14544_v43 = vld [vmem:[%s18366_s2 + $0x210] sm:$0xff]  }
 0x370   : > { %13113 = vmatmul.mubr.msk.bf16.gmra.mrb[52].mxu0 %vm1735_vm9, %v4619_v35  ;;  %v18641_v35 = vcombine.low %v18639_v33, %v18640_v57  ;;  %v17078_v57 = vld [vmem:[#allocation2 + $0x30] sm:$0xff]  }
 0x371   : > { %13122 = vmatprep.mubr.msk.bf16.mxu0 %vm1735_vm9, %v4771_v5  ;;  %v18642_v5 = vld [vmem:[#allocation44_spill] sm:$0xff] }
 0x372   : > { %v18644_v47 = vcombine.low %v18642_v5, %v18643_v56  ;;  %v5319_v5 = vshrl.u32 %v17073_v40, 16 }
 0x378   : > { %13123 = vmatmul.mubr.msk.bf16.vlgmr.msra.gmra.mrb[44].mxu0 %vm1735_vm9, %v4775_v38  ;;  %v18646_v38 = vld [vmem:[#allocation42_spill] sm:$0xff] }
 0x379   : > { %13126 = vmatprep.mubr.msk.bf16.mxu0 %vm1735_vm9, %v4779_v31  ;;  %13135 = vmatpush3.bf16.msra.mxu0 %v14519_v60  ;;  %v4796_v60 = vsel %vm2995_vm4, %v4786_v55, %v4795_v14  ;;  %v14568_v31 = vld [vmem:[%s18373_s9 + $0x34] ss:$12 sps:$4 sm:$0xff]   ;;  %v14779_v55 = vld [vmem:[#allocation2 + $0x1c] sm:$0xf] }
 0x37a   : > { %13136 = vmatprep.subr.bf16.mxu0 %v14520_v20  ;;  %6130 = vmatprep.subr.bf16.mxu1 %v14568_v31  ;;  %v17067_v14 = vld [vmem:[#allocation2 + $0x20] sm:$0xff]   ;;  %v5339_v31 = vshll.u32 %v17101_v24, 16 }
 0x37d   : > { %13137 = vmatpush3.bf16.msra.mxu0 %v14520_v20  ;;  %v18645_v20 = vld [vmem:[#allocation45_spill] sm:$0xff] }
 0x37e   : > { %13138 = vmatprep.subr.bf16.mxu0 %v14522_v41  ;;  %v18647_v50 = vcombine.low %v18645_v20, %v18646_v38  ;;  %v5331_v20 = vshll.u32 %v17092_v19, 16  ;;  %v14547_v38 = vld [vmem:[%s18366_s2 + $0x218] sm:$0xff]  }
 0x380   : > { %13127 = vmatmul.mubr.msk.bf16.gmra.mrb[48].mxu0 %vm1735_vm9, %v4783_v1  ;;  %v14536_v1 = vld [vmem:[#allocation2 + $0x30] sm:$0xff]  }
 0x381   : > { %13130 = vmatprep.mubr.msk.bf16.mxu0 %vm1735_vm9, %v4787_v42  ;;  %13139 = vmatpush3.bf16.msra.mxu0 %v14522_v41  ;;  %v14566_v41 = vld [vmem:[%s18373_s9 + $0x30] ss:$12 sps:$4 sm:$0xff]  }
 0x382   : > { %13152 = vmatprep.subr.bf16.mxu0 %v14525_v18  ;;  %6131 = vmatpush1.bf16.msra.mxu1 %v14566_v41  ;;  %v14538_v42 = vld [vmem:[#allocation2 + $0x38] sm:$0xff]   ;;  %v14550_v41 = vld [vmem:[%s18366_s2 + $0x220] sm:$0xff]  }
 0x388   : > { %13131 = vmatmul.mubr.msk.bf16.gmra.mrb[52].mxu0 %vm1735_vm9, %v4796_v60  ;;  %v5307_v60 = vshll.u32 %v17067_v14, 16 }
 0x389   : > { %13140 = vmatprep.mubr.msk.bf16.mxu0 %vm1735_vm9, %v18635_v52 }
 0x38a   : > { %v5309_v52 = vrot.slane %v5307_v60, 1 }
 0x390   : > { %13141 = vmatmul.mubr.msk.bf16.vlgmr.msra.gmra.mrb[44].mxu0 %vm1735_vm9, %v18638_v2  ;;  %v5315_v2 = vshll.u32 %v17073_v40, 16 }
 0x391   : > { %13144 = vmatprep.mubr.msk.bf16.mxu0 %vm1735_vm9, %v18641_v35  ;;  %13153 = vmatpush3.bf16.msra.mxu0 %v14525_v18  ;;  %v11795_v18 = vcombine.low %v5246_v16, %v14779_v55  ;;  %v5323_v35 = vshll.u32 %v17078_v57, 16  ;;  %v5341_v16 = vrot.slane %v5339_v31, 1 }
 0x392   : > { %13154 = vmatprep.subr.bf16.mxu0 %v14528_v21 }
 0x393   : > { %v5302_v25 = vshll.u32 %v11795_v18, 16  ;;  %v5300_v0 = vshrl.u32 %v11795_v18, 16  ;;  %v5325_v56 = vrot.slane %v5323_v35, 1  ;;  %v14552_v18 = vld [vmem:[%s18366_s2 + $0x228] sm:$0xff]  }
 0x395   : > { %13155 = vmatpush3.bf16.msra.mxu0 %v14528_v21  ;;  %v5304_v51 = vrot.slane %v5302_v25, 1  ;;  %v14539_v21 = vld [vmem:[#allocation2 + $0x40] sm:$0xff]  }
 0x396   : > { %13156 = vmatprep.subr.bf16.mxu0 %v14531_v13 }
 0x397   : > { %v5305_v7 = vor.u32 %v5304_v51, %v5300_v0  ;;  %v5480_v51 = vld [vmem:[#allocation2 + $0x18] sm:$0xe] }
 0x398   : > { %13145 = vmatmul.mubr.msk.bf16.gmra.mrb[48].mxu0 %vm1735_vm9, %v18644_v47  ;;  %v11817_v0 = vcombine.low %v5480_v51, %v14779_v55  ;;  %v14553_v55 = vld [vmem:[%s18366_s2 + $0x230] sm:$0xff]  }
 0x399   : > { %13148 = vmatprep.mubr.msk.bf16.mxu0 %vm1735_vm9, %v18647_v50  ;;  %13157 = vmatpush3.bf16.msra.mxu0 %v14531_v13  ;;  %v5310_v33 = vsel %vm1664_vm6, %v5305_v7, %v5309_v52  ;;  %v5317_v13 = vrot.slane %v5315_v2, 1  ;;  %v5492_v7 = vrot.slane %v17067_v14, 1 }
 0x39a   : > { %13170 = vmatprep.subr.bf16.mxu0 %v14534_v62 }
 0x39b   : > { %v5321_v17 = vor.u32 %v5319_v5, %v5317_v13 }
 0x39d   : > { %v5326_v3 = vsel %vm1664_vm6, %v5321_v17, %v5325_v56  ;;  %v5496_v17 = vrot.slane %v17078_v57, 1 }
 0x3a0   : > { %13149 = vmatmul.mubr.msk.bf16.gmra.mrb[52].mxu0 %vm1735_vm9, %v11758_v39  ;;  %v5333_v39 = vrot.slane %v5331_v20, 1 }
 0x3a1   : > { %13158 = vmatprep.mubr.msk.bf16.mxu0 %vm1735_vm9, %v14532_v6  ;;  %v5335_v6 = vshrl.u32 %v17092_v19, 16 }
 0x3a8   : > { %13159 = vmatmul.mubr.msk.bf16.vlgmr.msra.gmra.mrb[44].mxu0 %vm1735_vm9, %v14533_v45  ;;  %v5327_v45 = vshrl.u32 %v17078_v57, 16 }
 0x3a9   : > { %13162 = vmatprep.mubr.msk.bf16.mxu0 %vm1735_vm9, %v14535_v29  ;;  %13171 = vmatpush3.bf16.msra.mxu0 %v14534_v62  ;;  %v5311_v62 = vshrl.u32 %v17067_v14, 16  ;;  %v5337_v29 = vor.u32 %v5335_v6, %v5333_v39 }
 0x3aa   : > { %13172 = vmatprep.subr.bf16.mxu0 %v14537_v63 }
 0x3ab   : > { %v5313_v47 = vor.u32 %v5311_v62, %v5309_v52 }
 0x3ad   : > { %13173 = vmatpush3.bf16.msra.mxu0 %v14537_v63  ;;  %v5318_v50 = vsel %vm1664_vm6, %v5313_v47, %v5317_v13  ;;  %v14549_v63 = vld [vmem:[#allocation2 + $0x48] ss:$0 sps:$4 sm:$0x11]   ;;  %v5494_v47 = vrot.slane %v17073_v40, 1  ;;  %v5664_v40 = vrot.slane %v5335_v6, 1  ;;  %v14558_v6 = vld [vmem:[%s18366_s2 + $0x250] sm:$0xff]  }
 0x3ae   : > { %13174 = vmatprep.subr.bf16.mxu0 %v14540_v54  ;;  %v5347_v25 = vshll.u32 %v14549_v63, 16 }
 0x3b0   : > { %13163 = vmatmul.mubr.msk.bf16.gmra.mrb[48].mxu0 %vm1735_vm9, %v14536_v1 }
 0x3b1   : > { %13166 = vmatprep.mubr.msk.bf16.mxu0 %vm1735_vm9, %v14538_v42  ;;  %13175 = vmatpush3.bf16.msra.mxu0 %v14540_v54  ;;  %v5329_v54 = vor.u32 %v5327_v45, %v5325_v56  ;;  %v5343_v42 = vshrl.u32 %v17101_v24, 16 }
 0x3b2   : > { %13188 = vmatprep.subr.bf16.mxu0 %v14544_v43 }
 0x3b3   : > { %v5334_v1 = vsel %vm1664_vm6, %v5329_v54, %v5333_v39  ;;  %v5345_v52 = vor.u32 %v5343_v42, %v5341_v16  ;;  %v5498_v39 = vrot.slane %v17092_v19, 1  ;;  %v14555_v54 = vld [vmem:[%s18366_s2 + $0x240] sm:$0xff]  }
 0x3b8   : > { %13167 = vmatmul.mubr.msk.bf16.gmra.mrb[52].mxu0 %vm1735_vm9, %v14539_v21  ;;  %v5349_v21 = vrot.slane %v5347_v25, 1  ;;  %v5652_v25 = vrot.slane %v5311_v62, 1  ;;  %v5657_v62 = vrot.slane %v5315_v2, 2  ;;  %v5665_v2 = vrot.slane %v5331_v20, 2 }
 0x3b9   : > { %13176 = vmatprep.mubr.msk.bf16.mxu0 %vm1735_vm9, %v5310_v33  ;;  %v5491_v33 = vrot.slane %v11817_v0, 1 }
 0x3ba   : > { %v5350_v13 = vsel %vm1664_vm6, %v5345_v52, %v5349_v21  ;;  %v5502_v52 = vrot.slane %v14549_v63, 1 }
 0x3bb   : > { %v5493_v56 = vsel %vm1957_vm7, %v5491_v33, %v5492_v7  ;;  %v5656_v33 = vrot.slane %v5319_v5, 1  ;;  %v14556_v5 = vld [vmem:[%s18366_s2 + $0x248] sm:$0xff]  }
 0x3bd   : > { %v5658_v63 = vor.u32 %v5657_v62, %v5656_v33 }
 0x3c0   : > { %13177 = vmatmul.mubr.msk.bf16.vlgmr.msra.gmra.mrb[44].mxu0 %vm1735_vm9, %v5318_v50  ;;  %v5497_v50 = vsel %vm1957_vm7, %v5494_v47, %v5496_v17 }
 0x3c1   : > { %13180 = vmatprep.mubr.msk.bf16.mxu0 %vm1735_vm9, %v5326_v3  ;;  %13189 = vmatpush3.bf16.msra.mxu0 %v14544_v43  ;;  %v5342_v43 = vsel %vm1664_vm6, %v5337_v29, %v5341_v16  ;;  %v14554_v3 = vld [vmem:[%s18366_s2 + $0x238] sm:$0xff]   ;;  %v5645_v29 = vshrl.u32 %v11817_v0, 16  ;;  %v5648_v16 = vshll.u32 %v11817_v0, 16  ;;  %vm6876_vm6 = vsmask.f32 256 }
 0x3c2   : > { %13190 = vmatprep.subr.bf16.mxu0 %v14547_v38 }
 0x3c3   : > { %v5647_v51 = vrot.slane %v5645_v29, 1  ;;  %v5650_v0 = vrot.slane %v5648_v16, 2  ;;  %v18648_v29 = vld [vmem:[#allocation47_spill] sm:$0xff]  ;;  %v18649_v16 = vld [vmem:[#allocation48_spill] sm:$0xff] }
 0x3c5   : > { %13191 = vmatpush3.bf16.msra.mxu0 %v14547_v38  ;;  %v5495_v38 = vsel %vm1957_vm7, %v5492_v7, %v5494_v47  ;;  %v5651_v7 = vor.u32 %v5650_v0, %v5647_v51  ;;  %v14569_v51 = vld [vmem:[%s18373_s9 + $0x48] ss:$12 sps:$4 sm:$0xff]   ;;  %v14571_v0 = vld [vmem:[%s18373_s9 + $0x4c] ss:$12 sps:$4 sm:$0xff]  }
 0x3c6   : > { %13192 = vmatprep.subr.bf16.mxu0 %v14550_v41  ;;  %6132 = vmatprep.subr.bf16.mxu1 %v14571_v0 }
 0x3c7   : > { %6133 = vmatpush1.bf16.msra.mxu1 %v14569_v51 }
 0x3c8   : > { %13181 = vmatmul.mubr.msk.bf16.gmra.mrb[48].mxu0 %vm1735_vm9, %v5334_v1  ;;  %v5499_v1 = vsel %vm1957_vm7, %v5496_v17, %v5498_v39 }
 0x3c9   : > { %13184 = vmatprep.mubr.msk.bf16.mxu0 %vm1735_vm9, %v5342_v43  ;;  %13193 = vmatpush3.bf16.msra.mxu0 %v14550_v41  ;;  %v5500_v41 = vrot.slane %v17101_v24, 1  ;;  %v5653_v43 = vrot.slane %v5307_v60, 2  ;;  %v5660_v60 = vrot.slane %v5327_v45, 1  ;;  %v14557_v45 = vld [vmem:[#allocation2 + $0x48] ss:$0 sps:$4 sm:$0x33]  }
 0x3ca   : > { %13206 = vmatprep.subr.bf16.mxu0 %v14552_v18  ;;  %v5673_v19 = vshrl.u32 %v14557_v45, 16  ;;  %v5676_v20 = vshll.u32 %v14557_v45, 16 }
 0x3cb   : > { %v5654_v21 = vor.u32 %v5653_v43, %v5652_v25  ;;  %v18652_v25 = vrot.slane %v16581_v36, 2  ;;  %v18653_v36 = vmov 0  }
 0x3cc   : > { %8282 = vst.msk [vmem:[#allocation4] sm:$0xff] %vm6360_vm0, %v18653_v36  ;;  %8287 = vst.msk [vmem:[#allocation4 + $0x40] sm:$0xff] %vm6360_vm0, %v18653_v36 }
 0x3cd   : > { %v5655_v14 = vsel %vm2111_vm10, %v5651_v7, %v5654_v21  ;;  %v5659_v17 = vsel %vm2111_vm10, %v5654_v21, %v5658_v63 }
 0x3d0   : > { %13185 = vmatmul.mubr.msk.bf16.gmra.mrb[52].mxu0 %vm1735_vm9, %v5350_v13  ;;  %v5503_v13 = vsel %vm1957_vm7, %v5500_v41, %v5502_v52  ;;  %v11859_v52 = vld [vmem:[%s18367_s3] ss:$0 sm:$0xff] }
 0x3d1   : > { %13194 = vmatprep.mubr.msk.bf16.mxu0 %vm1735_vm9, %v5493_v56  ;;  %v5661_v56 = vrot.slane %v5323_v35, 2  ;;  %v5668_v35 = vrot.slane %v5343_v42, 1  ;;  %v5675_v42 = vrot.slane %v5673_v19, 1 }
 0x3d3   : > { %v5662_v47 = vor.u32 %v5661_v56, %v5660_v60 }
 0x3d5   : > { %v5663_v57 = vsel %vm2111_vm10, %v5658_v63, %v5662_v47 }
 0x3d8   : > { %13195 = vmatmul.mubr.msk.bf16.vlgmr.msra.gmra.mrb[44].mxu0 %vm1735_vm9, %v5495_v38  ;;  %v5666_v38 = vor.u32 %v5665_v2, %v5664_v40 }
 0x3d9   : > { %13198 = vmatprep.mubr.msk.bf16.mxu0 %vm1735_vm9, %v5497_v50  ;;  %13207 = vmatpush3.bf16.msra.mxu0 %v14552_v18  ;;  %v5501_v18 = vsel %vm1957_vm7, %v5498_v39, %v5500_v41  ;;  %v5678_v39 = vrot.slane %v5676_v20, 2  ;;  %vm7055_vm7 = vsmask.f32 3328 }
 0x3da   : > { %13208 = vmatprep.subr.bf16.mxu0 %v14553_v55 }
 0x3dd   : > { %13209 = vmatpush3.bf16.msra.mxu0 %v14553_v55  ;;  %v5669_v55 = vrot.slane %v5339_v31, 2  ;;  %v5679_v31 = vor.u32 %v5678_v39, %v5675_v42 }
 0x3de   : > { %13210 = vmatprep.subr.bf16.mxu0 %v14554_v3 }
 0x3df   : > { %v5670_v50 = vor.u32 %v5669_v55, %v5668_v35 }
 0x3e0   : > { %13199 = vmatmul.mubr.msk.bf16.gmra.mrb[48].mxu0 %vm1735_vm9, %v5499_v1  ;;  %v18651_v1 = vld [vmem:[#allocation50_spill] sm:$0xff] }
 0x3e1   : > { %13202 = vmatprep.mubr.msk.bf16.mxu0 %vm1735_vm9, %v5501_v18  ;;  %13211 = vmatpush3.bf16.msra.mxu0 %v14554_v3  ;;  %v5667_v3 = vsel %vm2111_vm10, %v5662_v47, %v5666_v38  ;;  %v5671_v24 = vsel %vm2111_vm10, %v5666_v38, %v5670_v50  ;;  %v5680_v41 = vsel %vm2111_vm10, %v5670_v50, %v5679_v31  ;;  %v5832_v18 = vrot.slane %v14557_v45, 2  ;;  %v14573_v31 = vld [vmem:[%s18373_s9 + $0x20] ss:$12 sps:$4 sm:$0xff]  }
 0x3e2   : > { %13224 = vmatprep.subr.bf16.mxu0 %v14555_v54 }
 0x3e3   : > { %v5833_v43 = vsel %vm2289_vm8, %v18652_v25, %v5832_v18  ;;  %vm8285_vm8 = vcmask 785413  }
 0x3e4   : > { %8286 = vst.msk [vmem:[#allocation4 + $0x38] sm:$0xe0] %vm8285_vm8, %v18653_v36 }
 0x3e8   : > { %13203 = vmatmul.mubr.msk.bf16.gmra.mrb[52].mxu0 %vm1735_vm9, %v5503_v13 }
 0x3e9   : > { %13212 = vmatprep.mubr.msk.bf16.mxu0 %vm1735_vm9, %v5655_v14 }
 0x3f0   : > { %13213 = vmatmul.mubr.msk.bf16.vlgmr.msra.gmra.mrb[44].mxu0 %vm1735_vm9, %v5659_v17 }
 0x3f1   : > { %13216 = vmatprep.mubr.msk.bf16.mxu0 %vm1735_vm9, %v5663_v57  ;;  %13225 = vmatpush3.bf16.msra.mxu0 %v14555_v54  ;;  %v18650_v54 = vld [vmem:[#allocation49_spill] sm:$0xff] }
 0x3f2   : > { %13226 = vmatprep.subr.bf16.mxu0 %v14556_v5 }
 0x3f5   : > { %13227 = vmatpush3.bf16.msra.mxu0 %v14556_v5 }
 0x3f6   : > { %13228 = vmatprep.subr.bf16.mxu0 %v14558_v6 }
 0x3f8   : > { %13217 = vmatmul.mubr.msk.bf16.gmra.mrb[48].mxu0 %vm1735_vm9, %v5667_v3 }
 0x3f9   : > { %13220 = vmatprep.mubr.msk.bf16.mxu0 %vm1735_vm9, %v5671_v24  ;;  %13229 = vmatpush3.bf16.msra.mxu0 %v14558_v6 }
 0x400   : > { %13221 = vmatmul.mubr.msk.bf16.gmra.mrb[52].mxu0 %vm1735_vm9, %v5680_v41 }
 0x401   : > { %13230 = vmatprep.mubr.msk.bf16.mxu0 %vm1735_vm9, %v18648_v29 }
 0x408   : > { %13231 = vmatmul.mubr.msk.bf16.vlgmr.msra.gmra.mrb[44].mxu0 %vm1735_vm9, %v18649_v16 }
 0x409   : > { %13234 = vmatprep.mubr.msk.bf16.mxu0 %vm1735_vm9, %v18650_v54 }
 0x410   : > { %13235 = vmatmul.mubr.msk.bf16.gmra.mrb[48].mxu0 %vm1735_vm9, %v18651_v1 }
 0x411   : > { %13238 = vmatprep.mubr.msk.bf16.mxu0 %vm1735_vm9, %v16596_v58  ;;  %v14572_v58 = vld [vmem:[%s18373_s9 + $0x8] ss:$12 sps:$4 sm:$0xff]  }
 0x412   : > { %13242 = vmatprep.subr.bf16.mxu1 %v14572_v58 }
 0x418   : > { %13239 = vmatmul.mubr.msk.bf16.gmra.mrb[52].mxu0 %vm1735_vm9, %v5833_v43  ;;  %v14574_v43 = vld [vmem:[%s18373_s9 + $0x38] ss:$12 sps:$4 sm:$0xff]   ;;  %vm8283_vm9 = vcmask 782336  }
 0x419   : > { %8284 = vst.msk [vmem:[#allocation4 + $0x8] sm:$0x1f] %vm8283_vm9, %v18653_v36 }
 0x4db   : > { %v13232_v21 = vpop.f32.mrb[44].mxu0 }
 0x4dc   : > { %v5904_v7 = vpop.f32.mrb[45].mxu0  ;;  %v5972_v60 = vadd.f32 %v13232_v21, %v11859_v52 }
 0x4dd   : > { %v5970_v33 = vadd.f32 %v11859_v52, %v5904_v7  ;;  %v13233_v13 = vpop.f32.mrb[46].mxu0 }
 0x4de   : > { %v5973_v62 = vadd.f32 %v13233_v13, %v11859_v52  ;;  %v5907_v14 = vpop.f32.mrb[47].mxu0  ;;  %v5984_v40 = vmax.f32 %v5972_v60, 0.0 }
 0x4df   : > { %v5982_v56 = vmax.f32 %v5970_v33, 0.0  ;;  %v5971_v63 = vadd.f32 %v11859_v52, %v5907_v14 }
 0x4e0   : > { %v5985_v17 = vmax.f32 %v5973_v62, 0.0 }
 0x4e1   : > { %v6006_v47 = vcombine.high %v5982_v56, %v5982_v56  ;;  %v5983_v5 = vmax.f32 %v5971_v63, 0.0 }
 0x4e2   : > { %v6008_v20 = vcombine.high %v5985_v17, %v5985_v17 }
 0x4e3   : > { %v6007_v2 = vcombine.high %v5983_v5, %v5983_v5  ;;  %v13236_v45 = vpop.f32.mrb[48].mxu0  ;;  %v6014_v35 = vcombine.low %v5982_v56, %v6006_v47  ;;  %v14575_v47 = vld [vmem:[%s18373_s9 + $0x50] ss:$12 sps:$4 sm:$0xff]  }
 0x4e4   : > { %v5920_v57 = vpop.f32.mrb[49].mxu0  ;;  %v5976_v6 = vadd.f32 %v13236_v45, %v11859_v52  ;;  %v6016_v54 = vcombine.low %v5985_v17, %v6008_v20  ;;  %v14581_v20 = vld [vmem:[%s18372_s8 + $0x1c] ss:$12 sps:$4 sm:$0xff]  }
 0x4e5   : > { %v6015_v55 = vcombine.low %v6007_v2, %v5984_v40  ;;  %v5974_v38 = vadd.f32 %v11859_v52, %v5920_v57  ;;  %v13237_v19 = vpop.f32.mrb[50].mxu0 }
 0x4e6   : > { %v5923_v50 = vpop.f32.mrb[51].mxu0  ;;  %v5977_v39 = vadd.f32 %v13237_v19, %v11859_v52  ;;  %v5988_v41 = vmax.f32 %v5976_v6, 0.0  ;;  %v14576_v19 = vld [vmem:[%s18372_s8] ss:$12 sps:$4 sm:$0xff]  }
 0x4e7   : > { %v6030_v3 = vpack.c.bf16 %v6015_v55, %v6014_v35  ;;  %v5986_v42 = vmax.f32 %v5974_v38, 0.0  ;;  %v5975_v24 = vadd.f32 %v11859_v52, %v5923_v50  ;;  %v14579_v50 = vld [vmem:[%s18372_s8 + $0x18] ss:$12 sps:$4 sm:$0xff]  }
 0x4e8   : > { %v5989_v1 = vmax.f32 %v5977_v39, 0.0  ;;  %v6010_v21 = vcombine.high %v5988_v41, %v5988_v41  ;;  %v14587_v39 = vld [vmem:[%s18372_s8 + $0x4c] ss:$12 sps:$4 sm:$0xff]  }
 0x4e9   : > { %v6009_v29 = vcombine.high %v5986_v42, %v5986_v42  ;;  %v5987_v16 = vmax.f32 %v5975_v24, 0.0  ;;  %11872 = vmatmul.mubr.msk.bf16.vlgmr.msra.gmra.mrb[28].mxu1 %vm1269_vm12, %v6030_v3  ;;  %v14582_v42 = vld [vmem:[%s18372_s8 + $0x30] ss:$12 sps:$4 sm:$0xff]   ;;  %v14585_v24 = vld [vmem:[%s18372_s8 + $0x48] ss:$12 sps:$4 sm:$0xff]  }
 0x4ea   : > { %13243 = vmatpush3.bf16.msra.mxu1 %v14572_v58  ;;  %6168 = vmatprep.mubr.bf16.mxu1 %v18653_v36  ;;  %v6011_v60 = vcombine.high %v5989_v1, %v5989_v1  ;;  %v6018_v40 = vcombine.low %v5988_v41, %v6010_v21  ;;  %v14588_v41 = vld [vmem:[%s18372_s8 + $0x60] ss:$12 sps:$4 sm:$0xff]  }
 0x4eb   : > { %v6017_v18 = vcombine.low %v6009_v29, %v5987_v16  ;;  %v13240_v25 = vpop.f32.mrb[52].mxu0  ;;  %13244 = vmatprep.subr.bf16.mxu1 %v14573_v31  ;;  %v14593_v29 = vld [vmem:[%s18372_s8 + $0x7c] ss:$12 sps:$4 sm:$0xff]   ;;  %v14591_v16 = vld [vmem:[%s18372_s8 + $0x78] ss:$12 sps:$4 sm:$0xff]  }
 0x4ec   : > { %v5980_v51 = vadd.f32 %v13240_v25, %v11859_v52  ;;  %v5936_v0 = vpop.f32.mrb[53].mxu0  ;;  %v14595_v1 = vld [vmem:[%s18372_s8 + $0x20] ss:$12 sps:$4 sm:$0xff]   ;;  %v14596_v25 = vld [vmem:[%s18372_s8 + $0x38] ss:$12 sps:$4 sm:$0xff]  }
 0x4ed   : > { %v6031_v7 = vpack.c.bf16 %v6017_v18, %v6016_v54  ;;  %v5978_v33 = vadd.f32 %v11859_v52, %v5936_v0  ;;  %v13241_v13 = vpop.f32.mrb[54].mxu0  ;;  %v14594_v54 = vld [vmem:[%s18372_s8 + $0x8] ss:$12 sps:$4 sm:$0xff]   ;;  %v18654_v18 = vld [vmem:[#allocation14_spill] sm:$0xff] }
 0x4ee   : > { %v5992_v62 = vmax.f32 %v5980_v51, 0.0  ;;  %v5981_v14 = vadd.f32 %v13241_v13, %v11859_v52  ;;  %v5939_v58 = vpop.f32.mrb[55].mxu0  ;;  %13245 = vmatpush3.bf16.msra.mxu1 %v14573_v31  ;;  %v14590_v31 = vld [vmem:[%s18372_s8 + $0x64] ss:$12 sps:$4 sm:$0xff]   ;;  %v14598_v0 = vld [vmem:[%s18372_s8 + $0x68] ss:$12 sps:$4 sm:$0xff]  }
 0x4ef   : > { %v5990_v56 = vmax.f32 %v5978_v33, 0.0  ;;  %v5979_v63 = vadd.f32 %v11859_v52, %v5939_v58  ;;  %13246 = vmatprep.subr.bf16.mxu1 %v14574_v43  ;;  %v14578_v52 = vld [vmem:[%s18372_s8 + $0x4] ss:$12 sps:$4 sm:$0xff]   ;;  %v14599_v21 = vld [vmem:[%s18372_s8 + $0x80] ss:$12 sps:$4 sm:$0xff]  }
 0x4f0   : > { %v6013_v5 = vcombine.high %v5992_v62, %v5992_v62  ;;  %v5993_v17 = vmax.f32 %v5981_v14, 0.0  ;;  %v18655_v51 = vld [vmem:[#allocation18_spill] sm:$0xff]  ;;  %v14601_v62 = vld [vmem:[%s18368_s4 + $0x28] sm:$0xff]   ;;  %v17314_v14 = vld [vmem:[#allocation3 + $0x8] sm:$0xff] }
 0x4f1   : > { %v6019_v2 = vcombine.low %v6011_v60, %v5990_v56  ;;  %v5991_v45 = vmax.f32 %v5979_v63, 0.0  ;;  %11873 = vmatmul.mubr.msk.bf16.gmra.mrb[32].mxu1 %vm1269_vm12, %v6031_v7  ;;  %v14600_v33 = vld [vmem:[%s18368_s4 + $0x20] sm:$0xff]   ;;  %v14602_v58 = vld [vmem:[%s18368_s4 + $0x30] sm:$0xff]   ;;  %v6545_v56 = vrot.slane %v17314_v14, 7 }
 0x4f2   : > { %v6021_v57 = vcombine.low %v6013_v5, %v5993_v17  ;;  %6178 = vmatprep.mubr.bf16.mxu1 %v18653_v36  ;;  %13247 = vmatpush3.bf16.msra.mxu1 %v14574_v43  ;;  %v14597_v43 = vld [vmem:[%s18372_s8 + $0x50] ss:$12 sps:$4 sm:$0xff]   ;;  %v18657_v13 = vld [vmem:[#allocation26_spill] sm:$0xff]  ;;  %v17319_v60 = vld [vmem:[#allocation3] sm:$0x80] }
 0x4f3   : > { %v6032_v35 = vpack.c.bf16 %v6019_v2, %v6018_v40  ;;  %v6012_v55 = vcombine.high %v5991_v45, %v5991_v45  ;;  %13248 = vmatprep.subr.bf16.mxu1 %v14575_v47  ;;  %v6544_v63 = vrot.slane %v17319_v60, 7  ;;  %v14604_v17 = vld [vmem:[%s18368_s4] sm:$0xff]  }
 0x4f4   : > { %v14785_v40 = vld [vmem:[#allocation3 + $0x10] sm:$0xff] }
 0x4f5   : > { %v6020_v6 = vcombine.low %v5991_v45, %v6012_v55  ;;  %v6546_v5 = vsel %vm790_vm1, %v6544_v63, %v6545_v56  ;;  %v6547_v2 = vrot.slane %v14785_v40, 7  ;;  %v14786_v45 = vld [vmem:[#allocation3 + $0x18] sm:$0xff] }
 0x4f6   : > { %13249 = vmatpush3.bf16.msra.mxu1 %v14575_v47  ;;  %v14603_v47 = vld [vmem:[%s18368_s4 + $0x38] sm:$0xff]  }
 0x4f7   : > { %v6033_v38 = vpack.c.bf16 %v6021_v57, %v6020_v6  ;;  %6373 = vmatprep.subr.bf16.mxu1 %v14578_v52  ;;  %v6549_v57 = vrot.slane %v14786_v45, 7  ;;  %v6548_v55 = vsel %vm790_vm1, %v6545_v56, %v6547_v2  ;;  %v14606_v6 = vld [vmem:[%s18368_s4 + $0x10] sm:$0xff]  }
 0x4f9   : > { %11874 = vmatmul.mubr.msk.bf16.gmra.mrb[36].mxu1 %vm1269_vm12, %v6032_v35  ;;  %v6550_v52 = vsel %vm790_vm1, %v6547_v2, %v6549_v57 }
 0x4fa   : > { %6188 = vmatprep.mubr.bf16.mxu1 %v18653_v36 }
 0x501   : > { %11875 = vmatmul.mubr.msk.bf16.gmra.mrb[40].mxu1 %vm1269_vm12, %v6033_v38 }
 0x502   : > { %13250 = vmatprep.mubr.msk.bf16.mxu1 %vm1269_vm12, %v6030_v3  ;;  %v14584_v3 = vld [vmem:[%s18372_s8 + $0x34] ss:$12 sps:$4 sm:$0xff]  }
 0x509   : > { %13251 = vmatmul.mubr.msk.bf16.vlgmr.msra.gmra.mrb[44].mxu1 %vm1269_vm12, %v6031_v7  ;;  %v18656_v7 = vld [vmem:[#allocation21_spill] sm:$0xff] }
 0x50a   : > { %6374 = vmatpush1.bf16.msra.mxu1 %v14576_v19  ;;  %13254 = vmatprep.mubr.msk.bf16.mxu1 %vm1269_vm12, %v6032_v35  ;;  %v14605_v35 = vld [vmem:[%s18368_s4 + $0x8] sm:$0xff]  }
 0x50b   : > { %6375 = vmatprep.subr.bf16.mxu1 %v14581_v20  ;;  %v6511_v20 = vld [vmem:[#allocation3] sm:$0xc0] }
 0x50e   : > { %6376 = vmatpush1.bf16.msra.mxu1 %v14579_v50  ;;  %v14788_v50 = vld [vmem:[#allocation3 + $0x28] sm:$0xff] }
 0x50f   : > { %6377 = vmatprep.subr.bf16.mxu1 %v14584_v3  ;;  %v6553_v3 = vrot.slane %v14788_v50, 7  ;;  %v17365_v2 = vshrl.u32 %v14788_v50, 16  ;;  %v17367_v45 = vshll.u32 %v14788_v50, 16 }
 0x511   : > { %13255 = vmatmul.mubr.msk.bf16.gmra.mrb[48].mxu1 %vm1269_vm12, %v6033_v38  ;;  %v14787_v38 = vld [vmem:[#allocation3 + $0x20] sm:$0xff] }
 0x512   : > { %6378 = vmatpush1.bf16.msra.mxu1 %v14582_v42  ;;  %6405 = vmatprep.mubr.bf16.mxu1 %v18653_v36  ;;  %v6551_v19 = vrot.slane %v14787_v38, 7  ;;  %v6690_v42 = vshrl.u32 %v17314_v14, 16  ;;  %v6728_v38 = vrot.slane %v17365_v2, 6 }
 0x513   : > { %6379 = vmatprep.subr.bf16.mxu1 %v14587_v39  ;;  %v6693_v39 = vshll.u32 %v17314_v14, 16 }
 0x516   : > { %6380 = vmatpush1.bf16.msra.mxu1 %v14585_v24  ;;  %v6682_v24 = vshrl.u32 %v6511_v20, 16 }
 0x517   : > { %6381 = vmatprep.subr.bf16.mxu1 %v14590_v31  ;;  %v6685_v31 = vshll.u32 %v6511_v20, 16  ;;  %v14610_v20 = vld [vmem:[%s18368_s4 + $0x50] sm:$0xff]  }
 0x51a   : > { %6382 = vmatpush1.bf16.msra.mxu1 %v14588_v41  ;;  %v14607_v41 = vld [vmem:[%s18368_s4 + $0x18] sm:$0xff]  }
 0x51b   : > { %6383 = vmatprep.subr.bf16.mxu1 %v14593_v29  ;;  %v6552_v29 = vsel %vm790_vm1, %v6549_v57, %v6551_v19  ;;  %v14609_v57 = vld [vmem:[%s18368_s4 + $0x48] sm:$0xff]  }
 0x51e   : > { %6384 = vmatpush1.bf16.msra.mxu1 %v14591_v16  ;;  %v6554_v16 = vsel %vm790_vm1, %v6551_v19, %v6553_v3  ;;  %v6731_v19 = vrot.slane %v17367_v45, 7 }
 0x51f   : > { %13258 = vmatprep.subr.bf16.mxu1 %v14594_v54 }
 0x521   : > { %11898 = vmatmul.mubr.msk.bf16.vlgmr.msra.gmra.mrb[28].mxu1 %vm6360_vm0, %v18654_v18 }
 0x522   : > { %13259 = vmatpush3.bf16.msra.mxu1 %v14594_v54  ;;  %6415 = vmatprep.mubr.bf16.mxu1 %v18653_v36  ;;  %v6517_v54 = vld [vmem:[#allocation3 + $0x30] sm:$0x7f] }
 0x523   : > { %13260 = vmatprep.subr.bf16.mxu1 %v14595_v1 }
 0x526   : > { %13261 = vmatpush3.bf16.msra.mxu1 %v14595_v1  ;;  %v6692_v1 = vrot.slane %v6690_v42, 6 }
 0x527   : > { %13262 = vmatprep.subr.bf16.mxu1 %v14596_v25 }
 0x529   : > { %11899 = vmatmul.mubr.msk.bf16.gmra.mrb[32].mxu1 %vm6360_vm0, %v18655_v51 }
 0x52a   : > { %13263 = vmatpush3.bf16.msra.mxu1 %v14596_v25  ;;  %6425 = vmatprep.mubr.bf16.mxu1 %v18653_v36  ;;  %v6684_v25 = vrot.slane %v6682_v24, 6  ;;  %v6738_v24 = vshll.u32 %v6517_v54, 16 }
 0x52b   : > { %13264 = vmatprep.subr.bf16.mxu1 %v14597_v43 }
 0x52e   : > { %13265 = vmatpush3.bf16.msra.mxu1 %v14597_v43  ;;  %v6687_v43 = vrot.slane %v6685_v31, 7  ;;  %v6732_v31 = vor.u32 %v6731_v19, %v6728_v38  ;;  %v6899_v19 = vrot.slane %v16111_v59, 7 }
 0x52f   : > { %13266 = vmatprep.subr.bf16.mxu1 %v14598_v0 }
 0x531   : > { %11900 = vmatmul.mubr.msk.bf16.gmra.mrb[36].mxu1 %vm6360_vm0, %v18656_v7 }
 0x532   : > { %6435 = vmatprep.mubr.bf16.mxu1 %v18653_v36  ;;  %13267 = vmatpush3.bf16.msra.mxu1 %v14598_v0  ;;  %v6555_v0 = vrot.slane %v6517_v54, 7 }
 0x533   : > { %13268 = vmatprep.subr.bf16.mxu1 %v14599_v21 }
 0x536   : > { %13269 = vmatpush3.bf16.msra.mxu1 %v14599_v21 }
 0x537   : > { %13278 = vmatprep.subr.bf16.mxu1 %v14600_v33 }
 0x539   : > { %11901 = vmatmul.mubr.msk.bf16.gmra.mrb[40].mxu1 %vm6360_vm0, %v18657_v13 }
 0x53a   : > { %13270 = vmatprep.mubr.msk.bf16.mxu1 %vm6360_vm0, %v18654_v18  ;;  %v6695_v18 = vrot.slane %v6693_v39, 7 }
 0x53c   : > { %v6696_v21 = vor.u32 %v6695_v18, %v6692_v1  ;;  %v6740_v1 = vrot.slane %v6738_v24, 7 }
 0x541   : > { %13271 = vmatmul.mubr.msk.bf16.vlgmr.msra.gmra.mrb[44].mxu1 %vm6360_vm0, %v18655_v51  ;;  %v14608_v51 = vld [vmem:[%s18368_s4 + $0x40] sm:$0xff]  }
 0x542   : > { %13274 = vmatprep.mubr.msk.bf16.mxu1 %vm6360_vm0, %v18656_v7  ;;  %13279 = vmatpush3.bf16.msra.mxu1 %v14600_v33  ;;  %v6688_v7 = vor.u32 %v6687_v43, %v6684_v25  ;;  %v6556_v33 = vsel %vm790_vm1, %v6553_v3, %v6555_v0  ;;  %v6735_v3 = vshrl.u32 %v6517_v54, 16  ;;  %v6881_v25 = vrot.slane %v6690_v42, 7  ;;  %v14612_v43 = vld [vmem:[%s18368_s4 + $0x60] sm:$0xff]  }
 0x543   : > { %13280 = vmatprep.subr.bf16.mxu1 %v14601_v62  ;;  %v6878_v54 = vshrl.u32 %v17319_v60, 16 }
 0x544   : > { %v6697_v63 = vsel %vm6680_vm5, %v6688_v7, %v6696_v21  ;;  %v6882_v0 = vor.u32 %v6881_v25, %v6693_v39  ;;  %v14613_v39 = vld [vmem:[%s18368_s4 + $0x68] sm:$0xff]  }
 0x546   : > { %13281 = vmatpush3.bf16.msra.mxu1 %v14601_v62 }
 0x547   : > { %13282 = vmatprep.subr.bf16.mxu1 %v14602_v58 }
 0x549   : > { %13275 = vmatmul.mubr.msk.bf16.gmra.mrb[48].mxu1 %vm6360_vm0, %v18657_v13  ;;  %v18658_v13 = vld [vmem:[#allocation53_spill] sm:$0xff] }
 0x54a   : > { %13283 = vmatpush3.bf16.msra.mxu1 %v14602_v58  ;;  %13286 = vmatprep.mubr.msk.bf16.mxu1 %vm1269_vm12, %v6546_v5  ;;  %v6701_v62 = vrot.slane %v18658_v13, 6  ;;  %v18659_v58 = vld [vmem:[#allocation54_spill] sm:$0xff]  ;;  %v6713_v5 = vrot.slane %v16078_v23, 7  ;;  %v6884_v7 = vrot.slane %v18658_v13, 7 }
 0x54b   : > { %13284 = vmatprep.subr.bf16.mxu1 %v14603_v47  ;;  %v6704_v56 = vrot.slane %v18659_v58, 7 }
 0x54e   : > { %13285 = vmatpush3.bf16.msra.mxu1 %v14603_v47  ;;  %v6710_v47 = vrot.slane %v16069_v11, 6 }
 0x54f   : > { %13298 = vmatprep.subr.bf16.mxu1 %v14604_v17 }
 0x550   : > { %v6714_v40 = vor.u32 %v6713_v5, %v6710_v47  ;;  %v6893_v5 = vrot.slane %v17365_v2, 7 }
 0x551   : > { %13287 = vmatmul.mubr.msk.bf16.vlgmr.msra.gmra.mrb[52].mxu1 %vm1269_vm12, %v6548_v55  ;;  %v6719_v55 = vrot.slane %v16093_v61, 6 }
 0x552   : > { %13290 = vmatprep.mubr.msk.bf16.mxu1 %vm1269_vm12, %v6550_v52  ;;  %13299 = vmatpush3.bf16.msra.mxu1 %v14604_v17  ;;  %v6705_v17 = vor.u32 %v6704_v56, %v6701_v62  ;;  %v6722_v52 = vrot.slane %v16096_v8, 7  ;;  %v6885_v62 = vor.u32 %v6884_v7, %v18659_v58 }
 0x553   : > { %13300 = vmatprep.subr.bf16.mxu1 %v14605_v35 }
 0x554   : > { %v6723_v50 = vor.u32 %v6722_v52, %v6719_v55  ;;  %v6886_v56 = vsel %vm6876_vm6, %v6881_v25, %v6885_v62 }
 0x556   : > { %13301 = vmatpush3.bf16.msra.mxu1 %v14605_v35  ;;  %v6706_v35 = vsel %vm6680_vm5, %v6696_v21, %v6705_v17  ;;  %v6733_v18 = vsel %vm6680_vm5, %v6723_v50, %v6732_v31  ;;  %v6880_v21 = vrot.slane %v6878_v54, 7  ;;  %v7085_v54 = vrot.slane %v16093_v61, 4 }
 0x557   : > { %13302 = vmatprep.subr.bf16.mxu1 %v14606_v6 }
 0x558   : > { %v6883_v60 = vsel %vm6876_vm6, %v6880_v21, %v6882_v0  ;;  %v14617_v21 = vld [vmem:[%s18368_s4 + $0x88] sm:$0xff]  }
 0x559   : > { %13291 = vmatmul.mubr.msk.bf16.gmra.mrb[56].mxu1 %vm1269_vm12, %v6552_v29  ;;  %v6724_v29 = vsel %vm6680_vm5, %v6714_v40, %v6723_v50  ;;  %v7067_v50 = vrot.slane %v18658_v13, 4 }
 0x55a   : > { %13294 = vmatprep.mubr.msk.bf16.mxu1 %vm1269_vm12, %v6554_v16  ;;  %13303 = vmatpush3.bf16.msra.mxu1 %v14606_v6  ;;  %v6715_v6 = vsel %vm6680_vm5, %v6705_v17, %v6714_v40  ;;  %v6737_v16 = vrot.slane %v6735_v3, 6  ;;  %v14614_v17 = vld [vmem:[%s18368_s4 + $0x70] sm:$0xff]   ;;  %v7070_v3 = vrot.slane %v18659_v58, 5  ;;  %v7076_v58 = vrot.slane %v16069_v11, 4 }
 0x55b   : > { %13304 = vmatprep.subr.bf16.mxu1 %v14607_v41 }
 0x55e   : > { %13305 = vmatpush3.bf16.msra.mxu1 %v14607_v41  ;;  %v14611_v41 = vld [vmem:[%s18368_s4 + $0x58] sm:$0xff]  }
 0x55f   : > { %13318 = vmatprep.subr.bf16.mxu1 %v14608_v51 }
 0x561   : > { %13295 = vmatmul.mubr.msk.bf16.gmra.mrb[60].mxu1 %vm1269_vm12, %v6556_v33  ;;  %v6887_v33 = vrot.slane %v16069_v11, 7 }
 0x562   : > { %13306 = vmatprep.mubr.msk.bf16.mxu1 %vm1269_vm12, %v6697_v63  ;;  %v6890_v63 = vrot.slane %v16093_v61, 7 }
 0x563   : > { %v6888_v14 = vor.u32 %v6887_v33, %v16078_v23 }
 0x564   : > { %v6891_v40 = vor.u32 %v6890_v63, %v16096_v8 }
 0x565   : > { %v6889_v47 = vsel %vm6876_vm6, %v6884_v7, %v6888_v14  ;;  %v7106_v7 = vrot.slane %v16114_v37, 5 }
 0x566   : > { %v6892_v38 = vsel %vm6876_vm6, %v6887_v33, %v6891_v40  ;;  %v14618_v33 = vld [vmem:[%s18368_s4 + $0x90] sm:$0xff]  }
 0x569   : > { %13307 = vmatmul.mubr.msk.bf16.vlgmr.msra.gmra.mrb[52].mxu1 %vm1269_vm12, %v6706_v35  ;;  %v6894_v35 = vor.u32 %v6893_v5, %v17367_v45 }
 0x56a   : > { %13310 = vmatprep.mubr.msk.bf16.mxu1 %vm1269_vm12, %v6715_v6  ;;  %13319 = vmatpush3.bf16.msra.mxu1 %v14608_v51  ;;  %v6741_v51 = vor.u32 %v6740_v1, %v6737_v16  ;;  %v14615_v6 = vld [vmem:[%s18368_s4 + $0x78] sm:$0xff]   ;;  %v7071_v16 = vor.u32 %v7070_v3, %v7067_v50  ;;  %v14622_v3 = vld [vmem:[%s18368_s4 + $0xb0] sm:$0xff]  }
 0x56b   : > { %13320 = vmatprep.subr.bf16.mxu1 %v14609_v57  ;;  %v18663_v50 = vld [vmem:[#allocation57_spill] sm:$0xff] }
 0x56c   : > { %v6742_v42 = vsel %vm6680_vm5, %v6732_v31, %v6741_v51 }
 0x56e   : > { %13321 = vmatpush3.bf16.msra.mxu1 %v14609_v57  ;;  %v7039_v57 = vld [vmem:[#allocation3 + $0x8] sm:$0xf0] }
 0x56f   : > { %13322 = vmatprep.subr.bf16.mxu1 %v14610_v20  ;;  %v7057_v55 = vshrl.u32 %v7039_v57, 16  ;;  %v7060_v52 = vshll.u32 %v7039_v57, 16  ;;  %v7253_v57 = vld [vmem:[#allocation3 + $0x8] sm:$0xe0] }
 0x571   : > { %13311 = vmatmul.mubr.msk.bf16.gmra.mrb[56].mxu1 %vm1269_vm12, %v6724_v29  ;;  %v7059_v24 = vrot.slane %v7057_v55, 4  ;;  %v7062_v31 = vrot.slane %v7060_v52, 5  ;;  %v6902_v29 = vor.u32 %v16114_v37, %v6899_v19  ;;  %v18660_v52 = vld [vmem:[#allocation52_spill] sm:$0xff]  ;;  %v14621_v19 = vld [vmem:[%s18368_s4 + $0xa8] sm:$0xff]  }
 0x572   : > { %13314 = vmatprep.mubr.msk.bf16.mxu1 %vm1269_vm12, %v6733_v18  ;;  %13323 = vmatpush3.bf16.msra.mxu1 %v14610_v20  ;;  %v6895_v20 = vsel %vm6876_vm6, %v6890_v63, %v6894_v35  ;;  %v7079_v18 = vrot.slane %v16078_v23, 5  ;;  %v7094_v23 = vrot.slane %v17365_v2, 4  ;;  %v7271_v35 = vrot.slane %v7253_v57, 5 }
 0x573   : > { %13324 = vmatprep.subr.bf16.mxu1 %v14611_v41  ;;  %v7063_v1 = vor.u32 %v7062_v31, %v7059_v24  ;;  %v6903_v13 = vsel %vm6876_vm6, %v6893_v5, %v6902_v29  ;;  %v14789_v24 = vld [vmem:[#allocation3 + $0x30] sm:$0xff]  ;;  %v7434_v29 = vshll.u32 %v7253_v57, 16 }
 0x574   : > { %v7080_v51 = vor.u32 %v7079_v18, %v7076_v58  ;;  %v7280_v31 = vrot.slane %v14789_v24, 5  ;;  %v7650_v24 = vrot.slane %v17367_v45, 3 }
 0x575   : > { %v7072_v25 = vsel %vm7055_vm7, %v7063_v1, %v7071_v16  ;;  %v18664_v1 = vld [vmem:[#allocation58_spill] sm:$0xff] }
 0x576   : > { %13325 = vmatpush3.bf16.msra.mxu1 %v14611_v41  ;;  %v14616_v41 = vld [vmem:[%s18368_s4 + $0x80] sm:$0xff]   ;;  %v7081_v11 = vsel %vm7055_vm7, %v7071_v16, %v7080_v51  ;;  %v14623_v16 = vld [vmem:[%s18368_s4 + $0xb8] sm:$0xff]  }
 0x577   : > { %13338 = vmatprep.subr.bf16.mxu1 %v14612_v43 }
 0x579   : > { %13315 = vmatmul.mubr.msk.bf16.gmra.mrb[60].mxu1 %vm1269_vm12, %v6742_v42  ;;  %v7097_v42 = vrot.slane %v17367_v45, 5 }
 0x57a   : > { %13326 = vmatprep.mubr.msk.bf16.mxu1 %vm1269_vm12, %v6883_v60  ;;  %v7045_v60 = vld [vmem:[#allocation3 + $0x38] sm:$0x1f] }
 0x57b   : > { %v7098_v62 = vor.u32 %v7097_v42, %v7094_v23  ;;  %v7110_v14 = vshrl.u32 %v7045_v60, 16  ;;  %v7450_v23 = vrot.slane %v17365_v2, 5  ;;  %v7451_v42 = vrot.slane %v17367_v45, 6 }
 0x57d   : > { %v7112_v63 = vrot.slane %v7110_v14, 4 }
 0x581   : > { %13327 = vmatmul.mubr.msk.bf16.vlgmr.msra.gmra.mrb[52].mxu1 %vm1269_vm12, %v6886_v56 }
 0x582   : > { %13330 = vmatprep.mubr.msk.bf16.mxu1 %vm1269_vm12, %v6889_v47  ;;  %13339 = vmatpush3.bf16.msra.mxu1 %v14612_v43  ;;  %v7088_v43 = vrot.slane %v16096_v8, 5  ;;  %v7103_v8 = vrot.slane %v16111_v59, 4  ;;  %v14619_v59 = vld [vmem:[%s18368_s4 + $0x98] sm:$0xff]  }
 0x583   : > { %13340 = vmatprep.subr.bf16.mxu1 %v14613_v39 }
 0x584   : > { %v7089_v0 = vor.u32 %v7088_v43, %v7085_v54  ;;  %v7107_v56 = vor.u32 %v7106_v7, %v7103_v8  ;;  %v14624_v54 = vld [vmem:[%s18368_s4 + $0xc0] sm:$0xff]   ;;  %v7282_v43 = vrot.slane %v7045_v60, 5  ;;  %v7419_v8 = vld [vmem:[#allocation3 + $0x38] sm:$0x3f] }
 0x585   : > { %v18668_v7 = vld [vmem:[#allocation62_spill] sm:$0xff]  ;;  %v7462_v14 = vshll.u32 %v7419_v8, 16 }
 0x586   : > { %13341 = vmatpush3.bf16.msra.mxu1 %v14613_v39  ;;  %v7090_v61 = vsel %vm7055_vm7, %v7080_v51, %v7089_v0  ;;  %v7113_v39 = vshll.u32 %v7045_v60, 16  ;;  %v7099_v37 = vsel %vm7055_vm7, %v7089_v0, %v7098_v62  ;;  %v7108_v5 = vsel %vm7055_vm7, %v7098_v62, %v7107_v56  ;;  %v14626_v60 = vld [vmem:[%s18368_s4 + $0xd0] sm:$0xff]  }
 0x587   : > { %13342 = vmatprep.subr.bf16.mxu1 %v14614_v17  ;;  %v7283_v0 = vsel %vm7270_vm14, %v7280_v31, %v7282_v43  ;;  %v7459_v62 = vshrl.u32 %v7419_v8, 16  ;;  %v7608_v43 = vld [vmem:[#allocation3 + $0x40] sm:$0x7] }
 0x588   : > { %v7115_v47 = vrot.slane %v7113_v39, 5  ;;  %v7602_v39 = vld [vmem:[#allocation3 + $0x10] sm:$0xfc] }
 0x589   : > { %13331 = vmatmul.mubr.msk.bf16.gmra.mrb[56].mxu1 %vm1269_vm12, %v6892_v38 }
 0x58a   : > { %13334 = vmatprep.mubr.msk.bf16.mxu1 %vm1269_vm12, %v6895_v20  ;;  %13343 = vmatpush3.bf16.msra.mxu1 %v14614_v17  ;;  %v14620_v17 = vld [vmem:[%s18368_s4 + $0xa0] sm:$0xff]   ;;  %v7116_v40 = vor.u32 %v7115_v47, %v7112_v63  ;;  %v18662_v20 = vld [vmem:[#allocation56_spill] sm:$0xff] }
 0x58b   : > { %13344 = vmatprep.subr.bf16.mxu1 %v14615_v6  ;;  %v18669_v63 = vld [vmem:[#allocation60_spill] sm:$0xff] }
 0x58c   : > { %v7117_v55 = vsel %vm7055_vm7, %v7107_v56, %v7116_v40  ;;  %v7619_v56 = vshrl.u32 %v7602_v39, 16  ;;  %v18670_v40 = vld [vmem:[#allocation63_spill] sm:$0xff] }
 0x58e   : > { %13345 = vmatpush3.bf16.msra.mxu1 %v14615_v6  ;;  %v18661_v6 = vrot.slane %v18660_v52, 5  ;;  %v14628_v52 = vld [vmem:[%s18368_s4 + $0xe0] sm:$0xff]  }
 0x58f   : > { %13358 = vmatprep.subr.bf16.mxu1 %v14616_v41 }
 0x590   : > { %v7273_v38 = vsel %vm7270_vm14, %v7271_v35, %v18661_v6  ;;  %v7621_v35 = vrot.slane %v7619_v56, 2  ;;  %v14633_v56 = vld [vmem:[%s18368_s4 + $0x108] sm:$0xff]  }
 0x591   : > { %13335 = vmatmul.mubr.msk.bf16.gmra.mrb[60].mxu1 %vm1269_vm12, %v6903_v13  ;;  %v18665_v13 = vrot.slane %v16039_v49, 5  ;;  %v18666_v49 = vld [vmem:[#allocation59_spill] sm:$0xff] }
 0x592   : > { %13346 = vmatprep.mubr.msk.bf16.mxu1 %vm1269_vm12, %v7072_v25  ;;  %v7436_v25 = vrot.slane %v7434_v29, 6 }
 0x593   : > { %v7281_v58 = vsel %vm7270_vm14, %v18665_v13, %v7280_v31  ;;  %v17529_v31 = vld [vmem:[#allocation3 + $0x38] sm:$0xff]  ;;  %v18672_v13 = vld [vmem:[#allocation69_spill] sm:$0xff] }
 0x594   : > { %v7663_v29 = vshrl.u32 %v17529_v31, 16 }
 0x599   : > { %13347 = vmatmul.mubr.msk.bf16.vlgmr.msra.gmra.mrb[52].mxu1 %vm1269_vm12, %v7081_v11  ;;  %v14625_v11 = vld [vmem:[%s18368_s4 + $0xc8] sm:$0xff]  }
 0x59a   : > { %13350 = vmatprep.mubr.msk.bf16.mxu1 %vm1269_vm12, %v7090_v61  ;;  %13359 = vmatpush3.bf16.msra.mxu1 %v14616_v41  ;;  %v7431_v41 = vshrl.u32 %v7253_v57, 16  ;;  %v18667_v61 = vld [vmem:[#allocation61_spill] sm:$0xff] }
 0x59b   : > { %13360 = vmatprep.subr.bf16.mxu1 %v14617_v21 }
 0x59c   : > { %v7433_v18 = vrot.slane %v7431_v41, 5 }
 0x59e   : > { %13361 = vmatpush3.bf16.msra.mxu1 %v14617_v21  ;;  %v7437_v51 = vor.u32 %v7436_v25, %v7433_v18  ;;  %v7665_v25 = vrot.slane %v7663_v29, 2 }
 0x59f   : > { %13362 = vmatprep.subr.bf16.mxu1 %v14618_v33 }
 0x5a0   : > { %v7441_v21 = vsel %vm7429_vm3, %v7437_v51, %v18666_v49  ;;  %v14630_v51 = vld [vmem:[%s18368_s4 + $0xf0] sm:$0xff]   ;;  %v7675_v49 = vshll.u32 %v7608_v43, 16 }
 0x5a1   : > { %13351 = vmatmul.mubr.msk.bf16.gmra.mrb[56].mxu1 %vm1269_vm12, %v7099_v37  ;;  %v14627_v37 = vld [vmem:[%s18368_s4 + $0xd8] sm:$0xff]  }
 0x5a2   : > { %13354 = vmatprep.mubr.msk.bf16.mxu1 %vm1269_vm12, %v7108_v5  ;;  %13363 = vmatpush3.bf16.msra.mxu1 %v14618_v33  ;;  %v7452_v33 = vor.u32 %v7451_v42, %v7450_v23  ;;  %v7461_v5 = vrot.slane %v7459_v62, 5 }
 0x5a3   : > { %13364 = vmatprep.subr.bf16.mxu1 %v14619_v59 }
 0x5a4   : > { %v7453_v47 = vsel %vm7429_vm3, %v18669_v63, %v7452_v33  ;;  %v7457_v57 = vsel %vm7429_vm3, %v7452_v33, %v18670_v40  ;;  %v7815_v33 = vld [vmem:[#allocation3 + $0x10] sm:$0xf8]  ;;  %v7841_v63 = vrot.slane %v17529_v31, 3 }
 0x5a5   : > { %v7832_v62 = vrot.slane %v7815_v33, 3 }
 0x5a6   : > { %13365 = vmatpush3.bf16.msra.mxu1 %v14619_v59  ;;  %v7622_v59 = vshll.u32 %v7602_v39, 16  ;;  %v18674_v39 = vrot.slane %v16029_v30, 3  ;;  %v14634_v30 = vld [vmem:[%s18368_s4 + $0x110] sm:$0xff]  }
 0x5a7   : > { %13378 = vmatprep.subr.bf16.mxu1 %v14620_v17 }
 0x5a9   : > { %13355 = vmatmul.mubr.msk.bf16.gmra.mrb[60].mxu1 %vm1269_vm12, %v7117_v55  ;;  %v7624_v55 = vrot.slane %v7622_v59, 3  ;;  %v18675_v59 = vld [vmem:[#allocation70_spill] sm:$0xff] }
 0x5aa   : > { %13366 = vmatprep.mubr.msk.bf16.mxu1 %vm1269_vm12, %v7273_v38 }
 0x5ab   : > { %v7625_v38 = vor.u32 %v7624_v55, %v7621_v35 }
 0x5b1   : > { %13367 = vmatmul.mubr.msk.bf16.vlgmr.msra.gmra.mrb[52].mxu1 %vm1269_vm12, %v18662_v20  ;;  %v18671_v20 = vld [vmem:[#allocation66_spill] sm:$0xff] }
 0x5b2   : > { %13370 = vmatprep.mubr.msk.bf16.mxu1 %vm1269_vm12, %v18663_v50  ;;  %13379 = vmatpush3.bf16.msra.mxu1 %v14620_v17  ;;  %v7464_v17 = vrot.slane %v7462_v14, 6  ;;  %v7634_v50 = vsel %vm2638_vm15, %v7625_v38, %v18671_v20  ;;  %v7843_v38 = vrot.slane %v7608_v43, 3 }
 0x5b3   : > { %13380 = vmatprep.subr.bf16.mxu1 %v14621_v19 }
 0x5b4   : > { %v7465_v6 = vor.u32 %v7464_v17, %v7461_v5  ;;  %v7994_v5 = vshll.u32 %v7815_v33, 16  ;;  %v14635_v17 = vld [vmem:[%s18368_s4 + $0x118] sm:$0xff]   ;;  %v7844_v20 = vsel %vm2841_vm2, %v7841_v63, %v7843_v38 }
 0x5b6   : > { %13381 = vmatpush3.bf16.msra.mxu1 %v14621_v19  ;;  %v7466_v19 = vsel %vm7429_vm3, %v18670_v40, %v7465_v6  ;;  %v18677_v40 = vld [vmem:[#allocation72_spill] sm:$0xff]  ;;  %v7996_v6 = vrot.slane %v7994_v5, 4 }
 0x5b7   : > { %13382 = vmatprep.subr.bf16.mxu1 %v14622_v3 }
 0x5b9   : > { %13371 = vmatmul.mubr.msk.bf16.gmra.mrb[56].mxu1 %vm1269_vm12, %v18664_v1  ;;  %v14629_v1 = vld [vmem:[%s18368_s4 + $0xe8] sm:$0xff]  }
 0x5ba   : > { %13374 = vmatprep.mubr.msk.bf16.mxu1 %vm1269_vm12, %v7281_v58  ;;  %13383 = vmatpush3.bf16.msra.mxu1 %v14622_v3  ;;  %v7647_v3 = vrot.slane %v17365_v2, 2  ;;  %v18673_v58 = vld [vmem:[#allocation67_spill] sm:$0xff] }
 0x5bb   : > { %13384 = vmatprep.subr.bf16.mxu1 %v14623_v16 }
 0x5bc   : > { %v7651_v41 = vor.u32 %v7650_v24, %v7647_v3  ;;  %v8006_v3 = vrot.slane %v17365_v2, 3  ;;  %v8007_v24 = vrot.slane %v17367_v45, 4 }
 0x5be   : > { %13385 = vmatpush3.bf16.msra.mxu1 %v14623_v16  ;;  %v7666_v16 = vshll.u32 %v17529_v31, 16  ;;  %v7652_v18 = vsel %vm2638_vm15, %v18673_v58, %v7651_v41  ;;  %v7661_v23 = vsel %vm2638_vm15, %v7651_v41, %v16276_v12  ;;  %v8008_v41 = vor.u32 %v8007_v24, %v8006_v3 }
 0x5bf   : > { %13398 = vmatprep.subr.bf16.mxu1 %v14624_v54  ;;  %v8014_v58 = vrot.slane %v7663_v29, 3 }
 0x5c1   : > { %13375 = vmatmul.mubr.msk.bf16.gmra.mrb[60].mxu1 %vm1269_vm12, %v7283_v0  ;;  %v7672_v0 = vshrl.u32 %v7608_v43, 16 }
 0x5c2   : > { %13386 = vmatprep.mubr.msk.bf16.mxu1 %vm1269_vm12, %v7441_v21 }
 0x5c3   : > { %v7674_v42 = vrot.slane %v7672_v0, 2  ;;  %v14638_v0 = vld [vmem:[%s18370_s6 + $0x40] sm:$0xff]  }
 0x5c9   : > { %13387 = vmatmul.mubr.msk.bf16.vlgmr.msra.gmra.mrb[52].mxu1 %vm1269_vm12, %v18667_v61  ;;  %v7677_v61 = vrot.slane %v7675_v49, 3  ;;  %v14639_v49 = vld [vmem:[%s18370_s6 + $0x48] sm:$0xff]  }
 0x5ca   : > { %13390 = vmatprep.mubr.msk.bf16.mxu1 %vm1269_vm12, %v18668_v7  ;;  %13399 = vmatpush3.bf16.msra.mxu1 %v14624_v54  ;;  %v7668_v54 = vrot.slane %v7666_v16, 3  ;;  %v14632_v7 = vld [vmem:[%s18368_s4 + $0x100] sm:$0xff]  }
 0x5cb   : > { %13400 = vmatprep.subr.bf16.mxu1 %v14625_v11 }
 0x5cc   : > { %v7669_v21 = vor.u32 %v7668_v54, %v7665_v25  ;;  %v8013_v54 = vsel %vm2995_vm4, %v8008_v41, %v16426_v9 }
 0x5ce   : > { %13401 = vmatpush3.bf16.msra.mxu1 %v14625_v11  ;;  %v14631_v11 = vld [vmem:[%s18368_s4 + $0xf8] sm:$0xff]   ;;  %v7670_v8 = vsel %vm2638_vm15, %v16276_v12, %v7669_v21  ;;  %v7834_v12 = vsel %vm2841_vm2, %v7832_v62, %v18674_v39 }
 0x5cf   : > { %13402 = vmatprep.subr.bf16.mxu1 %v14626_v60 }
 0x5d1   : > { %13391 = vmatmul.mubr.msk.bf16.gmra.mrb[56].mxu1 %vm1269_vm12, %v7453_v47  ;;  %v7991_v47 = vshrl.u32 %v7815_v33, 16 }
 0x5d2   : > { %13394 = vmatprep.mubr.msk.bf16.mxu1 %vm1269_vm12, %v7457_v57  ;;  %13403 = vmatpush3.bf16.msra.mxu1 %v14626_v60  ;;  %v7678_v60 = vor.u32 %v7677_v61, %v7674_v42  ;;  %v18678_v57 = vld [vmem:[#allocation55_spill] sm:$0xff]  ;;  %v12060_v42 = vld [vmem:[%s18369_s5] ss:$0 sm:$0xff] }
 0x5d3   : > { %13404 = vmatprep.subr.bf16.mxu1 %v14627_v37  ;;  %v18679_v35 = vrot.slane %v18678_v57, 3 }
 0x5d4   : > { %v7679_v14 = vsel %vm2638_vm15, %v7669_v21, %v7678_v60  ;;  %v14640_v21 = vld [vmem:[%s18370_s6 + $0x50] sm:$0xff]  }
 0x5d5   : > { %v7842_v55 = vsel %vm2841_vm2, %v18679_v35, %v7841_v63 }
 0x5d6   : > { %13405 = vmatpush3.bf16.msra.mxu1 %v14627_v37  ;;  %v18676_v37 = vld [vmem:[#allocation71_spill] sm:$0xff] }
 0x5d7   : > { %13418 = vmatprep.subr.bf16.mxu1 %v14628_v52 }
 0x5d9   : > { %13395 = vmatmul.mubr.msk.bf16.gmra.mrb[60].mxu1 %vm1269_vm12, %v7466_v19 }
 0x5da   : > { %13406 = vmatprep.mubr.msk.bf16.mxu1 %vm1269_vm12, %v7634_v50 }
 0x5e1   : > { %13407 = vmatmul.mubr.msk.bf16.vlgmr.msra.gmra.mrb[52].mxu1 %vm1269_vm12, %v18672_v13 }
 0x5e2   : > { %13410 = vmatprep.mubr.msk.bf16.mxu1 %vm1269_vm12, %v7652_v18  ;;  %13419 = vmatpush3.bf16.msra.mxu1 %v14628_v52  ;;  %v7993_v52 = vrot.slane %v7991_v47, 3  ;;  %v8015_v18 = vrot.slane %v7666_v16, 4  ;;  %v14636_v16 = vld [vmem:[%s18370_s6 + $0x30] sm:$0xff]  }
 0x5e3   : > { %13420 = vmatprep.subr.bf16.mxu1 %v14629_v1 }
 0x5e4   : > { %v7997_v19 = vor.u32 %v7996_v6, %v7993_v52  ;;  %v8016_v25 = vor.u32 %v8015_v18, %v8014_v58  ;;  %v18681_v58 = vld [vmem:[#allocation74_spill] sm:$0xff] }
 0x5e6   : > { %13421 = vmatpush3.bf16.msra.mxu1 %v14629_v1  ;;  %v8001_v50 = vsel %vm2995_vm4, %v7997_v19, %v16388_v28  ;;  %v18680_v1 = vld [vmem:[#allocation73_spill] sm:$0xff]  ;;  %v7980_v28 = vld [vmem:[#allocation3 + $0x40] sm:$0xf] }
 0x5e7   : > { %13422 = vmatprep.subr.bf16.mxu1 %v14630_v51  ;;  %v8009_v13 = vsel %vm2995_vm4, %v18680_v1, %v8008_v41  ;;  %v8019_v2 = vshrl.u32 %v7980_v28, 16  ;;  %v8022_v45 = vshll.u32 %v7980_v28, 16 }
 0x5e9   : > { %13411 = vmatmul.mubr.msk.bf16.gmra.mrb[56].mxu1 %vm1269_vm12, %v7661_v23  ;;  %v8021_v43 = vrot.slane %v8019_v2, 3  ;;  %v17635_v23 = vld [vmem:[%s18370_s6] sm:$0xff]  }
 0x5ea   : > { %13414 = vmatprep.mubr.msk.bf16.mxu1 %vm1269_vm12, %v7670_v8  ;;  %13423 = vmatpush3.bf16.msra.mxu1 %v14630_v51  ;;  %v8017_v51 = vsel %vm2995_vm4, %v16426_v9, %v8016_v25  ;;  %v14637_v9 = vld [vmem:[%s18370_s6 + $0x38] sm:$0xff]  }
 0x5eb   : > { %13424 = vmatprep.subr.bf16.mxu1 %v14631_v11 }
 0x5ee   : > { %13425 = vmatpush3.bf16.msra.mxu1 %v14631_v11  ;;  %v14641_v11 = vld [vmem:[%s18370_s6 + $0x58] sm:$0xff]  }
 0x5ef   : > { %13438 = vmatprep.subr.bf16.mxu1 %v14632_v7 }
 0x5f1   : > { %13415 = vmatmul.mubr.msk.bf16.gmra.mrb[60].mxu1 %vm1269_vm12, %v7679_v14 }
 0x5f2   : > { %13426 = vmatprep.mubr.msk.bf16.mxu1 %vm1269_vm12, %v7834_v12 }
 0x5f9   : > { %13427 = vmatmul.mubr.msk.bf16.vlgmr.msra.gmra.mrb[52].mxu1 %vm1269_vm12, %v18675_v59 }
 0x5fa   : > { %13430 = vmatprep.mubr.msk.bf16.mxu1 %vm1269_vm12, %v18676_v37  ;;  %13439 = vmatpush3.bf16.msra.mxu1 %v14632_v7 }
 0x5fb   : > { %13440 = vmatprep.subr.bf16.mxu1 %v14633_v56 }
 0x5fe   : > { %13441 = vmatpush3.bf16.msra.mxu1 %v14633_v56 }
 0x5ff   : > { %13442 = vmatprep.subr.bf16.mxu1 %v14634_v30 }
 0x601   : > { %13431 = vmatmul.mubr.msk.bf16.gmra.mrb[56].mxu1 %vm1269_vm12, %v18677_v40 }
 0x602   : > { %13434 = vmatprep.mubr.msk.bf16.mxu1 %vm1269_vm12, %v7842_v55  ;;  %13443 = vmatpush3.bf16.msra.mxu1 %v14634_v30 }
 0x603   : > { %13444 = vmatprep.subr.bf16.mxu1 %v14635_v17 }
 0x606   : > { %13445 = vmatpush3.bf16.msra.mxu1 %v14635_v17 }
 0x607   : > { %13458 = vmatprep.subr.bf16.mxu1 %v14636_v16 }
 0x609   : > { %13435 = vmatmul.mubr.msk.bf16.gmra.mrb[60].mxu1 %vm1269_vm12, %v7844_v20 }
 0x60a   : > { %13446 = vmatprep.mubr.msk.bf16.mxu1 %vm1269_vm12, %v8001_v50 }
 0x611   : > { %13447 = vmatmul.mubr.msk.bf16.vlgmr.msra.gmra.mrb[52].mxu1 %vm1269_vm12, %v16406_v48  ;;  %v8024_v48 = vrot.slane %v8022_v45, 4 }
 0x612   : > { %13450 = vmatprep.mubr.msk.bf16.mxu1 %vm1269_vm12, %v8009_v13  ;;  %13459 = vmatpush3.bf16.msra.mxu1 %v14636_v16 }
 0x613   : > { %v8025_v31 = vor.u32 %v8024_v48, %v8021_v43  ;;  %13460 = vmatprep.subr.bf16.mxu1 %v14637_v9  ;;  %v17652_v48 = vld [vmem:[#allocation4] sm:$0x80] }
 0x615   : > { %v8026_v29 = vsel %vm2995_vm4, %v8016_v25, %v8025_v31 }
 0x616   : > { %13461 = vmatpush3.bf16.msra.mxu1 %v14637_v9 }
 0x617   : > { %13462 = vmatprep.subr.bf16.mxu1 %v14638_v0 }
 0x619   : > { %13451 = vmatmul.mubr.msk.bf16.gmra.mrb[56].mxu1 %vm1269_vm12, %v8013_v54 }
 0x61a   : > { %13454 = vmatprep.mubr.msk.bf16.mxu1 %vm1269_vm12, %v8017_v51  ;;  %13463 = vmatpush3.bf16.msra.mxu1 %v14638_v0 }
 0x61b   : > { %13464 = vmatprep.subr.bf16.mxu1 %v14639_v49 }
 0x61e   : > { %13465 = vmatpush3.bf16.msra.mxu1 %v14639_v49  ;;  %v18682_v49 = vld [vmem:[#allocation75_spill] sm:$0xff] }
 0x61f   : > { %13466 = vmatprep.subr.bf16.mxu1 %v14640_v21 }
 0x621   : > { %13455 = vmatmul.mubr.msk.bf16.gmra.mrb[60].mxu1 %vm1269_vm12, %v8026_v29 }
 0x622   : > { %13467 = vmatpush3.bf16.msra.mxu1 %v14640_v21 }
 0x623   : > { %13468 = vmatprep.subr.bf16.mxu1 %v14641_v11 }
 0x626   : > { %13469 = vmatpush3.bf16.msra.mxu1 %v14641_v11 }
 0x627   : > { %13482 = vmatprep.subr.bf16.mxu1 %v17635_v23 }
 0x6e4   : > { %v13448_v61 = vpop.f32.mrb[52].mxu1 }
 0x6e5   : > { %v8171_v8 = vadd.f32 %v13448_v61, %v12060_v42  ;;  %v8103_v7 = vpop.f32.mrb[53].mxu1  ;;  %v8365_v61 = vrot.slane %v17652_v48, 7 }
 0x6e6   : > { %v8169_v60 = vadd.f32 %v12060_v42, %v8103_v7  ;;  %v13449_v33 = vpop.f32.mrb[54].mxu1 }
 0x6e7   : > { %v8183_v62 = vmax.f32 %v8171_v8, 0.0  ;;  %v8172_v14 = vadd.f32 %v13449_v33, %v12060_v42  ;;  %v8106_v39 = vpop.f32.mrb[55].mxu1 }
 0x6e8   : > { %v8181_v12 = vmax.f32 %v8169_v60, 0.0  ;;  %v8170_v56 = vadd.f32 %v12060_v42, %v8106_v39  ;;  %v18683_v60 = vld [vmem:[#allocation76_spill] sm:$0xff] }
 0x6e9   : > { %v8272_v59 = vmul.f32 %v16434_v44, %v8183_v62  ;;  %v8184_v37 = vmax.f32 %v8172_v14, 0.0 }
 0x6ea   : > { %v8270_v30 = vmul.f32 %v16441_v26, %v8181_v12  ;;  %v8182_v63 = vmax.f32 %v8170_v56, 0.0 }
 0x6eb   : > { %v8273_v47 = vmul.f32 %v16451_v46, %v8184_v37 }
 0x6ec   : > { %v8271_v5 = vmul.f32 %v16462_v4, %v8182_v63  ;;  %v13452_v17 = vpop.f32.mrb[56].mxu1 }
 0x6ed   : > { %v8289_v40 = vpack.c.bf16 %v8273_v47, %v8272_v59  ;;  %v8175_v57 = vadd.f32 %v13452_v17, %v12060_v42  ;;  %v8119_v35 = vpop.f32.mrb[57].mxu1  ;;  %v18685_v59 = vld [vmem:[#allocation77_spill] sm:$0xff] }
 0x6ee   : > { %v8288_v55 = vpack.c.bf16 %v8271_v5, %v8270_v30  ;;  %v8173_v52 = vadd.f32 %v12060_v42, %v8119_v35  ;;  %v13453_v6 = vpop.f32.mrb[58].mxu1  ;;  %v14643_v5 = vld [vmem:[%s18370_s6 + $0x8] sm:$0xff]  }
 0x6ef   : > { %v8301_v38 = vrot.slane %v8289_v40, 3  ;;  %v8187_v19 = vmax.f32 %v8175_v57, 0.0  ;;  %v8176_v20 = vadd.f32 %v13453_v6, %v12060_v42  ;;  %v8122_v50 = vpop.f32.mrb[59].mxu1  ;;  %v8325_v40 = vld [vmem:[#allocation4] sm:$0xc0] }
 0x6f0   : > { %v8300_v44 = vrot.slane %v8288_v55, 3  ;;  %v8185_v3 = vmax.f32 %v8173_v52, 0.0  ;;  %v8174_v24 = vadd.f32 %v12060_v42, %v8122_v50  ;;  %v14644_v55 = vld [vmem:[%s18370_s6 + $0x10] sm:$0xff]   ;;  %v8514_v52 = vshrl.u32 %v8325_v40, 16 }
 0x6f1   : > { %v8276_v26 = vmul.f32 %v16465_v32, %v8187_v19  ;;  %v8188_v41 = vmax.f32 %v8176_v20, 0.0  ;;  %v8517_v6 = vshll.u32 %v8325_v40, 16 }
 0x6f2   : > { %v8302_v46 = vsel %vm2841_vm2, %v8300_v44, %v8301_v38  ;;  %8318 = vst.msk [vmem:[#allocation4 + $0x8] sm:$0xe0] %vm8285_vm8, %v8300_v44  ;;  %v8274_v4 = vmul.f32 %v16468_v27, %v8185_v3  ;;  %v8186_v1 = vmax.f32 %v8174_v24, 0.0 }
 0x6f3   : > { %8319 = vst.msk [vmem:[#allocation4 + $0x10] sm:$0xff] %vm6360_vm0, %v8302_v46  ;;  %v8277_v13 = vmul.f32 %v16471_v22, %v8188_v41  ;;  %v14645_v46 = vld [vmem:[%s18370_s6 + $0x18] sm:$0xff]  }
 0x6f4   : > { %v8275_v18 = vmul.f32 %v18681_v58, %v8186_v1  ;;  %v13456_v28 = vpop.f32.mrb[60].mxu1  ;;  %v8519_v1 = vrot.slane %v8517_v6, 7 }
 0x6f5   : > { %v8291_v2 = vpack.c.bf16 %v8277_v13, %v8276_v26  ;;  %v8179_v45 = vadd.f32 %v13456_v28, %v12060_v42  ;;  %v8135_v25 = vpop.f32.mrb[61].mxu1 }
 0x6f6   : > { %v8290_v54 = vpack.c.bf16 %v8275_v18, %v8274_v4  ;;  %v8177_v32 = vadd.f32 %v12060_v42, %v8135_v25  ;;  %v13457_v43 = vpop.f32.mrb[62].mxu1  ;;  %v8516_v4 = vrot.slane %v8514_v52, 6  ;;  %v14646_v18 = vld [vmem:[%s18370_s6 + $0x20] sm:$0xff]  }
 0x6f7   : > { %v8305_v51 = vrot.slane %v8291_v2, 3  ;;  %v8191_v31 = vmax.f32 %v8179_v45, 0.0  ;;  %v8180_v29 = vadd.f32 %v13457_v43, %v12060_v42  ;;  %v8138_v27 = vpop.f32.mrb[63].mxu1 }
 0x6f8   : > { %v8303_v16 = vrot.slane %v8290_v54, 3  ;;  %v8189_v9 = vmax.f32 %v8177_v32, 0.0  ;;  %v8178_v0 = vadd.f32 %v12060_v42, %v8138_v27  ;;  %v18684_v42 = vld [vmem:[#allocation64_spill] sm:$0xff]  ;;  %v8520_v54 = vor.u32 %v8519_v1, %v8516_v4 }
 0x6f9   : > { %v8280_v22 = vmul.f32 %v18682_v49, %v8191_v31  ;;  %v8192_v21 = vmax.f32 %v8180_v29, 0.0  ;;  %v17655_v11 = vld [vmem:[#allocation4 + $0x8] sm:$0xff] }
 0x6fa   : > { %v8304_v8 = vsel %vm2841_vm2, %v8301_v38, %v8303_v16  ;;  %v8306_v7 = vsel %vm2841_vm2, %v8303_v16, %v8305_v51  ;;  %v8278_v33 = vmul.f32 %v18683_v60, %v8189_v9  ;;  %v8190_v62 = vmax.f32 %v8178_v0, 0.0  ;;  %v17661_v14 = vld [vmem:[#allocation4 + $0x10] sm:$0xff] }
 0x6fb   : > { %8320 = vst.msk [vmem:[#allocation4 + $0x18] sm:$0xff] %vm6360_vm0, %v8304_v8  ;;  %8321 = vst.msk [vmem:[#allocation4 + $0x20] sm:$0xff] %vm6360_vm0, %v8306_v7  ;;  %v8281_v39 = vmul.f32 %v18684_v42, %v8192_v21  ;;  %v8366_v12 = vrot.slane %v17655_v11, 7  ;;  %v8368_v56 = vrot.slane %v17661_v14, 7  ;;  %v8522_v44 = vshrl.u32 %v17655_v11, 16  ;;  %v14647_v9 = vld [vmem:[%s18370_s6 + $0x28] sm:$0xff]  }
 0x6fc   : > { %v8279_v37 = vmul.f32 %v18685_v59, %v8190_v62  ;;  %v17708_v28 = vshrl.u32 %v17661_v14, 16  ;;  %v17711_v2 = vshll.u32 %v17661_v14, 16  ;;  %v14648_v7 = vld [vmem:[%s18370_s6 + $0x60] sm:$0xff]  }
 0x6fd   : > { %v8293_v30 = vpack.c.bf16 %v8281_v39, %v8280_v22  ;;  %v8367_v63 = vsel %vm790_vm1, %v8365_v61, %v8366_v12  ;;  %v8369_v47 = vsel %vm790_vm1, %v8366_v12, %v8368_v56  ;;  %v8524_v13 = vrot.slane %v8522_v44, 6 }
 0x6fe   : > { %v8292_v17 = vpack.c.bf16 %v8279_v37, %v8278_v33  ;;  %13470 = vmatprep.mubr.msk.bf16.mxu1 %vm6360_vm0, %v8367_v63  ;;  %v8533_v0 = vrot.slane %v17708_v28, 6  ;;  %v8536_v49 = vrot.slane %v17711_v2, 7  ;;  %v9149_v12 = vrot.slane %v17661_v14, 5  ;;  %v14649_v37 = vld [vmem:[%s18370_s6 + $0x68] sm:$0xff]   ;;  %v14668_v14 = vld [vmem:[%s18370_s6 + $0x100] sm:$0xff]  }
 0x6ff   : > { %v8309_v57 = vrot.slane %v8293_v30, 3  ;;  %13471 = vmatmul.mubr.msk.bf16.vlgmr.msra.gmra.mrb[64].mxu1 %vm6360_vm0, %v8369_v47 }
 0x700   : > { %v8307_v35 = vrot.slane %v8292_v17, 3  ;;  %13483 = vmatpush3.bf16.msra.mxu1 %v17635_v23  ;;  %v8525_v23 = vshll.u32 %v17655_v11, 16  ;;  %v8537_v8 = vor.u32 %v8536_v49, %v8533_v0  ;;  %v14651_v0 = vld [vmem:[%s18370_s6 + $0x78] sm:$0xff]  }
 0x701   : > { %8324 = vst.msk [vmem:[#allocation4 + $0x38] sm:$0x1f] %vm8283_vm9, %v8309_v57  ;;  %13484 = vmatprep.subr.bf16.mxu1 %v14643_v5 }
 0x702   : > { %v8308_v38 = vsel %vm2841_vm2, %v8305_v51, %v8307_v35  ;;  %v8310_v19 = vsel %vm2841_vm2, %v8307_v35, %v8309_v57  ;;  %v17683_v20 = vld [vmem:[#allocation4 + $0x18] sm:$0xff]  ;;  %v17685_v50 = vld [vmem:[#allocation4 + $0x20] sm:$0xff]  ;;  %v8527_v58 = vrot.slane %v8525_v23, 7 }
 0x703   : > { %8322 = vst.msk [vmem:[#allocation4 + $0x28] sm:$0xff] %vm6360_vm0, %v8308_v38  ;;  %8323 = vst.msk [vmem:[#allocation4 + $0x30] sm:$0xff] %vm6360_vm0, %v8310_v19  ;;  %v8370_v3 = vrot.slane %v17683_v20, 7  ;;  %v8372_v24 = vrot.slane %v17685_v50, 7  ;;  %v17720_v31 = vshrl.u32 %v17683_v20, 16  ;;  %v17723_v29 = vshll.u32 %v17683_v20, 16 }
 0x704   : > { %13485 = vmatpush3.bf16.msra.mxu1 %v14643_v5  ;;  %v8528_v32 = vor.u32 %v8527_v58, %v8524_v13  ;;  %v17742_v60 = vshrl.u32 %v17685_v50, 16  ;;  %v17745_v33 = vshll.u32 %v17685_v50, 16  ;;  %v9153_v5 = vrot.slane %v17685_v50, 5 }
 0x705   : > { %v8371_v26 = vsel %vm790_vm1, %v8368_v56, %v8370_v3  ;;  %v8373_v41 = vsel %vm790_vm1, %v8370_v3, %v8372_v24  ;;  %13486 = vmatprep.subr.bf16.mxu1 %v14644_v55  ;;  %v8542_v21 = vrot.slane %v17720_v31, 6  ;;  %v8545_v61 = vrot.slane %v17723_v29, 7 }
 0x706   : > { %13474 = vmatprep.mubr.msk.bf16.mxu1 %vm6360_vm0, %v8371_v26  ;;  %v8529_v22 = vsel %vm6680_vm5, %v8520_v54, %v8528_v32  ;;  %v9151_v56 = vrot.slane %v17683_v20, 5  ;;  %v8538_v59 = vsel %vm6680_vm5, %v8528_v32, %v8537_v8  ;;  %v8551_v30 = vrot.slane %v17742_v60, 6 }
 0x707   : > { %13475 = vmatmul.mubr.msk.bf16.gmra.mrb[68].mxu1 %vm6360_vm0, %v8373_v41  ;;  %v8546_v39 = vor.u32 %v8545_v61, %v8542_v21  ;;  %v8554_v63 = vrot.slane %v17745_v33, 7  ;;  %v9330_v19 = vrot.slane %v17708_v28, 5  ;;  %v9334_v13 = vrot.slane %v17720_v31, 5 }
 0x708   : > { %13487 = vmatpush3.bf16.msra.mxu1 %v14644_v55  ;;  %v17769_v57 = vsel %vm7270_vm14, %v9149_v12, %v9151_v56  ;;  %v17775_v52 = vsel %vm7270_vm14, %v9151_v56, %v9153_v5  ;;  %v9335_v58 = vrot.slane %v17723_v29, 6  ;;  %v9338_v54 = vrot.slane %v17742_v60, 5 }
 0x709   : > { %13488 = vmatprep.subr.bf16.mxu1 %v14645_v46  ;;  %v8547_v55 = vsel %vm6680_vm5, %v8537_v8, %v8546_v39  ;;  %v8555_v3 = vor.u32 %v8554_v63, %v8551_v30  ;;  %v9339_v32 = vrot.slane %v17745_v33, 6  ;;  %v9537_v63 = vrot.slane %v17720_v31, 2 }
 0x70a   : > { %v17713_v45 = vld [vmem:[#allocation4 + $0x28] sm:$0xff]  ;;  %v17715_v25 = vld [vmem:[#allocation4 + $0x30] sm:$0x7f] }
 0x70b   : > { %v8374_v43 = vrot.slane %v17713_v45, 7  ;;  %v8376_v51 = vrot.slane %v17715_v25, 7  ;;  %v17748_v62 = vshrl.u32 %v17713_v45, 16  ;;  %v17751_v42 = vshll.u32 %v17713_v45, 16  ;;  %v17761_v47 = vld [vmem:[#allocation4 + $0x30] sm:$0xff] }
 0x70c   : > { %13489 = vmatpush3.bf16.msra.mxu1 %v14645_v46  ;;  %v9155_v35 = vrot.slane %v17713_v45, 5  ;;  %v17779_v6 = vshrl.u32 %v17761_v47, 16  ;;  %v8567_v26 = vshrl.u32 %v17715_v25, 16  ;;  %v17792_v41 = vshll.u32 %v17761_v47, 16 }
 0x70d   : > { %v8375_v27 = vsel %vm790_vm1, %v8372_v24, %v8374_v43  ;;  %v8377_v16 = vsel %vm790_vm1, %v8374_v43, %v8376_v51  ;;  %13490 = vmatprep.subr.bf16.mxu1 %v14646_v18  ;;  %v8560_v17 = vrot.slane %v17748_v62, 6  ;;  %v8563_v40 = vrot.slane %v17751_v42, 7  ;;  %v14650_v24 = vld [vmem:[%s18370_s6 + $0x70] sm:$0xff]  }
 0x70e   : > { %13478 = vmatprep.mubr.msk.bf16.mxu1 %vm6360_vm0, %v8375_v27  ;;  %v17784_v38 = vsel %vm7270_vm14, %v9153_v5, %v9155_v35  ;;  %v9331_v46 = vrot.slane %v17711_v2, 6  ;;  %v8570_v1 = vshll.u32 %v17715_v25, 16  ;;  %v9342_v43 = vrot.slane %v17748_v62, 5  ;;  %v14652_v5 = vld [vmem:[%s18370_s6 + $0x80] sm:$0xff]  }
 0x70f   : > { %13479 = vmatmul.mubr.msk.bf16.gmra.mrb[72].mxu1 %vm6360_vm0, %v8377_v16  ;;  %v8564_v4 = vor.u32 %v8563_v40, %v8560_v17  ;;  %v8725_v51 = vshrl.u32 %v17652_v48, 16  ;;  %v9336_v27 = vor.u32 %v9335_v58, %v9334_v13  ;;  %v9343_v16 = vrot.slane %v17751_v42, 6 }
 0x710   : > { %13491 = vmatpush3.bf16.msra.mxu1 %v14646_v18  ;;  %13494 = vmatprep.mubr.msk.bf16.mxu1 %vm6360_vm0, %v8529_v22  ;;  %v17798_v18 = vor.u32 %v9331_v46, %v9330_v19  ;;  %v9346_v25 = vrot.slane %v17779_v6, 5  ;;  %v9340_v49 = vor.u32 %v9339_v32, %v9338_v54  ;;  %v9347_v22 = vrot.slane %v17792_v41, 6 }
 0x711   : > { %13492 = vmatprep.subr.bf16.mxu1 %v14647_v9  ;;  %v8569_v21 = vrot.slane %v8567_v26, 6  ;;  %v8572_v61 = vrot.slane %v8570_v1, 7  ;;  %v9344_v8 = vor.u32 %v9343_v16, %v9342_v43  ;;  %v9540_v40 = vrot.slane %v17723_v29, 3  ;;  %v14653_v43 = vld [vmem:[%s18370_s6 + $0x88] sm:$0xff]  }
 0x712   : > { %v17813_v48 = vsel %vm7429_vm3, %v17798_v18, %v9336_v27  ;;  %v17820_v56 = vsel %vm7429_vm3, %v9336_v27, %v9340_v49  ;;  %v9558_v26 = vrot.slane %v17751_v42, 3  ;;  %v9564_v13 = vrot.slane %v17779_v6, 2 }
 0x713   : > { %v17826_v30 = vsel %vm7429_vm3, %v9340_v49, %v9344_v8  ;;  %v8573_v19 = vor.u32 %v8572_v61, %v8569_v21  ;;  %v17844_v1 = vor.u32 %v9540_v40, %v9537_v63  ;;  %v9567_v58 = vrot.slane %v17792_v41, 3  ;;  %v14654_v61 = vld [vmem:[%s18370_s6 + $0x90] sm:$0xff]  }
 0x714   : > { %13493 = vmatpush3.bf16.msra.mxu1 %v14647_v9  ;;  %v8556_v9 = vsel %vm6680_vm5, %v8546_v39, %v8555_v3  ;;  %v8728_v39 = vrot.slane %v8522_v44, 7  ;;  %v8731_v44 = vrot.slane %v17708_v28, 7  ;;  %v9759_v49 = vrot.slane %v17685_v50, 3 }
 0x715   : > { %13506 = vmatprep.subr.bf16.mxu1 %v14648_v7  ;;  %v8574_v27 = vsel %vm6680_vm5, %v8564_v4, %v8573_v19  ;;  %v9763_v21 = vrot.slane %v17761_v47, 3  ;;  %v9939_v40 = vrot.slane %v17723_v29, 4  ;;  %v9942_v19 = vrot.slane %v17742_v60, 3 }
 0x716   : > { %v8729_v46 = vor.u32 %v8728_v39, %v8525_v23 }
 0x717   : > { %13495 = vmatmul.mubr.msk.bf16.vlgmr.msra.gmra.mrb[64].mxu1 %vm6360_vm0, %v8538_v59  ;;  %v17822_v59 = vor.u32 %v9347_v22, %v9346_v25  ;;  %v8732_v25 = vor.u32 %v8731_v44, %v17711_v2  ;;  %v9761_v22 = vrot.slane %v17713_v45, 3  ;;  %v14671_v45 = vld [vmem:[%s18370_s6 + $0x118] sm:$0xff]  }
 0x718   : > { %13498 = vmatprep.mubr.msk.bf16.mxu1 %vm6360_vm0, %v8547_v55  ;;  %13507 = vmatpush3.bf16.msra.mxu1 %v14648_v7  ;;  %v8565_v7 = vsel %vm6680_vm5, %v8555_v3, %v8564_v4  ;;  %v9546_v55 = vrot.slane %v17742_v60, 2  ;;  %v9549_v3 = vrot.slane %v17745_v33, 3  ;;  %v9757_v4 = vrot.slane %v17683_v20, 3  ;;  %v14686_v20 = vld [vmem:[%s18370_s6 + $0x190] sm:$0xff]  }
 0x719   : > { %13508 = vmatprep.subr.bf16.mxu1 %v14649_v37  ;;  %v17835_v17 = vsel %vm7429_vm3, %v9344_v8, %v17822_v59  ;;  %v17888_v50 = vsel %vm2841_vm2, %v9761_v22, %v9763_v21  ;;  %v8733_v63 = vsel %vm6876_vm6, %v8728_v39, %v8732_v25 }
 0x71a   : > { %v9550_v54 = vor.u32 %v9549_v3, %v9546_v55  ;;  %v17880_v8 = vsel %vm2841_vm2, %v9757_v4, %v9759_v49  ;;  %v14655_v55 = vld [vmem:[%s18370_s6 + $0x98] sm:$0xff]   ;;  %v9943_v3 = vrot.slane %v17745_v33, 4 }
 0x71c   : > { %13509 = vmatpush3.bf16.msra.mxu1 %v14649_v37  ;;  %v8727_v37 = vrot.slane %v8725_v51, 7  ;;  %v17851_v51 = vor.u32 %v9567_v58, %v9564_v13  ;;  %v17856_v11 = vsel %vm2638_vm15, %v17844_v1, %v9550_v54  ;;  %v9950_v13 = vrot.slane %v17779_v6, 3 }
 0x71d   : > { %13510 = vmatprep.subr.bf16.mxu1 %v14650_v24  ;;  %v9951_v58 = vrot.slane %v17792_v41, 4 }
 0x71e   : > { %v8730_v16 = vsel %vm6876_vm6, %v8727_v37, %v8729_v46  ;;  %v8737_v46 = vrot.slane %v17742_v60, 7 }
 0x71f   : > { %13499 = vmatmul.mubr.msk.bf16.gmra.mrb[68].mxu1 %vm6360_vm0, %v8556_v9  ;;  %v8734_v9 = vrot.slane %v17720_v31, 7  ;;  %v17910_v25 = vor.u32 %v9951_v58, %v9950_v13 }
 0x720   : > { %13502 = vmatprep.mubr.msk.bf16.mxu1 %vm6360_vm0, %v8565_v7  ;;  %13511 = vmatpush3.bf16.msra.mxu1 %v14650_v24  ;;  %v9555_v24 = vrot.slane %v17748_v62, 2  ;;  %v17883_v7 = vsel %vm2841_vm2, %v9759_v49, %v9761_v22  ;;  %v14656_v49 = vld [vmem:[%s18370_s6 + $0xa0] sm:$0xff]  }
 0x721   : > { %13512 = vmatprep.subr.bf16.mxu1 %v14651_v0  ;;  %v8735_v37 = vor.u32 %v8734_v9, %v17723_v29 }
 0x722   : > { %v9559_v32 = vor.u32 %v9558_v26, %v9555_v24  ;;  %v9946_v24 = vrot.slane %v17748_v62, 3  ;;  %v9947_v26 = vrot.slane %v17751_v42, 4 }
 0x724   : > { %13513 = vmatpush3.bf16.msra.mxu1 %v14651_v0  ;;  %v17859_v23 = vsel %vm2638_vm15, %v9550_v54, %v9559_v32  ;;  %v17867_v0 = vsel %vm2638_vm15, %v9559_v32, %v17851_v51  ;;  %v8736_v54 = vsel %vm6876_vm6, %v8731_v44, %v8735_v37  ;;  %v8740_v32 = vrot.slane %v17748_v62, 7 }
 0x725   : > { %13514 = vmatprep.subr.bf16.mxu1 %v14652_v5  ;;  %v8738_v37 = vor.u32 %v8737_v46, %v17745_v33 }
 0x727   : > { %13503 = vmatmul.mubr.msk.bf16.gmra.mrb[72].mxu1 %vm6360_vm0, %v8574_v27  ;;  %v9944_v27 = vor.u32 %v9943_v3, %v9942_v19  ;;  %v14657_v19 = vld [vmem:[%s18370_s6 + $0xa8] sm:$0xff]   ;;  %v8739_v3 = vsel %vm6876_vm6, %v8734_v9, %v8738_v37  ;;  %v14658_v9 = vld [vmem:[%s18370_s6 + $0xb0] sm:$0xff]  }
 0x728   : > { %13515 = vmatpush3.bf16.msra.mxu1 %v14652_v5  ;;  %13518 = vmatprep.mubr.msk.bf16.mxu1 %vm6360_vm0, %v8730_v16  ;;  %v9938_v5 = vrot.slane %v17720_v31, 3  ;;  %v9948_v16 = vor.u32 %v9947_v26, %v9946_v24  ;;  %v8746_v24 = vrot.slane %v17779_v6, 7 }
 0x729   : > { %13516 = vmatprep.subr.bf16.mxu1 %v14653_v43 }
 0x72a   : > { %v17902_v39 = vor.u32 %v9939_v40, %v9938_v5  ;;  %v17920_v44 = vsel %vm2995_vm4, %v9944_v27, %v9948_v16  ;;  %v8741_v5 = vor.u32 %v8740_v32, %v17751_v42 }
 0x72c   : > { %13517 = vmatpush3.bf16.msra.mxu1 %v14653_v43  ;;  %v8898_v43 = vld [vmem:[#allocation4 + $0x8] sm:$0xf0]  ;;  %v17917_v22 = vsel %vm2995_vm4, %v17902_v39, %v9944_v27  ;;  %v8742_v13 = vsel %vm6876_vm6, %v8737_v46, %v8741_v5  ;;  %v8938_v46 = vrot.slane %v17720_v31, 4  ;;  %v8950_v5 = vrot.slane %v17745_v33, 5 }
 0x72d   : > { %13530 = vmatprep.subr.bf16.mxu1 %v14654_v61  ;;  %v8922_v40 = vshll.u32 %v8898_v43, 16  ;;  %v8956_v33 = vrot.slane %v17748_v62, 4 }
 0x72f   : > { %13519 = vmatmul.mubr.msk.bf16.vlgmr.msra.gmra.mrb[64].mxu1 %vm6360_vm0, %v8733_v63  ;;  %v8919_v63 = vshrl.u32 %v8898_v43, 16  ;;  %v8924_v58 = vrot.slane %v8922_v40, 5  ;;  %v8932_v43 = vrot.slane %v17711_v2, 5 }
 0x730   : > { %13522 = vmatprep.mubr.msk.bf16.mxu1 %vm6360_vm0, %v8736_v54  ;;  %13531 = vmatpush3.bf16.msra.mxu1 %v14654_v61  ;;  %v17925_v61 = vsel %vm2995_vm4, %v9948_v16, %v17910_v25  ;;  %v8929_v54 = vrot.slane %v17708_v28, 4  ;;  %v14659_v28 = vld [vmem:[%s18370_s6 + $0xb8] sm:$0xff]  }
 0x731   : > { %13532 = vmatprep.subr.bf16.mxu1 %v14655_v55  ;;  %v8921_v26 = vrot.slane %v8919_v63, 4  ;;  %v8947_v63 = vrot.slane %v17742_v60, 4 }
 0x732   : > { %v8933_v16 = vor.u32 %v8932_v43, %v8929_v54 }
 0x733   : > { %v8925_v27 = vor.u32 %v8924_v58, %v8921_v26  ;;  %v8951_v31 = vor.u32 %v8950_v5, %v8947_v63  ;;  %v8968_v26 = vrot.slane %v17792_v41, 5  ;;  %v8904_v58 = vld [vmem:[#allocation4 + $0x38] sm:$0x1f] }
 0x734   : > { %13533 = vmatpush3.bf16.msra.mxu1 %v14655_v55  ;;  %v8749_v55 = vor.u32 %v17792_v41, %v8746_v24  ;;  %v8965_v24 = vrot.slane %v17779_v6, 4  ;;  %v8975_v43 = vshll.u32 %v8904_v58, 16  ;;  %v14663_v6 = vld [vmem:[%s18370_s6 + $0xd8] sm:$0xff]   ;;  %v14666_v5 = vld [vmem:[%s18370_s6 + $0xf0] sm:$0xff]  }
 0x735   : > { %13534 = vmatprep.subr.bf16.mxu1 %v14656_v49  ;;  %v8934_v37 = vsel %vm7055_vm7, %v8925_v27, %v8933_v16 }
 0x736   : > { %v8750_v2 = vsel %vm6876_vm6, %v8740_v32, %v8749_v55  ;;  %v14660_v32 = vld [vmem:[%s18370_s6 + $0xc0] sm:$0xff]   ;;  %v8969_v54 = vor.u32 %v8968_v26, %v8965_v24  ;;  %v8977_v27 = vrot.slane %v8975_v43, 5  ;;  %v14673_v26 = vld [vmem:[%s18370_s6 + $0x128] sm:$0xff]  }
 0x737   : > { %13523 = vmatmul.mubr.msk.bf16.gmra.mrb[68].mxu1 %vm6360_vm0, %v8739_v3  ;;  %v14672_v24 = vld [vmem:[%s18370_s6 + $0x120] sm:$0xff]  }
 0x738   : > { %13526 = vmatprep.mubr.msk.bf16.mxu1 %vm6360_vm0, %v8742_v13  ;;  %13535 = vmatpush3.bf16.msra.mxu1 %v14656_v49  ;;  %v8941_v49 = vrot.slane %v17723_v29, 5  ;;  %v14661_v29 = vld [vmem:[%s18370_s6 + $0xc8] sm:$0xff]   ;;  %v14662_v13 = vld [vmem:[%s18370_s6 + $0xd0] sm:$0xff]  }
 0x739   : > { %13536 = vmatprep.subr.bf16.mxu1 %v14657_v19 }
 0x73a   : > { %v8942_v40 = vor.u32 %v8941_v49, %v8938_v46  ;;  %v14665_v49 = vld [vmem:[%s18370_s6 + $0xe8] sm:$0xff]  }
 0x73c   : > { %13537 = vmatpush3.bf16.msra.mxu1 %v14657_v19  ;;  %v8943_v60 = vsel %vm7055_vm7, %v8933_v16, %v8942_v40  ;;  %v8959_v19 = vrot.slane %v17751_v42, 5  ;;  %v8952_v3 = vsel %vm7055_vm7, %v8942_v40, %v8951_v31  ;;  %v8972_v42 = vshrl.u32 %v8904_v58, 16  ;;  %v9127_v16 = vld [vmem:[#allocation4 + $0x8] sm:$0xe0] }
 0x73d   : > { %13538 = vmatprep.subr.bf16.mxu1 %v14658_v9  ;;  %v9323_v40 = vshrl.u32 %v9127_v16, 16 }
 0x73e   : > { %v8960_v62 = vor.u32 %v8959_v19, %v8956_v33  ;;  %v8974_v55 = vrot.slane %v8972_v42, 4  ;;  %v14670_v33 = vld [vmem:[%s18370_s6 + $0x110] sm:$0xff]   ;;  %v14675_v42 = vld [vmem:[%s18370_s6 + $0x138] sm:$0xff]  }
 0x73f   : > { %13527 = vmatmul.mubr.msk.bf16.gmra.mrb[72].mxu1 %vm6360_vm0, %v8750_v2  ;;  %v9148_v2 = vrot.slane %v9127_v16, 5 }
 0x740   : > { %13539 = vmatpush3.bf16.msra.mxu1 %v14658_v9  ;;  %13542 = vmatprep.mubr.msk.bf16.mxu1 %vm6360_vm0, %v8934_v37  ;;  %v8961_v41 = vsel %vm7055_vm7, %v8951_v31, %v8960_v62  ;;  %v8970_v9 = vsel %vm7055_vm7, %v8960_v62, %v8969_v54  ;;  %v8978_v46 = vor.u32 %v8977_v27, %v8974_v55  ;;  %v9326_v31 = vshll.u32 %v9127_v16, 16 }
 0x741   : > { %13540 = vmatprep.subr.bf16.mxu1 %v14659_v28  ;;  %v9150_v63 = vsel %vm7270_vm14, %v9148_v2, %v9149_v12  ;;  %v9157_v12 = vrot.slane %v17761_v47, 5  ;;  %v14678_v2 = vld [vmem:[%s18370_s6 + $0x150] sm:$0xff]   ;;  %v14689_v47 = vld [vmem:[%s18370_s6 + $0x1a8] sm:$0xff]  }
 0x742   : > { %v8979_v37 = vsel %vm7055_vm7, %v8969_v54, %v8978_v46  ;;  %v18058_v46 = vld [vmem:[#allocation4 + $0x38] sm:$0xff] }
 0x744   : > { %13541 = vmatpush3.bf16.msra.mxu1 %v14659_v28  ;;  %v14664_v28 = vld [vmem:[%s18370_s6 + $0xe0] sm:$0xff]  }
 0x745   : > { %13554 = vmatprep.subr.bf16.mxu1 %v14660_v32 }
 0x747   : > { %13543 = vmatmul.mubr.msk.bf16.vlgmr.msra.gmra.mrb[64].mxu1 %vm6360_vm0, %v8943_v60  ;;  %v9328_v60 = vrot.slane %v9326_v31, 6 }
 0x748   : > { %13546 = vmatprep.mubr.msk.bf16.mxu1 %vm6360_vm0, %v8952_v3  ;;  %13555 = vmatpush3.bf16.msra.mxu1 %v14660_v32  ;;  %v14667_v32 = vld [vmem:[%s18370_s6 + $0xf8] sm:$0xff]   ;;  %v9159_v3 = vrot.slane %v8904_v58, 5  ;;  %v9506_v58 = vld [vmem:[#allocation4 + $0x10] sm:$0xfc] }
 0x749   : > { %13556 = vmatprep.subr.bf16.mxu1 %v14661_v29  ;;  %v9530_v43 = vshll.u32 %v9506_v58, 16 }
 0x74b   : > { %v9532_v55 = vrot.slane %v9530_v43, 3 }
 0x74c   : > { %13557 = vmatpush3.bf16.msra.mxu1 %v14661_v29  ;;  %v14669_v29 = vld [vmem:[%s18370_s6 + $0x108] sm:$0xff]  }
 0x74d   : > { %13558 = vmatprep.subr.bf16.mxu1 %v14662_v13 }
 0x74f   : > { %13547 = vmatmul.mubr.msk.bf16.gmra.mrb[68].mxu1 %vm6360_vm0, %v8961_v41  ;;  %v14676_v41 = vld [vmem:[%s18370_s6 + $0x140] sm:$0xff]  }
 0x750   : > { %13550 = vmatprep.mubr.msk.bf16.mxu1 %vm6360_vm0, %v8970_v9  ;;  %13559 = vmatpush3.bf16.msra.mxu1 %v14662_v13  ;;  %v9308_v13 = vld [vmem:[#allocation4 + $0x38] sm:$0x3f] }
 0x751   : > { %13560 = vmatprep.subr.bf16.mxu1 %v14663_v6  ;;  %v9351_v62 = vshrl.u32 %v9308_v13, 16  ;;  %v9354_v54 = vshll.u32 %v9308_v13, 16 }
 0x754   : > { %13561 = vmatpush3.bf16.msra.mxu1 %v14663_v6  ;;  %v9356_v6 = vrot.slane %v9354_v54, 6  ;;  %v14690_v54 = vld [vmem:[%s18374_s10] ss:$12 sps:$4 sm:$0xff]  }
 0x755   : > { %13562 = vmatprep.subr.bf16.mxu1 %v14664_v28 }
 0x757   : > { %13551 = vmatmul.mubr.msk.bf16.gmra.mrb[72].mxu1 %vm6360_vm0, %v8979_v37  ;;  %v18067_v37 = vld [vmem:[#allocation4 + $0x40] sm:$0x7] }
 0x758   : > { %13563 = vmatpush3.bf16.msra.mxu1 %v14664_v28  ;;  %13566 = vmatprep.mubr.msk.bf16.mxu1 %vm6360_vm0, %v9150_v63  ;;  %v14680_v63 = vld [vmem:[%s18370_s6 + $0x160] sm:$0xff]   ;;  %v9767_v13 = vrot.slane %v18067_v37, 3 }
 0x759   : > { %13564 = vmatprep.subr.bf16.mxu1 %v14665_v49 }
 0x75c   : > { %13565 = vmatpush3.bf16.msra.mxu1 %v14665_v49  ;;  %v9571_v49 = vshrl.u32 %v18058_v46, 16 }
 0x75d   : > { %13578 = vmatprep.subr.bf16.mxu1 %v14666_v5 }
 0x75e   : > { %v9954_v43 = vrot.slane %v9571_v49, 3 }
 0x75f   : > { %13567 = vmatmul.mubr.msk.bf16.vlgmr.msra.gmra.mrb[64].mxu1 %vm6360_vm0, %v17769_v57  ;;  %v9158_v57 = vsel %vm7270_vm14, %v9155_v35, %v9157_v12  ;;  %v9160_v35 = vsel %vm7270_vm14, %v9157_v12, %v9159_v3  ;;  %v14684_v3 = vld [vmem:[%s18370_s6 + $0x180] sm:$0xff]  }
 0x760   : > { %13570 = vmatprep.mubr.msk.bf16.mxu1 %vm6360_vm0, %v17775_v52  ;;  %13579 = vmatpush3.bf16.msra.mxu1 %v14666_v5  ;;  %v9325_v52 = vrot.slane %v9323_v40, 5  ;;  %v9573_v5 = vrot.slane %v9571_v49, 2  ;;  %v14708_v49 = vld [vmem:[%s18374_s10 + $0x8] ss:$12 sps:$4 sm:$0xff]  }
 0x761   : > { %13580 = vmatprep.subr.bf16.mxu1 %v14667_v32 }
 0x762   : > { %v9329_v19 = vor.u32 %v9328_v60, %v9325_v52  ;;  %v9735_v60 = vld [vmem:[#allocation4 + $0x10] sm:$0xf8] }
 0x764   : > { %13581 = vmatpush3.bf16.msra.mxu1 %v14667_v32 }
 0x765   : > { %13582 = vmatprep.subr.bf16.mxu1 %v14668_v14 }
 0x767   : > { %13571 = vmatmul.mubr.msk.bf16.gmra.mrb[68].mxu1 %vm6360_vm0, %v17784_v38  ;;  %v9333_v38 = vsel %vm7429_vm3, %v9329_v19, %v17798_v18  ;;  %v14674_v18 = vld [vmem:[%s18370_s6 + $0x130] sm:$0xff]  }
 0x768   : > { %13574 = vmatprep.mubr.msk.bf16.mxu1 %vm6360_vm0, %v9158_v57  ;;  %13583 = vmatpush3.bf16.msra.mxu1 %v14668_v14  ;;  %v9580_v14 = vshrl.u32 %v18067_v37, 16  ;;  %v14682_v57 = vld [vmem:[%s18370_s6 + $0x170] sm:$0xff]  }
 0x769   : > { %13584 = vmatprep.subr.bf16.mxu1 %v14669_v29 }
 0x76a   : > { %v9582_v40 = vrot.slane %v9580_v14, 2 }
 0x76c   : > { %13585 = vmatpush3.bf16.msra.mxu1 %v14669_v29 }
 0x76d   : > { %13586 = vmatprep.subr.bf16.mxu1 %v14670_v33 }
 0x76f   : > { %13575 = vmatmul.mubr.msk.bf16.gmra.mrb[72].mxu1 %vm6360_vm0, %v9160_v35  ;;  %v14687_v35 = vld [vmem:[%s18370_s6 + $0x198] sm:$0xff]  }
 0x770   : > { %13587 = vmatpush3.bf16.msra.mxu1 %v14670_v33  ;;  %13590 = vmatprep.mubr.msk.bf16.mxu1 %vm6360_vm0, %v9333_v38  ;;  %v9756_v33 = vrot.slane %v9735_v60, 3  ;;  %v9931_v38 = vshrl.u32 %v9735_v60, 16 }
 0x771   : > { %13588 = vmatprep.subr.bf16.mxu1 %v14671_v45 }
 0x774   : > { %13589 = vmatpush3.bf16.msra.mxu1 %v14671_v45  ;;  %v14685_v45 = vld [vmem:[%s18370_s6 + $0x188] sm:$0xff]  }
 0x775   : > { %13602 = vmatprep.subr.bf16.mxu1 %v14672_v24 }
 0x777   : > { %13591 = vmatmul.mubr.msk.bf16.vlgmr.msra.gmra.mrb[64].mxu1 %vm6360_vm0, %v17813_v48  ;;  %v9527_v48 = vshrl.u32 %v9506_v58, 16 }
 0x778   : > { %13594 = vmatprep.mubr.msk.bf16.mxu1 %vm6360_vm0, %v17820_v56  ;;  %13603 = vmatpush3.bf16.msra.mxu1 %v14672_v24  ;;  %v9353_v56 = vrot.slane %v9351_v62, 5  ;;  %v9934_v24 = vshll.u32 %v9735_v60, 16  ;;  %v14692_v62 = vld [vmem:[%s18374_s10 + $0x4] ss:$12 sps:$4 sm:$0xff]  }
 0x779   : > { %13604 = vmatprep.subr.bf16.mxu1 %v14673_v26  ;;  %v9529_v9 = vrot.slane %v9527_v48, 2  ;;  %v14693_v48 = vld [vmem:[%s18374_s10 + $0x18] ss:$12 sps:$4 sm:$0xff]  }
 0x77a   : > { %v9357_v27 = vor.u32 %v9356_v6, %v9353_v56 }
 0x77b   : > { %v9533_v16 = vor.u32 %v9532_v55, %v9529_v9 }
 0x77c   : > { %13605 = vmatpush3.bf16.msra.mxu1 %v14673_v26  ;;  %v9933_v26 = vrot.slane %v9931_v38, 3 }
 0x77d   : > { %13606 = vmatprep.subr.bf16.mxu1 %v14674_v18  ;;  %v9542_v28 = vsel %vm2638_vm15, %v9533_v16, %v17844_v1  ;;  %v9574_v1 = vshll.u32 %v18058_v46, 16 }
 0x77f   : > { %13595 = vmatmul.mubr.msk.bf16.gmra.mrb[68].mxu1 %vm6360_vm0, %v17826_v30  ;;  %v14677_v30 = vld [vmem:[%s18370_s6 + $0x148] sm:$0xff]   ;;  %v9576_v32 = vrot.slane %v9574_v1, 3  ;;  %v9955_v56 = vrot.slane %v9574_v1, 4  ;;  %v12265_v1 = vld [vmem:[%s18371_s7] ss:$0 sm:$0xff] }
 0x780   : > { %13598 = vmatprep.mubr.msk.bf16.mxu1 %vm6360_vm0, %v17835_v17  ;;  %13607 = vmatpush3.bf16.msra.mxu1 %v14674_v18  ;;  %v9358_v17 = vsel %vm7429_vm3, %v17822_v59, %v9357_v27  ;;  %v14679_v59 = vld [vmem:[%s18370_s6 + $0x158] sm:$0xff]   ;;  %v9936_v18 = vrot.slane %v9934_v24, 4 }
 0x781   : > { %13608 = vmatprep.subr.bf16.mxu1 %v14675_v42  ;;  %v9577_v12 = vor.u32 %v9576_v32, %v9573_v5  ;;  %v9956_v9 = vor.u32 %v9955_v56, %v9954_v43 }
 0x782   : > { %v9937_v58 = vor.u32 %v9936_v18, %v9933_v26  ;;  %v14709_v26 = vld [vmem:[%s18374_s10 + $0x20] ss:$12 sps:$4 sm:$0xff]  }
 0x783   : > { %v9578_v29 = vsel %vm2638_vm15, %v17851_v51, %v9577_v12  ;;  %v9758_v51 = vsel %vm2841_vm2, %v9756_v33, %v9757_v4  ;;  %v9765_v4 = vrot.slane %v18058_v46, 3  ;;  %v9957_v16 = vsel %vm2995_vm4, %v17910_v25, %v9956_v9  ;;  %v14702_v25 = vld [vmem:[%s18374_s10 + $0x60] ss:$12 sps:$4 sm:$0xff]   ;;  %v14707_v46 = vld [vmem:[%s18374_s10 + $0x7c] ss:$12 sps:$4 sm:$0xff]  }
 0x784   : > { %13609 = vmatpush3.bf16.msra.mxu1 %v14675_v42  ;;  %v14695_v42 = vld [vmem:[%s18374_s10 + $0x1c] ss:$12 sps:$4 sm:$0xff]  }
 0x785   : > { %13610 = vmatprep.subr.bf16.mxu1 %v14676_v41 }
 0x787   : > { %13599 = vmatmul.mubr.msk.bf16.gmra.mrb[72].mxu1 %vm6360_vm0, %v9358_v17 }
 0x788   : > { %13611 = vmatpush3.bf16.msra.mxu1 %v14676_v41  ;;  %13614 = vmatprep.mubr.msk.bf16.mxu1 %vm6360_vm0, %v9542_v28  ;;  %v14699_v28 = vld [vmem:[%s18374_s10 + $0x48] ss:$12 sps:$4 sm:$0xff]  }
 0x789   : > { %13612 = vmatprep.subr.bf16.mxu1 %v14677_v30 }
 0x78c   : > { %13613 = vmatpush3.bf16.msra.mxu1 %v14677_v30 }
 0x78d   : > { %13626 = vmatprep.subr.bf16.mxu1 %v14678_v2 }
 0x78f   : > { %13615 = vmatmul.mubr.msk.bf16.vlgmr.msra.gmra.mrb[64].mxu1 %vm6360_vm0, %v17856_v11  ;;  %v9583_v11 = vshll.u32 %v18067_v37, 16 }
 0x790   : > { %13618 = vmatprep.mubr.msk.bf16.mxu1 %vm6360_vm0, %v17859_v23  ;;  %13627 = vmatpush3.bf16.msra.mxu1 %v14678_v2  ;;  %v14681_v23 = vld [vmem:[%s18370_s6 + $0x168] sm:$0xff]   ;;  %v14704_v2 = vld [vmem:[%s18374_s10 + $0x64] ss:$12 sps:$4 sm:$0xff]  }
 0x791   : > { %13628 = vmatprep.subr.bf16.mxu1 %v14679_v59  ;;  %v9585_v31 = vrot.slane %v9583_v11, 3 }
 0x793   : > { %v9586_v52 = vor.u32 %v9585_v31, %v9582_v40 }
 0x794   : > { %13629 = vmatpush3.bf16.msra.mxu1 %v14679_v59  ;;  %v14705_v59 = vld [vmem:[%s18374_s10 + $0x78] ss:$12 sps:$4 sm:$0xff]  }
 0x795   : > { %13630 = vmatprep.subr.bf16.mxu1 %v14680_v63  ;;  %v9587_v19 = vsel %vm2638_vm15, %v9577_v12, %v9586_v52 }
 0x797   : > { %13619 = vmatmul.mubr.msk.bf16.gmra.mrb[68].mxu1 %vm6360_vm0, %v17867_v0  ;;  %v14683_v0 = vld [vmem:[%s18370_s6 + $0x178] sm:$0xff]  }
 0x798   : > { %13622 = vmatprep.mubr.msk.bf16.mxu1 %vm6360_vm0, %v9578_v29  ;;  %13631 = vmatpush3.bf16.msra.mxu1 %v14680_v63 }
 0x799   : > { %13632 = vmatprep.subr.bf16.mxu1 %v14681_v23 }
 0x79c   : > { %13633 = vmatpush3.bf16.msra.mxu1 %v14681_v23 }
 0x79d   : > { %13634 = vmatprep.subr.bf16.mxu1 %v14682_v57 }
 0x79f   : > { %13623 = vmatmul.mubr.msk.bf16.gmra.mrb[72].mxu1 %vm6360_vm0, %v9587_v19 }
 0x7a0   : > { %13635 = vmatpush3.bf16.msra.mxu1 %v14682_v57  ;;  %13638 = vmatprep.mubr.msk.bf16.mxu1 %vm6360_vm0, %v9758_v51 }
 0x7a1   : > { %13636 = vmatprep.subr.bf16.mxu1 %v14683_v0 }
 0x7a4   : > { %13637 = vmatpush3.bf16.msra.mxu1 %v14683_v0 }
 0x7a5   : > { %13650 = vmatprep.subr.bf16.mxu1 %v14684_v3 }
 0x7a7   : > { %13639 = vmatmul.mubr.msk.bf16.vlgmr.msra.gmra.mrb[64].mxu1 %vm6360_vm0, %v17880_v8  ;;  %v9766_v8 = vsel %vm2841_vm2, %v9763_v21, %v9765_v4  ;;  %v9768_v21 = vsel %vm2841_vm2, %v9765_v4, %v9767_v13 }
 0x7a8   : > { %13642 = vmatprep.mubr.msk.bf16.mxu1 %vm6360_vm0, %v17883_v7  ;;  %13651 = vmatpush3.bf16.msra.mxu1 %v14684_v3  ;;  %v14688_v7 = vld [vmem:[%s18370_s6 + $0x1a0] sm:$0xff]  }
 0x7a9   : > { %13652 = vmatprep.subr.bf16.mxu1 %v14685_v45 }
 0x7ac   : > { %13653 = vmatpush3.bf16.msra.mxu1 %v14685_v45 }
 0x7ad   : > { %13654 = vmatprep.subr.bf16.mxu1 %v14686_v20 }
 0x7af   : > { %13643 = vmatmul.mubr.msk.bf16.gmra.mrb[68].mxu1 %vm6360_vm0, %v17888_v50  ;;  %v9941_v50 = vsel %vm2995_vm4, %v9937_v58, %v17902_v39  ;;  %v9916_v39 = vld [vmem:[#allocation4 + $0x40] sm:$0xf] }
 0x7b0   : > { %13646 = vmatprep.mubr.msk.bf16.mxu1 %vm6360_vm0, %v9766_v8  ;;  %13655 = vmatpush3.bf16.msra.mxu1 %v14686_v20  ;;  %v9959_v6 = vshrl.u32 %v9916_v39, 16  ;;  %v9962_v41 = vshll.u32 %v9916_v39, 16 }
 0x7b1   : > { %13656 = vmatprep.subr.bf16.mxu1 %v14687_v35 }
 0x7b2   : > { %v9961_v55 = vrot.slane %v9959_v6, 3  ;;  %v9964_v27 = vrot.slane %v9962_v41, 4 }
 0x7b4   : > { %13657 = vmatpush3.bf16.msra.mxu1 %v14687_v35  ;;  %v9965_v30 = vor.u32 %v9964_v27, %v9961_v55 }
 0x7b5   : > { %13658 = vmatprep.subr.bf16.mxu1 %v14688_v7 }
 0x7b6   : > { %v9966_v17 = vsel %vm2995_vm4, %v9956_v9, %v9965_v30 }
 0x7b7   : > { %13647 = vmatmul.mubr.msk.bf16.gmra.mrb[72].mxu1 %vm6360_vm0, %v9768_v21 }
 0x7b8   : > { %13659 = vmatpush3.bf16.msra.mxu1 %v14688_v7  ;;  %13662 = vmatprep.mubr.msk.bf16.mxu1 %vm6360_vm0, %v9941_v50 }
 0x7b9   : > { %13660 = vmatprep.subr.bf16.mxu1 %v14689_v47 }
 0x7bc   : > { %13661 = vmatpush3.bf16.msra.mxu1 %v14689_v47 }
 0x7bd   : > { %10317 = vmatprep.subr.bf16.mxu1 %v14692_v62 }
 0x7bf   : > { %13663 = vmatmul.mubr.msk.bf16.vlgmr.msra.gmra.mrb[64].mxu1 %vm6360_vm0, %v17917_v22  ;;  %v14698_v22 = vld [vmem:[%s18374_s10 + $0x34] ss:$12 sps:$4 sm:$0xff]  }
 0x7c0   : > { %13666 = vmatprep.mubr.msk.bf16.mxu1 %vm6360_vm0, %v17920_v44  ;;  %10318 = vmatpush1.bf16.msra.mxu1 %v14690_v54  ;;  %v14696_v44 = vld [vmem:[%s18374_s10 + $0x30] ss:$12 sps:$4 sm:$0xff]   ;;  %v14710_v54 = vld [vmem:[%s18374_s10 + $0x38] ss:$12 sps:$4 sm:$0xff]  }
 0x7c1   : > { %10319 = vmatprep.subr.bf16.mxu1 %v14695_v42 }
 0x7c4   : > { %10320 = vmatpush1.bf16.msra.mxu1 %v14693_v48 }
 0x7c5   : > { %10321 = vmatprep.subr.bf16.mxu1 %v14698_v22 }
 0x7c7   : > { %13667 = vmatmul.mubr.msk.bf16.gmra.mrb[68].mxu1 %vm6360_vm0, %v17925_v61  ;;  %v14701_v61 = vld [vmem:[%s18374_s10 + $0x4c] ss:$12 sps:$4 sm:$0xff]  }
 0x7c8   : > { %13670 = vmatprep.mubr.msk.bf16.mxu1 %vm6360_vm0, %v9957_v16  ;;  %10322 = vmatpush1.bf16.msra.mxu1 %v14696_v44  ;;  %v14711_v16 = vld [vmem:[%s18374_s10 + $0x50] ss:$12 sps:$4 sm:$0xff]  }
 0x7c9   : > { %10323 = vmatprep.subr.bf16.mxu1 %v14701_v61 }
 0x7cc   : > { %10324 = vmatpush1.bf16.msra.mxu1 %v14699_v28 }
 0x7cd   : > { %10325 = vmatprep.subr.bf16.mxu1 %v14704_v2 }
 0x7cf   : > { %13671 = vmatmul.mubr.msk.bf16.gmra.mrb[72].mxu1 %vm6360_vm0, %v9966_v17 }
 0x7d0   : > { %10349 = vmatprep.mubr.bf16.mxu1 %v18653_v36  ;;  %10326 = vmatpush1.bf16.msra.mxu1 %v14702_v25 }
 0x7d1   : > { %10327 = vmatprep.subr.bf16.mxu1 %v14707_v46 }
 0x7d4   : > { %10328 = vmatpush1.bf16.msra.mxu1 %v14705_v59 }
 0x7d5   : > { %13674 = vmatprep.subr.bf16.mxu1 %v14708_v49 }
 0x892   : > { %v13664_v37 = vpop.f32.mrb[64].mxu1 }
 0x893   : > { %v10055_v63 = vpop.f32.mrb[65].mxu1  ;;  %v10123_v12 = vadd.f32 %v13664_v37, %v12265_v1 }
 0x894   : > { %v10121_v5 = vadd.f32 %v12265_v1, %v10055_v63  ;;  %v13665_v32 = vpop.f32.mrb[66].mxu1  ;;  %v14713_v63 = vld [vmem:[%s18374_s10 + $0x80] ss:$12 sps:$4 sm:$0xff]  }
 0x895   : > { %v10124_v14 = vadd.f32 %v13665_v32, %v12265_v1  ;;  %v10058_v11 = vpop.f32.mrb[67].mxu1  ;;  %v10135_v52 = vmax.f32 %v10123_v12, 0.0  ;;  %v14714_v32 = vld [vmem:[%s18375_s11] ss:$12 sps:$4 sm:$0xff]  }
 0x896   : > { %v10133_v23 = vmax.f32 %v10121_v5, 0.0  ;;  %v10122_v40 = vadd.f32 %v12265_v1, %v10058_v11  ;;  %v14716_v5 = vld [vmem:[%s18375_s11 + $0x4] ss:$12 sps:$4 sm:$0xff]   ;;  %v14722_v12 = vld [vmem:[%s18375_s11 + $0x34] ss:$12 sps:$4 sm:$0xff]  }
 0x897   : > { %v10136_v57 = vmax.f32 %v10124_v14, 0.0  ;;  %v14719_v14 = vld [vmem:[%s18375_s11 + $0x1c] ss:$12 sps:$4 sm:$0xff]   ;;  %v14717_v11 = vld [vmem:[%s18375_s11 + $0x18] ss:$12 sps:$4 sm:$0xff]  }
 0x898   : > { %v10157_v31 = vcombine.high %v10133_v23, %v10133_v23  ;;  %v10134_v29 = vmax.f32 %v10122_v40, 0.0  ;;  %v14725_v40 = vld [vmem:[%s18375_s11 + $0x4c] ss:$12 sps:$4 sm:$0xff]  }
 0x899   : > { %v10159_v4 = vcombine.high %v10136_v57, %v10136_v57 }
 0x89a   : > { %v10158_v60 = vcombine.high %v10134_v29, %v10134_v29  ;;  %v13668_v33 = vpop.f32.mrb[68].mxu1  ;;  %v10165_v19 = vcombine.low %v10133_v23, %v10157_v31  ;;  %v14720_v23 = vld [vmem:[%s18375_s11 + $0x30] ss:$12 sps:$4 sm:$0xff]   ;;  %v14723_v31 = vld [vmem:[%s18375_s11 + $0x48] ss:$12 sps:$4 sm:$0xff]  }
 0x89b   : > { %v10071_v0 = vpop.f32.mrb[69].mxu1  ;;  %v10127_v3 = vadd.f32 %v13668_v33, %v12265_v1  ;;  %v10167_v47 = vcombine.low %v10136_v57, %v10159_v4  ;;  %v14726_v29 = vld [vmem:[%s18375_s11 + $0x8] ss:$12 sps:$4 sm:$0xff]   ;;  %v14727_v57 = vld [vmem:[%s18375_s11 + $0x20] ss:$12 sps:$4 sm:$0xff]  }
 0x89c   : > { %v10166_v51 = vcombine.low %v10158_v60, %v10135_v52  ;;  %v10125_v45 = vadd.f32 %v12265_v1, %v10071_v0  ;;  %v13669_v20 = vpop.f32.mrb[70].mxu1  ;;  %v14728_v52 = vld [vmem:[%s18375_s11 + $0x38] ss:$12 sps:$4 sm:$0xff]   ;;  %v14729_v60 = vld [vmem:[%s18375_s11 + $0x50] ss:$12 sps:$4 sm:$0xff]  }
 0x89d   : > { %v10074_v35 = vpop.f32.mrb[71].mxu1  ;;  %v10128_v8 = vadd.f32 %v13669_v20, %v12265_v1  ;;  %v10139_v18 = vmax.f32 %v10127_v3, 0.0 }
 0x89e   : > { %v10181_v38 = vpack.c.bf16 %v10166_v51, %v10165_v19  ;;  %v10137_v24 = vmax.f32 %v10125_v45, 0.0  ;;  %v10126_v7 = vadd.f32 %v12265_v1, %v10074_v35 }
 0x89f   : > { %v10140_v21 = vmax.f32 %v10128_v8, 0.0  ;;  %v10161_v48 = vcombine.high %v10139_v18, %v10139_v18 }
 0x8a0   : > { %v10160_v13 = vcombine.high %v10137_v24, %v10137_v24  ;;  %v10138_v58 = vmax.f32 %v10126_v7, 0.0  ;;  %12284 = vmatmul.mubr.msk.bf16.vlgmr.msra.gmra.mrb[28].mxu1 %vm6360_vm0, %v10181_v38 }
 0x8a1   : > { %13675 = vmatpush3.bf16.msra.mxu1 %v14708_v49  ;;  %10359 = vmatprep.mubr.bf16.mxu1 %v18653_v36  ;;  %v10162_v9 = vcombine.high %v10140_v21, %v10140_v21  ;;  %v10169_v28 = vcombine.low %v10139_v18, %v10161_v48  ;;  %v14712_v49 = vld [vmem:[%s18374_s10 + $0x68] ss:$12 sps:$4 sm:$0xff]  }
 0x8a2   : > { %v10168_v50 = vcombine.low %v10160_v13, %v10138_v58  ;;  %v13672_v62 = vpop.f32.mrb[72].mxu1  ;;  %13676 = vmatprep.subr.bf16.mxu1 %v14709_v26 }
 0x8a3   : > { %v10131_v42 = vadd.f32 %v13672_v62, %v12265_v1  ;;  %v10087_v39 = vpop.f32.mrb[73].mxu1 }
 0x8a4   : > { %v10182_v43 = vpack.c.bf16 %v10168_v50, %v10167_v47  ;;  %v10129_v56 = vadd.f32 %v12265_v1, %v10087_v39  ;;  %v13673_v22 = vpop.f32.mrb[74].mxu1 }
 0x8a5   : > { %v10143_v6 = vmax.f32 %v10131_v42, 0.0  ;;  %v10132_v41 = vadd.f32 %v13673_v22, %v12265_v1  ;;  %v10090_v44 = vpop.f32.mrb[75].mxu1  ;;  %13677 = vmatpush3.bf16.msra.mxu1 %v14709_v26 }
 0x8a6   : > { %v10141_v55 = vmax.f32 %v10129_v56, 0.0  ;;  %v10130_v27 = vadd.f32 %v12265_v1, %v10090_v44  ;;  %13678 = vmatprep.subr.bf16.mxu1 %v14710_v54 }
 0x8a7   : > { %v10164_v30 = vcombine.high %v10143_v6, %v10143_v6  ;;  %v10144_v17 = vmax.f32 %v10132_v41, 0.0 }
 0x8a8   : > { %v10170_v61 = vcombine.low %v10162_v9, %v10141_v55  ;;  %v10142_v25 = vmax.f32 %v10130_v27, 0.0  ;;  %12285 = vmatmul.mubr.msk.bf16.gmra.mrb[32].mxu1 %vm6360_vm0, %v10182_v43 }
 0x8a9   : > { %v10172_v2 = vcombine.low %v10164_v30, %v10144_v17  ;;  %13679 = vmatpush3.bf16.msra.mxu1 %v14710_v54  ;;  %10369 = vmatprep.mubr.bf16.mxu1 %v18653_v36 }
 0x8aa   : > { %v10183_v46 = vpack.c.bf16 %v10170_v61, %v10169_v28  ;;  %v10163_v59 = vcombine.high %v10142_v25, %v10142_v25  ;;  %13680 = vmatprep.subr.bf16.mxu1 %v14711_v16 }
 0x8ac   : > { %v10171_v1 = vcombine.low %v10142_v25, %v10163_v59 }
 0x8ad   : > { %13681 = vmatpush3.bf16.msra.mxu1 %v14711_v16 }
 0x8ae   : > { %v10184_v37 = vpack.c.bf16 %v10172_v2, %v10171_v1  ;;  %13682 = vmatprep.subr.bf16.mxu1 %v14712_v49 }
 0x8b0   : > { %12286 = vmatmul.mubr.msk.bf16.gmra.mrb[36].mxu1 %vm6360_vm0, %v10183_v46 }
 0x8b1   : > { %10379 = vmatprep.mubr.bf16.mxu1 %v18653_v36  ;;  %13683 = vmatpush3.bf16.msra.mxu1 %v14712_v49 }
 0x8b2   : > { %13684 = vmatprep.subr.bf16.mxu1 %v14713_v63 }
 0x8b5   : > { %13685 = vmatpush3.bf16.msra.mxu1 %v14713_v63 }
 0x8b6   : > { %11048 = vmatprep.subr.bf16.mxu1 %v14716_v5 }
 0x8b8   : > { %12287 = vmatmul.mubr.msk.bf16.gmra.mrb[40].mxu1 %vm6360_vm0, %v10184_v37 }
 0x8b9   : > { %13686 = vmatprep.mubr.msk.bf16.mxu1 %vm6360_vm0, %v10181_v38 }
 0x8c0   : > { %13687 = vmatmul.mubr.msk.bf16.vlgmr.msra.gmra.mrb[44].mxu1 %vm6360_vm0, %v10182_v43 }
 0x8c1   : > { %13690 = vmatprep.mubr.msk.bf16.mxu1 %vm6360_vm0, %v10183_v46  ;;  %11049 = vmatpush1.bf16.msra.mxu1 %v14714_v32 }
 0x8c2   : > { %11050 = vmatprep.subr.bf16.mxu1 %v14719_v14 }
 0x8c5   : > { %11051 = vmatpush1.bf16.msra.mxu1 %v14717_v11 }
 0x8c6   : > { %11052 = vmatprep.subr.bf16.mxu1 %v14722_v12 }
 0x8c8   : > { %13691 = vmatmul.mubr.msk.bf16.gmra.mrb[48].mxu1 %vm6360_vm0, %v10184_v37 }
 0x8c9   : > { %11053 = vmatpush1.bf16.msra.mxu1 %v14720_v23  ;;  %11080 = vmatprep.mubr.bf16.mxu1 %v18653_v36 }
 0x8ca   : > { %11054 = vmatprep.subr.bf16.mxu1 %v14725_v40 }
 0x8cd   : > { %11055 = vmatpush1.bf16.msra.mxu1 %v14723_v31 }
 0x8ce   : > { %13694 = vmatprep.subr.bf16.mxu1 %v14726_v29 }
 0x8d0   : > { %12304 = vmatmul.mubr.msk.bf16.vlgmr.msra.gmra.mrb[28].mxu1 %vm1269_vm12, %v16744_v10 }
 0x8d1   : > { %13695 = vmatpush3.bf16.msra.mxu1 %v14726_v29  ;;  %11090 = vmatprep.mubr.bf16.mxu1 %v18653_v36 }
 0x8d2   : > { %13696 = vmatprep.subr.bf16.mxu1 %v14727_v57 }
 0x8d5   : > { %13697 = vmatpush3.bf16.msra.mxu1 %v14727_v57 }
 0x8d6   : > { %13698 = vmatprep.subr.bf16.mxu1 %v14728_v52 }
 0x8d8   : > { %12305 = vmatmul.mubr.msk.bf16.gmra.mrb[32].mxu1 %vm1269_vm12, %v16769_v15 }
 0x8d9   : > { %11100 = vmatprep.mubr.bf16.mxu1 %v18653_v36  ;;  %13699 = vmatpush3.bf16.msra.mxu1 %v14728_v52 }
 0x8da   : > { %13700 = vmatprep.subr.bf16.mxu1 %v14729_v60 }
 0x8dd   : > { %13701 = vmatpush3.bf16.msra.mxu1 %v14729_v60 }
 0x8e0   : > { %12306 = vmatmul.mubr.msk.bf16.gmra.mrb[36].mxu1 %vm1269_vm12, %v16805_v34 }
 0x8e1   : > { %11110 = vmatprep.mubr.bf16.mxu1 %v18653_v36 }
 0x8e8   : > { %12307 = vmatmul.mubr.msk.bf16.gmra.mrb[40].mxu1 %vm1269_vm12, %v16815_v53 }
 0x8e9   : > { %13702 = vmatprep.mubr.msk.bf16.mxu1 %vm1269_vm12, %v16744_v10 }
 0x8f0   : > { %13703 = vmatmul.mubr.msk.bf16.vlgmr.msra.gmra.mrb[44].mxu1 %vm1269_vm12, %v16769_v15 }
 0x8f1   : > { %13706 = vmatprep.mubr.msk.bf16.mxu1 %vm1269_vm12, %v16805_v34 }
 0x8f8   : > { %13707 = vmatmul.mubr.msk.bf16.gmra.mrb[48].mxu1 %vm1269_vm12, %v16815_v53 }
 0x9a3   : > { %v11082_v33 = vpop.f32.mrb[28].mxu1 }
 0x9a4   : > { %11210 = vst [vmem:[%s18278_s15] sm:$0xff] %v11082_v33  ;;  %v11084_v10 = vpop.f32.mrb[29].mxu1 }
 0x9a5   : > { %11211 = vst [vmem:[%s18278_s15 + $0x8] sm:$0xff] %v11084_v10  ;;  %v11086_v15 = vpop.f32.mrb[30].mxu1 }
 0x9a6   : > { %11213 = vst [vmem:[%s18278_s15 + $0x18] sm:$0xff] %v11086_v15  ;;  %v11088_v34 = vpop.f32.mrb[31].mxu1 }
 0x9a7   : > { %11214 = vst [vmem:[%s18278_s15 + $0x20] sm:$0xff] %v11088_v34 }
 0x9ab   : > { %v11092_v53 = vpop.f32.mrb[32].mxu1 }
 0x9ac   : > { %11216 = vst [vmem:[%s18278_s15 + $0x30] sm:$0xff] %v11092_v53  ;;  %v11094_v36 = vpop.f32.mrb[33].mxu1 }
 0x9ad   : > { %11217 = vst [vmem:[%s18278_s15 + $0x38] sm:$0xff] %v11094_v36  ;;  %v11096_v0 = vpop.f32.mrb[34].mxu1 }
 0x9ae   : > { %11219 = vst [vmem:[%s18278_s15 + $0x48] sm:$0xff] %v11096_v0  ;;  %v11098_v19 = vpop.f32.mrb[35].mxu1 }
 0x9af   : > { %11220 = vst [vmem:[%s18278_s15 + $0x50] sm:$0xff] %v11098_v19 }
 0x9b3   : > { %v11102_v51 = vpop.f32.mrb[36].mxu1 }
 0x9b4   : > { %11222 = vst [vmem:[%s18278_s15 + $0x60] sm:$0xff] %v11102_v51  ;;  %v11104_v3 = vpop.f32.mrb[37].mxu1 }
 0x9b5   : > { %11223 = vst [vmem:[%s18278_s15 + $0x68] sm:$0xff] %v11104_v3  ;;  %v11106_v45 = vpop.f32.mrb[38].mxu1 }
 0x9b6   : > { %11225 = vst [vmem:[%s18278_s15 + $0x78] sm:$0xff] %v11106_v45  ;;  %v11108_v20 = vpop.f32.mrb[39].mxu1 }
 0x9b7   : > { %11226 = vst [vmem:[%s18278_s15 + $0x80] sm:$0xff] %v11108_v20 }
 0x9bb   : > { %v11112_v4 = vpop.f32.mrb[40].mxu1 }
 0x9bc   : > { %11228 = vst [vmem:[%s18278_s15 + $0x90] sm:$0xff] %v11112_v4  ;;  %v11114_v35 = vpop.f32.mrb[41].mxu1 }
 0x9bd   : > { %11229 = vst [vmem:[%s18278_s15 + $0x98] sm:$0xff] %v11114_v35  ;;  %v11116_v38 = vpop.f32.mrb[42].mxu1 }
 0x9be   : > { %11231 = vst [vmem:[%s18278_s15 + $0xa8] sm:$0xff] %v11116_v38  ;;  %v11118_v24 = vpop.f32.mrb[43].mxu1 }
 0x9bf   : > { %11232 = vst [vmem:[%s18278_s15 + $0xb0] sm:$0xff] %v11118_v24 }
 0x9c3   : > { %v13704_v8 = vpop.f32.mrb[44].mxu1 }
 0x9c4   : > { %11218 = vst.msk [vmem:[%s18278_s15 + $0x40] sm:$0xff] %vm1269_vm12, %v13704_v8  ;;  %v11155_v7 = vpop.f32.mrb[45].mxu1 }
 0x9c5   : > { %11212 = vst.msk [vmem:[%s18278_s15 + $0x10] sm:$0xff] %vm1269_vm12, %v11155_v7  ;;  %v13705_v26 = vpop.f32.mrb[46].mxu1 }
 0x9c6   : > { %11221 = vst.msk [vmem:[%s18278_s15 + $0x58] sm:$0xff] %vm1269_vm12, %v13705_v26  ;;  %v11158_v18 = vpop.f32.mrb[47].mxu1 }
 0x9c7   : > { %11215 = vst.msk [vmem:[%s18278_s15 + $0x28] sm:$0xff] %vm1269_vm12, %v11158_v18 }
 0x9cb   : > { %v13708_v13 = vpop.f32.mrb[48].mxu1 }
 0x9cc   : > { %11230 = vst.msk [vmem:[%s18278_s15 + $0xa0] sm:$0xff] %vm1269_vm12, %v13708_v13  ;;  %v11171_v58 = vpop.f32.mrb[49].mxu1 }
 0x9cd   : > { %11224 = vst.msk [vmem:[%s18278_s15 + $0x70] sm:$0xff] %vm1269_vm12, %v11171_v58  ;;  %v13709_v47 = vpop.f32.mrb[50].mxu1 }
 0x9ce   : > { %11233 = vst.msk [vmem:[%s18278_s15 + $0xb8] sm:$0xff] %vm1269_vm12, %v13709_v47  ;;  %v11174_v21 = vpop.f32.mrb[51].mxu1 }
 0x9cf   : > { %11227 = vst.msk [vmem:[%s18278_s15 + $0x88] sm:$0xff] %vm1269_vm12, %v11174_v21 }
 0x9d0   : > { %14803 = shalt.err (!%p14800_p3)
}
 0x9d1   : > { %s14804_s16 = scalar_lea.hbm %s18315_s26, 3072  ;;  %s14808_s18 = scalar_lea.hbm %s18376_s12, 6144 }
 0x9d2   : > { %p14805_p4 = scmp.ne.s32.totalorder %s18315_s26, %s14804_s16  ;;  %p14809_p9 = scmp.lt.u32.totalorder %s18315_s26, %s18376_s12 }
 0x9d3   : > { %p14810_p10 = scmp.lt.u32.totalorder %s14808_s18, %s14804_s16  ;;  %p14812_p12 = scmp.lt.u32.totalorder %s14804_s16, %s18315_s26 }
 0x9d4   : > { %p14806_p7 = pnand %p14805_p4, %p14967_p5 }
 0x9d5   : > { %p14811_p11 = por %p14810_p10, %p14809_p9 }
 0x9d6   : > { %p14807_p8 = pneg %p14806_p7 }
 0x9d7   : > { %p14813_p13 = por %p14812_p12, %p14811_p11 }
 0x9d9   : > { %p14814_p0 = pnand %p14813_p13, %p14807_p8 }
 0x9db   : > { %14817 = shalt.err (!%p14814_p0)
}
 0x9dc   : > { %s14862_s28 = smov 384   ;;  %s14863_s23 = smov 24  }
 0x9dd   : > { %14291 = dma.vmem_to_hbm [thread:$0]  (%p14967_p5), %s18308_s19, 3072, %s18315_s26, %s18323_s25, %s14862_s28, %s14862_s28, %s14863_s23  }
 0x9de PF: > { %p14297_p1 = scmp.ge.s32.totalorder %s14852_s24, 2  ;;  %s11263_s27 = sand.u32 1, %s14840_s21  }
 0x9df   : > { %s11264_s30 = scalar_lea.sflag [#allocation7], %s11263_s27 }
 0x9e0   : > { %p14294_p2 = pnand %p14297_p1, %p14971_p6 }
 0x9e2   : > { %14835 = dma.done.wait (!%p14294_p2), %s11264_s30, 3072  }
 0x9e3   : > { %14837 = vsyncadd (!%p14294_p2), %s11264_s30, 4294964224  ;;  %s18686_s24 = sld [smem:[#allocation10_spill]]  ;;  %s18687_s16 = sld [smem:[#allocation9_spill]] }
 0x9e4   : > { %s18688_s23 = sld [smem:[#allocation11_spill]]  ;;  %s18689_s21 = smov %s14844_s22 }
 0x9e9   : > { %p22_p3 = scmp.ge.s32.totalorder %s18686_s24, 4   ;;  %s18690_s22 = smov %s18687_s16 }
 0x9eb   :  { %24 = sbr.rel (!%p22_p3) target bundleno = 3 (0x3), region = 143 }
 0x9f2   :  { %11269 = vsyncpa [#allocation7], 1 }
 0x9f3   :  { %11271 = vsyncpa [#allocation7 + $0x1], 1 }

</bundles_post_ra>
